<compile_context>
chip_gen: v7x
topology: tpu7x:2x2x1
jax: 0.10.0
libtpu: 0.0.40
codegen_flags: <defaults>
</compile_context>

<pallas_src>
import functools

import jax
import jax.numpy as jnp
from jax.experimental import pallas as pl
from jax.experimental.pallas import tpu as pltpu

ACT_DTYPE = jnp.bfloat16          # activation / weight streaming dtype
_VMEM_LIMIT = 32 * 1024 * 1024    # explicit scoped-VMEM budget (portable to v7x)
FC_DIM = 257                      # Encoder.fc_dim
_EPS = 1e-5


# ---------------------------------------------------------------------------
# Pallas kernels
# ---------------------------------------------------------------------------
def _conv_kernel(*refs, s, kh, kw, Wo, apply_relu, fuse_res):
    """Fused KxK conv + BN shift (+residual) (+ReLU) for one output row.

    refs = [x_row_0 .. x_row_{kh-1}, w, shift, (residual), out]
      x_row_di : (1, 1, s, Wq, Cin)  padded input row stride*ho + di, W phase-split
      w        : (kh*kw, Cin, Cout)  BN scale already folded in (bf16)
      shift    : (1, Cout)           folded BN shift (f32)
      residual : (1, 1, Wo, Cout)    optional skip connection (fused add)
      out      : (1, 1, Wo, Cout)
    """
    o_ref = refs[-1]
    x_refs = refs[:kh]
    w_ref = refs[kh]
    shift_ref = refs[kh + 1]
    res_ref = refs[kh + 2] if fuse_res else None

    cout = o_ref.shape[-1]
    acc = jnp.zeros((Wo, cout), jnp.float32)
    for di in range(kh):                    # static unroll over taps
        for dj in range(kw):
            pj, qj = dj % s, dj // s
            a = x_refs[di][0, 0, pj, qj:qj + Wo, :]          # (Wo, Cin) bf16
            acc = acc + jnp.dot(a, w_ref[di * kw + dj],
                                preferred_element_type=jnp.float32)
    y = acc + shift_ref[...]                                  # f32 epilogue
    if fuse_res:
        y = y + res_ref[0, 0].astype(jnp.float32)
    if apply_relu:
        y = jnp.maximum(y, 0.0)
    o_ref[0, 0] = y.astype(o_ref.dtype)


def _pool_kernel(*refs, s, kh, kw, Wo):
    """3x3/s2 max-pool for one output row (max over the 9 shifted windows)."""
    o_ref = refs[-1]
    x_refs = refs[:kh]
    m = None
    for di in range(kh):
        for dj in range(kw):
            pj, qj = dj % s, dj // s
            a = x_refs[di][0, 0, pj, qj:qj + Wo, :]
            m = a if m is None else jnp.maximum(m, a)
    o_ref[0, 0] = m


def _gap_kernel(x_ref, o_ref):
    """Global average pool for one batch element: (1,H,W,C) -> (1,1,C)."""
    x = x_ref[0].astype(jnp.float32)                # (H, W, C)
    m = jnp.mean(x, axis=0)                         # (W, C)
    o_ref[0] = jnp.mean(m, axis=0, keepdims=True)   # (1, C)


def _fc_kernel(x_ref, w_ref, b_ref, o_ref):
    o_ref[...] = (jnp.dot(x_ref[...], w_ref[...],
                          preferred_element_type=jnp.float32) + b_ref[...])


# ---------------------------------------------------------------------------
# Layout glue (pure JAX, ~1x copies only)
# ---------------------------------------------------------------------------
def _prep_conv_input(x, kh, kw, stride, pad, pad_value):
    """Pad (B,H,W,C) and phase-split W by `stride`.

    Returns xw with xw[b, h, p, q, c] == x_padded[b, h, stride*q + p, c], shape
    (B, Hp, stride, Wq, C), so that every conv/pool tap inside the kernel is a
    unit-stride static slice.  Cost: one ~1x copy of the activation (vs the
    9x/49x fp32 im2col blowup of the previous version).
    """
    B, H, W, C = x.shape
    s = stride
    Ho = (H + 2 * pad - kh) // s + 1
    Wo = (W + 2 * pad - kw) // s + 1
    Wq = Wo + (kw - 1) // s
    Hp = s * (Ho - 1) + kh          # rows actually referenced by any tap
    Wt = s * Wq

    xp = jnp.pad(x, ((0, 0), (pad, pad), (pad, pad), (0, 0)),
                 constant_values=pad_value)
    dh = Hp - xp.shape[1]
    dw = Wt - xp.shape[2]
    if dh > 0 or dw > 0:
        xp = jnp.pad(xp, ((0, 0), (0, max(dh, 0)), (0, max(dw, 0)), (0, 0)),
                     constant_values=pad_value)
    xp = xp[:, :Hp, :Wt, :]
    xw = xp.reshape(B, Hp, Wq, s, C).transpose(0, 1, 3, 2, 4)
    return xw, Ho, Wo, Wq


def conv_bn_act(x, p, stride, pad, relu, residual=None):
    """y = act( conv(x, w_folded) + shift [+ residual] ), one fused pallas_call."""
    kh, kw = p["kh"], p["kw"]
    B, _, _, Cin = x.shape
    Cout = p["w"].shape[-1]
    s = stride
    xw, Ho, Wo, Wq = _prep_conv_input(x, kh, kw, s, pad, 0.0)
    fuse_res = residual is not None

    def x_map(c):
        return lambda b, h, c=c, s=s: (b, s * h + c, 0, 0, 0)

    in_specs = [pl.BlockSpec((1, 1, s, Wq, Cin), x_map(c)) for c in range(kh)]
    in_specs += [
        pl.BlockSpec((kh * kw, Cin, Cout), lambda b, h: (0, 0, 0)),   # weights
        pl.BlockSpec((1, Cout), lambda b, h: (0, 0)),                 # BN shift
    ]
    args = [xw] * kh + [p["w"], p["shift"]]
    if fuse_res:
        in_specs.append(pl.BlockSpec((1, 1, Wo, Cout),
                                     lambda b, h: (b, h, 0, 0)))
        args.append(residual)

    kernel = functools.partial(_conv_kernel, s=s, kh=kh, kw=kw, Wo=Wo,
                               apply_relu=relu, fuse_res=fuse_res)
    return pl.pallas_call(
        kernel,
        grid=(B, Ho),
        in_specs=in_specs,
        out_specs=pl.BlockSpec((1, 1, Wo, Cout), lambda b, h: (b, h, 0, 0)),
        out_shape=jax.ShapeDtypeStruct((B, Ho, Wo, Cout), ACT_DTYPE),
        compiler_params=pltpu.CompilerParams(
            dimension_semantics=("parallel", "parallel"),
            vmem_limit_bytes=_VMEM_LIMIT),
    )(*args)


def maxpool_3x3_s2(x):
    kh = kw = 3
    s = 2
    B, _, _, C = x.shape
    xw, Ho, Wo, Wq = _prep_conv_input(x, kh, kw, s, 1, -1e30)

    def x_map(c):
        return lambda b, h, c=c, s=s: (b, s * h + c, 0, 0, 0)

    in_specs = [pl.BlockSpec((1, 1, s, Wq, C), x_map(c)) for c in range(kh)]
    kernel = functools.partial(_pool_kernel, s=s, kh=kh, kw=kw, Wo=Wo)
    return pl.pallas_call(
        kernel,
        grid=(B, Ho),
        in_specs=in_specs,
        out_specs=pl.BlockSpec((1, 1, Wo, C), lambda b, h: (b, h, 0, 0)),
        out_shape=jax.ShapeDtypeStruct((B, Ho, Wo, C), x.dtype),
        compiler_params=pltpu.CompilerParams(
            dimension_semantics=("parallel", "parallel"),
            vmem_limit_bytes=_VMEM_LIMIT),
    )(*([xw] * kh))


def global_avg_pool(x):
    B, H, W, C = x.shape
    out = pl.pallas_call(
        _gap_kernel,
        grid=(B,),
        in_specs=[pl.BlockSpec((1, H, W, C), lambda b: (b, 0, 0, 0))],
        out_specs=pl.BlockSpec((1, 1, C), lambda b: (b, 0, 0)),
        out_shape=jax.ShapeDtypeStruct((B, 1, C), jnp.float32),
        compiler_params=pltpu.CompilerParams(
            dimension_semantics=("parallel",),
            vmem_limit_bytes=_VMEM_LIMIT),
    )(x)
    return out.reshape(B, C)


# ---------------------------------------------------------------------------
# Parameters (deterministic synthetic init, BN folded at init) and forward
# ---------------------------------------------------------------------------
def _conv_bn_params(key, kh, kw, cin, cout):
    w_key, g_key, b_key, m_key, v_key = jax.random.split(key, 5)
    fan_in = kh * kw * cin
    w = jax.random.normal(w_key, (kh * kw, cin, cout),
                          jnp.float32) * jnp.sqrt(2.0 / fan_in)
    gamma = 1.0 + 0.1 * jax.random.normal(g_key, (cout,), jnp.float32)
    beta = 0.1 * jax.random.normal(b_key, (cout,), jnp.float32)
    mean = 0.1 * jax.random.normal(m_key, (cout,), jnp.float32)
    var = jnp.abs(jax.random.normal(v_key, (cout,), jnp.float32)) + 1.0
    scale = gamma / jnp.sqrt(var + _EPS)            # eval-mode BN fold
    shift = beta - mean * scale
    return dict(
        w=(w * scale[None, None, :]).astype(ACT_DTYPE),   # scale folded into w
        shift=shift.reshape(1, cout).astype(jnp.float32),
        kh=kh, kw=kw)


def _block_params(key, cin, cout, downsample):
    k1, k2, k3 = jax.random.split(key, 3)
    p = dict(conv1=_conv_bn_params(k1, 3, 3, cin, cout),
             conv2=_conv_bn_params(k2, 3, 3, cout, cout))
    if downsample:
        p["down"] = _conv_bn_params(k3, 1, 1, cin, cout)
    return p


def init_encoder_params(key):
    # Scaled-down ResNet-18-style backbone; last_dim = 128.
    ks = jax.random.split(key, 8)
    return dict(
        stem=_conv_bn_params(ks[0], 7, 7, 3, 16),
        layer1=_block_params(ks[1], 16, 16, downsample=False),
        layer2=_block_params(ks[2], 16, 32, downsample=True),
        layer3=_block_params(ks[3], 32, 64, downsample=True),
        layer4=_block_params(ks[4], 64, 128, downsample=True),
        fc_w=0.02 * jax.random.normal(ks[5], (128, FC_DIM), jnp.float32),
        fc_b=jnp.zeros((1, FC_DIM), jnp.float32),
    )


def basic_block(x, p, stride):
    y = conv_bn_act(x, p["conv1"], stride, 1, relu=True)
    if "down" in p:
        idt = conv_bn_act(x, p["down"], stride, 0, relu=False)
    else:
        idt = x
    # conv2 + BN + residual add + ReLU fused into one kernel epilogue.
    return conv_bn_act(y, p["conv2"], 1, 1, relu=True, residual=idt)


def encoder_forward(params, x_nchw, use_last_fc=False):
    """Equivalent of Encoder.forward: x = backbone(x)."""
    x = jnp.transpose(x_nchw, (0, 2, 3, 1)).astype(ACT_DTYPE)    # NCHW -> NHWC
    x = conv_bn_act(x, params["stem"], stride=2, pad=3, relu=True)
    x = maxpool_3x3_s2(x)
    x = basic_block(x, params["layer1"], stride=1)
    x = basic_block(x, params["layer2"], stride=2)
    x = basic_block(x, params["layer3"], stride=2)
    x = basic_block(x, params["layer4"], stride=2)
    B = x.shape[0]
    feat = global_avg_pool(x)                                    # (B, last_dim) f32
    if use_last_fc:
        # fc(num_classes=257): single-block Pallas matmul.
        return pl.pallas_call(
            _fc_kernel,
            out_shape=jax.ShapeDtypeStruct((B, FC_DIM), jnp.float32),
        )(feat, params["fc_w"], params["fc_b"])                  # (B, 257)
    # use_last_fc=False (Encoder default): pooled features [B, last_dim, 1, 1].
    return feat.reshape(B, -1, 1, 1)


if __name__ == "__main__":
    key = jax.random.PRNGKey(0)
    pkey, xkey = jax.random.split(key)
    params = init_encoder_params(pkey)

    # Small NCHW input consistent with the module (RGB image batch).
    x = jax.random.normal(xkey, (2, 3, 64, 64), jnp.float32)

    fwd = jax.jit(lambda inp: encoder_forward(params, inp, use_last_fc=False))
    out = jax.block_until_ready(fwd(x))
    assert out.shape == (2, 128, 1, 1), out.shape
    assert bool(jnp.all(jnp.isfinite(out)))
    print("KERNEL_OK")
</pallas_src>

<mosaic_0001>
module attributes {stable_mosaic.version = 11 : i64} {
  func.func @_conv_kernel(%arg0: i32, %arg1: i32, %arg2: memref<1x1x2x35x3xbf16, #tpu.memory_space<vmem>>, %arg3: memref<1x1x2x35x3xbf16, #tpu.memory_space<vmem>>, %arg4: memref<1x1x2x35x3xbf16, #tpu.memory_space<vmem>>, %arg5: memref<1x1x2x35x3xbf16, #tpu.memory_space<vmem>>, %arg6: memref<1x1x2x35x3xbf16, #tpu.memory_space<vmem>>, %arg7: memref<1x1x2x35x3xbf16, #tpu.memory_space<vmem>>, %arg8: memref<1x1x2x35x3xbf16, #tpu.memory_space<vmem>>, %arg9: memref<49x3x16xbf16, #tpu.memory_space<vmem>>, %arg10: memref<1x16xf32, #tpu.memory_space<vmem>>, %arg11: memref<1x1x32x16xbf16, #tpu.memory_space<vmem>>) attributes {dimension_semantics = [#tpu.dimension_semantics<parallel>, #tpu.dimension_semantics<parallel>], iteration_bounds = array<i64: 2, 32>, scalar_prefetch = 0 : i64, scratch_operands = 0 : i64, tpu.core_type = #tpu.core_type<tc>, window_params = [{transform_indices = @transform_0, window_bounds = array<i64: 1, 1, 2, 35, 3>}, {transform_indices = @transform_1, window_bounds = array<i64: 1, 1, 2, 35, 3>}, {transform_indices = @transform_2, window_bounds = array<i64: 1, 1, 2, 35, 3>}, {transform_indices = @transform_3, window_bounds = array<i64: 1, 1, 2, 35, 3>}, {transform_indices = @transform_4, window_bounds = array<i64: 1, 1, 2, 35, 3>}, {transform_indices = @transform_5, window_bounds = array<i64: 1, 1, 2, 35, 3>}, {transform_indices = @transform_6, window_bounds = array<i64: 1, 1, 2, 35, 3>}, {pipeline_mode = #tpu.pipeline_mode<synchronous>, transform_indices = @transform_7, window_bounds = array<i64: 49, 3, 16>}, {pipeline_mode = #tpu.pipeline_mode<synchronous>, transform_indices = @transform_8, window_bounds = array<i64: 1, 16>}, {transform_indices = @transform_9, window_bounds = array<i64: 1, 1, 32, 16>}]} {
    %cst = arith.constant 0.000000e+00 : f32
    %0 = vector.broadcast %cst : f32 to vector<32x16xf32>
    %c0 = arith.constant 0 : index
    %c0_0 = arith.constant 0 : index
    %c0_1 = arith.constant 0 : index
    %c0_2 = arith.constant 0 : index
    %c0_3 = arith.constant 0 : index
    %1 = vector.load %arg2[%c0, %c0_0, %c0_1, %c0_2, %c0_3] : memref<1x1x2x35x3xbf16, #tpu.memory_space<vmem>>, vector<1x1x1x32x3xbf16>
    %2 = vector.shape_cast %1 : vector<1x1x1x32x3xbf16> to vector<32x3xbf16>
    %c0_4 = arith.constant 0 : index
    %c0_5 = arith.constant 0 : index
    %c0_6 = arith.constant 0 : index
    %3 = vector.load %arg9[%c0_4, %c0_5, %c0_6] : memref<49x3x16xbf16, #tpu.memory_space<vmem>>, vector<1x3x16xbf16>
    %4 = vector.shape_cast %3 : vector<1x3x16xbf16> to vector<3x16xbf16>
    %cst_7 = arith.constant dense<0.000000e+00> : vector<32x16xf32>
    %5 = tpu.matmul %2, %4, %cst_7 {dimension_numbers = #tpu.dot_dimension_numbers<[1], [0], [0], [1], [0, 0, 1, 1], [], []>} : vector<32x3xbf16>, vector<3x16xbf16>, vector<32x16xf32> -> vector<32x16xf32>
    %6 = arith.addf %0, %5 : vector<32x16xf32>
    %c0_8 = arith.constant 0 : index
    %c0_9 = arith.constant 0 : index
    %c1 = arith.constant 1 : index
    %c0_10 = arith.constant 0 : index
    %c0_11 = arith.constant 0 : index
    %7 = vector.load %arg2[%c0_8, %c0_9, %c1, %c0_10, %c0_11] : memref<1x1x2x35x3xbf16, #tpu.memory_space<vmem>>, vector<1x1x1x32x3xbf16>
    %8 = vector.shape_cast %7 : vector<1x1x1x32x3xbf16> to vector<32x3xbf16>
    %c1_12 = arith.constant 1 : index
    %c0_13 = arith.constant 0 : index
    %c0_14 = arith.constant 0 : index
    %9 = vector.load %arg9[%c1_12, %c0_13, %c0_14] : memref<49x3x16xbf16, #tpu.memory_space<vmem>>, vector<1x3x16xbf16>
    %10 = vector.shape_cast %9 : vector<1x3x16xbf16> to vector<3x16xbf16>
    %cst_15 = arith.constant dense<0.000000e+00> : vector<32x16xf32>
    %11 = tpu.matmul %8, %10, %cst_15 {dimension_numbers = #tpu.dot_dimension_numbers<[1], [0], [0], [1], [0, 0, 1, 1], [], []>} : vector<32x3xbf16>, vector<3x16xbf16>, vector<32x16xf32> -> vector<32x16xf32>
    %12 = arith.addf %6, %11 : vector<32x16xf32>
    %c0_16 = arith.constant 0 : index
    %c0_17 = arith.constant 0 : index
    %c0_18 = arith.constant 0 : index
    %c1_19 = arith.constant 1 : index
    %c0_20 = arith.constant 0 : index
    %13 = vector.load %arg2[%c0_16, %c0_17, %c0_18, %c1_19, %c0_20] : memref<1x1x2x35x3xbf16, #tpu.memory_space<vmem>>, vector<1x1x1x32x3xbf16>
    %14 = vector.shape_cast %13 : vector<1x1x1x32x3xbf16> to vector<32x3xbf16>
    %c2 = arith.constant 2 : index
    %c0_21 = arith.constant 0 : index
    %c0_22 = arith.constant 0 : index
    %15 = vector.load %arg9[%c2, %c0_21, %c0_22] : memref<49x3x16xbf16, #tpu.memory_space<vmem>>, vector<1x3x16xbf16>
    %16 = vector.shape_cast %15 : vector<1x3x16xbf16> to vector<3x16xbf16>
    %cst_23 = arith.constant dense<0.000000e+00> : vector<32x16xf32>
    %17 = tpu.matmul %14, %16, %cst_23 {dimension_numbers = #tpu.dot_dimension_numbers<[1], [0], [0], [1], [0, 0, 1, 1], [], []>} : vector<32x3xbf16>, vector<3x16xbf16>, vector<32x16xf32> -> vector<32x16xf32>
    %18 = arith.addf %12, %17 : vector<32x16xf32>
    %c0_24 = arith.constant 0 : index
    %c0_25 = arith.constant 0 : index
    %c1_26 = arith.constant 1 : index
    %c1_27 = arith.constant 1 : index
    %c0_28 = arith.constant 0 : index
    %19 = vector.load %arg2[%c0_24, %c0_25, %c1_26, %c1_27, %c0_28] : memref<1x1x2x35x3xbf16, #tpu.memory_space<vmem>>, vector<1x1x1x32x3xbf16>
    %20 = vector.shape_cast %19 : vector<1x1x1x32x3xbf16> to vector<32x3xbf16>
    %c3 = arith.constant 3 : index
    %c0_29 = arith.constant 0 : index
    %c0_30 = arith.constant 0 : index
    %21 = vector.load %arg9[%c3, %c0_29, %c0_30] : memref<49x3x16xbf16, #tpu.memory_space<vmem>>, vector<1x3x16xbf16>
    %22 = vector.shape_cast %21 : vector<1x3x16xbf16> to vector<3x16xbf16>
    %cst_31 = arith.constant dense<0.000000e+00> : vector<32x16xf32>
    %23 = tpu.matmul %20, %22, %cst_31 {dimension_numbers = #tpu.dot_dimension_numbers<[1], [0], [0], [1], [0, 0, 1, 1], [], []>} : vector<32x3xbf16>, vector<3x16xbf16>, vector<32x16xf32> -> vector<32x16xf32>
    %24 = arith.addf %18, %23 : vector<32x16xf32>
    %c0_32 = arith.constant 0 : index
    %c0_33 = arith.constant 0 : index
    %c0_34 = arith.constant 0 : index
    %c2_35 = arith.constant 2 : index
    %c0_36 = arith.constant 0 : index
    %25 = vector.load %arg2[%c0_32, %c0_33, %c0_34, %c2_35, %c0_36] : memref<1x1x2x35x3xbf16, #tpu.memory_space<vmem>>, vector<1x1x1x32x3xbf16>
    %26 = vector.shape_cast %25 : vector<1x1x1x32x3xbf16> to vector<32x3xbf16>
    %c4 = arith.constant 4 : index
    %c0_37 = arith.constant 0 : index
    %c0_38 = arith.constant 0 : index
    %27 = vector.load %arg9[%c4, %c0_37, %c0_38] : memref<49x3x16xbf16, #tpu.memory_space<vmem>>, vector<1x3x16xbf16>
    %28 = vector.shape_cast %27 : vector<1x3x16xbf16> to vector<3x16xbf16>
    %cst_39 = arith.constant dense<0.000000e+00> : vector<32x16xf32>
    %29 = tpu.matmul %26, %28, %cst_39 {dimension_numbers = #tpu.dot_dimension_numbers<[1], [0], [0], [1], [0, 0, 1, 1], [], []>} : vector<32x3xbf16>, vector<3x16xbf16>, vector<32x16xf32> -> vector<32x16xf32>
    %30 = arith.addf %24, %29 : vector<32x16xf32>
    %c0_40 = arith.constant 0 : index
    %c0_41 = arith.constant 0 : index
    %c1_42 = arith.constant 1 : index
    %c2_43 = arith.constant 2 : index
    %c0_44 = arith.constant 0 : index
    %31 = vector.load %arg2[%c0_40, %c0_41, %c1_42, %c2_43, %c0_44] : memref<1x1x2x35x3xbf16, #tpu.memory_space<vmem>>, vector<1x1x1x32x3xbf16>
    %32 = vector.shape_cast %31 : vector<1x1x1x32x3xbf16> to vector<32x3xbf16>
    %c5 = arith.constant 5 : index
    %c0_45 = arith.constant 0 : index
    %c0_46 = arith.constant 0 : index
    %33 = vector.load %arg9[%c5, %c0_45, %c0_46] : memref<49x3x16xbf16, #tpu.memory_space<vmem>>, vector<1x3x16xbf16>
    %34 = vector.shape_cast %33 : vector<1x3x16xbf16> to vector<3x16xbf16>
    %cst_47 = arith.constant dense<0.000000e+00> : vector<32x16xf32>
    %35 = tpu.matmul %32, %34, %cst_47 {dimension_numbers = #tpu.dot_dimension_numbers<[1], [0], [0], [1], [0, 0, 1, 1], [], []>} : vector<32x3xbf16>, vector<3x16xbf16>, vector<32x16xf32> -> vector<32x16xf32>
    %36 = arith.addf %30, %35 : vector<32x16xf32>
    %c0_48 = arith.constant 0 : index
    %c0_49 = arith.constant 0 : index
    %c0_50 = arith.constant 0 : index
    %c3_51 = arith.constant 3 : index
    %c0_52 = arith.constant 0 : index
    %37 = vector.load %arg2[%c0_48, %c0_49, %c0_50, %c3_51, %c0_52] : memref<1x1x2x35x3xbf16, #tpu.memory_space<vmem>>, vector<1x1x1x32x3xbf16>
    %38 = vector.shape_cast %37 : vector<1x1x1x32x3xbf16> to vector<32x3xbf16>
    %c6 = arith.constant 6 : index
    %c0_53 = arith.constant 0 : index
    %c0_54 = arith.constant 0 : index
    %39 = vector.load %arg9[%c6, %c0_53, %c0_54] : memref<49x3x16xbf16, #tpu.memory_space<vmem>>, vector<1x3x16xbf16>
    %40 = vector.shape_cast %39 : vector<1x3x16xbf16> to vector<3x16xbf16>
    %cst_55 = arith.constant dense<0.000000e+00> : vector<32x16xf32>
    %41 = tpu.matmul %38, %40, %cst_55 {dimension_numbers = #tpu.dot_dimension_numbers<[1], [0], [0], [1], [0, 0, 1, 1], [], []>} : vector<32x3xbf16>, vector<3x16xbf16>, vector<32x16xf32> -> vector<32x16xf32>
    %42 = arith.addf %36, %41 : vector<32x16xf32>
    %c0_56 = arith.constant 0 : index
    %c0_57 = arith.constant 0 : index
    %c0_58 = arith.constant 0 : index
    %c0_59 = arith.constant 0 : index
    %c0_60 = arith.constant 0 : index
    %43 = vector.load %arg3[%c0_56, %c0_57, %c0_58, %c0_59, %c0_60] : memref<1x1x2x35x3xbf16, #tpu.memory_space<vmem>>, vector<1x1x1x32x3xbf16>
    %44 = vector.shape_cast %43 : vector<1x1x1x32x3xbf16> to vector<32x3xbf16>
    %c7 = arith.constant 7 : index
    %c0_61 = arith.constant 0 : index
    %c0_62 = arith.constant 0 : index
    %45 = vector.load %arg9[%c7, %c0_61, %c0_62] : memref<49x3x16xbf16, #tpu.memory_space<vmem>>, vector<1x3x16xbf16>
    %46 = vector.shape_cast %45 : vector<1x3x16xbf16> to vector<3x16xbf16>
    %cst_63 = arith.constant dense<0.000000e+00> : vector<32x16xf32>
    %47 = tpu.matmul %44, %46, %cst_63 {dimension_numbers = #tpu.dot_dimension_numbers<[1], [0], [0], [1], [0, 0, 1, 1], [], []>} : vector<32x3xbf16>, vector<3x16xbf16>, vector<32x16xf32> -> vector<32x16xf32>
    %48 = arith.addf %42, %47 : vector<32x16xf32>
    %c0_64 = arith.constant 0 : index
    %c0_65 = arith.constant 0 : index
    %c1_66 = arith.constant 1 : index
    %c0_67 = arith.constant 0 : index
    %c0_68 = arith.constant 0 : index
    %49 = vector.load %arg3[%c0_64, %c0_65, %c1_66, %c0_67, %c0_68] : memref<1x1x2x35x3xbf16, #tpu.memory_space<vmem>>, vector<1x1x1x32x3xbf16>
    %50 = vector.shape_cast %49 : vector<1x1x1x32x3xbf16> to vector<32x3xbf16>
    %c8 = arith.constant 8 : index
    %c0_69 = arith.constant 0 : index
    %c0_70 = arith.constant 0 : index
    %51 = vector.load %arg9[%c8, %c0_69, %c0_70] : memref<49x3x16xbf16, #tpu.memory_space<vmem>>, vector<1x3x16xbf16>
    %52 = vector.shape_cast %51 : vector<1x3x16xbf16> to vector<3x16xbf16>
    %cst_71 = arith.constant dense<0.000000e+00> : vector<32x16xf32>
    %53 = tpu.matmul %50, %52, %cst_71 {dimension_numbers = #tpu.dot_dimension_numbers<[1], [0], [0], [1], [0, 0, 1, 1], [], []>} : vector<32x3xbf16>, vector<3x16xbf16>, vector<32x16xf32> -> vector<32x16xf32>
    %54 = arith.addf %48, %53 : vector<32x16xf32>
    %c0_72 = arith.constant 0 : index
    %c0_73 = arith.constant 0 : index
    %c0_74 = arith.constant 0 : index
    %c1_75 = arith.constant 1 : index
    %c0_76 = arith.constant 0 : index
    %55 = vector.load %arg3[%c0_72, %c0_73, %c0_74, %c1_75, %c0_76] : memref<1x1x2x35x3xbf16, #tpu.memory_space<vmem>>, vector<1x1x1x32x3xbf16>
    %56 = vector.shape_cast %55 : vector<1x1x1x32x3xbf16> to vector<32x3xbf16>
    %c9 = arith.constant 9 : index
    %c0_77 = arith.constant 0 : index
    %c0_78 = arith.constant 0 : index
    %57 = vector.load %arg9[%c9, %c0_77, %c0_78] : memref<49x3x16xbf16, #tpu.memory_space<vmem>>, vector<1x3x16xbf16>
    %58 = vector.shape_cast %57 : vector<1x3x16xbf16> to vector<3x16xbf16>
    %cst_79 = arith.constant dense<0.000000e+00> : vector<32x16xf32>
    %59 = tpu.matmul %56, %58, %cst_79 {dimension_numbers = #tpu.dot_dimension_numbers<[1], [0], [0], [1], [0, 0, 1, 1], [], []>} : vector<32x3xbf16>, vector<3x16xbf16>, vector<32x16xf32> -> vector<32x16xf32>
    %60 = arith.addf %54, %59 : vector<32x16xf32>
    %c0_80 = arith.constant 0 : index
    %c0_81 = arith.constant 0 : index
    %c1_82 = arith.constant 1 : index
    %c1_83 = arith.constant 1 : index
    %c0_84 = arith.constant 0 : index
    %61 = vector.load %arg3[%c0_80, %c0_81, %c1_82, %c1_83, %c0_84] : memref<1x1x2x35x3xbf16, #tpu.memory_space<vmem>>, vector<1x1x1x32x3xbf16>
    %62 = vector.shape_cast %61 : vector<1x1x1x32x3xbf16> to vector<32x3xbf16>
    %c10 = arith.constant 10 : index
    %c0_85 = arith.constant 0 : index
    %c0_86 = arith.constant 0 : index
    %63 = vector.load %arg9[%c10, %c0_85, %c0_86] : memref<49x3x16xbf16, #tpu.memory_space<vmem>>, vector<1x3x16xbf16>
    %64 = vector.shape_cast %63 : vector<1x3x16xbf16> to vector<3x16xbf16>
    %cst_87 = arith.constant dense<0.000000e+00> : vector<32x16xf32>
    %65 = tpu.matmul %62, %64, %cst_87 {dimension_numbers = #tpu.dot_dimension_numbers<[1], [0], [0], [1], [0, 0, 1, 1], [], []>} : vector<32x3xbf16>, vector<3x16xbf16>, vector<32x16xf32> -> vector<32x16xf32>
    %66 = arith.addf %60, %65 : vector<32x16xf32>
    %c0_88 = arith.constant 0 : index
    %c0_89 = arith.constant 0 : index
    %c0_90 = arith.constant 0 : index
    %c2_91 = arith.constant 2 : index
    %c0_92 = arith.constant 0 : index
    %67 = vector.load %arg3[%c0_88, %c0_89, %c0_90, %c2_91, %c0_92] : memref<1x1x2x35x3xbf16, #tpu.memory_space<vmem>>, vector<1x1x1x32x3xbf16>
    %68 = vector.shape_cast %67 : vector<1x1x1x32x3xbf16> to vector<32x3xbf16>
    %c11 = arith.constant 11 : index
    %c0_93 = arith.constant 0 : index
    %c0_94 = arith.constant 0 : index
    %69 = vector.load %arg9[%c11, %c0_93, %c0_94] : memref<49x3x16xbf16, #tpu.memory_space<vmem>>, vector<1x3x16xbf16>
    %70 = vector.shape_cast %69 : vector<1x3x16xbf16> to vector<3x16xbf16>
    %cst_95 = arith.constant dense<0.000000e+00> : vector<32x16xf32>
    %71 = tpu.matmul %68, %70, %cst_95 {dimension_numbers = #tpu.dot_dimension_numbers<[1], [0], [0], [1], [0, 0, 1, 1], [], []>} : vector<32x3xbf16>, vector<3x16xbf16>, vector<32x16xf32> -> vector<32x16xf32>
    %72 = arith.addf %66, %71 : vector<32x16xf32>
    %c0_96 = arith.constant 0 : index
    %c0_97 = arith.constant 0 : index
    %c1_98 = arith.constant 1 : index
    %c2_99 = arith.constant 2 : index
    %c0_100 = arith.constant 0 : index
    %73 = vector.load %arg3[%c0_96, %c0_97, %c1_98, %c2_99, %c0_100] : memref<1x1x2x35x3xbf16, #tpu.memory_space<vmem>>, vector<1x1x1x32x3xbf16>
    %74 = vector.shape_cast %73 : vector<1x1x1x32x3xbf16> to vector<32x3xbf16>
    %c12 = arith.constant 12 : index
    %c0_101 = arith.constant 0 : index
    %c0_102 = arith.constant 0 : index
    %75 = vector.load %arg9[%c12, %c0_101, %c0_102] : memref<49x3x16xbf16, #tpu.memory_space<vmem>>, vector<1x3x16xbf16>
    %76 = vector.shape_cast %75 : vector<1x3x16xbf16> to vector<3x16xbf16>
    %cst_103 = arith.constant dense<0.000000e+00> : vector<32x16xf32>
    %77 = tpu.matmul %74, %76, %cst_103 {dimension_numbers = #tpu.dot_dimension_numbers<[1], [0], [0], [1], [0, 0, 1, 1], [], []>} : vector<32x3xbf16>, vector<3x16xbf16>, vector<32x16xf32> -> vector<32x16xf32>
    %78 = arith.addf %72, %77 : vector<32x16xf32>
    %c0_104 = arith.constant 0 : index
    %c0_105 = arith.constant 0 : index
    %c0_106 = arith.constant 0 : index
    %c3_107 = arith.constant 3 : index
    %c0_108 = arith.constant 0 : index
    %79 = vector.load %arg3[%c0_104, %c0_105, %c0_106, %c3_107, %c0_108] : memref<1x1x2x35x3xbf16, #tpu.memory_space<vmem>>, vector<1x1x1x32x3xbf16>
    %80 = vector.shape_cast %79 : vector<1x1x1x32x3xbf16> to vector<32x3xbf16>
    %c13 = arith.constant 13 : index
    %c0_109 = arith.constant 0 : index
    %c0_110 = arith.constant 0 : index
    %81 = vector.load %arg9[%c13, %c0_109, %c0_110] : memref<49x3x16xbf16, #tpu.memory_space<vmem>>, vector<1x3x16xbf16>
    %82 = vector.shape_cast %81 : vector<1x3x16xbf16> to vector<3x16xbf16>
    %cst_111 = arith.constant dense<0.000000e+00> : vector<32x16xf32>
    %83 = tpu.matmul %80, %82, %cst_111 {dimension_numbers = #tpu.dot_dimension_numbers<[1], [0], [0], [1], [0, 0, 1, 1], [], []>} : vector<32x3xbf16>, vector<3x16xbf16>, vector<32x16xf32> -> vector<32x16xf32>
    %84 = arith.addf %78, %83 : vector<32x16xf32>
    %c0_112 = arith.constant 0 : index
    %c0_113 = arith.constant 0 : index
    %c0_114 = arith.constant 0 : index
    %c0_115 = arith.constant 0 : index
    %c0_116 = arith.constant 0 : index
    %85 = vector.load %arg4[%c0_112, %c0_113, %c0_114, %c0_115, %c0_116] : memref<1x1x2x35x3xbf16, #tpu.memory_space<vmem>>, vector<1x1x1x32x3xbf16>
    %86 = vector.shape_cast %85 : vector<1x1x1x32x3xbf16> to vector<32x3xbf16>
    %c14 = arith.constant 14 : index
    %c0_117 = arith.constant 0 : index
    %c0_118 = arith.constant 0 : index
    %87 = vector.load %arg9[%c14, %c0_117, %c0_118] : memref<49x3x16xbf16, #tpu.memory_space<vmem>>, vector<1x3x16xbf16>
    %88 = vector.shape_cast %87 : vector<1x3x16xbf16> to vector<3x16xbf16>
    %cst_119 = arith.constant dense<0.000000e+00> : vector<32x16xf32>
    %89 = tpu.matmul %86, %88, %cst_119 {dimension_numbers = #tpu.dot_dimension_numbers<[1], [0], [0], [1], [0, 0, 1, 1], [], []>} : vector<32x3xbf16>, vector<3x16xbf16>, vector<32x16xf32> -> vector<32x16xf32>
    %90 = arith.addf %84, %89 : vector<32x16xf32>
    %c0_120 = arith.constant 0 : index
    %c0_121 = arith.constant 0 : index
    %c1_122 = arith.constant 1 : index
    %c0_123 = arith.constant 0 : index
    %c0_124 = arith.constant 0 : index
    %91 = vector.load %arg4[%c0_120, %c0_121, %c1_122, %c0_123, %c0_124] : memref<1x1x2x35x3xbf16, #tpu.memory_space<vmem>>, vector<1x1x1x32x3xbf16>
    %92 = vector.shape_cast %91 : vector<1x1x1x32x3xbf16> to vector<32x3xbf16>
    %c15 = arith.constant 15 : index
    %c0_125 = arith.constant 0 : index
    %c0_126 = arith.constant 0 : index
    %93 = vector.load %arg9[%c15, %c0_125, %c0_126] : memref<49x3x16xbf16, #tpu.memory_space<vmem>>, vector<1x3x16xbf16>
    %94 = vector.shape_cast %93 : vector<1x3x16xbf16> to vector<3x16xbf16>
    %cst_127 = arith.constant dense<0.000000e+00> : vector<32x16xf32>
    %95 = tpu.matmul %92, %94, %cst_127 {dimension_numbers = #tpu.dot_dimension_numbers<[1], [0], [0], [1], [0, 0, 1, 1], [], []>} : vector<32x3xbf16>, vector<3x16xbf16>, vector<32x16xf32> -> vector<32x16xf32>
    %96 = arith.addf %90, %95 : vector<32x16xf32>
    %c0_128 = arith.constant 0 : index
    %c0_129 = arith.constant 0 : index
    %c0_130 = arith.constant 0 : index
    %c1_131 = arith.constant 1 : index
    %c0_132 = arith.constant 0 : index
    %97 = vector.load %arg4[%c0_128, %c0_129, %c0_130, %c1_131, %c0_132] : memref<1x1x2x35x3xbf16, #tpu.memory_space<vmem>>, vector<1x1x1x32x3xbf16>
    %98 = vector.shape_cast %97 : vector<1x1x1x32x3xbf16> to vector<32x3xbf16>
    %c16 = arith.constant 16 : index
    %c0_133 = arith.constant 0 : index
    %c0_134 = arith.constant 0 : index
    %99 = vector.load %arg9[%c16, %c0_133, %c0_134] : memref<49x3x16xbf16, #tpu.memory_space<vmem>>, vector<1x3x16xbf16>
    %100 = vector.shape_cast %99 : vector<1x3x16xbf16> to vector<3x16xbf16>
    %cst_135 = arith.constant dense<0.000000e+00> : vector<32x16xf32>
    %101 = tpu.matmul %98, %100, %cst_135 {dimension_numbers = #tpu.dot_dimension_numbers<[1], [0], [0], [1], [0, 0, 1, 1], [], []>} : vector<32x3xbf16>, vector<3x16xbf16>, vector<32x16xf32> -> vector<32x16xf32>
    %102 = arith.addf %96, %101 : vector<32x16xf32>
    %c0_136 = arith.constant 0 : index
    %c0_137 = arith.constant 0 : index
    %c1_138 = arith.constant 1 : index
    %c1_139 = arith.constant 1 : index
    %c0_140 = arith.constant 0 : index
    %103 = vector.load %arg4[%c0_136, %c0_137, %c1_138, %c1_139, %c0_140] : memref<1x1x2x35x3xbf16, #tpu.memory_space<vmem>>, vector<1x1x1x32x3xbf16>
    %104 = vector.shape_cast %103 : vector<1x1x1x32x3xbf16> to vector<32x3xbf16>
    %c17 = arith.constant 17 : index
    %c0_141 = arith.constant 0 : index
    %c0_142 = arith.constant 0 : index
    %105 = vector.load %arg9[%c17, %c0_141, %c0_142] : memref<49x3x16xbf16, #tpu.memory_space<vmem>>, vector<1x3x16xbf16>
    %106 = vector.shape_cast %105 : vector<1x3x16xbf16> to vector<3x16xbf16>
    %cst_143 = arith.constant dense<0.000000e+00> : vector<32x16xf32>
    %107 = tpu.matmul %104, %106, %cst_143 {dimension_numbers = #tpu.dot_dimension_numbers<[1], [0], [0], [1], [0, 0, 1, 1], [], []>} : vector<32x3xbf16>, vector<3x16xbf16>, vector<32x16xf32> -> vector<32x16xf32>
    %108 = arith.addf %102, %107 : vector<32x16xf32>
    %c0_144 = arith.constant 0 : index
    %c0_145 = arith.constant 0 : index
    %c0_146 = arith.constant 0 : index
    %c2_147 = arith.constant 2 : index
    %c0_148 = arith.constant 0 : index
    %109 = vector.load %arg4[%c0_144, %c0_145, %c0_146, %c2_147, %c0_148] : memref<1x1x2x35x3xbf16, #tpu.memory_space<vmem>>, vector<1x1x1x32x3xbf16>
    %110 = vector.shape_cast %109 : vector<1x1x1x32x3xbf16> to vector<32x3xbf16>
    %c18 = arith.constant 18 : index
    %c0_149 = arith.constant 0 : index
    %c0_150 = arith.constant 0 : index
    %111 = vector.load %arg9[%c18, %c0_149, %c0_150] : memref<49x3x16xbf16, #tpu.memory_space<vmem>>, vector<1x3x16xbf16>
    %112 = vector.shape_cast %111 : vector<1x3x16xbf16> to vector<3x16xbf16>
    %cst_151 = arith.constant dense<0.000000e+00> : vector<32x16xf32>
    %113 = tpu.matmul %110, %112, %cst_151 {dimension_numbers = #tpu.dot_dimension_numbers<[1], [0], [0], [1], [0, 0, 1, 1], [], []>} : vector<32x3xbf16>, vector<3x16xbf16>, vector<32x16xf32> -> vector<32x16xf32>
    %114 = arith.addf %108, %113 : vector<32x16xf32>
    %c0_152 = arith.constant 0 : index
    %c0_153 = arith.constant 0 : index
    %c1_154 = arith.constant 1 : index
    %c2_155 = arith.constant 2 : index
    %c0_156 = arith.constant 0 : index
    %115 = vector.load %arg4[%c0_152, %c0_153, %c1_154, %c2_155, %c0_156] : memref<1x1x2x35x3xbf16, #tpu.memory_space<vmem>>, vector<1x1x1x32x3xbf16>
    %116 = vector.shape_cast %115 : vector<1x1x1x32x3xbf16> to vector<32x3xbf16>
    %c19 = arith.constant 19 : index
    %c0_157 = arith.constant 0 : index
    %c0_158 = arith.constant 0 : index
    %117 = vector.load %arg9[%c19, %c0_157, %c0_158] : memref<49x3x16xbf16, #tpu.memory_space<vmem>>, vector<1x3x16xbf16>
    %118 = vector.shape_cast %117 : vector<1x3x16xbf16> to vector<3x16xbf16>
    %cst_159 = arith.constant dense<0.000000e+00> : vector<32x16xf32>
    %119 = tpu.matmul %116, %118, %cst_159 {dimension_numbers = #tpu.dot_dimension_numbers<[1], [0], [0], [1], [0, 0, 1, 1], [], []>} : vector<32x3xbf16>, vector<3x16xbf16>, vector<32x16xf32> -> vector<32x16xf32>
    %120 = arith.addf %114, %119 : vector<32x16xf32>
    %c0_160 = arith.constant 0 : index
    %c0_161 = arith.constant 0 : index
    %c0_162 = arith.constant 0 : index
    %c3_163 = arith.constant 3 : index
    %c0_164 = arith.constant 0 : index
    %121 = vector.load %arg4[%c0_160, %c0_161, %c0_162, %c3_163, %c0_164] : memref<1x1x2x35x3xbf16, #tpu.memory_space<vmem>>, vector<1x1x1x32x3xbf16>
    %122 = vector.shape_cast %121 : vector<1x1x1x32x3xbf16> to vector<32x3xbf16>
    %c20 = arith.constant 20 : index
    %c0_165 = arith.constant 0 : index
    %c0_166 = arith.constant 0 : index
    %123 = vector.load %arg9[%c20, %c0_165, %c0_166] : memref<49x3x16xbf16, #tpu.memory_space<vmem>>, vector<1x3x16xbf16>
    %124 = vector.shape_cast %123 : vector<1x3x16xbf16> to vector<3x16xbf16>
    %cst_167 = arith.constant dense<0.000000e+00> : vector<32x16xf32>
    %125 = tpu.matmul %122, %124, %cst_167 {dimension_numbers = #tpu.dot_dimension_numbers<[1], [0], [0], [1], [0, 0, 1, 1], [], []>} : vector<32x3xbf16>, vector<3x16xbf16>, vector<32x16xf32> -> vector<32x16xf32>
    %126 = arith.addf %120, %125 : vector<32x16xf32>
    %c0_168 = arith.constant 0 : index
    %c0_169 = arith.constant 0 : index
    %c0_170 = arith.constant 0 : index
    %c0_171 = arith.constant 0 : index
    %c0_172 = arith.constant 0 : index
    %127 = vector.load %arg5[%c0_168, %c0_169, %c0_170, %c0_171, %c0_172] : memref<1x1x2x35x3xbf16, #tpu.memory_space<vmem>>, vector<1x1x1x32x3xbf16>
    %128 = vector.shape_cast %127 : vector<1x1x1x32x3xbf16> to vector<32x3xbf16>
    %c21 = arith.constant 21 : index
    %c0_173 = arith.constant 0 : index
    %c0_174 = arith.constant 0 : index
    %129 = vector.load %arg9[%c21, %c0_173, %c0_174] : memref<49x3x16xbf16, #tpu.memory_space<vmem>>, vector<1x3x16xbf16>
    %130 = vector.shape_cast %129 : vector<1x3x16xbf16> to vector<3x16xbf16>
    %cst_175 = arith.constant dense<0.000000e+00> : vector<32x16xf32>
    %131 = tpu.matmul %128, %130, %cst_175 {dimension_numbers = #tpu.dot_dimension_numbers<[1], [0], [0], [1], [0, 0, 1, 1], [], []>} : vector<32x3xbf16>, vector<3x16xbf16>, vector<32x16xf32> -> vector<32x16xf32>
    %132 = arith.addf %126, %131 : vector<32x16xf32>
    %c0_176 = arith.constant 0 : index
    %c0_177 = arith.constant 0 : index
    %c1_178 = arith.constant 1 : index
    %c0_179 = arith.constant 0 : index
    %c0_180 = arith.constant 0 : index
    %133 = vector.load %arg5[%c0_176, %c0_177, %c1_178, %c0_179, %c0_180] : memref<1x1x2x35x3xbf16, #tpu.memory_space<vmem>>, vector<1x1x1x32x3xbf16>
    %134 = vector.shape_cast %133 : vector<1x1x1x32x3xbf16> to vector<32x3xbf16>
    %c22 = arith.constant 22 : index
    %c0_181 = arith.constant 0 : index
    %c0_182 = arith.constant 0 : index
    %135 = vector.load %arg9[%c22, %c0_181, %c0_182] : memref<49x3x16xbf16, #tpu.memory_space<vmem>>, vector<1x3x16xbf16>
    %136 = vector.shape_cast %135 : vector<1x3x16xbf16> to vector<3x16xbf16>
    %cst_183 = arith.constant dense<0.000000e+00> : vector<32x16xf32>
    %137 = tpu.matmul %134, %136, %cst_183 {dimension_numbers = #tpu.dot_dimension_numbers<[1], [0], [0], [1], [0, 0, 1, 1], [], []>} : vector<32x3xbf16>, vector<3x16xbf16>, vector<32x16xf32> -> vector<32x16xf32>
    %138 = arith.addf %132, %137 : vector<32x16xf32>
    %c0_184 = arith.constant 0 : index
    %c0_185 = arith.constant 0 : index
    %c0_186 = arith.constant 0 : index
    %c1_187 = arith.constant 1 : index
    %c0_188 = arith.constant 0 : index
    %139 = vector.load %arg5[%c0_184, %c0_185, %c0_186, %c1_187, %c0_188] : memref<1x1x2x35x3xbf16, #tpu.memory_space<vmem>>, vector<1x1x1x32x3xbf16>
    %140 = vector.shape_cast %139 : vector<1x1x1x32x3xbf16> to vector<32x3xbf16>
    %c23 = arith.constant 23 : index
    %c0_189 = arith.constant 0 : index
    %c0_190 = arith.constant 0 : index
    %141 = vector.load %arg9[%c23, %c0_189, %c0_190] : memref<49x3x16xbf16, #tpu.memory_space<vmem>>, vector<1x3x16xbf16>
    %142 = vector.shape_cast %141 : vector<1x3x16xbf16> to vector<3x16xbf16>
    %cst_191 = arith.constant dense<0.000000e+00> : vector<32x16xf32>
    %143 = tpu.matmul %140, %142, %cst_191 {dimension_numbers = #tpu.dot_dimension_numbers<[1], [0], [0], [1], [0, 0, 1, 1], [], []>} : vector<32x3xbf16>, vector<3x16xbf16>, vector<32x16xf32> -> vector<32x16xf32>
    %144 = arith.addf %138, %143 : vector<32x16xf32>
    %c0_192 = arith.constant 0 : index
    %c0_193 = arith.constant 0 : index
    %c1_194 = arith.constant 1 : index
    %c1_195 = arith.constant 1 : index
    %c0_196 = arith.constant 0 : index
    %145 = vector.load %arg5[%c0_192, %c0_193, %c1_194, %c1_195, %c0_196] : memref<1x1x2x35x3xbf16, #tpu.memory_space<vmem>>, vector<1x1x1x32x3xbf16>
    %146 = vector.shape_cast %145 : vector<1x1x1x32x3xbf16> to vector<32x3xbf16>
    %c24 = arith.constant 24 : index
    %c0_197 = arith.constant 0 : index
    %c0_198 = arith.constant 0 : index
    %147 = vector.load %arg9[%c24, %c0_197, %c0_198] : memref<49x3x16xbf16, #tpu.memory_space<vmem>>, vector<1x3x16xbf16>
    %148 = vector.shape_cast %147 : vector<1x3x16xbf16> to vector<3x16xbf16>
    %cst_199 = arith.constant dense<0.000000e+00> : vector<32x16xf32>
    %149 = tpu.matmul %146, %148, %cst_199 {dimension_numbers = #tpu.dot_dimension_numbers<[1], [0], [0], [1], [0, 0, 1, 1], [], []>} : vector<32x3xbf16>, vector<3x16xbf16>, vector<32x16xf32> -> vector<32x16xf32>
    %150 = arith.addf %144, %149 : vector<32x16xf32>
    %c0_200 = arith.constant 0 : index
    %c0_201 = arith.constant 0 : index
    %c0_202 = arith.constant 0 : index
    %c2_203 = arith.constant 2 : index
    %c0_204 = arith.constant 0 : index
    %151 = vector.load %arg5[%c0_200, %c0_201, %c0_202, %c2_203, %c0_204] : memref<1x1x2x35x3xbf16, #tpu.memory_space<vmem>>, vector<1x1x1x32x3xbf16>
    %152 = vector.shape_cast %151 : vector<1x1x1x32x3xbf16> to vector<32x3xbf16>
    %c25 = arith.constant 25 : index
    %c0_205 = arith.constant 0 : index
    %c0_206 = arith.constant 0 : index
    %153 = vector.load %arg9[%c25, %c0_205, %c0_206] : memref<49x3x16xbf16, #tpu.memory_space<vmem>>, vector<1x3x16xbf16>
    %154 = vector.shape_cast %153 : vector<1x3x16xbf16> to vector<3x16xbf16>
    %cst_207 = arith.constant dense<0.000000e+00> : vector<32x16xf32>
    %155 = tpu.matmul %152, %154, %cst_207 {dimension_numbers = #tpu.dot_dimension_numbers<[1], [0], [0], [1], [0, 0, 1, 1], [], []>} : vector<32x3xbf16>, vector<3x16xbf16>, vector<32x16xf32> -> vector<32x16xf32>
    %156 = arith.addf %150, %155 : vector<32x16xf32>
    %c0_208 = arith.constant 0 : index
    %c0_209 = arith.constant 0 : index
    %c1_210 = arith.constant 1 : index
    %c2_211 = arith.constant 2 : index
    %c0_212 = arith.constant 0 : index
    %157 = vector.load %arg5[%c0_208, %c0_209, %c1_210, %c2_211, %c0_212] : memref<1x1x2x35x3xbf16, #tpu.memory_space<vmem>>, vector<1x1x1x32x3xbf16>
    %158 = vector.shape_cast %157 : vector<1x1x1x32x3xbf16> to vector<32x3xbf16>
    %c26 = arith.constant 26 : index
    %c0_213 = arith.constant 0 : index
    %c0_214 = arith.constant 0 : index
    %159 = vector.load %arg9[%c26, %c0_213, %c0_214] : memref<49x3x16xbf16, #tpu.memory_space<vmem>>, vector<1x3x16xbf16>
    %160 = vector.shape_cast %159 : vector<1x3x16xbf16> to vector<3x16xbf16>
    %cst_215 = arith.constant dense<0.000000e+00> : vector<32x16xf32>
    %161 = tpu.matmul %158, %160, %cst_215 {dimension_numbers = #tpu.dot_dimension_numbers<[1], [0], [0], [1], [0, 0, 1, 1], [], []>} : vector<32x3xbf16>, vector<3x16xbf16>, vector<32x16xf32> -> vector<32x16xf32>
    %162 = arith.addf %156, %161 : vector<32x16xf32>
    %c0_216 = arith.constant 0 : index
    %c0_217 = arith.constant 0 : index
    %c0_218 = arith.constant 0 : index
    %c3_219 = arith.constant 3 : index
    %c0_220 = arith.constant 0 : index
    %163 = vector.load %arg5[%c0_216, %c0_217, %c0_218, %c3_219, %c0_220] : memref<1x1x2x35x3xbf16, #tpu.memory_space<vmem>>, vector<1x1x1x32x3xbf16>
    %164 = vector.shape_cast %163 : vector<1x1x1x32x3xbf16> to vector<32x3xbf16>
    %c27 = arith.constant 27 : index
    %c0_221 = arith.constant 0 : index
    %c0_222 = arith.constant 0 : index
    %165 = vector.load %arg9[%c27, %c0_221, %c0_222] : memref<49x3x16xbf16, #tpu.memory_space<vmem>>, vector<1x3x16xbf16>
    %166 = vector.shape_cast %165 : vector<1x3x16xbf16> to vector<3x16xbf16>
    %cst_223 = arith.constant dense<0.000000e+00> : vector<32x16xf32>
    %167 = tpu.matmul %164, %166, %cst_223 {dimension_numbers = #tpu.dot_dimension_numbers<[1], [0], [0], [1], [0, 0, 1, 1], [], []>} : vector<32x3xbf16>, vector<3x16xbf16>, vector<32x16xf32> -> vector<32x16xf32>
    %168 = arith.addf %162, %167 : vector<32x16xf32>
    %c0_224 = arith.constant 0 : index
    %c0_225 = arith.constant 0 : index
    %c0_226 = arith.constant 0 : index
    %c0_227 = arith.constant 0 : index
    %c0_228 = arith.constant 0 : index
    %169 = vector.load %arg6[%c0_224, %c0_225, %c0_226, %c0_227, %c0_228] : memref<1x1x2x35x3xbf16, #tpu.memory_space<vmem>>, vector<1x1x1x32x3xbf16>
    %170 = vector.shape_cast %169 : vector<1x1x1x32x3xbf16> to vector<32x3xbf16>
    %c28 = arith.constant 28 : index
    %c0_229 = arith.constant 0 : index
    %c0_230 = arith.constant 0 : index
    %171 = vector.load %arg9[%c28, %c0_229, %c0_230] : memref<49x3x16xbf16, #tpu.memory_space<vmem>>, vector<1x3x16xbf16>
    %172 = vector.shape_cast %171 : vector<1x3x16xbf16> to vector<3x16xbf16>
    %cst_231 = arith.constant dense<0.000000e+00> : vector<32x16xf32>
    %173 = tpu.matmul %170, %172, %cst_231 {dimension_numbers = #tpu.dot_dimension_numbers<[1], [0], [0], [1], [0, 0, 1, 1], [], []>} : vector<32x3xbf16>, vector<3x16xbf16>, vector<32x16xf32> -> vector<32x16xf32>
    %174 = arith.addf %168, %173 : vector<32x16xf32>
    %c0_232 = arith.constant 0 : index
    %c0_233 = arith.constant 0 : index
    %c1_234 = arith.constant 1 : index
    %c0_235 = arith.constant 0 : index
    %c0_236 = arith.constant 0 : index
    %175 = vector.load %arg6[%c0_232, %c0_233, %c1_234, %c0_235, %c0_236] : memref<1x1x2x35x3xbf16, #tpu.memory_space<vmem>>, vector<1x1x1x32x3xbf16>
    %176 = vector.shape_cast %175 : vector<1x1x1x32x3xbf16> to vector<32x3xbf16>
    %c29 = arith.constant 29 : index
    %c0_237 = arith.constant 0 : index
    %c0_238 = arith.constant 0 : index
    %177 = vector.load %arg9[%c29, %c0_237, %c0_238] : memref<49x3x16xbf16, #tpu.memory_space<vmem>>, vector<1x3x16xbf16>
    %178 = vector.shape_cast %177 : vector<1x3x16xbf16> to vector<3x16xbf16>
    %cst_239 = arith.constant dense<0.000000e+00> : vector<32x16xf32>
    %179 = tpu.matmul %176, %178, %cst_239 {dimension_numbers = #tpu.dot_dimension_numbers<[1], [0], [0], [1], [0, 0, 1, 1], [], []>} : vector<32x3xbf16>, vector<3x16xbf16>, vector<32x16xf32> -> vector<32x16xf32>
    %180 = arith.addf %174, %179 : vector<32x16xf32>
    %c0_240 = arith.constant 0 : index
    %c0_241 = arith.constant 0 : index
    %c0_242 = arith.constant 0 : index
    %c1_243 = arith.constant 1 : index
    %c0_244 = arith.constant 0 : index
    %181 = vector.load %arg6[%c0_240, %c0_241, %c0_242, %c1_243, %c0_244] : memref<1x1x2x35x3xbf16, #tpu.memory_space<vmem>>, vector<1x1x1x32x3xbf16>
    %182 = vector.shape_cast %181 : vector<1x1x1x32x3xbf16> to vector<32x3xbf16>
    %c30 = arith.constant 30 : index
    %c0_245 = arith.constant 0 : index
    %c0_246 = arith.constant 0 : index
    %183 = vector.load %arg9[%c30, %c0_245, %c0_246] : memref<49x3x16xbf16, #tpu.memory_space<vmem>>, vector<1x3x16xbf16>
    %184 = vector.shape_cast %183 : vector<1x3x16xbf16> to vector<3x16xbf16>
    %cst_247 = arith.constant dense<0.000000e+00> : vector<32x16xf32>
    %185 = tpu.matmul %182, %184, %cst_247 {dimension_numbers = #tpu.dot_dimension_numbers<[1], [0], [0], [1], [0, 0, 1, 1], [], []>} : vector<32x3xbf16>, vector<3x16xbf16>, vector<32x16xf32> -> vector<32x16xf32>
    %186 = arith.addf %180, %185 : vector<32x16xf32>
    %c0_248 = arith.constant 0 : index
    %c0_249 = arith.constant 0 : index
    %c1_250 = arith.constant 1 : index
    %c1_251 = arith.constant 1 : index
    %c0_252 = arith.constant 0 : index
    %187 = vector.load %arg6[%c0_248, %c0_249, %c1_250, %c1_251, %c0_252] : memref<1x1x2x35x3xbf16, #tpu.memory_space<vmem>>, vector<1x1x1x32x3xbf16>
    %188 = vector.shape_cast %187 : vector<1x1x1x32x3xbf16> to vector<32x3xbf16>
    %c31 = arith.constant 31 : index
    %c0_253 = arith.constant 0 : index
    %c0_254 = arith.constant 0 : index
    %189 = vector.load %arg9[%c31, %c0_253, %c0_254] : memref<49x3x16xbf16, #tpu.memory_space<vmem>>, vector<1x3x16xbf16>
    %190 = vector.shape_cast %189 : vector<1x3x16xbf16> to vector<3x16xbf16>
    %cst_255 = arith.constant dense<0.000000e+00> : vector<32x16xf32>
    %191 = tpu.matmul %188, %190, %cst_255 {dimension_numbers = #tpu.dot_dimension_numbers<[1], [0], [0], [1], [0, 0, 1, 1], [], []>} : vector<32x3xbf16>, vector<3x16xbf16>, vector<32x16xf32> -> vector<32x16xf32>
    %192 = arith.addf %186, %191 : vector<32x16xf32>
    %c0_256 = arith.constant 0 : index
    %c0_257 = arith.constant 0 : index
    %c0_258 = arith.constant 0 : index
    %c2_259 = arith.constant 2 : index
    %c0_260 = arith.constant 0 : index
    %193 = vector.load %arg6[%c0_256, %c0_257, %c0_258, %c2_259, %c0_260] : memref<1x1x2x35x3xbf16, #tpu.memory_space<vmem>>, vector<1x1x1x32x3xbf16>
    %194 = vector.shape_cast %193 : vector<1x1x1x32x3xbf16> to vector<32x3xbf16>
    %c32 = arith.constant 32 : index
    %c0_261 = arith.constant 0 : index
    %c0_262 = arith.constant 0 : index
    %195 = vector.load %arg9[%c32, %c0_261, %c0_262] : memref<49x3x16xbf16, #tpu.memory_space<vmem>>, vector<1x3x16xbf16>
    %196 = vector.shape_cast %195 : vector<1x3x16xbf16> to vector<3x16xbf16>
    %cst_263 = arith.constant dense<0.000000e+00> : vector<32x16xf32>
    %197 = tpu.matmul %194, %196, %cst_263 {dimension_numbers = #tpu.dot_dimension_numbers<[1], [0], [0], [1], [0, 0, 1, 1], [], []>} : vector<32x3xbf16>, vector<3x16xbf16>, vector<32x16xf32> -> vector<32x16xf32>
    %198 = arith.addf %192, %197 : vector<32x16xf32>
    %c0_264 = arith.constant 0 : index
    %c0_265 = arith.constant 0 : index
    %c1_266 = arith.constant 1 : index
    %c2_267 = arith.constant 2 : index
    %c0_268 = arith.constant 0 : index
    %199 = vector.load %arg6[%c0_264, %c0_265, %c1_266, %c2_267, %c0_268] : memref<1x1x2x35x3xbf16, #tpu.memory_space<vmem>>, vector<1x1x1x32x3xbf16>
    %200 = vector.shape_cast %199 : vector<1x1x1x32x3xbf16> to vector<32x3xbf16>
    %c33 = arith.constant 33 : index
    %c0_269 = arith.constant 0 : index
    %c0_270 = arith.constant 0 : index
    %201 = vector.load %arg9[%c33, %c0_269, %c0_270] : memref<49x3x16xbf16, #tpu.memory_space<vmem>>, vector<1x3x16xbf16>
    %202 = vector.shape_cast %201 : vector<1x3x16xbf16> to vector<3x16xbf16>
    %cst_271 = arith.constant dense<0.000000e+00> : vector<32x16xf32>
    %203 = tpu.matmul %200, %202, %cst_271 {dimension_numbers = #tpu.dot_dimension_numbers<[1], [0], [0], [1], [0, 0, 1, 1], [], []>} : vector<32x3xbf16>, vector<3x16xbf16>, vector<32x16xf32> -> vector<32x16xf32>
    %204 = arith.addf %198, %203 : vector<32x16xf32>
    %c0_272 = arith.constant 0 : index
    %c0_273 = arith.constant 0 : index
    %c0_274 = arith.constant 0 : index
    %c3_275 = arith.constant 3 : index
    %c0_276 = arith.constant 0 : index
    %205 = vector.load %arg6[%c0_272, %c0_273, %c0_274, %c3_275, %c0_276] : memref<1x1x2x35x3xbf16, #tpu.memory_space<vmem>>, vector<1x1x1x32x3xbf16>
    %206 = vector.shape_cast %205 : vector<1x1x1x32x3xbf16> to vector<32x3xbf16>
    %c34 = arith.constant 34 : index
    %c0_277 = arith.constant 0 : index
    %c0_278 = arith.constant 0 : index
    %207 = vector.load %arg9[%c34, %c0_277, %c0_278] : memref<49x3x16xbf16, #tpu.memory_space<vmem>>, vector<1x3x16xbf16>
    %208 = vector.shape_cast %207 : vector<1x3x16xbf16> to vector<3x16xbf16>
    %cst_279 = arith.constant dense<0.000000e+00> : vector<32x16xf32>
    %209 = tpu.matmul %206, %208, %cst_279 {dimension_numbers = #tpu.dot_dimension_numbers<[1], [0], [0], [1], [0, 0, 1, 1], [], []>} : vector<32x3xbf16>, vector<3x16xbf16>, vector<32x16xf32> -> vector<32x16xf32>
    %210 = arith.addf %204, %209 : vector<32x16xf32>
    %c0_280 = arith.constant 0 : index
    %c0_281 = arith.constant 0 : index
    %c0_282 = arith.constant 0 : index
    %c0_283 = arith.constant 0 : index
    %c0_284 = arith.constant 0 : index
    %211 = vector.load %arg7[%c0_280, %c0_281, %c0_282, %c0_283, %c0_284] : memref<1x1x2x35x3xbf16, #tpu.memory_space<vmem>>, vector<1x1x1x32x3xbf16>
    %212 = vector.shape_cast %211 : vector<1x1x1x32x3xbf16> to vector<32x3xbf16>
    %c35 = arith.constant 35 : index
    %c0_285 = arith.constant 0 : index
    %c0_286 = arith.constant 0 : index
    %213 = vector.load %arg9[%c35, %c0_285, %c0_286] : memref<49x3x16xbf16, #tpu.memory_space<vmem>>, vector<1x3x16xbf16>
    %214 = vector.shape_cast %213 : vector<1x3x16xbf16> to vector<3x16xbf16>
    %cst_287 = arith.constant dense<0.000000e+00> : vector<32x16xf32>
    %215 = tpu.matmul %212, %214, %cst_287 {dimension_numbers = #tpu.dot_dimension_numbers<[1], [0], [0], [1], [0, 0, 1, 1], [], []>} : vector<32x3xbf16>, vector<3x16xbf16>, vector<32x16xf32> -> vector<32x16xf32>
    %216 = arith.addf %210, %215 : vector<32x16xf32>
    %c0_288 = arith.constant 0 : index
    %c0_289 = arith.constant 0 : index
    %c1_290 = arith.constant 1 : index
    %c0_291 = arith.constant 0 : index
    %c0_292 = arith.constant 0 : index
    %217 = vector.load %arg7[%c0_288, %c0_289, %c1_290, %c0_291, %c0_292] : memref<1x1x2x35x3xbf16, #tpu.memory_space<vmem>>, vector<1x1x1x32x3xbf16>
    %218 = vector.shape_cast %217 : vector<1x1x1x32x3xbf16> to vector<32x3xbf16>
    %c36 = arith.constant 36 : index
    %c0_293 = arith.constant 0 : index
    %c0_294 = arith.constant 0 : index
    %219 = vector.load %arg9[%c36, %c0_293, %c0_294] : memref<49x3x16xbf16, #tpu.memory_space<vmem>>, vector<1x3x16xbf16>
    %220 = vector.shape_cast %219 : vector<1x3x16xbf16> to vector<3x16xbf16>
    %cst_295 = arith.constant dense<0.000000e+00> : vector<32x16xf32>
    %221 = tpu.matmul %218, %220, %cst_295 {dimension_numbers = #tpu.dot_dimension_numbers<[1], [0], [0], [1], [0, 0, 1, 1], [], []>} : vector<32x3xbf16>, vector<3x16xbf16>, vector<32x16xf32> -> vector<32x16xf32>
    %222 = arith.addf %216, %221 : vector<32x16xf32>
    %c0_296 = arith.constant 0 : index
    %c0_297 = arith.constant 0 : index
    %c0_298 = arith.constant 0 : index
    %c1_299 = arith.constant 1 : index
    %c0_300 = arith.constant 0 : index
    %223 = vector.load %arg7[%c0_296, %c0_297, %c0_298, %c1_299, %c0_300] : memref<1x1x2x35x3xbf16, #tpu.memory_space<vmem>>, vector<1x1x1x32x3xbf16>
    %224 = vector.shape_cast %223 : vector<1x1x1x32x3xbf16> to vector<32x3xbf16>
    %c37 = arith.constant 37 : index
    %c0_301 = arith.constant 0 : index
    %c0_302 = arith.constant 0 : index
    %225 = vector.load %arg9[%c37, %c0_301, %c0_302] : memref<49x3x16xbf16, #tpu.memory_space<vmem>>, vector<1x3x16xbf16>
    %226 = vector.shape_cast %225 : vector<1x3x16xbf16> to vector<3x16xbf16>
    %cst_303 = arith.constant dense<0.000000e+00> : vector<32x16xf32>
    %227 = tpu.matmul %224, %226, %cst_303 {dimension_numbers = #tpu.dot_dimension_numbers<[1], [0], [0], [1], [0, 0, 1, 1], [], []>} : vector<32x3xbf16>, vector<3x16xbf16>, vector<32x16xf32> -> vector<32x16xf32>
    %228 = arith.addf %222, %227 : vector<32x16xf32>
    %c0_304 = arith.constant 0 : index
    %c0_305 = arith.constant 0 : index
    %c1_306 = arith.constant 1 : index
    %c1_307 = arith.constant 1 : index
    %c0_308 = arith.constant 0 : index
    %229 = vector.load %arg7[%c0_304, %c0_305, %c1_306, %c1_307, %c0_308] : memref<1x1x2x35x3xbf16, #tpu.memory_space<vmem>>, vector<1x1x1x32x3xbf16>
    %230 = vector.shape_cast %229 : vector<1x1x1x32x3xbf16> to vector<32x3xbf16>
    %c38 = arith.constant 38 : index
    %c0_309 = arith.constant 0 : index
    %c0_310 = arith.constant 0 : index
    %231 = vector.load %arg9[%c38, %c0_309, %c0_310] : memref<49x3x16xbf16, #tpu.memory_space<vmem>>, vector<1x3x16xbf16>
    %232 = vector.shape_cast %231 : vector<1x3x16xbf16> to vector<3x16xbf16>
    %cst_311 = arith.constant dense<0.000000e+00> : vector<32x16xf32>
    %233 = tpu.matmul %230, %232, %cst_311 {dimension_numbers = #tpu.dot_dimension_numbers<[1], [0], [0], [1], [0, 0, 1, 1], [], []>} : vector<32x3xbf16>, vector<3x16xbf16>, vector<32x16xf32> -> vector<32x16xf32>
    %234 = arith.addf %228, %233 : vector<32x16xf32>
    %c0_312 = arith.constant 0 : index
    %c0_313 = arith.constant 0 : index
    %c0_314 = arith.constant 0 : index
    %c2_315 = arith.constant 2 : index
    %c0_316 = arith.constant 0 : index
    %235 = vector.load %arg7[%c0_312, %c0_313, %c0_314, %c2_315, %c0_316] : memref<1x1x2x35x3xbf16, #tpu.memory_space<vmem>>, vector<1x1x1x32x3xbf16>
    %236 = vector.shape_cast %235 : vector<1x1x1x32x3xbf16> to vector<32x3xbf16>
    %c39 = arith.constant 39 : index
    %c0_317 = arith.constant 0 : index
    %c0_318 = arith.constant 0 : index
    %237 = vector.load %arg9[%c39, %c0_317, %c0_318] : memref<49x3x16xbf16, #tpu.memory_space<vmem>>, vector<1x3x16xbf16>
    %238 = vector.shape_cast %237 : vector<1x3x16xbf16> to vector<3x16xbf16>
    %cst_319 = arith.constant dense<0.000000e+00> : vector<32x16xf32>
    %239 = tpu.matmul %236, %238, %cst_319 {dimension_numbers = #tpu.dot_dimension_numbers<[1], [0], [0], [1], [0, 0, 1, 1], [], []>} : vector<32x3xbf16>, vector<3x16xbf16>, vector<32x16xf32> -> vector<32x16xf32>
    %240 = arith.addf %234, %239 : vector<32x16xf32>
    %c0_320 = arith.constant 0 : index
    %c0_321 = arith.constant 0 : index
    %c1_322 = arith.constant 1 : index
    %c2_323 = arith.constant 2 : index
    %c0_324 = arith.constant 0 : index
    %241 = vector.load %arg7[%c0_320, %c0_321, %c1_322, %c2_323, %c0_324] : memref<1x1x2x35x3xbf16, #tpu.memory_space<vmem>>, vector<1x1x1x32x3xbf16>
    %242 = vector.shape_cast %241 : vector<1x1x1x32x3xbf16> to vector<32x3xbf16>
    %c40 = arith.constant 40 : index
    %c0_325 = arith.constant 0 : index
    %c0_326 = arith.constant 0 : index
    %243 = vector.load %arg9[%c40, %c0_325, %c0_326] : memref<49x3x16xbf16, #tpu.memory_space<vmem>>, vector<1x3x16xbf16>
    %244 = vector.shape_cast %243 : vector<1x3x16xbf16> to vector<3x16xbf16>
    %cst_327 = arith.constant dense<0.000000e+00> : vector<32x16xf32>
    %245 = tpu.matmul %242, %244, %cst_327 {dimension_numbers = #tpu.dot_dimension_numbers<[1], [0], [0], [1], [0, 0, 1, 1], [], []>} : vector<32x3xbf16>, vector<3x16xbf16>, vector<32x16xf32> -> vector<32x16xf32>
    %246 = arith.addf %240, %245 : vector<32x16xf32>
    %c0_328 = arith.constant 0 : index
    %c0_329 = arith.constant 0 : index
    %c0_330 = arith.constant 0 : index
    %c3_331 = arith.constant 3 : index
    %c0_332 = arith.constant 0 : index
    %247 = vector.load %arg7[%c0_328, %c0_329, %c0_330, %c3_331, %c0_332] : memref<1x1x2x35x3xbf16, #tpu.memory_space<vmem>>, vector<1x1x1x32x3xbf16>
    %248 = vector.shape_cast %247 : vector<1x1x1x32x3xbf16> to vector<32x3xbf16>
    %c41 = arith.constant 41 : index
    %c0_333 = arith.constant 0 : index
    %c0_334 = arith.constant 0 : index
    %249 = vector.load %arg9[%c41, %c0_333, %c0_334] : memref<49x3x16xbf16, #tpu.memory_space<vmem>>, vector<1x3x16xbf16>
    %250 = vector.shape_cast %249 : vector<1x3x16xbf16> to vector<3x16xbf16>
    %cst_335 = arith.constant dense<0.000000e+00> : vector<32x16xf32>
    %251 = tpu.matmul %248, %250, %cst_335 {dimension_numbers = #tpu.dot_dimension_numbers<[1], [0], [0], [1], [0, 0, 1, 1], [], []>} : vector<32x3xbf16>, vector<3x16xbf16>, vector<32x16xf32> -> vector<32x16xf32>
    %252 = arith.addf %246, %251 : vector<32x16xf32>
    %c0_336 = arith.constant 0 : index
    %c0_337 = arith.constant 0 : index
    %c0_338 = arith.constant 0 : index
    %c0_339 = arith.constant 0 : index
    %c0_340 = arith.constant 0 : index
    %253 = vector.load %arg8[%c0_336, %c0_337, %c0_338, %c0_339, %c0_340] : memref<1x1x2x35x3xbf16, #tpu.memory_space<vmem>>, vector<1x1x1x32x3xbf16>
    %254 = vector.shape_cast %253 : vector<1x1x1x32x3xbf16> to vector<32x3xbf16>
    %c42 = arith.constant 42 : index
    %c0_341 = arith.constant 0 : index
    %c0_342 = arith.constant 0 : index
    %255 = vector.load %arg9[%c42, %c0_341, %c0_342] : memref<49x3x16xbf16, #tpu.memory_space<vmem>>, vector<1x3x16xbf16>
    %256 = vector.shape_cast %255 : vector<1x3x16xbf16> to vector<3x16xbf16>
    %cst_343 = arith.constant dense<0.000000e+00> : vector<32x16xf32>
    %257 = tpu.matmul %254, %256, %cst_343 {dimension_numbers = #tpu.dot_dimension_numbers<[1], [0], [0], [1], [0, 0, 1, 1], [], []>} : vector<32x3xbf16>, vector<3x16xbf16>, vector<32x16xf32> -> vector<32x16xf32>
    %258 = arith.addf %252, %257 : vector<32x16xf32>
    %c0_344 = arith.constant 0 : index
    %c0_345 = arith.constant 0 : index
    %c1_346 = arith.constant 1 : index
    %c0_347 = arith.constant 0 : index
    %c0_348 = arith.constant 0 : index
    %259 = vector.load %arg8[%c0_344, %c0_345, %c1_346, %c0_347, %c0_348] : memref<1x1x2x35x3xbf16, #tpu.memory_space<vmem>>, vector<1x1x1x32x3xbf16>
    %260 = vector.shape_cast %259 : vector<1x1x1x32x3xbf16> to vector<32x3xbf16>
    %c43 = arith.constant 43 : index
    %c0_349 = arith.constant 0 : index
    %c0_350 = arith.constant 0 : index
    %261 = vector.load %arg9[%c43, %c0_349, %c0_350] : memref<49x3x16xbf16, #tpu.memory_space<vmem>>, vector<1x3x16xbf16>
    %262 = vector.shape_cast %261 : vector<1x3x16xbf16> to vector<3x16xbf16>
    %cst_351 = arith.constant dense<0.000000e+00> : vector<32x16xf32>
    %263 = tpu.matmul %260, %262, %cst_351 {dimension_numbers = #tpu.dot_dimension_numbers<[1], [0], [0], [1], [0, 0, 1, 1], [], []>} : vector<32x3xbf16>, vector<3x16xbf16>, vector<32x16xf32> -> vector<32x16xf32>
    %264 = arith.addf %258, %263 : vector<32x16xf32>
    %c0_352 = arith.constant 0 : index
    %c0_353 = arith.constant 0 : index
    %c0_354 = arith.constant 0 : index
    %c1_355 = arith.constant 1 : index
    %c0_356 = arith.constant 0 : index
    %265 = vector.load %arg8[%c0_352, %c0_353, %c0_354, %c1_355, %c0_356] : memref<1x1x2x35x3xbf16, #tpu.memory_space<vmem>>, vector<1x1x1x32x3xbf16>
    %266 = vector.shape_cast %265 : vector<1x1x1x32x3xbf16> to vector<32x3xbf16>
    %c44 = arith.constant 44 : index
    %c0_357 = arith.constant 0 : index
    %c0_358 = arith.constant 0 : index
    %267 = vector.load %arg9[%c44, %c0_357, %c0_358] : memref<49x3x16xbf16, #tpu.memory_space<vmem>>, vector<1x3x16xbf16>
    %268 = vector.shape_cast %267 : vector<1x3x16xbf16> to vector<3x16xbf16>
    %cst_359 = arith.constant dense<0.000000e+00> : vector<32x16xf32>
    %269 = tpu.matmul %266, %268, %cst_359 {dimension_numbers = #tpu.dot_dimension_numbers<[1], [0], [0], [1], [0, 0, 1, 1], [], []>} : vector<32x3xbf16>, vector<3x16xbf16>, vector<32x16xf32> -> vector<32x16xf32>
    %270 = arith.addf %264, %269 : vector<32x16xf32>
    %c0_360 = arith.constant 0 : index
    %c0_361 = arith.constant 0 : index
    %c1_362 = arith.constant 1 : index
    %c1_363 = arith.constant 1 : index
    %c0_364 = arith.constant 0 : index
    %271 = vector.load %arg8[%c0_360, %c0_361, %c1_362, %c1_363, %c0_364] : memref<1x1x2x35x3xbf16, #tpu.memory_space<vmem>>, vector<1x1x1x32x3xbf16>
    %272 = vector.shape_cast %271 : vector<1x1x1x32x3xbf16> to vector<32x3xbf16>
    %c45 = arith.constant 45 : index
    %c0_365 = arith.constant 0 : index
    %c0_366 = arith.constant 0 : index
    %273 = vector.load %arg9[%c45, %c0_365, %c0_366] : memref<49x3x16xbf16, #tpu.memory_space<vmem>>, vector<1x3x16xbf16>
    %274 = vector.shape_cast %273 : vector<1x3x16xbf16> to vector<3x16xbf16>
    %cst_367 = arith.constant dense<0.000000e+00> : vector<32x16xf32>
    %275 = tpu.matmul %272, %274, %cst_367 {dimension_numbers = #tpu.dot_dimension_numbers<[1], [0], [0], [1], [0, 0, 1, 1], [], []>} : vector<32x3xbf16>, vector<3x16xbf16>, vector<32x16xf32> -> vector<32x16xf32>
    %276 = arith.addf %270, %275 : vector<32x16xf32>
    %c0_368 = arith.constant 0 : index
    %c0_369 = arith.constant 0 : index
    %c0_370 = arith.constant 0 : index
    %c2_371 = arith.constant 2 : index
    %c0_372 = arith.constant 0 : index
    %277 = vector.load %arg8[%c0_368, %c0_369, %c0_370, %c2_371, %c0_372] : memref<1x1x2x35x3xbf16, #tpu.memory_space<vmem>>, vector<1x1x1x32x3xbf16>
    %278 = vector.shape_cast %277 : vector<1x1x1x32x3xbf16> to vector<32x3xbf16>
    %c46 = arith.constant 46 : index
    %c0_373 = arith.constant 0 : index
    %c0_374 = arith.constant 0 : index
    %279 = vector.load %arg9[%c46, %c0_373, %c0_374] : memref<49x3x16xbf16, #tpu.memory_space<vmem>>, vector<1x3x16xbf16>
    %280 = vector.shape_cast %279 : vector<1x3x16xbf16> to vector<3x16xbf16>
    %cst_375 = arith.constant dense<0.000000e+00> : vector<32x16xf32>
    %281 = tpu.matmul %278, %280, %cst_375 {dimension_numbers = #tpu.dot_dimension_numbers<[1], [0], [0], [1], [0, 0, 1, 1], [], []>} : vector<32x3xbf16>, vector<3x16xbf16>, vector<32x16xf32> -> vector<32x16xf32>
    %282 = arith.addf %276, %281 : vector<32x16xf32>
    %c0_376 = arith.constant 0 : index
    %c0_377 = arith.constant 0 : index
    %c1_378 = arith.constant 1 : index
    %c2_379 = arith.constant 2 : index
    %c0_380 = arith.constant 0 : index
    %283 = vector.load %arg8[%c0_376, %c0_377, %c1_378, %c2_379, %c0_380] : memref<1x1x2x35x3xbf16, #tpu.memory_space<vmem>>, vector<1x1x1x32x3xbf16>
    %284 = vector.shape_cast %283 : vector<1x1x1x32x3xbf16> to vector<32x3xbf16>
    %c47 = arith.constant 47 : index
    %c0_381 = arith.constant 0 : index
    %c0_382 = arith.constant 0 : index
    %285 = vector.load %arg9[%c47, %c0_381, %c0_382] : memref<49x3x16xbf16, #tpu.memory_space<vmem>>, vector<1x3x16xbf16>
    %286 = vector.shape_cast %285 : vector<1x3x16xbf16> to vector<3x16xbf16>
    %cst_383 = arith.constant dense<0.000000e+00> : vector<32x16xf32>
    %287 = tpu.matmul %284, %286, %cst_383 {dimension_numbers = #tpu.dot_dimension_numbers<[1], [0], [0], [1], [0, 0, 1, 1], [], []>} : vector<32x3xbf16>, vector<3x16xbf16>, vector<32x16xf32> -> vector<32x16xf32>
    %288 = arith.addf %282, %287 : vector<32x16xf32>
    %c0_384 = arith.constant 0 : index
    %c0_385 = arith.constant 0 : index
    %c0_386 = arith.constant 0 : index
    %c3_387 = arith.constant 3 : index
    %c0_388 = arith.constant 0 : index
    %289 = vector.load %arg8[%c0_384, %c0_385, %c0_386, %c3_387, %c0_388] : memref<1x1x2x35x3xbf16, #tpu.memory_space<vmem>>, vector<1x1x1x32x3xbf16>
    %290 = vector.shape_cast %289 : vector<1x1x1x32x3xbf16> to vector<32x3xbf16>
    %c48 = arith.constant 48 : index
    %c0_389 = arith.constant 0 : index
    %c0_390 = arith.constant 0 : index
    %291 = vector.load %arg9[%c48, %c0_389, %c0_390] : memref<49x3x16xbf16, #tpu.memory_space<vmem>>, vector<1x3x16xbf16>
    %292 = vector.shape_cast %291 : vector<1x3x16xbf16> to vector<3x16xbf16>
    %cst_391 = arith.constant dense<0.000000e+00> : vector<32x16xf32>
    %293 = tpu.matmul %290, %292, %cst_391 {dimension_numbers = #tpu.dot_dimension_numbers<[1], [0], [0], [1], [0, 0, 1, 1], [], []>} : vector<32x3xbf16>, vector<3x16xbf16>, vector<32x16xf32> -> vector<32x16xf32>
    %294 = arith.addf %288, %293 : vector<32x16xf32>
    %c0_392 = arith.constant 0 : index
    %c0_393 = arith.constant 0 : index
    %295 = vector.load %arg10[%c0_392, %c0_393] : memref<1x16xf32, #tpu.memory_space<vmem>>, vector<1x16xf32>
    %296 = vector.broadcast %295 : vector<1x16xf32> to vector<32x16xf32>
    %297 = arith.addf %294, %296 : vector<32x16xf32>
    %cst_394 = arith.constant 0.000000e+00 : f32
    %298 = vector.broadcast %cst_394 : f32 to vector<32x16xf32>
    %299 = arith.maximumf %297, %298 : vector<32x16xf32>
    %300 = arith.truncf %299 : vector<32x16xf32> to vector<32x16xbf16>
    %c0_395 = arith.constant 0 : index
    %c0_396 = arith.constant 0 : index
    %c0_397 = arith.constant 0 : index
    %c0_398 = arith.constant 0 : index
    %301 = vector.load %arg11[%c0_395, %c0_396, %c0_397, %c0_398] : memref<1x1x32x16xbf16, #tpu.memory_space<vmem>>, vector<1x1x32x16xbf16>
    %302 = vector.shape_cast %301 : vector<1x1x32x16xbf16> to vector<32x16xbf16>
    %303 = vector.shape_cast %300 : vector<32x16xbf16> to vector<1x1x32x16xbf16>
    tpu.vector_store %arg11[%c0_395, %c0_396, %c0_397, %c0_398], %303 {strides = array<i32>} : memref<1x1x32x16xbf16, #tpu.memory_space<vmem>>, vector<1x1x32x16xbf16>,
    return
  }
  func.func @transform_0(%arg0: i32, %arg1: i32) -> (i32, i32, i32, i32, i32) {
    %c2_i32 = arith.constant 2 : i32
    %0 = arith.muli %c2_i32, %arg1 : i32
    %c0_i32 = arith.constant 0 : i32
    %1 = arith.addi %0, %c0_i32 : i32
    %c0_i32_0 = arith.constant 0 : i32
    %c0_i32_1 = arith.constant 0 : i32
    %c0_i32_2 = arith.constant 0 : i32
    %c0_i32_3 = arith.constant 0 : i32
    return %arg0, %1, %c0_i32_0, %c0_i32_1, %c0_i32_2 : i32, i32, i32, i32, i32
  }
  func.func @transform_1(%arg0: i32, %arg1: i32) -> (i32, i32, i32, i32, i32) {
    %c2_i32 = arith.constant 2 : i32
    %0 = arith.muli %c2_i32, %arg1 : i32
    %c1_i32 = arith.constant 1 : i32
    %1 = arith.addi %0, %c1_i32 : i32
    %c0_i32 = arith.constant 0 : i32
    %c0_i32_0 = arith.constant 0 : i32
    %c0_i32_1 = arith.constant 0 : i32
    %c0_i32_2 = arith.constant 0 : i32
    return %arg0, %1, %c0_i32, %c0_i32_0, %c0_i32_1 : i32, i32, i32, i32, i32
  }
  func.func @transform_2(%arg0: i32, %arg1: i32) -> (i32, i32, i32, i32, i32) {
    %c2_i32 = arith.constant 2 : i32
    %0 = arith.muli %c2_i32, %arg1 : i32
    %c2_i32_0 = arith.constant 2 : i32
    %1 = arith.addi %0, %c2_i32_0 : i32
    %c0_i32 = arith.constant 0 : i32
    %c0_i32_1 = arith.constant 0 : i32
    %c0_i32_2 = arith.constant 0 : i32
    %c0_i32_3 = arith.constant 0 : i32
    return %arg0, %1, %c0_i32, %c0_i32_1, %c0_i32_2 : i32, i32, i32, i32, i32
  }
  func.func @transform_3(%arg0: i32, %arg1: i32) -> (i32, i32, i32, i32, i32) {
    %c2_i32 = arith.constant 2 : i32
    %0 = arith.muli %c2_i32, %arg1 : i32
    %c3_i32 = arith.constant 3 : i32
    %1 = arith.addi %0, %c3_i32 : i32
    %c0_i32 = arith.constant 0 : i32
    %c0_i32_0 = arith.constant 0 : i32
    %c0_i32_1 = arith.constant 0 : i32
    %c0_i32_2 = arith.constant 0 : i32
    return %arg0, %1, %c0_i32, %c0_i32_0, %c0_i32_1 : i32, i32, i32, i32, i32
  }
  func.func @transform_4(%arg0: i32, %arg1: i32) -> (i32, i32, i32, i32, i32) {
    %c2_i32 = arith.constant 2 : i32
    %0 = arith.muli %c2_i32, %arg1 : i32
    %c4_i32 = arith.constant 4 : i32
    %1 = arith.addi %0, %c4_i32 : i32
    %c0_i32 = arith.constant 0 : i32
    %c0_i32_0 = arith.constant 0 : i32
    %c0_i32_1 = arith.constant 0 : i32
    %c0_i32_2 = arith.constant 0 : i32
    return %arg0, %1, %c0_i32, %c0_i32_0, %c0_i32_1 : i32, i32, i32, i32, i32
  }
  func.func @transform_5(%arg0: i32, %arg1: i32) -> (i32, i32, i32, i32, i32) {
    %c2_i32 = arith.constant 2 : i32
    %0 = arith.muli %c2_i32, %arg1 : i32
    %c5_i32 = arith.constant 5 : i32
    %1 = arith.addi %0, %c5_i32 : i32
    %c0_i32 = arith.constant 0 : i32
    %c0_i32_0 = arith.constant 0 : i32
    %c0_i32_1 = arith.constant 0 : i32
    %c0_i32_2 = arith.constant 0 : i32
    return %arg0, %1, %c0_i32, %c0_i32_0, %c0_i32_1 : i32, i32, i32, i32, i32
  }
  func.func @transform_6(%arg0: i32, %arg1: i32) -> (i32, i32, i32, i32, i32) {
    %c2_i32 = arith.constant 2 : i32
    %0 = arith.muli %c2_i32, %arg1 : i32
    %c6_i32 = arith.constant 6 : i32
    %1 = arith.addi %0, %c6_i32 : i32
    %c0_i32 = arith.constant 0 : i32
    %c0_i32_0 = arith.constant 0 : i32
    %c0_i32_1 = arith.constant 0 : i32
    %c0_i32_2 = arith.constant 0 : i32
    return %arg0, %1, %c0_i32, %c0_i32_0, %c0_i32_1 : i32, i32, i32, i32, i32
  }
  func.func @transform_7(%arg0: i32, %arg1: i32) -> (i32, i32, i32) {
    %c0_i32 = arith.constant 0 : i32
    %c0_i32_0 = arith.constant 0 : i32
    %c0_i32_1 = arith.constant 0 : i32
    %c0_i32_2 = arith.constant 0 : i32
    return %c0_i32, %c0_i32_0, %c0_i32_1 : i32, i32, i32
  }
  func.func @transform_8(%arg0: i32, %arg1: i32) -> (i32, i32) {
    %c0_i32 = arith.constant 0 : i32
    %c0_i32_0 = arith.constant 0 : i32
    %c0_i32_1 = arith.constant 0 : i32
    return %c0_i32, %c0_i32_0 : i32, i32
  }
  func.func @transform_9(%arg0: i32, %arg1: i32) -> (i32, i32, i32, i32) {
    %c0_i32 = arith.constant 0 : i32
    %c0_i32_0 = arith.constant 0 : i32
    %c0_i32_1 = arith.constant 0 : i32
    return %arg0, %arg1, %c0_i32, %c0_i32_0 : i32, i32, i32, i32
  }
}

module attributes {stable_mosaic.version = 11 : i64} {
  func.func @_pool_kernel(%arg0: i32, %arg1: i32, %arg2: memref<1x1x2x17x16xbf16, #tpu.memory_space<vmem>>, %arg3: memref<1x1x2x17x16xbf16, #tpu.memory_space<vmem>>, %arg4: memref<1x1x2x17x16xbf16, #tpu.memory_space<vmem>>, %arg5: memref<1x1x16x16xbf16, #tpu.memory_space<vmem>>) attributes {dimension_semantics = [#tpu.dimension_semantics<parallel>, #tpu.dimension_semantics<parallel>], iteration_bounds = array<i64: 2, 16>, scalar_prefetch = 0 : i64, scratch_operands = 0 : i64, tpu.core_type = #tpu.core_type<tc>, window_params = [{transform_indices = @transform_0, window_bounds = array<i64: 1, 1, 2, 17, 16>}, {transform_indices = @transform_1, window_bounds = array<i64: 1, 1, 2, 17, 16>}, {transform_indices = @transform_2, window_bounds = array<i64: 1, 1, 2, 17, 16>}, {transform_indices = @transform_3, window_bounds = array<i64: 1, 1, 16, 16>}]} {
    %c0 = arith.constant 0 : index
    %c0_0 = arith.constant 0 : index
    %c0_1 = arith.constant 0 : index
    %c0_2 = arith.constant 0 : index
    %c0_3 = arith.constant 0 : index
    %0 = vector.load %arg2[%c0, %c0_0, %c0_1, %c0_2, %c0_3] : memref<1x1x2x17x16xbf16, #tpu.memory_space<vmem>>, vector<1x1x1x16x16xbf16>
    %1 = vector.shape_cast %0 : vector<1x1x1x16x16xbf16> to vector<16x16xbf16>
    %c0_4 = arith.constant 0 : index
    %c0_5 = arith.constant 0 : index
    %c1 = arith.constant 1 : index
    %c0_6 = arith.constant 0 : index
    %c0_7 = arith.constant 0 : index
    %2 = vector.load %arg2[%c0_4, %c0_5, %c1, %c0_6, %c0_7] : memref<1x1x2x17x16xbf16, #tpu.memory_space<vmem>>, vector<1x1x1x16x16xbf16>
    %3 = vector.shape_cast %2 : vector<1x1x1x16x16xbf16> to vector<16x16xbf16>
    %4 = arith.maximumf %1, %3 : vector<16x16xbf16>
    %c0_8 = arith.constant 0 : index
    %c0_9 = arith.constant 0 : index
    %c0_10 = arith.constant 0 : index
    %c1_11 = arith.constant 1 : index
    %c0_12 = arith.constant 0 : index
    %5 = vector.load %arg2[%c0_8, %c0_9, %c0_10, %c1_11, %c0_12] : memref<1x1x2x17x16xbf16, #tpu.memory_space<vmem>>, vector<1x1x1x16x16xbf16>
    %6 = vector.shape_cast %5 : vector<1x1x1x16x16xbf16> to vector<16x16xbf16>
    %7 = arith.maximumf %4, %6 : vector<16x16xbf16>
    %c0_13 = arith.constant 0 : index
    %c0_14 = arith.constant 0 : index
    %c0_15 = arith.constant 0 : index
    %c0_16 = arith.constant 0 : index
    %c0_17 = arith.constant 0 : index
    %8 = vector.load %arg3[%c0_13, %c0_14, %c0_15, %c0_16, %c0_17] : memref<1x1x2x17x16xbf16, #tpu.memory_space<vmem>>, vector<1x1x1x16x16xbf16>
    %9 = vector.shape_cast %8 : vector<1x1x1x16x16xbf16> to vector<16x16xbf16>
    %10 = arith.maximumf %7, %9 : vector<16x16xbf16>
    %c0_18 = arith.constant 0 : index
    %c0_19 = arith.constant 0 : index
    %c1_20 = arith.constant 1 : index
    %c0_21 = arith.constant 0 : index
    %c0_22 = arith.constant 0 : index
    %11 = vector.load %arg3[%c0_18, %c0_19, %c1_20, %c0_21, %c0_22] : memref<1x1x2x17x16xbf16, #tpu.memory_space<vmem>>, vector<1x1x1x16x16xbf16>
    %12 = vector.shape_cast %11 : vector<1x1x1x16x16xbf16> to vector<16x16xbf16>
    %13 = arith.maximumf %10, %12 : vector<16x16xbf16>
    %c0_23 = arith.constant 0 : index
    %c0_24 = arith.constant 0 : index
    %c0_25 = arith.constant 0 : index
    %c1_26 = arith.constant 1 : index
    %c0_27 = arith.constant 0 : index
    %14 = vector.load %arg3[%c0_23, %c0_24, %c0_25, %c1_26, %c0_27] : memref<1x1x2x17x16xbf16, #tpu.memory_space<vmem>>, vector<1x1x1x16x16xbf16>
    %15 = vector.shape_cast %14 : vector<1x1x1x16x16xbf16> to vector<16x16xbf16>
    %16 = arith.maximumf %13, %15 : vector<16x16xbf16>
    %c0_28 = arith.constant 0 : index
    %c0_29 = arith.constant 0 : index
    %c0_30 = arith.constant 0 : index
    %c0_31 = arith.constant 0 : index
    %c0_32 = arith.constant 0 : index
    %17 = vector.load %arg4[%c0_28, %c0_29, %c0_30, %c0_31, %c0_32] : memref<1x1x2x17x16xbf16, #tpu.memory_space<vmem>>, vector<1x1x1x16x16xbf16>
    %18 = vector.shape_cast %17 : vector<1x1x1x16x16xbf16> to vector<16x16xbf16>
    %19 = arith.maximumf %16, %18 : vector<16x16xbf16>
    %c0_33 = arith.constant 0 : index
    %c0_34 = arith.constant 0 : index
    %c1_35 = arith.constant 1 : index
    %c0_36 = arith.constant 0 : index
    %c0_37 = arith.constant 0 : index
    %20 = vector.load %arg4[%c0_33, %c0_34, %c1_35, %c0_36, %c0_37] : memref<1x1x2x17x16xbf16, #tpu.memory_space<vmem>>, vector<1x1x1x16x16xbf16>
    %21 = vector.shape_cast %20 : vector<1x1x1x16x16xbf16> to vector<16x16xbf16>
    %22 = arith.maximumf %19, %21 : vector<16x16xbf16>
    %c0_38 = arith.constant 0 : index
    %c0_39 = arith.constant 0 : index
    %c0_40 = arith.constant 0 : index
    %c1_41 = arith.constant 1 : index
    %c0_42 = arith.constant 0 : index
    %23 = vector.load %arg4[%c0_38, %c0_39, %c0_40, %c1_41, %c0_42] : memref<1x1x2x17x16xbf16, #tpu.memory_space<vmem>>, vector<1x1x1x16x16xbf16>
    %24 = vector.shape_cast %23 : vector<1x1x1x16x16xbf16> to vector<16x16xbf16>
    %25 = arith.maximumf %22, %24 : vector<16x16xbf16>
    %c0_43 = arith.constant 0 : index
    %c0_44 = arith.constant 0 : index
    %c0_45 = arith.constant 0 : index
    %c0_46 = arith.constant 0 : index
    %26 = vector.load %arg5[%c0_43, %c0_44, %c0_45, %c0_46] : memref<1x1x16x16xbf16, #tpu.memory_space<vmem>>, vector<1x1x16x16xbf16>
    %27 = vector.shape_cast %26 : vector<1x1x16x16xbf16> to vector<16x16xbf16>
    %28 = vector.shape_cast %25 : vector<16x16xbf16> to vector<1x1x16x16xbf16>
    tpu.vector_store %arg5[%c0_43, %c0_44, %c0_45, %c0_46], %28 {strides = array<i32>} : memref<1x1x16x16xbf16, #tpu.memory_space<vmem>>, vector<1x1x16x16xbf16>,
    return
  }
  func.func @transform_0(%arg0: i32, %arg1: i32) -> (i32, i32, i32, i32, i32) {
    %c2_i32 = arith.constant 2 : i32
    %0 = arith.muli %c2_i32, %arg1 : i32
    %c0_i32 = arith.constant 0 : i32
    %1 = arith.addi %0, %c0_i32 : i32
    %c0_i32_0 = arith.constant 0 : i32
    %c0_i32_1 = arith.constant 0 : i32
    %c0_i32_2 = arith.constant 0 : i32
    %c0_i32_3 = arith.constant 0 : i32
    return %arg0, %1, %c0_i32_0, %c0_i32_1, %c0_i32_2 : i32, i32, i32, i32, i32
  }
  func.func @transform_1(%arg0: i32, %arg1: i32) -> (i32, i32, i32, i32, i32) {
    %c2_i32 = arith.constant 2 : i32
    %0 = arith.muli %c2_i32, %arg1 : i32
    %c1_i32 = arith.constant 1 : i32
    %1 = arith.addi %0, %c1_i32 : i32
    %c0_i32 = arith.constant 0 : i32
    %c0_i32_0 = arith.constant 0 : i32
    %c0_i32_1 = arith.constant 0 : i32
    %c0_i32_2 = arith.constant 0 : i32
    return %arg0, %1, %c0_i32, %c0_i32_0, %c0_i32_1 : i32, i32, i32, i32, i32
  }
  func.func @transform_2(%arg0: i32, %arg1: i32) -> (i32, i32, i32, i32, i32) {
    %c2_i32 = arith.constant 2 : i32
    %0 = arith.muli %c2_i32, %arg1 : i32
    %c2_i32_0 = arith.constant 2 : i32
    %1 = arith.addi %0, %c2_i32_0 : i32
    %c0_i32 = arith.constant 0 : i32
    %c0_i32_1 = arith.constant 0 : i32
    %c0_i32_2 = arith.constant 0 : i32
    %c0_i32_3 = arith.constant 0 : i32
    return %arg0, %1, %c0_i32, %c0_i32_1, %c0_i32_2 : i32, i32, i32, i32, i32
  }
  func.func @transform_3(%arg0: i32, %arg1: i32) -> (i32, i32, i32, i32) {
    %c0_i32 = arith.constant 0 : i32
    %c0_i32_0 = arith.constant 0 : i32
    %c0_i32_1 = arith.constant 0 : i32
    return %arg0, %arg1, %c0_i32, %c0_i32_0 : i32, i32, i32, i32
  }
}

module attributes {stable_mosaic.version = 11 : i64} {
  func.func @_conv_kernel(%arg0: i32, %arg1: i32, %arg2: memref<1x1x1x18x16xbf16, #tpu.memory_space<vmem>>, %arg3: memref<1x1x1x18x16xbf16, #tpu.memory_space<vmem>>, %arg4: memref<1x1x1x18x16xbf16, #tpu.memory_space<vmem>>, %arg5: memref<9x16x16xbf16, #tpu.memory_space<vmem>>, %arg6: memref<1x16xf32, #tpu.memory_space<vmem>>, %arg7: memref<1x1x16x16xbf16, #tpu.memory_space<vmem>>) attributes {dimension_semantics = [#tpu.dimension_semantics<parallel>, #tpu.dimension_semantics<parallel>], iteration_bounds = array<i64: 2, 16>, scalar_prefetch = 0 : i64, scratch_operands = 0 : i64, tpu.core_type = #tpu.core_type<tc>, window_params = [{transform_indices = @transform_0, window_bounds = array<i64: 1, 1, 1, 18, 16>}, {transform_indices = @transform_1, window_bounds = array<i64: 1, 1, 1, 18, 16>}, {transform_indices = @transform_2, window_bounds = array<i64: 1, 1, 1, 18, 16>}, {pipeline_mode = #tpu.pipeline_mode<synchronous>, transform_indices = @transform_3, window_bounds = array<i64: 9, 16, 16>}, {pipeline_mode = #tpu.pipeline_mode<synchronous>, transform_indices = @transform_4, window_bounds = array<i64: 1, 16>}, {transform_indices = @transform_5, window_bounds = array<i64: 1, 1, 16, 16>}]} {
    %cst = arith.constant 0.000000e+00 : f32
    %0 = vector.broadcast %cst : f32 to vector<16x16xf32>
    %c0 = arith.constant 0 : index
    %c0_0 = arith.constant 0 : index
    %c0_1 = arith.constant 0 : index
    %c0_2 = arith.constant 0 : index
    %c0_3 = arith.constant 0 : index
    %1 = vector.load %arg2[%c0, %c0_0, %c0_1, %c0_2, %c0_3] : memref<1x1x1x18x16xbf16, #tpu.memory_space<vmem>>, vector<1x1x1x16x16xbf16>
    %2 = vector.shape_cast %1 : vector<1x1x1x16x16xbf16> to vector<16x16xbf16>
    %c0_4 = arith.constant 0 : index
    %c0_5 = arith.constant 0 : index
    %c0_6 = arith.constant 0 : index
    %3 = vector.load %arg5[%c0_4, %c0_5, %c0_6] : memref<9x16x16xbf16, #tpu.memory_space<vmem>>, vector<1x16x16xbf16>
    %4 = vector.shape_cast %3 : vector<1x16x16xbf16> to vector<16x16xbf16>
    %cst_7 = arith.constant dense<0.000000e+00> : vector<16x16xf32>
    %5 = tpu.matmul %2, %4, %cst_7 {dimension_numbers = #tpu.dot_dimension_numbers<[1], [0], [0], [1], [0, 0, 1, 1], [], []>} : vector<16x16xbf16>, vector<16x16xbf16>, vector<16x16xf32> -> vector<16x16xf32>
    %6 = arith.addf %0, %5 : vector<16x16xf32>
    %c0_8 = arith.constant 0 : index
    %c0_9 = arith.constant 0 : index
    %c0_10 = arith.constant 0 : index
    %c1 = arith.constant 1 : index
    %c0_11 = arith.constant 0 : index
    %7 = vector.load %arg2[%c0_8, %c0_9, %c0_10, %c1, %c0_11] : memref<1x1x1x18x16xbf16, #tpu.memory_space<vmem>>, vector<1x1x1x16x16xbf16>
    %8 = vector.shape_cast %7 : vector<1x1x1x16x16xbf16> to vector<16x16xbf16>
    %c1_12 = arith.constant 1 : index
    %c0_13 = arith.constant 0 : index
    %c0_14 = arith.constant 0 : index
    %9 = vector.load %arg5[%c1_12, %c0_13, %c0_14] : memref<9x16x16xbf16, #tpu.memory_space<vmem>>, vector<1x16x16xbf16>
    %10 = vector.shape_cast %9 : vector<1x16x16xbf16> to vector<16x16xbf16>
    %cst_15 = arith.constant dense<0.000000e+00> : vector<16x16xf32>
    %11 = tpu.matmul %8, %10, %cst_15 {dimension_numbers = #tpu.dot_dimension_numbers<[1], [0], [0], [1], [0, 0, 1, 1], [], []>} : vector<16x16xbf16>, vector<16x16xbf16>, vector<16x16xf32> -> vector<16x16xf32>
    %12 = arith.addf %6, %11 : vector<16x16xf32>
    %c0_16 = arith.constant 0 : index
    %c0_17 = arith.constant 0 : index
    %c0_18 = arith.constant 0 : index
    %c2 = arith.constant 2 : index
    %c0_19 = arith.constant 0 : index
    %13 = vector.load %arg2[%c0_16, %c0_17, %c0_18, %c2, %c0_19] : memref<1x1x1x18x16xbf16, #tpu.memory_space<vmem>>, vector<1x1x1x16x16xbf16>
    %14 = vector.shape_cast %13 : vector<1x1x1x16x16xbf16> to vector<16x16xbf16>
    %c2_20 = arith.constant 2 : index
    %c0_21 = arith.constant 0 : index
    %c0_22 = arith.constant 0 : index
    %15 = vector.load %arg5[%c2_20, %c0_21, %c0_22] : memref<9x16x16xbf16, #tpu.memory_space<vmem>>, vector<1x16x16xbf16>
    %16 = vector.shape_cast %15 : vector<1x16x16xbf16> to vector<16x16xbf16>
    %cst_23 = arith.constant dense<0.000000e+00> : vector<16x16xf32>
    %17 = tpu.matmul %14, %16, %cst_23 {dimension_numbers = #tpu.dot_dimension_numbers<[1], [0], [0], [1], [0, 0, 1, 1], [], []>} : vector<16x16xbf16>, vector<16x16xbf16>, vector<16x16xf32> -> vector<16x16xf32>
    %18 = arith.addf %12, %17 : vector<16x16xf32>
    %c0_24 = arith.constant 0 : index
    %c0_25 = arith.constant 0 : index
    %c0_26 = arith.constant 0 : index
    %c0_27 = arith.constant 0 : index
    %c0_28 = arith.constant 0 : index
    %19 = vector.load %arg3[%c0_24, %c0_25, %c0_26, %c0_27, %c0_28] : memref<1x1x1x18x16xbf16, #tpu.memory_space<vmem>>, vector<1x1x1x16x16xbf16>
    %20 = vector.shape_cast %19 : vector<1x1x1x16x16xbf16> to vector<16x16xbf16>
    %c3 = arith.constant 3 : index
    %c0_29 = arith.constant 0 : index
    %c0_30 = arith.constant 0 : index
    %21 = vector.load %arg5[%c3, %c0_29, %c0_30] : memref<9x16x16xbf16, #tpu.memory_space<vmem>>, vector<1x16x16xbf16>
    %22 = vector.shape_cast %21 : vector<1x16x16xbf16> to vector<16x16xbf16>
    %cst_31 = arith.constant dense<0.000000e+00> : vector<16x16xf32>
    %23 = tpu.matmul %20, %22, %cst_31 {dimension_numbers = #tpu.dot_dimension_numbers<[1], [0], [0], [1], [0, 0, 1, 1], [], []>} : vector<16x16xbf16>, vector<16x16xbf16>, vector<16x16xf32> -> vector<16x16xf32>
    %24 = arith.addf %18, %23 : vector<16x16xf32>
    %c0_32 = arith.constant 0 : index
    %c0_33 = arith.constant 0 : index
    %c0_34 = arith.constant 0 : index
    %c1_35 = arith.constant 1 : index
    %c0_36 = arith.constant 0 : index
    %25 = vector.load %arg3[%c0_32, %c0_33, %c0_34, %c1_35, %c0_36] : memref<1x1x1x18x16xbf16, #tpu.memory_space<vmem>>, vector<1x1x1x16x16xbf16>
    %26 = vector.shape_cast %25 : vector<1x1x1x16x16xbf16> to vector<16x16xbf16>
    %c4 = arith.constant 4 : index
    %c0_37 = arith.constant 0 : index
    %c0_38 = arith.constant 0 : index
    %27 = vector.load %arg5[%c4, %c0_37, %c0_38] : memref<9x16x16xbf16, #tpu.memory_space<vmem>>, vector<1x16x16xbf16>
    %28 = vector.shape_cast %27 : vector<1x16x16xbf16> to vector<16x16xbf16>
    %cst_39 = arith.constant dense<0.000000e+00> : vector<16x16xf32>
    %29 = tpu.matmul %26, %28, %cst_39 {dimension_numbers = #tpu.dot_dimension_numbers<[1], [0], [0], [1], [0, 0, 1, 1], [], []>} : vector<16x16xbf16>, vector<16x16xbf16>, vector<16x16xf32> -> vector<16x16xf32>
    %30 = arith.addf %24, %29 : vector<16x16xf32>
    %c0_40 = arith.constant 0 : index
    %c0_41 = arith.constant 0 : index
    %c0_42 = arith.constant 0 : index
    %c2_43 = arith.constant 2 : index
    %c0_44 = arith.constant 0 : index
    %31 = vector.load %arg3[%c0_40, %c0_41, %c0_42, %c2_43, %c0_44] : memref<1x1x1x18x16xbf16, #tpu.memory_space<vmem>>, vector<1x1x1x16x16xbf16>
    %32 = vector.shape_cast %31 : vector<1x1x1x16x16xbf16> to vector<16x16xbf16>
    %c5 = arith.constant 5 : index
    %c0_45 = arith.constant 0 : index
    %c0_46 = arith.constant 0 : index
    %33 = vector.load %arg5[%c5, %c0_45, %c0_46] : memref<9x16x16xbf16, #tpu.memory_space<vmem>>, vector<1x16x16xbf16>
    %34 = vector.shape_cast %33 : vector<1x16x16xbf16> to vector<16x16xbf16>
    %cst_47 = arith.constant dense<0.000000e+00> : vector<16x16xf32>
    %35 = tpu.matmul %32, %34, %cst_47 {dimension_numbers = #tpu.dot_dimension_numbers<[1], [0], [0], [1], [0, 0, 1, 1], [], []>} : vector<16x16xbf16>, vector<16x16xbf16>, vector<16x16xf32> -> vector<16x16xf32>
    %36 = arith.addf %30, %35 : vector<16x16xf32>
    %c0_48 = arith.constant 0 : index
    %c0_49 = arith.constant 0 : index
    %c0_50 = arith.constant 0 : index
    %c0_51 = arith.constant 0 : index
    %c0_52 = arith.constant 0 : index
    %37 = vector.load %arg4[%c0_48, %c0_49, %c0_50, %c0_51, %c0_52] : memref<1x1x1x18x16xbf16, #tpu.memory_space<vmem>>, vector<1x1x1x16x16xbf16>
    %38 = vector.shape_cast %37 : vector<1x1x1x16x16xbf16> to vector<16x16xbf16>
    %c6 = arith.constant 6 : index
    %c0_53 = arith.constant 0 : index
    %c0_54 = arith.constant 0 : index
    %39 = vector.load %arg5[%c6, %c0_53, %c0_54] : memref<9x16x16xbf16, #tpu.memory_space<vmem>>, vector<1x16x16xbf16>
    %40 = vector.shape_cast %39 : vector<1x16x16xbf16> to vector<16x16xbf16>
    %cst_55 = arith.constant dense<0.000000e+00> : vector<16x16xf32>
    %41 = tpu.matmul %38, %40, %cst_55 {dimension_numbers = #tpu.dot_dimension_numbers<[1], [0], [0], [1], [0, 0, 1, 1], [], []>} : vector<16x16xbf16>, vector<16x16xbf16>, vector<16x16xf32> -> vector<16x16xf32>
    %42 = arith.addf %36, %41 : vector<16x16xf32>
    %c0_56 = arith.constant 0 : index
    %c0_57 = arith.constant 0 : index
    %c0_58 = arith.constant 0 : index
    %c1_59 = arith.constant 1 : index
    %c0_60 = arith.constant 0 : index
    %43 = vector.load %arg4[%c0_56, %c0_57, %c0_58, %c1_59, %c0_60] : memref<1x1x1x18x16xbf16, #tpu.memory_space<vmem>>, vector<1x1x1x16x16xbf16>
    %44 = vector.shape_cast %43 : vector<1x1x1x16x16xbf16> to vector<16x16xbf16>
    %c7 = arith.constant 7 : index
    %c0_61 = arith.constant 0 : index
    %c0_62 = arith.constant 0 : index
    %45 = vector.load %arg5[%c7, %c0_61, %c0_62] : memref<9x16x16xbf16, #tpu.memory_space<vmem>>, vector<1x16x16xbf16>
    %46 = vector.shape_cast %45 : vector<1x16x16xbf16> to vector<16x16xbf16>
    %cst_63 = arith.constant dense<0.000000e+00> : vector<16x16xf32>
    %47 = tpu.matmul %44, %46, %cst_63 {dimension_numbers = #tpu.dot_dimension_numbers<[1], [0], [0], [1], [0, 0, 1, 1], [], []>} : vector<16x16xbf16>, vector<16x16xbf16>, vector<16x16xf32> -> vector<16x16xf32>
    %48 = arith.addf %42, %47 : vector<16x16xf32>
    %c0_64 = arith.constant 0 : index
    %c0_65 = arith.constant 0 : index
    %c0_66 = arith.constant 0 : index
    %c2_67 = arith.constant 2 : index
    %c0_68 = arith.constant 0 : index
    %49 = vector.load %arg4[%c0_64, %c0_65, %c0_66, %c2_67, %c0_68] : memref<1x1x1x18x16xbf16, #tpu.memory_space<vmem>>, vector<1x1x1x16x16xbf16>
    %50 = vector.shape_cast %49 : vector<1x1x1x16x16xbf16> to vector<16x16xbf16>
    %c8 = arith.constant 8 : index
    %c0_69 = arith.constant 0 : index
    %c0_70 = arith.constant 0 : index
    %51 = vector.load %arg5[%c8, %c0_69, %c0_70] : memref<9x16x16xbf16, #tpu.memory_space<vmem>>, vector<1x16x16xbf16>
    %52 = vector.shape_cast %51 : vector<1x16x16xbf16> to vector<16x16xbf16>
    %cst_71 = arith.constant dense<0.000000e+00> : vector<16x16xf32>
    %53 = tpu.matmul %50, %52, %cst_71 {dimension_numbers = #tpu.dot_dimension_numbers<[1], [0], [0], [1], [0, 0, 1, 1], [], []>} : vector<16x16xbf16>, vector<16x16xbf16>, vector<16x16xf32> -> vector<16x16xf32>
    %54 = arith.addf %48, %53 : vector<16x16xf32>
    %c0_72 = arith.constant 0 : index
    %c0_73 = arith.constant 0 : index
    %55 = vector.load %arg6[%c0_72, %c0_73] : memref<1x16xf32, #tpu.memory_space<vmem>>, vector<1x16xf32>
    %56 = vector.broadcast %55 : vector<1x16xf32> to vector<16x16xf32>
    %57 = arith.addf %54, %56 : vector<16x16xf32>
    %cst_74 = arith.constant 0.000000e+00 : f32
    %58 = vector.broadcast %cst_74 : f32 to vector<16x16xf32>
    %59 = arith.maximumf %57, %58 : vector<16x16xf32>
    %60 = arith.truncf %59 : vector<16x16xf32> to vector<16x16xbf16>
    %c0_75 = arith.constant 0 : index
    %c0_76 = arith.constant 0 : index
    %c0_77 = arith.constant 0 : index
    %c0_78 = arith.constant 0 : index
    %61 = vector.load %arg7[%c0_75, %c0_76, %c0_77, %c0_78] : memref<1x1x16x16xbf16, #tpu.memory_space<vmem>>, vector<1x1x16x16xbf16>
    %62 = vector.shape_cast %61 : vector<1x1x16x16xbf16> to vector<16x16xbf16>
    %63 = vector.shape_cast %60 : vector<16x16xbf16> to vector<1x1x16x16xbf16>
    tpu.vector_store %arg7[%c0_75, %c0_76, %c0_77, %c0_78], %63 {strides = array<i32>} : memref<1x1x16x16xbf16, #tpu.memory_space<vmem>>, vector<1x1x16x16xbf16>,
    return
  }
  func.func @transform_0(%arg0: i32, %arg1: i32) -> (i32, i32, i32, i32, i32) {
    %c1_i32 = arith.constant 1 : i32
    %0 = arith.muli %c1_i32, %arg1 : i32
    %c0_i32 = arith.constant 0 : i32
    %1 = arith.addi %0, %c0_i32 : i32
    %c0_i32_0 = arith.constant 0 : i32
    %c0_i32_1 = arith.constant 0 : i32
    %c0_i32_2 = arith.constant 0 : i32
    %c0_i32_3 = arith.constant 0 : i32
    return %arg0, %1, %c0_i32_0, %c0_i32_1, %c0_i32_2 : i32, i32, i32, i32, i32
  }
  func.func @transform_1(%arg0: i32, %arg1: i32) -> (i32, i32, i32, i32, i32) {
    %c1_i32 = arith.constant 1 : i32
    %0 = arith.muli %c1_i32, %arg1 : i32
    %c1_i32_0 = arith.constant 1 : i32
    %1 = arith.addi %0, %c1_i32_0 : i32
    %c0_i32 = arith.constant 0 : i32
    %c0_i32_1 = arith.constant 0 : i32
    %c0_i32_2 = arith.constant 0 : i32
    %c0_i32_3 = arith.constant 0 : i32
    return %arg0, %1, %c0_i32, %c0_i32_1, %c0_i32_2 : i32, i32, i32, i32, i32
  }
  func.func @transform_2(%arg0: i32, %arg1: i32) -> (i32, i32, i32, i32, i32) {
    %c1_i32 = arith.constant 1 : i32
    %0 = arith.muli %c1_i32, %arg1 : i32
    %c2_i32 = arith.constant 2 : i32
    %1 = arith.addi %0, %c2_i32 : i32
    %c0_i32 = arith.constant 0 : i32
    %c0_i32_0 = arith.constant 0 : i32
    %c0_i32_1 = arith.constant 0 : i32
    %c0_i32_2 = arith.constant 0 : i32
    return %arg0, %1, %c0_i32, %c0_i32_0, %c0_i32_1 : i32, i32, i32, i32, i32
  }
  func.func @transform_3(%arg0: i32, %arg1: i32) -> (i32, i32, i32) {
    %c0_i32 = arith.constant 0 : i32
    %c0_i32_0 = arith.constant 0 : i32
    %c0_i32_1 = arith.constant 0 : i32
    %c0_i32_2 = arith.constant 0 : i32
    return %c0_i32, %c0_i32_0, %c0_i32_1 : i32, i32, i32
  }
  func.func @transform_4(%arg0: i32, %arg1: i32) -> (i32, i32) {
    %c0_i32 = arith.constant 0 : i32
    %c0_i32_0 = arith.constant 0 : i32
    %c0_i32_1 = arith.constant 0 : i32
    return %c0_i32, %c0_i32_0 : i32, i32
  }
  func.func @transform_5(%arg0: i32, %arg1: i32) -> (i32, i32, i32, i32) {
    %c0_i32 = arith.constant 0 : i32
    %c0_i32_0 = arith.constant 0 : i32
    %c0_i32_1 = arith.constant 0 : i32
    return %arg0, %arg1, %c0_i32, %c0_i32_0 : i32, i32, i32, i32
  }
}

module attributes {stable_mosaic.version = 11 : i64} {
  func.func @_conv_kernel(%arg0: i32, %arg1: i32, %arg2: memref<1x1x1x18x16xbf16, #tpu.memory_space<vmem>>, %arg3: memref<1x1x1x18x16xbf16, #tpu.memory_space<vmem>>, %arg4: memref<1x1x1x18x16xbf16, #tpu.memory_space<vmem>>, %arg5: memref<9x16x16xbf16, #tpu.memory_space<vmem>>, %arg6: memref<1x16xf32, #tpu.memory_space<vmem>>, %arg7: memref<1x1x16x16xbf16, #tpu.memory_space<vmem>>, %arg8: memref<1x1x16x16xbf16, #tpu.memory_space<vmem>>) attributes {dimension_semantics = [#tpu.dimension_semantics<parallel>, #tpu.dimension_semantics<parallel>], iteration_bounds = array<i64: 2, 16>, scalar_prefetch = 0 : i64, scratch_operands = 0 : i64, tpu.core_type = #tpu.core_type<tc>, window_params = [{transform_indices = @transform_0, window_bounds = array<i64: 1, 1, 1, 18, 16>}, {transform_indices = @transform_1, window_bounds = array<i64: 1, 1, 1, 18, 16>}, {transform_indices = @transform_2, window_bounds = array<i64: 1, 1, 1, 18, 16>}, {pipeline_mode = #tpu.pipeline_mode<synchronous>, transform_indices = @transform_3, window_bounds = array<i64: 9, 16, 16>}, {pipeline_mode = #tpu.pipeline_mode<synchronous>, transform_indices = @transform_4, window_bounds = array<i64: 1, 16>}, {transform_indices = @transform_5, window_bounds = array<i64: 1, 1, 16, 16>}, {transform_indices = @transform_6, window_bounds = array<i64: 1, 1, 16, 16>}]} {
    %cst = arith.constant 0.000000e+00 : f32
    %0 = vector.broadcast %cst : f32 to vector<16x16xf32>
    %c0 = arith.constant 0 : index
    %c0_0 = arith.constant 0 : index
    %c0_1 = arith.constant 0 : index
    %c0_2 = arith.constant 0 : index
    %c0_3 = arith.constant 0 : index
    %1 = vector.load %arg2[%c0, %c0_0, %c0_1, %c0_2, %c0_3] : memref<1x1x1x18x16xbf16, #tpu.memory_space<vmem>>, vector<1x1x1x16x16xbf16>
    %2 = vector.shape_cast %1 : vector<1x1x1x16x16xbf16> to vector<16x16xbf16>
    %c0_4 = arith.constant 0 : index
    %c0_5 = arith.constant 0 : index
    %c0_6 = arith.constant 0 : index
    %3 = vector.load %arg5[%c0_4, %c0_5, %c0_6] : memref<9x16x16xbf16, #tpu.memory_space<vmem>>, vector<1x16x16xbf16>
    %4 = vector.shape_cast %3 : vector<1x16x16xbf16> to vector<16x16xbf16>
    %cst_7 = arith.constant dense<0.000000e+00> : vector<16x16xf32>
    %5 = tpu.matmul %2, %4, %cst_7 {dimension_numbers = #tpu.dot_dimension_numbers<[1], [0], [0], [1], [0, 0, 1, 1], [], []>} : vector<16x16xbf16>, vector<16x16xbf16>, vector<16x16xf32> -> vector<16x16xf32>
    %6 = arith.addf %0, %5 : vector<16x16xf32>
    %c0_8 = arith.constant 0 : index
    %c0_9 = arith.constant 0 : index
    %c0_10 = arith.constant 0 : index
    %c1 = arith.constant 1 : index
    %c0_11 = arith.constant 0 : index
    %7 = vector.load %arg2[%c0_8, %c0_9, %c0_10, %c1, %c0_11] : memref<1x1x1x18x16xbf16, #tpu.memory_space<vmem>>, vector<1x1x1x16x16xbf16>
    %8 = vector.shape_cast %7 : vector<1x1x1x16x16xbf16> to vector<16x16xbf16>
    %c1_12 = arith.constant 1 : index
    %c0_13 = arith.constant 0 : index
    %c0_14 = arith.constant 0 : index
    %9 = vector.load %arg5[%c1_12, %c0_13, %c0_14] : memref<9x16x16xbf16, #tpu.memory_space<vmem>>, vector<1x16x16xbf16>
    %10 = vector.shape_cast %9 : vector<1x16x16xbf16> to vector<16x16xbf16>
    %cst_15 = arith.constant dense<0.000000e+00> : vector<16x16xf32>
    %11 = tpu.matmul %8, %10, %cst_15 {dimension_numbers = #tpu.dot_dimension_numbers<[1], [0], [0], [1], [0, 0, 1, 1], [], []>} : vector<16x16xbf16>, vector<16x16xbf16>, vector<16x16xf32> -> vector<16x16xf32>
    %12 = arith.addf %6, %11 : vector<16x16xf32>
    %c0_16 = arith.constant 0 : index
    %c0_17 = arith.constant 0 : index
    %c0_18 = arith.constant 0 : index
    %c2 = arith.constant 2 : index
    %c0_19 = arith.constant 0 : index
    %13 = vector.load %arg2[%c0_16, %c0_17, %c0_18, %c2, %c0_19] : memref<1x1x1x18x16xbf16, #tpu.memory_space<vmem>>, vector<1x1x1x16x16xbf16>
    %14 = vector.shape_cast %13 : vector<1x1x1x16x16xbf16> to vector<16x16xbf16>
    %c2_20 = arith.constant 2 : index
    %c0_21 = arith.constant 0 : index
    %c0_22 = arith.constant 0 : index
    %15 = vector.load %arg5[%c2_20, %c0_21, %c0_22] : memref<9x16x16xbf16, #tpu.memory_space<vmem>>, vector<1x16x16xbf16>
    %16 = vector.shape_cast %15 : vector<1x16x16xbf16> to vector<16x16xbf16>
    %cst_23 = arith.constant dense<0.000000e+00> : vector<16x16xf32>
    %17 = tpu.matmul %14, %16, %cst_23 {dimension_numbers = #tpu.dot_dimension_numbers<[1], [0], [0], [1], [0, 0, 1, 1], [], []>} : vector<16x16xbf16>, vector<16x16xbf16>, vector<16x16xf32> -> vector<16x16xf32>
    %18 = arith.addf %12, %17 : vector<16x16xf32>
    %c0_24 = arith.constant 0 : index
    %c0_25 = arith.constant 0 : index
    %c0_26 = arith.constant 0 : index
    %c0_27 = arith.constant 0 : index
    %c0_28 = arith.constant 0 : index
    %19 = vector.load %arg3[%c0_24, %c0_25, %c0_26, %c0_27, %c0_28] : memref<1x1x1x18x16xbf16, #tpu.memory_space<vmem>>, vector<1x1x1x16x16xbf16>
    %20 = vector.shape_cast %19 : vector<1x1x1x16x16xbf16> to vector<16x16xbf16>
    %c3 = arith.constant 3 : index
    %c0_29 = arith.constant 0 : index
    %c0_30 = arith.constant 0 : index
    %21 = vector.load %arg5[%c3, %c0_29, %c0_30] : memref<9x16x16xbf16, #tpu.memory_space<vmem>>, vector<1x16x16xbf16>
    %22 = vector.shape_cast %21 : vector<1x16x16xbf16> to vector<16x16xbf16>
    %cst_31 = arith.constant dense<0.000000e+00> : vector<16x16xf32>
    %23 = tpu.matmul %20, %22, %cst_31 {dimension_numbers = #tpu.dot_dimension_numbers<[1], [0], [0], [1], [0, 0, 1, 1], [], []>} : vector<16x16xbf16>, vector<16x16xbf16>, vector<16x16xf32> -> vector<16x16xf32>
    %24 = arith.addf %18, %23 : vector<16x16xf32>
    %c0_32 = arith.constant 0 : index
    %c0_33 = arith.constant 0 : index
    %c0_34 = arith.constant 0 : index
    %c1_35 = arith.constant 1 : index
    %c0_36 = arith.constant 0 : index
    %25 = vector.load %arg3[%c0_32, %c0_33, %c0_34, %c1_35, %c0_36] : memref<1x1x1x18x16xbf16, #tpu.memory_space<vmem>>, vector<1x1x1x16x16xbf16>
    %26 = vector.shape_cast %25 : vector<1x1x1x16x16xbf16> to vector<16x16xbf16>
    %c4 = arith.constant 4 : index
    %c0_37 = arith.constant 0 : index
    %c0_38 = arith.constant 0 : index
    %27 = vector.load %arg5[%c4, %c0_37, %c0_38] : memref<9x16x16xbf16, #tpu.memory_space<vmem>>, vector<1x16x16xbf16>
    %28 = vector.shape_cast %27 : vector<1x16x16xbf16> to vector<16x16xbf16>
    %cst_39 = arith.constant dense<0.000000e+00> : vector<16x16xf32>
    %29 = tpu.matmul %26, %28, %cst_39 {dimension_numbers = #tpu.dot_dimension_numbers<[1], [0], [0], [1], [0, 0, 1, 1], [], []>} : vector<16x16xbf16>, vector<16x16xbf16>, vector<16x16xf32> -> vector<16x16xf32>
    %30 = arith.addf %24, %29 : vector<16x16xf32>
    %c0_40 = arith.constant 0 : index
    %c0_41 = arith.constant 0 : index
    %c0_42 = arith.constant 0 : index
    %c2_43 = arith.constant 2 : index
    %c0_44 = arith.constant 0 : index
    %31 = vector.load %arg3[%c0_40, %c0_41, %c0_42, %c2_43, %c0_44] : memref<1x1x1x18x16xbf16, #tpu.memory_space<vmem>>, vector<1x1x1x16x16xbf16>
    %32 = vector.shape_cast %31 : vector<1x1x1x16x16xbf16> to vector<16x16xbf16>
    %c5 = arith.constant 5 : index
    %c0_45 = arith.constant 0 : index
    %c0_46 = arith.constant 0 : index
    %33 = vector.load %arg5[%c5, %c0_45, %c0_46] : memref<9x16x16xbf16, #tpu.memory_space<vmem>>, vector<1x16x16xbf16>
    %34 = vector.shape_cast %33 : vector<1x16x16xbf16> to vector<16x16xbf16>
    %cst_47 = arith.constant dense<0.000000e+00> : vector<16x16xf32>
    %35 = tpu.matmul %32, %34, %cst_47 {dimension_numbers = #tpu.dot_dimension_numbers<[1], [0], [0], [1], [0, 0, 1, 1], [], []>} : vector<16x16xbf16>, vector<16x16xbf16>, vector<16x16xf32> -> vector<16x16xf32>
    %36 = arith.addf %30, %35 : vector<16x16xf32>
    %c0_48 = arith.constant 0 : index
    %c0_49 = arith.constant 0 : index
    %c0_50 = arith.constant 0 : index
    %c0_51 = arith.constant 0 : index
    %c0_52 = arith.constant 0 : index
    %37 = vector.load %arg4[%c0_48, %c0_49, %c0_50, %c0_51, %c0_52] : memref<1x1x1x18x16xbf16, #tpu.memory_space<vmem>>, vector<1x1x1x16x16xbf16>
    %38 = vector.shape_cast %37 : vector<1x1x1x16x16xbf16> to vector<16x16xbf16>
    %c6 = arith.constant 6 : index
    %c0_53 = arith.constant 0 : index
    %c0_54 = arith.constant 0 : index
    %39 = vector.load %arg5[%c6, %c0_53, %c0_54] : memref<9x16x16xbf16, #tpu.memory_space<vmem>>, vector<1x16x16xbf16>
    %40 = vector.shape_cast %39 : vector<1x16x16xbf16> to vector<16x16xbf16>
    %cst_55 = arith.constant dense<0.000000e+00> : vector<16x16xf32>
    %41 = tpu.matmul %38, %40, %cst_55 {dimension_numbers = #tpu.dot_dimension_numbers<[1], [0], [0], [1], [0, 0, 1, 1], [], []>} : vector<16x16xbf16>, vector<16x16xbf16>, vector<16x16xf32> -> vector<16x16xf32>
    %42 = arith.addf %36, %41 : vector<16x16xf32>
    %c0_56 = arith.constant 0 : index
    %c0_57 = arith.constant 0 : index
    %c0_58 = arith.constant 0 : index
    %c1_59 = arith.constant 1 : index
    %c0_60 = arith.constant 0 : index
    %43 = vector.load %arg4[%c0_56, %c0_57, %c0_58, %c1_59, %c0_60] : memref<1x1x1x18x16xbf16, #tpu.memory_space<vmem>>, vector<1x1x1x16x16xbf16>
    %44 = vector.shape_cast %43 : vector<1x1x1x16x16xbf16> to vector<16x16xbf16>
    %c7 = arith.constant 7 : index
    %c0_61 = arith.constant 0 : index
    %c0_62 = arith.constant 0 : index
    %45 = vector.load %arg5[%c7, %c0_61, %c0_62] : memref<9x16x16xbf16, #tpu.memory_space<vmem>>, vector<1x16x16xbf16>
    %46 = vector.shape_cast %45 : vector<1x16x16xbf16> to vector<16x16xbf16>
    %cst_63 = arith.constant dense<0.000000e+00> : vector<16x16xf32>
    %47 = tpu.matmul %44, %46, %cst_63 {dimension_numbers = #tpu.dot_dimension_numbers<[1], [0], [0], [1], [0, 0, 1, 1], [], []>} : vector<16x16xbf16>, vector<16x16xbf16>, vector<16x16xf32> -> vector<16x16xf32>
    %48 = arith.addf %42, %47 : vector<16x16xf32>
    %c0_64 = arith.constant 0 : index
    %c0_65 = arith.constant 0 : index
    %c0_66 = arith.constant 0 : index
    %c2_67 = arith.constant 2 : index
    %c0_68 = arith.constant 0 : index
    %49 = vector.load %arg4[%c0_64, %c0_65, %c0_66, %c2_67, %c0_68] : memref<1x1x1x18x16xbf16, #tpu.memory_space<vmem>>, vector<1x1x1x16x16xbf16>
    %50 = vector.shape_cast %49 : vector<1x1x1x16x16xbf16> to vector<16x16xbf16>
    %c8 = arith.constant 8 : index
    %c0_69 = arith.constant 0 : index
    %c0_70 = arith.constant 0 : index
    %51 = vector.load %arg5[%c8, %c0_69, %c0_70] : memref<9x16x16xbf16, #tpu.memory_space<vmem>>, vector<1x16x16xbf16>
    %52 = vector.shape_cast %51 : vector<1x16x16xbf16> to vector<16x16xbf16>
    %cst_71 = arith.constant dense<0.000000e+00> : vector<16x16xf32>
    %53 = tpu.matmul %50, %52, %cst_71 {dimension_numbers = #tpu.dot_dimension_numbers<[1], [0], [0], [1], [0, 0, 1, 1], [], []>} : vector<16x16xbf16>, vector<16x16xbf16>, vector<16x16xf32> -> vector<16x16xf32>
    %54 = arith.addf %48, %53 : vector<16x16xf32>
    %c0_72 = arith.constant 0 : index
    %c0_73 = arith.constant 0 : index
    %55 = vector.load %arg6[%c0_72, %c0_73] : memref<1x16xf32, #tpu.memory_space<vmem>>, vector<1x16xf32>
    %56 = vector.broadcast %55 : vector<1x16xf32> to vector<16x16xf32>
    %57 = arith.addf %54, %56 : vector<16x16xf32>
    %c0_74 = arith.constant 0 : index
    %c0_75 = arith.constant 0 : index
    %c0_76 = arith.constant 0 : index
    %c0_77 = arith.constant 0 : index
    %58 = vector.load %arg7[%c0_74, %c0_75, %c0_76, %c0_77] : memref<1x1x16x16xbf16, #tpu.memory_space<vmem>>, vector<1x1x16x16xbf16>
    %59 = vector.shape_cast %58 : vector<1x1x16x16xbf16> to vector<16x16xbf16>
    %60 = arith.extf %59 : vector<16x16xbf16> to vector<16x16xf32>
    %61 = arith.addf %57, %60 : vector<16x16xf32>
    %cst_78 = arith.constant 0.000000e+00 : f32
    %62 = vector.broadcast %cst_78 : f32 to vector<16x16xf32>
    %63 = arith.maximumf %61, %62 : vector<16x16xf32>
    %64 = arith.truncf %63 : vector<16x16xf32> to vector<16x16xbf16>
    %c0_79 = arith.constant 0 : index
    %c0_80 = arith.constant 0 : index
    %c0_81 = arith.constant 0 : index
    %c0_82 = arith.constant 0 : index
    %65 = vector.load %arg8[%c0_79, %c0_80, %c0_81, %c0_82] : memref<1x1x16x16xbf16, #tpu.memory_space<vmem>>, vector<1x1x16x16xbf16>
    %66 = vector.shape_cast %65 : vector<1x1x16x16xbf16> to vector<16x16xbf16>
    %67 = vector.shape_cast %64 : vector<16x16xbf16> to vector<1x1x16x16xbf16>
    tpu.vector_store %arg8[%c0_79, %c0_80, %c0_81, %c0_82], %67 {strides = array<i32>} : memref<1x1x16x16xbf16, #tpu.memory_space<vmem>>, vector<1x1x16x16xbf16>,
    return
  }
  func.func @transform_0(%arg0: i32, %arg1: i32) -> (i32, i32, i32, i32, i32) {
    %c1_i32 = arith.constant 1 : i32
    %0 = arith.muli %c1_i32, %arg1 : i32
    %c0_i32 = arith.constant 0 : i32
    %1 = arith.addi %0, %c0_i32 : i32
    %c0_i32_0 = arith.constant 0 : i32
    %c0_i32_1 = arith.constant 0 : i32
    %c0_i32_2 = arith.constant 0 : i32
    %c0_i32_3 = arith.constant 0 : i32
    return %arg0, %1, %c0_i32_0, %c0_i32_1, %c0_i32_2 : i32, i32, i32, i32, i32
  }
  func.func @transform_1(%arg0: i32, %arg1: i32) -> (i32, i32, i32, i32, i32) {
    %c1_i32 = arith.constant 1 : i32
    %0 = arith.muli %c1_i32, %arg1 : i32
    %c1_i32_0 = arith.constant 1 : i32
    %1 = arith.addi %0, %c1_i32_0 : i32
    %c0_i32 = arith.constant 0 : i32
    %c0_i32_1 = arith.constant 0 : i32
    %c0_i32_2 = arith.constant 0 : i32
    %c0_i32_3 = arith.constant 0 : i32
    return %arg0, %1, %c0_i32, %c0_i32_1, %c0_i32_2 : i32, i32, i32, i32, i32
  }
  func.func @transform_2(%arg0: i32, %arg1: i32) -> (i32, i32, i32, i32, i32) {
    %c1_i32 = arith.constant 1 : i32
    %0 = arith.muli %c1_i32, %arg1 : i32
    %c2_i32 = arith.constant 2 : i32
    %1 = arith.addi %0, %c2_i32 : i32
    %c0_i32 = arith.constant 0 : i32
    %c0_i32_0 = arith.constant 0 : i32
    %c0_i32_1 = arith.constant 0 : i32
    %c0_i32_2 = arith.constant 0 : i32
    return %arg0, %1, %c0_i32, %c0_i32_0, %c0_i32_1 : i32, i32, i32, i32, i32
  }
  func.func @transform_3(%arg0: i32, %arg1: i32) -> (i32, i32, i32) {
    %c0_i32 = arith.constant 0 : i32
    %c0_i32_0 = arith.constant 0 : i32
    %c0_i32_1 = arith.constant 0 : i32
    %c0_i32_2 = arith.constant 0 : i32
    return %c0_i32, %c0_i32_0, %c0_i32_1 : i32, i32, i32
  }
  func.func @transform_4(%arg0: i32, %arg1: i32) -> (i32, i32) {
    %c0_i32 = arith.constant 0 : i32
    %c0_i32_0 = arith.constant 0 : i32
    %c0_i32_1 = arith.constant 0 : i32
    return %c0_i32, %c0_i32_0 : i32, i32
  }
  func.func @transform_5(%arg0: i32, %arg1: i32) -> (i32, i32, i32, i32) {
    %c0_i32 = arith.constant 0 : i32
    %c0_i32_0 = arith.constant 0 : i32
    %c0_i32_1 = arith.constant 0 : i32
    return %arg0, %arg1, %c0_i32, %c0_i32_0 : i32, i32, i32, i32
  }
  func.func @transform_6(%arg0: i32, %arg1: i32) -> (i32, i32, i32, i32) {
    %c0_i32 = arith.constant 0 : i32
    %c0_i32_0 = arith.constant 0 : i32
    %c0_i32_1 = arith.constant 0 : i32
    return %arg0, %arg1, %c0_i32, %c0_i32_0 : i32, i32, i32, i32
  }
}

module attributes {stable_mosaic.version = 11 : i64} {
  func.func @_conv_kernel(%arg0: i32, %arg1: i32, %arg2: memref<1x1x2x8x16xbf16, #tpu.memory_space<vmem>>, %arg3: memref<1x16x32xbf16, #tpu.memory_space<vmem>>, %arg4: memref<1x32xf32, #tpu.memory_space<vmem>>, %arg5: memref<1x1x8x32xbf16, #tpu.memory_space<vmem>>) attributes {dimension_semantics = [#tpu.dimension_semantics<parallel>, #tpu.dimension_semantics<parallel>], iteration_bounds = array<i64: 2, 8>, scalar_prefetch = 0 : i64, scratch_operands = 0 : i64, tpu.core_type = #tpu.core_type<tc>, window_params = [{transform_indices = @transform_0, window_bounds = array<i64: 1, 1, 2, 8, 16>}, {pipeline_mode = #tpu.pipeline_mode<synchronous>, transform_indices = @transform_1, window_bounds = array<i64: 1, 16, 32>}, {pipeline_mode = #tpu.pipeline_mode<synchronous>, transform_indices = @transform_2, window_bounds = array<i64: 1, 32>}, {transform_indices = @transform_3, window_bounds = array<i64: 1, 1, 8, 32>}]} {
    %cst = arith.constant 0.000000e+00 : f32
    %0 = vector.broadcast %cst : f32 to vector<8x32xf32>
    %c0 = arith.constant 0 : index
    %c0_0 = arith.constant 0 : index
    %c0_1 = arith.constant 0 : index
    %c0_2 = arith.constant 0 : index
    %c0_3 = arith.constant 0 : index
    %1 = vector.load %arg2[%c0, %c0_0, %c0_1, %c0_2, %c0_3] : memref<1x1x2x8x16xbf16, #tpu.memory_space<vmem>>, vector<1x1x1x8x16xbf16>
    %2 = vector.shape_cast %1 : vector<1x1x1x8x16xbf16> to vector<8x16xbf16>
    %c0_4 = arith.constant 0 : index
    %c0_5 = arith.constant 0 : index
    %c0_6 = arith.constant 0 : index
    %3 = vector.load %arg3[%c0_4, %c0_5, %c0_6] : memref<1x16x32xbf16, #tpu.memory_space<vmem>>, vector<1x16x32xbf16>
    %4 = vector.shape_cast %3 : vector<1x16x32xbf16> to vector<16x32xbf16>
    %cst_7 = arith.constant dense<0.000000e+00> : vector<8x32xf32>
    %5 = tpu.matmul %2, %4, %cst_7 {dimension_numbers = #tpu.dot_dimension_numbers<[1], [0], [0], [1], [0, 0, 1, 1], [], []>} : vector<8x16xbf16>, vector<16x32xbf16>, vector<8x32xf32> -> vector<8x32xf32>
    %6 = arith.addf %0, %5 : vector<8x32xf32>
    %c0_8 = arith.constant 0 : index
    %c0_9 = arith.constant 0 : index
    %7 = vector.load %arg4[%c0_8, %c0_9] : memref<1x32xf32, #tpu.memory_space<vmem>>, vector<1x32xf32>
    %8 = vector.broadcast %7 : vector<1x32xf32> to vector<8x32xf32>
    %9 = arith.addf %6, %8 : vector<8x32xf32>
    %10 = arith.truncf %9 : vector<8x32xf32> to vector<8x32xbf16>
    %c0_10 = arith.constant 0 : index
    %c0_11 = arith.constant 0 : index
    %c0_12 = arith.constant 0 : index
    %c0_13 = arith.constant 0 : index
    %11 = vector.load %arg5[%c0_10, %c0_11, %c0_12, %c0_13] : memref<1x1x8x32xbf16, #tpu.memory_space<vmem>>, vector<1x1x8x32xbf16>
    %12 = vector.shape_cast %11 : vector<1x1x8x32xbf16> to vector<8x32xbf16>
    %13 = vector.shape_cast %10 : vector<8x32xbf16> to vector<1x1x8x32xbf16>
    tpu.vector_store %arg5[%c0_10, %c0_11, %c0_12, %c0_13], %13 {strides = array<i32>} : memref<1x1x8x32xbf16, #tpu.memory_space<vmem>>, vector<1x1x8x32xbf16>,
    return
  }
  func.func @transform_0(%arg0: i32, %arg1: i32) -> (i32, i32, i32, i32, i32) {
    %c2_i32 = arith.constant 2 : i32
    %0 = arith.muli %c2_i32, %arg1 : i32
    %c0_i32 = arith.constant 0 : i32
    %1 = arith.addi %0, %c0_i32 : i32
    %c0_i32_0 = arith.constant 0 : i32
    %c0_i32_1 = arith.constant 0 : i32
    %c0_i32_2 = arith.constant 0 : i32
    %c0_i32_3 = arith.constant 0 : i32
    return %arg0, %1, %c0_i32_0, %c0_i32_1, %c0_i32_2 : i32, i32, i32, i32, i32
  }
  func.func @transform_1(%arg0: i32, %arg1: i32) -> (i32, i32, i32) {
    %c0_i32 = arith.constant 0 : i32
    %c0_i32_0 = arith.constant 0 : i32
    %c0_i32_1 = arith.constant 0 : i32
    %c0_i32_2 = arith.constant 0 : i32
    return %c0_i32, %c0_i32_0, %c0_i32_1 : i32, i32, i32
  }
  func.func @transform_2(%arg0: i32, %arg1: i32) -> (i32, i32) {
    %c0_i32 = arith.constant 0 : i32
    %c0_i32_0 = arith.constant 0 : i32
    %c0_i32_1 = arith.constant 0 : i32
    return %c0_i32, %c0_i32_0 : i32, i32
  }
  func.func @transform_3(%arg0: i32, %arg1: i32) -> (i32, i32, i32, i32) {
    %c0_i32 = arith.constant 0 : i32
    %c0_i32_0 = arith.constant 0 : i32
    %c0_i32_1 = arith.constant 0 : i32
    return %arg0, %arg1, %c0_i32, %c0_i32_0 : i32, i32, i32, i32
  }
}

module attributes {stable_mosaic.version = 11 : i64} {
  func.func @_conv_kernel(%arg0: i32, %arg1: i32, %arg2: memref<1x1x2x9x16xbf16, #tpu.memory_space<vmem>>, %arg3: memref<1x1x2x9x16xbf16, #tpu.memory_space<vmem>>, %arg4: memref<1x1x2x9x16xbf16, #tpu.memory_space<vmem>>, %arg5: memref<9x16x32xbf16, #tpu.memory_space<vmem>>, %arg6: memref<1x32xf32, #tpu.memory_space<vmem>>, %arg7: memref<1x1x8x32xbf16, #tpu.memory_space<vmem>>) attributes {dimension_semantics = [#tpu.dimension_semantics<parallel>, #tpu.dimension_semantics<parallel>], iteration_bounds = array<i64: 2, 8>, scalar_prefetch = 0 : i64, scratch_operands = 0 : i64, tpu.core_type = #tpu.core_type<tc>, window_params = [{transform_indices = @transform_0, window_bounds = array<i64: 1, 1, 2, 9, 16>}, {transform_indices = @transform_1, window_bounds = array<i64: 1, 1, 2, 9, 16>}, {transform_indices = @transform_2, window_bounds = array<i64: 1, 1, 2, 9, 16>}, {pipeline_mode = #tpu.pipeline_mode<synchronous>, transform_indices = @transform_3, window_bounds = array<i64: 9, 16, 32>}, {pipeline_mode = #tpu.pipeline_mode<synchronous>, transform_indices = @transform_4, window_bounds = array<i64: 1, 32>}, {transform_indices = @transform_5, window_bounds = array<i64: 1, 1, 8, 32>}]} {
    %cst = arith.constant 0.000000e+00 : f32
    %0 = vector.broadcast %cst : f32 to vector<8x32xf32>
    %c0 = arith.constant 0 : index
    %c0_0 = arith.constant 0 : index
    %c0_1 = arith.constant 0 : index
    %c0_2 = arith.constant 0 : index
    %c0_3 = arith.constant 0 : index
    %1 = vector.load %arg2[%c0, %c0_0, %c0_1, %c0_2, %c0_3] : memref<1x1x2x9x16xbf16, #tpu.memory_space<vmem>>, vector<1x1x1x8x16xbf16>
    %2 = vector.shape_cast %1 : vector<1x1x1x8x16xbf16> to vector<8x16xbf16>
    %c0_4 = arith.constant 0 : index
    %c0_5 = arith.constant 0 : index
    %c0_6 = arith.constant 0 : index
    %3 = vector.load %arg5[%c0_4, %c0_5, %c0_6] : memref<9x16x32xbf16, #tpu.memory_space<vmem>>, vector<1x16x32xbf16>
    %4 = vector.shape_cast %3 : vector<1x16x32xbf16> to vector<16x32xbf16>
    %cst_7 = arith.constant dense<0.000000e+00> : vector<8x32xf32>
    %5 = tpu.matmul %2, %4, %cst_7 {dimension_numbers = #tpu.dot_dimension_numbers<[1], [0], [0], [1], [0, 0, 1, 1], [], []>} : vector<8x16xbf16>, vector<16x32xbf16>, vector<8x32xf32> -> vector<8x32xf32>
    %6 = arith.addf %0, %5 : vector<8x32xf32>
    %c0_8 = arith.constant 0 : index
    %c0_9 = arith.constant 0 : index
    %c1 = arith.constant 1 : index
    %c0_10 = arith.constant 0 : index
    %c0_11 = arith.constant 0 : index
    %7 = vector.load %arg2[%c0_8, %c0_9, %c1, %c0_10, %c0_11] : memref<1x1x2x9x16xbf16, #tpu.memory_space<vmem>>, vector<1x1x1x8x16xbf16>
    %8 = vector.shape_cast %7 : vector<1x1x1x8x16xbf16> to vector<8x16xbf16>
    %c1_12 = arith.constant 1 : index
    %c0_13 = arith.constant 0 : index
    %c0_14 = arith.constant 0 : index
    %9 = vector.load %arg5[%c1_12, %c0_13, %c0_14] : memref<9x16x32xbf16, #tpu.memory_space<vmem>>, vector<1x16x32xbf16>
    %10 = vector.shape_cast %9 : vector<1x16x32xbf16> to vector<16x32xbf16>
    %cst_15 = arith.constant dense<0.000000e+00> : vector<8x32xf32>
    %11 = tpu.matmul %8, %10, %cst_15 {dimension_numbers = #tpu.dot_dimension_numbers<[1], [0], [0], [1], [0, 0, 1, 1], [], []>} : vector<8x16xbf16>, vector<16x32xbf16>, vector<8x32xf32> -> vector<8x32xf32>
    %12 = arith.addf %6, %11 : vector<8x32xf32>
    %c0_16 = arith.constant 0 : index
    %c0_17 = arith.constant 0 : index
    %c0_18 = arith.constant 0 : index
    %c1_19 = arith.constant 1 : index
    %c0_20 = arith.constant 0 : index
    %13 = vector.load %arg2[%c0_16, %c0_17, %c0_18, %c1_19, %c0_20] : memref<1x1x2x9x16xbf16, #tpu.memory_space<vmem>>, vector<1x1x1x8x16xbf16>
    %14 = vector.shape_cast %13 : vector<1x1x1x8x16xbf16> to vector<8x16xbf16>
    %c2 = arith.constant 2 : index
    %c0_21 = arith.constant 0 : index
    %c0_22 = arith.constant 0 : index
    %15 = vector.load %arg5[%c2, %c0_21, %c0_22] : memref<9x16x32xbf16, #tpu.memory_space<vmem>>, vector<1x16x32xbf16>
    %16 = vector.shape_cast %15 : vector<1x16x32xbf16> to vector<16x32xbf16>
    %cst_23 = arith.constant dense<0.000000e+00> : vector<8x32xf32>
    %17 = tpu.matmul %14, %16, %cst_23 {dimension_numbers = #tpu.dot_dimension_numbers<[1], [0], [0], [1], [0, 0, 1, 1], [], []>} : vector<8x16xbf16>, vector<16x32xbf16>, vector<8x32xf32> -> vector<8x32xf32>
    %18 = arith.addf %12, %17 : vector<8x32xf32>
    %c0_24 = arith.constant 0 : index
    %c0_25 = arith.constant 0 : index
    %c0_26 = arith.constant 0 : index
    %c0_27 = arith.constant 0 : index
    %c0_28 = arith.constant 0 : index
    %19 = vector.load %arg3[%c0_24, %c0_25, %c0_26, %c0_27, %c0_28] : memref<1x1x2x9x16xbf16, #tpu.memory_space<vmem>>, vector<1x1x1x8x16xbf16>
    %20 = vector.shape_cast %19 : vector<1x1x1x8x16xbf16> to vector<8x16xbf16>
    %c3 = arith.constant 3 : index
    %c0_29 = arith.constant 0 : index
    %c0_30 = arith.constant 0 : index
    %21 = vector.load %arg5[%c3, %c0_29, %c0_30] : memref<9x16x32xbf16, #tpu.memory_space<vmem>>, vector<1x16x32xbf16>
    %22 = vector.shape_cast %21 : vector<1x16x32xbf16> to vector<16x32xbf16>
    %cst_31 = arith.constant dense<0.000000e+00> : vector<8x32xf32>
    %23 = tpu.matmul %20, %22, %cst_31 {dimension_numbers = #tpu.dot_dimension_numbers<[1], [0], [0], [1], [0, 0, 1, 1], [], []>} : vector<8x16xbf16>, vector<16x32xbf16>, vector<8x32xf32> -> vector<8x32xf32>
    %24 = arith.addf %18, %23 : vector<8x32xf32>
    %c0_32 = arith.constant 0 : index
    %c0_33 = arith.constant 0 : index
    %c1_34 = arith.constant 1 : index
    %c0_35 = arith.constant 0 : index
    %c0_36 = arith.constant 0 : index
    %25 = vector.load %arg3[%c0_32, %c0_33, %c1_34, %c0_35, %c0_36] : memref<1x1x2x9x16xbf16, #tpu.memory_space<vmem>>, vector<1x1x1x8x16xbf16>
    %26 = vector.shape_cast %25 : vector<1x1x1x8x16xbf16> to vector<8x16xbf16>
    %c4 = arith.constant 4 : index
    %c0_37 = arith.constant 0 : index
    %c0_38 = arith.constant 0 : index
    %27 = vector.load %arg5[%c4, %c0_37, %c0_38] : memref<9x16x32xbf16, #tpu.memory_space<vmem>>, vector<1x16x32xbf16>
    %28 = vector.shape_cast %27 : vector<1x16x32xbf16> to vector<16x32xbf16>
    %cst_39 = arith.constant dense<0.000000e+00> : vector<8x32xf32>
    %29 = tpu.matmul %26, %28, %cst_39 {dimension_numbers = #tpu.dot_dimension_numbers<[1], [0], [0], [1], [0, 0, 1, 1], [], []>} : vector<8x16xbf16>, vector<16x32xbf16>, vector<8x32xf32> -> vector<8x32xf32>
    %30 = arith.addf %24, %29 : vector<8x32xf32>
    %c0_40 = arith.constant 0 : index
    %c0_41 = arith.constant 0 : index
    %c0_42 = arith.constant 0 : index
    %c1_43 = arith.constant 1 : index
    %c0_44 = arith.constant 0 : index
    %31 = vector.load %arg3[%c0_40, %c0_41, %c0_42, %c1_43, %c0_44] : memref<1x1x2x9x16xbf16, #tpu.memory_space<vmem>>, vector<1x1x1x8x16xbf16>
    %32 = vector.shape_cast %31 : vector<1x1x1x8x16xbf16> to vector<8x16xbf16>
    %c5 = arith.constant 5 : index
    %c0_45 = arith.constant 0 : index
    %c0_46 = arith.constant 0 : index
    %33 = vector.load %arg5[%c5, %c0_45, %c0_46] : memref<9x16x32xbf16, #tpu.memory_space<vmem>>, vector<1x16x32xbf16>
    %34 = vector.shape_cast %33 : vector<1x16x32xbf16> to vector<16x32xbf16>
    %cst_47 = arith.constant dense<0.000000e+00> : vector<8x32xf32>
    %35 = tpu.matmul %32, %34, %cst_47 {dimension_numbers = #tpu.dot_dimension_numbers<[1], [0], [0], [1], [0, 0, 1, 1], [], []>} : vector<8x16xbf16>, vector<16x32xbf16>, vector<8x32xf32> -> vector<8x32xf32>
    %36 = arith.addf %30, %35 : vector<8x32xf32>
    %c0_48 = arith.constant 0 : index
    %c0_49 = arith.constant 0 : index
    %c0_50 = arith.constant 0 : index
    %c0_51 = arith.constant 0 : index
    %c0_52 = arith.constant 0 : index
    %37 = vector.load %arg4[%c0_48, %c0_49, %c0_50, %c0_51, %c0_52] : memref<1x1x2x9x16xbf16, #tpu.memory_space<vmem>>, vector<1x1x1x8x16xbf16>
    %38 = vector.shape_cast %37 : vector<1x1x1x8x16xbf16> to vector<8x16xbf16>
    %c6 = arith.constant 6 : index
    %c0_53 = arith.constant 0 : index
    %c0_54 = arith.constant 0 : index
    %39 = vector.load %arg5[%c6, %c0_53, %c0_54] : memref<9x16x32xbf16, #tpu.memory_space<vmem>>, vector<1x16x32xbf16>
    %40 = vector.shape_cast %39 : vector<1x16x32xbf16> to vector<16x32xbf16>
    %cst_55 = arith.constant dense<0.000000e+00> : vector<8x32xf32>
    %41 = tpu.matmul %38, %40, %cst_55 {dimension_numbers = #tpu.dot_dimension_numbers<[1], [0], [0], [1], [0, 0, 1, 1], [], []>} : vector<8x16xbf16>, vector<16x32xbf16>, vector<8x32xf32> -> vector<8x32xf32>
    %42 = arith.addf %36, %41 : vector<8x32xf32>
    %c0_56 = arith.constant 0 : index
    %c0_57 = arith.constant 0 : index
    %c1_58 = arith.constant 1 : index
    %c0_59 = arith.constant 0 : index
    %c0_60 = arith.constant 0 : index
    %43 = vector.load %arg4[%c0_56, %c0_57, %c1_58, %c0_59, %c0_60] : memref<1x1x2x9x16xbf16, #tpu.memory_space<vmem>>, vector<1x1x1x8x16xbf16>
    %44 = vector.shape_cast %43 : vector<1x1x1x8x16xbf16> to vector<8x16xbf16>
    %c7 = arith.constant 7 : index
    %c0_61 = arith.constant 0 : index
    %c0_62 = arith.constant 0 : index
    %45 = vector.load %arg5[%c7, %c0_61, %c0_62] : memref<9x16x32xbf16, #tpu.memory_space<vmem>>, vector<1x16x32xbf16>
    %46 = vector.shape_cast %45 : vector<1x16x32xbf16> to vector<16x32xbf16>
    %cst_63 = arith.constant dense<0.000000e+00> : vector<8x32xf32>
    %47 = tpu.matmul %44, %46, %cst_63 {dimension_numbers = #tpu.dot_dimension_numbers<[1], [0], [0], [1], [0, 0, 1, 1], [], []>} : vector<8x16xbf16>, vector<16x32xbf16>, vector<8x32xf32> -> vector<8x32xf32>
    %48 = arith.addf %42, %47 : vector<8x32xf32>
    %c0_64 = arith.constant 0 : index
    %c0_65 = arith.constant 0 : index
    %c0_66 = arith.constant 0 : index
    %c1_67 = arith.constant 1 : index
    %c0_68 = arith.constant 0 : index
    %49 = vector.load %arg4[%c0_64, %c0_65, %c0_66, %c1_67, %c0_68] : memref<1x1x2x9x16xbf16, #tpu.memory_space<vmem>>, vector<1x1x1x8x16xbf16>
    %50 = vector.shape_cast %49 : vector<1x1x1x8x16xbf16> to vector<8x16xbf16>
    %c8 = arith.constant 8 : index
    %c0_69 = arith.constant 0 : index
    %c0_70 = arith.constant 0 : index
    %51 = vector.load %arg5[%c8, %c0_69, %c0_70] : memref<9x16x32xbf16, #tpu.memory_space<vmem>>, vector<1x16x32xbf16>
    %52 = vector.shape_cast %51 : vector<1x16x32xbf16> to vector<16x32xbf16>
    %cst_71 = arith.constant dense<0.000000e+00> : vector<8x32xf32>
    %53 = tpu.matmul %50, %52, %cst_71 {dimension_numbers = #tpu.dot_dimension_numbers<[1], [0], [0], [1], [0, 0, 1, 1], [], []>} : vector<8x16xbf16>, vector<16x32xbf16>, vector<8x32xf32> -> vector<8x32xf32>
    %54 = arith.addf %48, %53 : vector<8x32xf32>
    %c0_72 = arith.constant 0 : index
    %c0_73 = arith.constant 0 : index
    %55 = vector.load %arg6[%c0_72, %c0_73] : memref<1x32xf32, #tpu.memory_space<vmem>>, vector<1x32xf32>
    %56 = vector.broadcast %55 : vector<1x32xf32> to vector<8x32xf32>
    %57 = arith.addf %54, %56 : vector<8x32xf32>
    %cst_74 = arith.constant 0.000000e+00 : f32
    %58 = vector.broadcast %cst_74 : f32 to vector<8x32xf32>
    %59 = arith.maximumf %57, %58 : vector<8x32xf32>
    %60 = arith.truncf %59 : vector<8x32xf32> to vector<8x32xbf16>
    %c0_75 = arith.constant 0 : index
    %c0_76 = arith.constant 0 : index
    %c0_77 = arith.constant 0 : index
    %c0_78 = arith.constant 0 : index
    %61 = vector.load %arg7[%c0_75, %c0_76, %c0_77, %c0_78] : memref<1x1x8x32xbf16, #tpu.memory_space<vmem>>, vector<1x1x8x32xbf16>
    %62 = vector.shape_cast %61 : vector<1x1x8x32xbf16> to vector<8x32xbf16>
    %63 = vector.shape_cast %60 : vector<8x32xbf16> to vector<1x1x8x32xbf16>
    tpu.vector_store %arg7[%c0_75, %c0_76, %c0_77, %c0_78], %63 {strides = array<i32>} : memref<1x1x8x32xbf16, #tpu.memory_space<vmem>>, vector<1x1x8x32xbf16>,
    return
  }
  func.func @transform_0(%arg0: i32, %arg1: i32) -> (i32, i32, i32, i32, i32) {
    %c2_i32 = arith.constant 2 : i32
    %0 = arith.muli %c2_i32, %arg1 : i32
    %c0_i32 = arith.constant 0 : i32
    %1 = arith.addi %0, %c0_i32 : i32
    %c0_i32_0 = arith.constant 0 : i32
    %c0_i32_1 = arith.constant 0 : i32
    %c0_i32_2 = arith.constant 0 : i32
    %c0_i32_3 = arith.constant 0 : i32
    return %arg0, %1, %c0_i32_0, %c0_i32_1, %c0_i32_2 : i32, i32, i32, i32, i32
  }
  func.func @transform_1(%arg0: i32, %arg1: i32) -> (i32, i32, i32, i32, i32) {
    %c2_i32 = arith.constant 2 : i32
    %0 = arith.muli %c2_i32, %arg1 : i32
    %c1_i32 = arith.constant 1 : i32
    %1 = arith.addi %0, %c1_i32 : i32
    %c0_i32 = arith.constant 0 : i32
    %c0_i32_0 = arith.constant 0 : i32
    %c0_i32_1 = arith.constant 0 : i32
    %c0_i32_2 = arith.constant 0 : i32
    return %arg0, %1, %c0_i32, %c0_i32_0, %c0_i32_1 : i32, i32, i32, i32, i32
  }
  func.func @transform_2(%arg0: i32, %arg1: i32) -> (i32, i32, i32, i32, i32) {
    %c2_i32 = arith.constant 2 : i32
    %0 = arith.muli %c2_i32, %arg1 : i32
    %c2_i32_0 = arith.constant 2 : i32
    %1 = arith.addi %0, %c2_i32_0 : i32
    %c0_i32 = arith.constant 0 : i32
    %c0_i32_1 = arith.constant 0 : i32
    %c0_i32_2 = arith.constant 0 : i32
    %c0_i32_3 = arith.constant 0 : i32
    return %arg0, %1, %c0_i32, %c0_i32_1, %c0_i32_2 : i32, i32, i32, i32, i32
  }
  func.func @transform_3(%arg0: i32, %arg1: i32) -> (i32, i32, i32) {
    %c0_i32 = arith.constant 0 : i32
    %c0_i32_0 = arith.constant 0 : i32
    %c0_i32_1 = arith.constant 0 : i32
    %c0_i32_2 = arith.constant 0 : i32
    return %c0_i32, %c0_i32_0, %c0_i32_1 : i32, i32, i32
  }
  func.func @transform_4(%arg0: i32, %arg1: i32) -> (i32, i32) {
    %c0_i32 = arith.constant 0 : i32
    %c0_i32_0 = arith.constant 0 : i32
    %c0_i32_1 = arith.constant 0 : i32
    return %c0_i32, %c0_i32_0 : i32, i32
  }
  func.func @transform_5(%arg0: i32, %arg1: i32) -> (i32, i32, i32, i32) {
    %c0_i32 = arith.constant 0 : i32
    %c0_i32_0 = arith.constant 0 : i32
    %c0_i32_1 = arith.constant 0 : i32
    return %arg0, %arg1, %c0_i32, %c0_i32_0 : i32, i32, i32, i32
  }
}

module attributes {stable_mosaic.version = 11 : i64} {
  func.func @_conv_kernel(%arg0: i32, %arg1: i32, %arg2: memref<1x1x1x10x32xbf16, #tpu.memory_space<vmem>>, %arg3: memref<1x1x1x10x32xbf16, #tpu.memory_space<vmem>>, %arg4: memref<1x1x1x10x32xbf16, #tpu.memory_space<vmem>>, %arg5: memref<9x32x32xbf16, #tpu.memory_space<vmem>>, %arg6: memref<1x32xf32, #tpu.memory_space<vmem>>, %arg7: memref<1x1x8x32xbf16, #tpu.memory_space<vmem>>, %arg8: memref<1x1x8x32xbf16, #tpu.memory_space<vmem>>) attributes {dimension_semantics = [#tpu.dimension_semantics<parallel>, #tpu.dimension_semantics<parallel>], iteration_bounds = array<i64: 2, 8>, scalar_prefetch = 0 : i64, scratch_operands = 0 : i64, tpu.core_type = #tpu.core_type<tc>, window_params = [{transform_indices = @transform_0, window_bounds = array<i64: 1, 1, 1, 10, 32>}, {transform_indices = @transform_1, window_bounds = array<i64: 1, 1, 1, 10, 32>}, {transform_indices = @transform_2, window_bounds = array<i64: 1, 1, 1, 10, 32>}, {pipeline_mode = #tpu.pipeline_mode<synchronous>, transform_indices = @transform_3, window_bounds = array<i64: 9, 32, 32>}, {pipeline_mode = #tpu.pipeline_mode<synchronous>, transform_indices = @transform_4, window_bounds = array<i64: 1, 32>}, {transform_indices = @transform_5, window_bounds = array<i64: 1, 1, 8, 32>}, {transform_indices = @transform_6, window_bounds = array<i64: 1, 1, 8, 32>}]} {
    %cst = arith.constant 0.000000e+00 : f32
    %0 = vector.broadcast %cst : f32 to vector<8x32xf32>
    %c0 = arith.constant 0 : index
    %c0_0 = arith.constant 0 : index
    %c0_1 = arith.constant 0 : index
    %c0_2 = arith.constant 0 : index
    %c0_3 = arith.constant 0 : index
    %1 = vector.load %arg2[%c0, %c0_0, %c0_1, %c0_2, %c0_3] : memref<1x1x1x10x32xbf16, #tpu.memory_space<vmem>>, vector<1x1x1x8x32xbf16>
    %2 = vector.shape_cast %1 : vector<1x1x1x8x32xbf16> to vector<8x32xbf16>
    %c0_4 = arith.constant 0 : index
    %c0_5 = arith.constant 0 : index
    %c0_6 = arith.constant 0 : index
    %3 = vector.load %arg5[%c0_4, %c0_5, %c0_6] : memref<9x32x32xbf16, #tpu.memory_space<vmem>>, vector<1x32x32xbf16>
    %4 = vector.shape_cast %3 : vector<1x32x32xbf16> to vector<32x32xbf16>
    %cst_7 = arith.constant dense<0.000000e+00> : vector<8x32xf32>
    %5 = tpu.matmul %2, %4, %cst_7 {dimension_numbers = #tpu.dot_dimension_numbers<[1], [0], [0], [1], [0, 0, 1, 1], [], []>} : vector<8x32xbf16>, vector<32x32xbf16>, vector<8x32xf32> -> vector<8x32xf32>
    %6 = arith.addf %0, %5 : vector<8x32xf32>
    %c0_8 = arith.constant 0 : index
    %c0_9 = arith.constant 0 : index
    %c0_10 = arith.constant 0 : index
    %c1 = arith.constant 1 : index
    %c0_11 = arith.constant 0 : index
    %7 = vector.load %arg2[%c0_8, %c0_9, %c0_10, %c1, %c0_11] : memref<1x1x1x10x32xbf16, #tpu.memory_space<vmem>>, vector<1x1x1x8x32xbf16>
    %8 = vector.shape_cast %7 : vector<1x1x1x8x32xbf16> to vector<8x32xbf16>
    %c1_12 = arith.constant 1 : index
    %c0_13 = arith.constant 0 : index
    %c0_14 = arith.constant 0 : index
    %9 = vector.load %arg5[%c1_12, %c0_13, %c0_14] : memref<9x32x32xbf16, #tpu.memory_space<vmem>>, vector<1x32x32xbf16>
    %10 = vector.shape_cast %9 : vector<1x32x32xbf16> to vector<32x32xbf16>
    %cst_15 = arith.constant dense<0.000000e+00> : vector<8x32xf32>
    %11 = tpu.matmul %8, %10, %cst_15 {dimension_numbers = #tpu.dot_dimension_numbers<[1], [0], [0], [1], [0, 0, 1, 1], [], []>} : vector<8x32xbf16>, vector<32x32xbf16>, vector<8x32xf32> -> vector<8x32xf32>
    %12 = arith.addf %6, %11 : vector<8x32xf32>
    %c0_16 = arith.constant 0 : index
    %c0_17 = arith.constant 0 : index
    %c0_18 = arith.constant 0 : index
    %c2 = arith.constant 2 : index
    %c0_19 = arith.constant 0 : index
    %13 = vector.load %arg2[%c0_16, %c0_17, %c0_18, %c2, %c0_19] : memref<1x1x1x10x32xbf16, #tpu.memory_space<vmem>>, vector<1x1x1x8x32xbf16>
    %14 = vector.shape_cast %13 : vector<1x1x1x8x32xbf16> to vector<8x32xbf16>
    %c2_20 = arith.constant 2 : index
    %c0_21 = arith.constant 0 : index
    %c0_22 = arith.constant 0 : index
    %15 = vector.load %arg5[%c2_20, %c0_21, %c0_22] : memref<9x32x32xbf16, #tpu.memory_space<vmem>>, vector<1x32x32xbf16>
    %16 = vector.shape_cast %15 : vector<1x32x32xbf16> to vector<32x32xbf16>
    %cst_23 = arith.constant dense<0.000000e+00> : vector<8x32xf32>
    %17 = tpu.matmul %14, %16, %cst_23 {dimension_numbers = #tpu.dot_dimension_numbers<[1], [0], [0], [1], [0, 0, 1, 1], [], []>} : vector<8x32xbf16>, vector<32x32xbf16>, vector<8x32xf32> -> vector<8x32xf32>
    %18 = arith.addf %12, %17 : vector<8x32xf32>
    %c0_24 = arith.constant 0 : index
    %c0_25 = arith.constant 0 : index
    %c0_26 = arith.constant 0 : index
    %c0_27 = arith.constant 0 : index
    %c0_28 = arith.constant 0 : index
    %19 = vector.load %arg3[%c0_24, %c0_25, %c0_26, %c0_27, %c0_28] : memref<1x1x1x10x32xbf16, #tpu.memory_space<vmem>>, vector<1x1x1x8x32xbf16>
    %20 = vector.shape_cast %19 : vector<1x1x1x8x32xbf16> to vector<8x32xbf16>
    %c3 = arith.constant 3 : index
    %c0_29 = arith.constant 0 : index
    %c0_30 = arith.constant 0 : index
    %21 = vector.load %arg5[%c3, %c0_29, %c0_30] : memref<9x32x32xbf16, #tpu.memory_space<vmem>>, vector<1x32x32xbf16>
    %22 = vector.shape_cast %21 : vector<1x32x32xbf16> to vector<32x32xbf16>
    %cst_31 = arith.constant dense<0.000000e+00> : vector<8x32xf32>
    %23 = tpu.matmul %20, %22, %cst_31 {dimension_numbers = #tpu.dot_dimension_numbers<[1], [0], [0], [1], [0, 0, 1, 1], [], []>} : vector<8x32xbf16>, vector<32x32xbf16>, vector<8x32xf32> -> vector<8x32xf32>
    %24 = arith.addf %18, %23 : vector<8x32xf32>
    %c0_32 = arith.constant 0 : index
    %c0_33 = arith.constant 0 : index
    %c0_34 = arith.constant 0 : index
    %c1_35 = arith.constant 1 : index
    %c0_36 = arith.constant 0 : index
    %25 = vector.load %arg3[%c0_32, %c0_33, %c0_34, %c1_35, %c0_36] : memref<1x1x1x10x32xbf16, #tpu.memory_space<vmem>>, vector<1x1x1x8x32xbf16>
    %26 = vector.shape_cast %25 : vector<1x1x1x8x32xbf16> to vector<8x32xbf16>
    %c4 = arith.constant 4 : index
    %c0_37 = arith.constant 0 : index
    %c0_38 = arith.constant 0 : index
    %27 = vector.load %arg5[%c4, %c0_37, %c0_38] : memref<9x32x32xbf16, #tpu.memory_space<vmem>>, vector<1x32x32xbf16>
    %28 = vector.shape_cast %27 : vector<1x32x32xbf16> to vector<32x32xbf16>
    %cst_39 = arith.constant dense<0.000000e+00> : vector<8x32xf32>
    %29 = tpu.matmul %26, %28, %cst_39 {dimension_numbers = #tpu.dot_dimension_numbers<[1], [0], [0], [1], [0, 0, 1, 1], [], []>} : vector<8x32xbf16>, vector<32x32xbf16>, vector<8x32xf32> -> vector<8x32xf32>
    %30 = arith.addf %24, %29 : vector<8x32xf32>
    %c0_40 = arith.constant 0 : index
    %c0_41 = arith.constant 0 : index
    %c0_42 = arith.constant 0 : index
    %c2_43 = arith.constant 2 : index
    %c0_44 = arith.constant 0 : index
    %31 = vector.load %arg3[%c0_40, %c0_41, %c0_42, %c2_43, %c0_44] : memref<1x1x1x10x32xbf16, #tpu.memory_space<vmem>>, vector<1x1x1x8x32xbf16>
    %32 = vector.shape_cast %31 : vector<1x1x1x8x32xbf16> to vector<8x32xbf16>
    %c5 = arith.constant 5 : index
    %c0_45 = arith.constant 0 : index
    %c0_46 = arith.constant 0 : index
    %33 = vector.load %arg5[%c5, %c0_45, %c0_46] : memref<9x32x32xbf16, #tpu.memory_space<vmem>>, vector<1x32x32xbf16>
    %34 = vector.shape_cast %33 : vector<1x32x32xbf16> to vector<32x32xbf16>
    %cst_47 = arith.constant dense<0.000000e+00> : vector<8x32xf32>
    %35 = tpu.matmul %32, %34, %cst_47 {dimension_numbers = #tpu.dot_dimension_numbers<[1], [0], [0], [1], [0, 0, 1, 1], [], []>} : vector<8x32xbf16>, vector<32x32xbf16>, vector<8x32xf32> -> vector<8x32xf32>
    %36 = arith.addf %30, %35 : vector<8x32xf32>
    %c0_48 = arith.constant 0 : index
    %c0_49 = arith.constant 0 : index
    %c0_50 = arith.constant 0 : index
    %c0_51 = arith.constant 0 : index
    %c0_52 = arith.constant 0 : index
    %37 = vector.load %arg4[%c0_48, %c0_49, %c0_50, %c0_51, %c0_52] : memref<1x1x1x10x32xbf16, #tpu.memory_space<vmem>>, vector<1x1x1x8x32xbf16>
    %38 = vector.shape_cast %37 : vector<1x1x1x8x32xbf16> to vector<8x32xbf16>
    %c6 = arith.constant 6 : index
    %c0_53 = arith.constant 0 : index
    %c0_54 = arith.constant 0 : index
    %39 = vector.load %arg5[%c6, %c0_53, %c0_54] : memref<9x32x32xbf16, #tpu.memory_space<vmem>>, vector<1x32x32xbf16>
    %40 = vector.shape_cast %39 : vector<1x32x32xbf16> to vector<32x32xbf16>
    %cst_55 = arith.constant dense<0.000000e+00> : vector<8x32xf32>
    %41 = tpu.matmul %38, %40, %cst_55 {dimension_numbers = #tpu.dot_dimension_numbers<[1], [0], [0], [1], [0, 0, 1, 1], [], []>} : vector<8x32xbf16>, vector<32x32xbf16>, vector<8x32xf32> -> vector<8x32xf32>
    %42 = arith.addf %36, %41 : vector<8x32xf32>
    %c0_56 = arith.constant 0 : index
    %c0_57 = arith.constant 0 : index
    %c0_58 = arith.constant 0 : index
    %c1_59 = arith.constant 1 : index
    %c0_60 = arith.constant 0 : index
    %43 = vector.load %arg4[%c0_56, %c0_57, %c0_58, %c1_59, %c0_60] : memref<1x1x1x10x32xbf16, #tpu.memory_space<vmem>>, vector<1x1x1x8x32xbf16>
    %44 = vector.shape_cast %43 : vector<1x1x1x8x32xbf16> to vector<8x32xbf16>
    %c7 = arith.constant 7 : index
    %c0_61 = arith.constant 0 : index
    %c0_62 = arith.constant 0 : index
    %45 = vector.load %arg5[%c7, %c0_61, %c0_62] : memref<9x32x32xbf16, #tpu.memory_space<vmem>>, vector<1x32x32xbf16>
    %46 = vector.shape_cast %45 : vector<1x32x32xbf16> to vector<32x32xbf16>
    %cst_63 = arith.constant dense<0.000000e+00> : vector<8x32xf32>
    %47 = tpu.matmul %44, %46, %cst_63 {dimension_numbers = #tpu.dot_dimension_numbers<[1], [0], [0], [1], [0, 0, 1, 1], [], []>} : vector<8x32xbf16>, vector<32x32xbf16>, vector<8x32xf32> -> vector<8x32xf32>
    %48 = arith.addf %42, %47 : vector<8x32xf32>
    %c0_64 = arith.constant 0 : index
    %c0_65 = arith.constant 0 : index
    %c0_66 = arith.constant 0 : index
    %c2_67 = arith.constant 2 : index
    %c0_68 = arith.constant 0 : index
    %49 = vector.load %arg4[%c0_64, %c0_65, %c0_66, %c2_67, %c0_68] : memref<1x1x1x10x32xbf16, #tpu.memory_space<vmem>>, vector<1x1x1x8x32xbf16>
    %50 = vector.shape_cast %49 : vector<1x1x1x8x32xbf16> to vector<8x32xbf16>
    %c8 = arith.constant 8 : index
    %c0_69 = arith.constant 0 : index
    %c0_70 = arith.constant 0 : index
    %51 = vector.load %arg5[%c8, %c0_69, %c0_70] : memref<9x32x32xbf16, #tpu.memory_space<vmem>>, vector<1x32x32xbf16>
    %52 = vector.shape_cast %51 : vector<1x32x32xbf16> to vector<32x32xbf16>
    %cst_71 = arith.constant dense<0.000000e+00> : vector<8x32xf32>
    %53 = tpu.matmul %50, %52, %cst_71 {dimension_numbers = #tpu.dot_dimension_numbers<[1], [0], [0], [1], [0, 0, 1, 1], [], []>} : vector<8x32xbf16>, vector<32x32xbf16>, vector<8x32xf32> -> vector<8x32xf32>
    %54 = arith.addf %48, %53 : vector<8x32xf32>
    %c0_72 = arith.constant 0 : index
    %c0_73 = arith.constant 0 : index
    %55 = vector.load %arg6[%c0_72, %c0_73] : memref<1x32xf32, #tpu.memory_space<vmem>>, vector<1x32xf32>
    %56 = vector.broadcast %55 : vector<1x32xf32> to vector<8x32xf32>
    %57 = arith.addf %54, %56 : vector<8x32xf32>
    %c0_74 = arith.constant 0 : index
    %c0_75 = arith.constant 0 : index
    %c0_76 = arith.constant 0 : index
    %c0_77 = arith.constant 0 : index
    %58 = vector.load %arg7[%c0_74, %c0_75, %c0_76, %c0_77] : memref<1x1x8x32xbf16, #tpu.memory_space<vmem>>, vector<1x1x8x32xbf16>
    %59 = vector.shape_cast %58 : vector<1x1x8x32xbf16> to vector<8x32xbf16>
    %60 = arith.extf %59 : vector<8x32xbf16> to vector<8x32xf32>
    %61 = arith.addf %57, %60 : vector<8x32xf32>
    %cst_78 = arith.constant 0.000000e+00 : f32
    %62 = vector.broadcast %cst_78 : f32 to vector<8x32xf32>
    %63 = arith.maximumf %61, %62 : vector<8x32xf32>
    %64 = arith.truncf %63 : vector<8x32xf32> to vector<8x32xbf16>
    %c0_79 = arith.constant 0 : index
    %c0_80 = arith.constant 0 : index
    %c0_81 = arith.constant 0 : index
    %c0_82 = arith.constant 0 : index
    %65 = vector.load %arg8[%c0_79, %c0_80, %c0_81, %c0_82] : memref<1x1x8x32xbf16, #tpu.memory_space<vmem>>, vector<1x1x8x32xbf16>
    %66 = vector.shape_cast %65 : vector<1x1x8x32xbf16> to vector<8x32xbf16>
    %67 = vector.shape_cast %64 : vector<8x32xbf16> to vector<1x1x8x32xbf16>
    tpu.vector_store %arg8[%c0_79, %c0_80, %c0_81, %c0_82], %67 {strides = array<i32>} : memref<1x1x8x32xbf16, #tpu.memory_space<vmem>>, vector<1x1x8x32xbf16>,
    return
  }
  func.func @transform_0(%arg0: i32, %arg1: i32) -> (i32, i32, i32, i32, i32) {
    %c1_i32 = arith.constant 1 : i32
    %0 = arith.muli %c1_i32, %arg1 : i32
    %c0_i32 = arith.constant 0 : i32
    %1 = arith.addi %0, %c0_i32 : i32
    %c0_i32_0 = arith.constant 0 : i32
    %c0_i32_1 = arith.constant 0 : i32
    %c0_i32_2 = arith.constant 0 : i32
    %c0_i32_3 = arith.constant 0 : i32
    return %arg0, %1, %c0_i32_0, %c0_i32_1, %c0_i32_2 : i32, i32, i32, i32, i32
  }
  func.func @transform_1(%arg0: i32, %arg1: i32) -> (i32, i32, i32, i32, i32) {
    %c1_i32 = arith.constant 1 : i32
    %0 = arith.muli %c1_i32, %arg1 : i32
    %c1_i32_0 = arith.constant 1 : i32
    %1 = arith.addi %0, %c1_i32_0 : i32
    %c0_i32 = arith.constant 0 : i32
    %c0_i32_1 = arith.constant 0 : i32
    %c0_i32_2 = arith.constant 0 : i32
    %c0_i32_3 = arith.constant 0 : i32
    return %arg0, %1, %c0_i32, %c0_i32_1, %c0_i32_2 : i32, i32, i32, i32, i32
  }
  func.func @transform_2(%arg0: i32, %arg1: i32) -> (i32, i32, i32, i32, i32) {
    %c1_i32 = arith.constant 1 : i32
    %0 = arith.muli %c1_i32, %arg1 : i32
    %c2_i32 = arith.constant 2 : i32
    %1 = arith.addi %0, %c2_i32 : i32
    %c0_i32 = arith.constant 0 : i32
    %c0_i32_0 = arith.constant 0 : i32
    %c0_i32_1 = arith.constant 0 : i32
    %c0_i32_2 = arith.constant 0 : i32
    return %arg0, %1, %c0_i32, %c0_i32_0, %c0_i32_1 : i32, i32, i32, i32, i32
  }
  func.func @transform_3(%arg0: i32, %arg1: i32) -> (i32, i32, i32) {
    %c0_i32 = arith.constant 0 : i32
    %c0_i32_0 = arith.constant 0 : i32
    %c0_i32_1 = arith.constant 0 : i32
    %c0_i32_2 = arith.constant 0 : i32
    return %c0_i32, %c0_i32_0, %c0_i32_1 : i32, i32, i32
  }
  func.func @transform_4(%arg0: i32, %arg1: i32) -> (i32, i32) {
    %c0_i32 = arith.constant 0 : i32
    %c0_i32_0 = arith.constant 0 : i32
    %c0_i32_1 = arith.constant 0 : i32
    return %c0_i32, %c0_i32_0 : i32, i32
  }
  func.func @transform_5(%arg0: i32, %arg1: i32) -> (i32, i32, i32, i32) {
    %c0_i32 = arith.constant 0 : i32
    %c0_i32_0 = arith.constant 0 : i32
    %c0_i32_1 = arith.constant 0 : i32
    return %arg0, %arg1, %c0_i32, %c0_i32_0 : i32, i32, i32, i32
  }
  func.func @transform_6(%arg0: i32, %arg1: i32) -> (i32, i32, i32, i32) {
    %c0_i32 = arith.constant 0 : i32
    %c0_i32_0 = arith.constant 0 : i32
    %c0_i32_1 = arith.constant 0 : i32
    return %arg0, %arg1, %c0_i32, %c0_i32_0 : i32, i32, i32, i32
  }
}

module attributes {stable_mosaic.version = 11 : i64} {
  func.func @_conv_kernel(%arg0: i32, %arg1: i32, %arg2: memref<1x1x2x4x32xbf16, #tpu.memory_space<vmem>>, %arg3: memref<1x32x64xbf16, #tpu.memory_space<vmem>>, %arg4: memref<1x64xf32, #tpu.memory_space<vmem>>, %arg5: memref<1x1x4x64xbf16, #tpu.memory_space<vmem>>) attributes {dimension_semantics = [#tpu.dimension_semantics<parallel>, #tpu.dimension_semantics<parallel>], iteration_bounds = array<i64: 2, 4>, scalar_prefetch = 0 : i64, scratch_operands = 0 : i64, tpu.core_type = #tpu.core_type<tc>, window_params = [{transform_indices = @transform_0, window_bounds = array<i64: 1, 1, 2, 4, 32>}, {pipeline_mode = #tpu.pipeline_mode<synchronous>, transform_indices = @transform_1, window_bounds = array<i64: 1, 32, 64>}, {pipeline_mode = #tpu.pipeline_mode<synchronous>, transform_indices = @transform_2, window_bounds = array<i64: 1, 64>}, {transform_indices = @transform_3, window_bounds = array<i64: 1, 1, 4, 64>}]} {
    %cst = arith.constant 0.000000e+00 : f32
    %0 = vector.broadcast %cst : f32 to vector<4x64xf32>
    %c0 = arith.constant 0 : index
    %c0_0 = arith.constant 0 : index
    %c0_1 = arith.constant 0 : index
    %c0_2 = arith.constant 0 : index
    %c0_3 = arith.constant 0 : index
    %1 = vector.load %arg2[%c0, %c0_0, %c0_1, %c0_2, %c0_3] : memref<1x1x2x4x32xbf16, #tpu.memory_space<vmem>>, vector<1x1x1x4x32xbf16>
    %2 = vector.shape_cast %1 : vector<1x1x1x4x32xbf16> to vector<4x32xbf16>
    %c0_4 = arith.constant 0 : index
    %c0_5 = arith.constant 0 : index
    %c0_6 = arith.constant 0 : index
    %3 = vector.load %arg3[%c0_4, %c0_5, %c0_6] : memref<1x32x64xbf16, #tpu.memory_space<vmem>>, vector<1x32x64xbf16>
    %4 = vector.shape_cast %3 : vector<1x32x64xbf16> to vector<32x64xbf16>
    %cst_7 = arith.constant dense<0.000000e+00> : vector<4x64xf32>
    %5 = tpu.matmul %2, %4, %cst_7 {dimension_numbers = #tpu.dot_dimension_numbers<[1], [0], [0], [1], [0, 0, 1, 1], [], []>} : vector<4x32xbf16>, vector<32x64xbf16>, vector<4x64xf32> -> vector<4x64xf32>
    %6 = arith.addf %0, %5 : vector<4x64xf32>
    %c0_8 = arith.constant 0 : index
    %c0_9 = arith.constant 0 : index
    %7 = vector.load %arg4[%c0_8, %c0_9] : memref<1x64xf32, #tpu.memory_space<vmem>>, vector<1x64xf32>
    %8 = vector.broadcast %7 : vector<1x64xf32> to vector<4x64xf32>
    %9 = arith.addf %6, %8 : vector<4x64xf32>
    %10 = arith.truncf %9 : vector<4x64xf32> to vector<4x64xbf16>
    %c0_10 = arith.constant 0 : index
    %c0_11 = arith.constant 0 : index
    %c0_12 = arith.constant 0 : index
    %c0_13 = arith.constant 0 : index
    %11 = vector.load %arg5[%c0_10, %c0_11, %c0_12, %c0_13] : memref<1x1x4x64xbf16, #tpu.memory_space<vmem>>, vector<1x1x4x64xbf16>
    %12 = vector.shape_cast %11 : vector<1x1x4x64xbf16> to vector<4x64xbf16>
    %13 = vector.shape_cast %10 : vector<4x64xbf16> to vector<1x1x4x64xbf16>
    tpu.vector_store %arg5[%c0_10, %c0_11, %c0_12, %c0_13], %13 {strides = array<i32>} : memref<1x1x4x64xbf16, #tpu.memory_space<vmem>>, vector<1x1x4x64xbf16>,
    return
  }
  func.func @transform_0(%arg0: i32, %arg1: i32) -> (i32, i32, i32, i32, i32) {
    %c2_i32 = arith.constant 2 : i32
    %0 = arith.muli %c2_i32, %arg1 : i32
    %c0_i32 = arith.constant 0 : i32
    %1 = arith.addi %0, %c0_i32 : i32
    %c0_i32_0 = arith.constant 0 : i32
    %c0_i32_1 = arith.constant 0 : i32
    %c0_i32_2 = arith.constant 0 : i32
    %c0_i32_3 = arith.constant 0 : i32
    return %arg0, %1, %c0_i32_0, %c0_i32_1, %c0_i32_2 : i32, i32, i32, i32, i32
  }
  func.func @transform_1(%arg0: i32, %arg1: i32) -> (i32, i32, i32) {
    %c0_i32 = arith.constant 0 : i32
    %c0_i32_0 = arith.constant 0 : i32
    %c0_i32_1 = arith.constant 0 : i32
    %c0_i32_2 = arith.constant 0 : i32
    return %c0_i32, %c0_i32_0, %c0_i32_1 : i32, i32, i32
  }
  func.func @transform_2(%arg0: i32, %arg1: i32) -> (i32, i32) {
    %c0_i32 = arith.constant 0 : i32
    %c0_i32_0 = arith.constant 0 : i32
    %c0_i32_1 = arith.constant 0 : i32
    return %c0_i32, %c0_i32_0 : i32, i32
  }
  func.func @transform_3(%arg0: i32, %arg1: i32) -> (i32, i32, i32, i32) {
    %c0_i32 = arith.constant 0 : i32
    %c0_i32_0 = arith.constant 0 : i32
    %c0_i32_1 = arith.constant 0 : i32
    return %arg0, %arg1, %c0_i32, %c0_i32_0 : i32, i32, i32, i32
  }
}

module attributes {stable_mosaic.version = 11 : i64} {
  func.func @_conv_kernel(%arg0: i32, %arg1: i32, %arg2: memref<1x1x2x5x32xbf16, #tpu.memory_space<vmem>>, %arg3: memref<1x1x2x5x32xbf16, #tpu.memory_space<vmem>>, %arg4: memref<1x1x2x5x32xbf16, #tpu.memory_space<vmem>>, %arg5: memref<9x32x64xbf16, #tpu.memory_space<vmem>>, %arg6: memref<1x64xf32, #tpu.memory_space<vmem>>, %arg7: memref<1x1x4x64xbf16, #tpu.memory_space<vmem>>) attributes {dimension_semantics = [#tpu.dimension_semantics<parallel>, #tpu.dimension_semantics<parallel>], iteration_bounds = array<i64: 2, 4>, scalar_prefetch = 0 : i64, scratch_operands = 0 : i64, tpu.core_type = #tpu.core_type<tc>, window_params = [{transform_indices = @transform_0, window_bounds = array<i64: 1, 1, 2, 5, 32>}, {transform_indices = @transform_1, window_bounds = array<i64: 1, 1, 2, 5, 32>}, {transform_indices = @transform_2, window_bounds = array<i64: 1, 1, 2, 5, 32>}, {pipeline_mode = #tpu.pipeline_mode<synchronous>, transform_indices = @transform_3, window_bounds = array<i64: 9, 32, 64>}, {pipeline_mode = #tpu.pipeline_mode<synchronous>, transform_indices = @transform_4, window_bounds = array<i64: 1, 64>}, {transform_indices = @transform_5, window_bounds = array<i64: 1, 1, 4, 64>}]} {
    %cst = arith.constant 0.000000e+00 : f32
    %0 = vector.broadcast %cst : f32 to vector<4x64xf32>
    %c0 = arith.constant 0 : index
    %c0_0 = arith.constant 0 : index
    %c0_1 = arith.constant 0 : index
    %c0_2 = arith.constant 0 : index
    %c0_3 = arith.constant 0 : index
    %1 = vector.load %arg2[%c0, %c0_0, %c0_1, %c0_2, %c0_3] : memref<1x1x2x5x32xbf16, #tpu.memory_space<vmem>>, vector<1x1x1x4x32xbf16>
    %2 = vector.shape_cast %1 : vector<1x1x1x4x32xbf16> to vector<4x32xbf16>
    %c0_4 = arith.constant 0 : index
    %c0_5 = arith.constant 0 : index
    %c0_6 = arith.constant 0 : index
    %3 = vector.load %arg5[%c0_4, %c0_5, %c0_6] : memref<9x32x64xbf16, #tpu.memory_space<vmem>>, vector<1x32x64xbf16>
    %4 = vector.shape_cast %3 : vector<1x32x64xbf16> to vector<32x64xbf16>
    %cst_7 = arith.constant dense<0.000000e+00> : vector<4x64xf32>
    %5 = tpu.matmul %2, %4, %cst_7 {dimension_numbers = #tpu.dot_dimension_numbers<[1], [0], [0], [1], [0, 0, 1, 1], [], []>} : vector<4x32xbf16>, vector<32x64xbf16>, vector<4x64xf32> -> vector<4x64xf32>
    %6 = arith.addf %0, %5 : vector<4x64xf32>
    %c0_8 = arith.constant 0 : index
    %c0_9 = arith.constant 0 : index
    %c1 = arith.constant 1 : index
    %c0_10 = arith.constant 0 : index
    %c0_11 = arith.constant 0 : index
    %7 = vector.load %arg2[%c0_8, %c0_9, %c1, %c0_10, %c0_11] : memref<1x1x2x5x32xbf16, #tpu.memory_space<vmem>>, vector<1x1x1x4x32xbf16>
    %8 = vector.shape_cast %7 : vector<1x1x1x4x32xbf16> to vector<4x32xbf16>
    %c1_12 = arith.constant 1 : index
    %c0_13 = arith.constant 0 : index
    %c0_14 = arith.constant 0 : index
    %9 = vector.load %arg5[%c1_12, %c0_13, %c0_14] : memref<9x32x64xbf16, #tpu.memory_space<vmem>>, vector<1x32x64xbf16>
    %10 = vector.shape_cast %9 : vector<1x32x64xbf16> to vector<32x64xbf16>
    %cst_15 = arith.constant dense<0.000000e+00> : vector<4x64xf32>
    %11 = tpu.matmul %8, %10, %cst_15 {dimension_numbers = #tpu.dot_dimension_numbers<[1], [0], [0], [1], [0, 0, 1, 1], [], []>} : vector<4x32xbf16>, vector<32x64xbf16>, vector<4x64xf32> -> vector<4x64xf32>
    %12 = arith.addf %6, %11 : vector<4x64xf32>
    %c0_16 = arith.constant 0 : index
    %c0_17 = arith.constant 0 : index
    %c0_18 = arith.constant 0 : index
    %c1_19 = arith.constant 1 : index
    %c0_20 = arith.constant 0 : index
    %13 = vector.load %arg2[%c0_16, %c0_17, %c0_18, %c1_19, %c0_20] : memref<1x1x2x5x32xbf16, #tpu.memory_space<vmem>>, vector<1x1x1x4x32xbf16>
    %14 = vector.shape_cast %13 : vector<1x1x1x4x32xbf16> to vector<4x32xbf16>
    %c2 = arith.constant 2 : index
    %c0_21 = arith.constant 0 : index
    %c0_22 = arith.constant 0 : index
    %15 = vector.load %arg5[%c2, %c0_21, %c0_22] : memref<9x32x64xbf16, #tpu.memory_space<vmem>>, vector<1x32x64xbf16>
    %16 = vector.shape_cast %15 : vector<1x32x64xbf16> to vector<32x64xbf16>
    %cst_23 = arith.constant dense<0.000000e+00> : vector<4x64xf32>
    %17 = tpu.matmul %14, %16, %cst_23 {dimension_numbers = #tpu.dot_dimension_numbers<[1], [0], [0], [1], [0, 0, 1, 1], [], []>} : vector<4x32xbf16>, vector<32x64xbf16>, vector<4x64xf32> -> vector<4x64xf32>
    %18 = arith.addf %12, %17 : vector<4x64xf32>
    %c0_24 = arith.constant 0 : index
    %c0_25 = arith.constant 0 : index
    %c0_26 = arith.constant 0 : index
    %c0_27 = arith.constant 0 : index
    %c0_28 = arith.constant 0 : index
    %19 = vector.load %arg3[%c0_24, %c0_25, %c0_26, %c0_27, %c0_28] : memref<1x1x2x5x32xbf16, #tpu.memory_space<vmem>>, vector<1x1x1x4x32xbf16>
    %20 = vector.shape_cast %19 : vector<1x1x1x4x32xbf16> to vector<4x32xbf16>
    %c3 = arith.constant 3 : index
    %c0_29 = arith.constant 0 : index
    %c0_30 = arith.constant 0 : index
    %21 = vector.load %arg5[%c3, %c0_29, %c0_30] : memref<9x32x64xbf16, #tpu.memory_space<vmem>>, vector<1x32x64xbf16>
    %22 = vector.shape_cast %21 : vector<1x32x64xbf16> to vector<32x64xbf16>
    %cst_31 = arith.constant dense<0.000000e+00> : vector<4x64xf32>
    %23 = tpu.matmul %20, %22, %cst_31 {dimension_numbers = #tpu.dot_dimension_numbers<[1], [0], [0], [1], [0, 0, 1, 1], [], []>} : vector<4x32xbf16>, vector<32x64xbf16>, vector<4x64xf32> -> vector<4x64xf32>
    %24 = arith.addf %18, %23 : vector<4x64xf32>
    %c0_32 = arith.constant 0 : index
    %c0_33 = arith.constant 0 : index
    %c1_34 = arith.constant 1 : index
    %c0_35 = arith.constant 0 : index
    %c0_36 = arith.constant 0 : index
    %25 = vector.load %arg3[%c0_32, %c0_33, %c1_34, %c0_35, %c0_36] : memref<1x1x2x5x32xbf16, #tpu.memory_space<vmem>>, vector<1x1x1x4x32xbf16>
    %26 = vector.shape_cast %25 : vector<1x1x1x4x32xbf16> to vector<4x32xbf16>
    %c4 = arith.constant 4 : index
    %c0_37 = arith.constant 0 : index
    %c0_38 = arith.constant 0 : index
    %27 = vector.load %arg5[%c4, %c0_37, %c0_38] : memref<9x32x64xbf16, #tpu.memory_space<vmem>>, vector<1x32x64xbf16>
    %28 = vector.shape_cast %27 : vector<1x32x64xbf16> to vector<32x64xbf16>
    %cst_39 = arith.constant dense<0.000000e+00> : vector<4x64xf32>
    %29 = tpu.matmul %26, %28, %cst_39 {dimension_numbers = #tpu.dot_dimension_numbers<[1], [0], [0], [1], [0, 0, 1, 1], [], []>} : vector<4x32xbf16>, vector<32x64xbf16>, vector<4x64xf32> -> vector<4x64xf32>
    %30 = arith.addf %24, %29 : vector<4x64xf32>
    %c0_40 = arith.constant 0 : index
    %c0_41 = arith.constant 0 : index
    %c0_42 = arith.constant 0 : index
    %c1_43 = arith.constant 1 : index
    %c0_44 = arith.constant 0 : index
    %31 = vector.load %arg3[%c0_40, %c0_41, %c0_42, %c1_43, %c0_44] : memref<1x1x2x5x32xbf16, #tpu.memory_space<vmem>>, vector<1x1x1x4x32xbf16>
    %32 = vector.shape_cast %31 : vector<1x1x1x4x32xbf16> to vector<4x32xbf16>
    %c5 = arith.constant 5 : index
    %c0_45 = arith.constant 0 : index
    %c0_46 = arith.constant 0 : index
    %33 = vector.load %arg5[%c5, %c0_45, %c0_46] : memref<9x32x64xbf16, #tpu.memory_space<vmem>>, vector<1x32x64xbf16>
    %34 = vector.shape_cast %33 : vector<1x32x64xbf16> to vector<32x64xbf16>
    %cst_47 = arith.constant dense<0.000000e+00> : vector<4x64xf32>
    %35 = tpu.matmul %32, %34, %cst_47 {dimension_numbers = #tpu.dot_dimension_numbers<[1], [0], [0], [1], [0, 0, 1, 1], [], []>} : vector<4x32xbf16>, vector<32x64xbf16>, vector<4x64xf32> -> vector<4x64xf32>
    %36 = arith.addf %30, %35 : vector<4x64xf32>
    %c0_48 = arith.constant 0 : index
    %c0_49 = arith.constant 0 : index
    %c0_50 = arith.constant 0 : index
    %c0_51 = arith.constant 0 : index
    %c0_52 = arith.constant 0 : index
    %37 = vector.load %arg4[%c0_48, %c0_49, %c0_50, %c0_51, %c0_52] : memref<1x1x2x5x32xbf16, #tpu.memory_space<vmem>>, vector<1x1x1x4x32xbf16>
    %38 = vector.shape_cast %37 : vector<1x1x1x4x32xbf16> to vector<4x32xbf16>
    %c6 = arith.constant 6 : index
    %c0_53 = arith.constant 0 : index
    %c0_54 = arith.constant 0 : index
    %39 = vector.load %arg5[%c6, %c0_53, %c0_54] : memref<9x32x64xbf16, #tpu.memory_space<vmem>>, vector<1x32x64xbf16>
    %40 = vector.shape_cast %39 : vector<1x32x64xbf16> to vector<32x64xbf16>
    %cst_55 = arith.constant dense<0.000000e+00> : vector<4x64xf32>
    %41 = tpu.matmul %38, %40, %cst_55 {dimension_numbers = #tpu.dot_dimension_numbers<[1], [0], [0], [1], [0, 0, 1, 1], [], []>} : vector<4x32xbf16>, vector<32x64xbf16>, vector<4x64xf32> -> vector<4x64xf32>
    %42 = arith.addf %36, %41 : vector<4x64xf32>
    %c0_56 = arith.constant 0 : index
    %c0_57 = arith.constant 0 : index
    %c1_58 = arith.constant 1 : index
    %c0_59 = arith.constant 0 : index
    %c0_60 = arith.constant 0 : index
    %43 = vector.load %arg4[%c0_56, %c0_57, %c1_58, %c0_59, %c0_60] : memref<1x1x2x5x32xbf16, #tpu.memory_space<vmem>>, vector<1x1x1x4x32xbf16>
    %44 = vector.shape_cast %43 : vector<1x1x1x4x32xbf16> to vector<4x32xbf16>
    %c7 = arith.constant 7 : index
    %c0_61 = arith.constant 0 : index
    %c0_62 = arith.constant 0 : index
    %45 = vector.load %arg5[%c7, %c0_61, %c0_62] : memref<9x32x64xbf16, #tpu.memory_space<vmem>>, vector<1x32x64xbf16>
    %46 = vector.shape_cast %45 : vector<1x32x64xbf16> to vector<32x64xbf16>
    %cst_63 = arith.constant dense<0.000000e+00> : vector<4x64xf32>
    %47 = tpu.matmul %44, %46, %cst_63 {dimension_numbers = #tpu.dot_dimension_numbers<[1], [0], [0], [1], [0, 0, 1, 1], [], []>} : vector<4x32xbf16>, vector<32x64xbf16>, vector<4x64xf32> -> vector<4x64xf32>
    %48 = arith.addf %42, %47 : vector<4x64xf32>
    %c0_64 = arith.constant 0 : index
    %c0_65 = arith.constant 0 : index
    %c0_66 = arith.constant 0 : index
    %c1_67 = arith.constant 1 : index
    %c0_68 = arith.constant 0 : index
    %49 = vector.load %arg4[%c0_64, %c0_65, %c0_66, %c1_67, %c0_68] : memref<1x1x2x5x32xbf16, #tpu.memory_space<vmem>>, vector<1x1x1x4x32xbf16>
    %50 = vector.shape_cast %49 : vector<1x1x1x4x32xbf16> to vector<4x32xbf16>
    %c8 = arith.constant 8 : index
    %c0_69 = arith.constant 0 : index
    %c0_70 = arith.constant 0 : index
    %51 = vector.load %arg5[%c8, %c0_69, %c0_70] : memref<9x32x64xbf16, #tpu.memory_space<vmem>>, vector<1x32x64xbf16>
    %52 = vector.shape_cast %51 : vector<1x32x64xbf16> to vector<32x64xbf16>
    %cst_71 = arith.constant dense<0.000000e+00> : vector<4x64xf32>
    %53 = tpu.matmul %50, %52, %cst_71 {dimension_numbers = #tpu.dot_dimension_numbers<[1], [0], [0], [1], [0, 0, 1, 1], [], []>} : vector<4x32xbf16>, vector<32x64xbf16>, vector<4x64xf32> -> vector<4x64xf32>
    %54 = arith.addf %48, %53 : vector<4x64xf32>
    %c0_72 = arith.constant 0 : index
    %c0_73 = arith.constant 0 : index
    %55 = vector.load %arg6[%c0_72, %c0_73] : memref<1x64xf32, #tpu.memory_space<vmem>>, vector<1x64xf32>
    %56 = vector.broadcast %55 : vector<1x64xf32> to vector<4x64xf32>
    %57 = arith.addf %54, %56 : vector<4x64xf32>
    %cst_74 = arith.constant 0.000000e+00 : f32
    %58 = vector.broadcast %cst_74 : f32 to vector<4x64xf32>
    %59 = arith.maximumf %57, %58 : vector<4x64xf32>
    %60 = arith.truncf %59 : vector<4x64xf32> to vector<4x64xbf16>
    %c0_75 = arith.constant 0 : index
    %c0_76 = arith.constant 0 : index
    %c0_77 = arith.constant 0 : index
    %c0_78 = arith.constant 0 : index
    %61 = vector.load %arg7[%c0_75, %c0_76, %c0_77, %c0_78] : memref<1x1x4x64xbf16, #tpu.memory_space<vmem>>, vector<1x1x4x64xbf16>
    %62 = vector.shape_cast %61 : vector<1x1x4x64xbf16> to vector<4x64xbf16>
    %63 = vector.shape_cast %60 : vector<4x64xbf16> to vector<1x1x4x64xbf16>
    tpu.vector_store %arg7[%c0_75, %c0_76, %c0_77, %c0_78], %63 {strides = array<i32>} : memref<1x1x4x64xbf16, #tpu.memory_space<vmem>>, vector<1x1x4x64xbf16>,
    return
  }
  func.func @transform_0(%arg0: i32, %arg1: i32) -> (i32, i32, i32, i32, i32) {
    %c2_i32 = arith.constant 2 : i32
    %0 = arith.muli %c2_i32, %arg1 : i32
    %c0_i32 = arith.constant 0 : i32
    %1 = arith.addi %0, %c0_i32 : i32
    %c0_i32_0 = arith.constant 0 : i32
    %c0_i32_1 = arith.constant 0 : i32
    %c0_i32_2 = arith.constant 0 : i32
    %c0_i32_3 = arith.constant 0 : i32
    return %arg0, %1, %c0_i32_0, %c0_i32_1, %c0_i32_2 : i32, i32, i32, i32, i32
  }
  func.func @transform_1(%arg0: i32, %arg1: i32) -> (i32, i32, i32, i32, i32) {
    %c2_i32 = arith.constant 2 : i32
    %0 = arith.muli %c2_i32, %arg1 : i32
    %c1_i32 = arith.constant 1 : i32
    %1 = arith.addi %0, %c1_i32 : i32
    %c0_i32 = arith.constant 0 : i32
    %c0_i32_0 = arith.constant 0 : i32
    %c0_i32_1 = arith.constant 0 : i32
    %c0_i32_2 = arith.constant 0 : i32
    return %arg0, %1, %c0_i32, %c0_i32_0, %c0_i32_1 : i32, i32, i32, i32, i32
  }
  func.func @transform_2(%arg0: i32, %arg1: i32) -> (i32, i32, i32, i32, i32) {
    %c2_i32 = arith.constant 2 : i32
    %0 = arith.muli %c2_i32, %arg1 : i32
    %c2_i32_0 = arith.constant 2 : i32
    %1 = arith.addi %0, %c2_i32_0 : i32
    %c0_i32 = arith.constant 0 : i32
    %c0_i32_1 = arith.constant 0 : i32
    %c0_i32_2 = arith.constant 0 : i32
    %c0_i32_3 = arith.constant 0 : i32
    return %arg0, %1, %c0_i32, %c0_i32_1, %c0_i32_2 : i32, i32, i32, i32, i32
  }
  func.func @transform_3(%arg0: i32, %arg1: i32) -> (i32, i32, i32) {
    %c0_i32 = arith.constant 0 : i32
    %c0_i32_0 = arith.constant 0 : i32
    %c0_i32_1 = arith.constant 0 : i32
    %c0_i32_2 = arith.constant 0 : i32
    return %c0_i32, %c0_i32_0, %c0_i32_1 : i32, i32, i32
  }
  func.func @transform_4(%arg0: i32, %arg1: i32) -> (i32, i32) {
    %c0_i32 = arith.constant 0 : i32
    %c0_i32_0 = arith.constant 0 : i32
    %c0_i32_1 = arith.constant 0 : i32
    return %c0_i32, %c0_i32_0 : i32, i32
  }
  func.func @transform_5(%arg0: i32, %arg1: i32) -> (i32, i32, i32, i32) {
    %c0_i32 = arith.constant 0 : i32
    %c0_i32_0 = arith.constant 0 : i32
    %c0_i32_1 = arith.constant 0 : i32
    return %arg0, %arg1, %c0_i32, %c0_i32_0 : i32, i32, i32, i32
  }
}

module attributes {stable_mosaic.version = 11 : i64} {
  func.func @_conv_kernel(%arg0: i32, %arg1: i32, %arg2: memref<1x1x1x6x64xbf16, #tpu.memory_space<vmem>>, %arg3: memref<1x1x1x6x64xbf16, #tpu.memory_space<vmem>>, %arg4: memref<1x1x1x6x64xbf16, #tpu.memory_space<vmem>>, %arg5: memref<9x64x64xbf16, #tpu.memory_space<vmem>>, %arg6: memref<1x64xf32, #tpu.memory_space<vmem>>, %arg7: memref<1x1x4x64xbf16, #tpu.memory_space<vmem>>, %arg8: memref<1x1x4x64xbf16, #tpu.memory_space<vmem>>) attributes {dimension_semantics = [#tpu.dimension_semantics<parallel>, #tpu.dimension_semantics<parallel>], iteration_bounds = array<i64: 2, 4>, scalar_prefetch = 0 : i64, scratch_operands = 0 : i64, tpu.core_type = #tpu.core_type<tc>, window_params = [{transform_indices = @transform_0, window_bounds = array<i64: 1, 1, 1, 6, 64>}, {transform_indices = @transform_1, window_bounds = array<i64: 1, 1, 1, 6, 64>}, {transform_indices = @transform_2, window_bounds = array<i64: 1, 1, 1, 6, 64>}, {pipeline_mode = #tpu.pipeline_mode<synchronous>, transform_indices = @transform_3, window_bounds = array<i64: 9, 64, 64>}, {pipeline_mode = #tpu.pipeline_mode<synchronous>, transform_indices = @transform_4, window_bounds = array<i64: 1, 64>}, {transform_indices = @transform_5, window_bounds = array<i64: 1, 1, 4, 64>}, {transform_indices = @transform_6, window_bounds = array<i64: 1, 1, 4, 64>}]} {
    %cst = arith.constant 0.000000e+00 : f32
    %0 = vector.broadcast %cst : f32 to vector<4x64xf32>
    %c0 = arith.constant 0 : index
    %c0_0 = arith.constant 0 : index
    %c0_1 = arith.constant 0 : index
    %c0_2 = arith.constant 0 : index
    %c0_3 = arith.constant 0 : index
    %1 = vector.load %arg2[%c0, %c0_0, %c0_1, %c0_2, %c0_3] : memref<1x1x1x6x64xbf16, #tpu.memory_space<vmem>>, vector<1x1x1x4x64xbf16>
    %2 = vector.shape_cast %1 : vector<1x1x1x4x64xbf16> to vector<4x64xbf16>
    %c0_4 = arith.constant 0 : index
    %c0_5 = arith.constant 0 : index
    %c0_6 = arith.constant 0 : index
    %3 = vector.load %arg5[%c0_4, %c0_5, %c0_6] : memref<9x64x64xbf16, #tpu.memory_space<vmem>>, vector<1x64x64xbf16>
    %4 = vector.shape_cast %3 : vector<1x64x64xbf16> to vector<64x64xbf16>
    %cst_7 = arith.constant dense<0.000000e+00> : vector<4x64xf32>
    %5 = tpu.matmul %2, %4, %cst_7 {dimension_numbers = #tpu.dot_dimension_numbers<[1], [0], [0], [1], [0, 0, 1, 1], [], []>} : vector<4x64xbf16>, vector<64x64xbf16>, vector<4x64xf32> -> vector<4x64xf32>
    %6 = arith.addf %0, %5 : vector<4x64xf32>
    %c0_8 = arith.constant 0 : index
    %c0_9 = arith.constant 0 : index
    %c0_10 = arith.constant 0 : index
    %c1 = arith.constant 1 : index
    %c0_11 = arith.constant 0 : index
    %7 = vector.load %arg2[%c0_8, %c0_9, %c0_10, %c1, %c0_11] : memref<1x1x1x6x64xbf16, #tpu.memory_space<vmem>>, vector<1x1x1x4x64xbf16>
    %8 = vector.shape_cast %7 : vector<1x1x1x4x64xbf16> to vector<4x64xbf16>
    %c1_12 = arith.constant 1 : index
    %c0_13 = arith.constant 0 : index
    %c0_14 = arith.constant 0 : index
    %9 = vector.load %arg5[%c1_12, %c0_13, %c0_14] : memref<9x64x64xbf16, #tpu.memory_space<vmem>>, vector<1x64x64xbf16>
    %10 = vector.shape_cast %9 : vector<1x64x64xbf16> to vector<64x64xbf16>
    %cst_15 = arith.constant dense<0.000000e+00> : vector<4x64xf32>
    %11 = tpu.matmul %8, %10, %cst_15 {dimension_numbers = #tpu.dot_dimension_numbers<[1], [0], [0], [1], [0, 0, 1, 1], [], []>} : vector<4x64xbf16>, vector<64x64xbf16>, vector<4x64xf32> -> vector<4x64xf32>
    %12 = arith.addf %6, %11 : vector<4x64xf32>
    %c0_16 = arith.constant 0 : index
    %c0_17 = arith.constant 0 : index
    %c0_18 = arith.constant 0 : index
    %c2 = arith.constant 2 : index
    %c0_19 = arith.constant 0 : index
    %13 = vector.load %arg2[%c0_16, %c0_17, %c0_18, %c2, %c0_19] : memref<1x1x1x6x64xbf16, #tpu.memory_space<vmem>>, vector<1x1x1x4x64xbf16>
    %14 = vector.shape_cast %13 : vector<1x1x1x4x64xbf16> to vector<4x64xbf16>
    %c2_20 = arith.constant 2 : index
    %c0_21 = arith.constant 0 : index
    %c0_22 = arith.constant 0 : index
    %15 = vector.load %arg5[%c2_20, %c0_21, %c0_22] : memref<9x64x64xbf16, #tpu.memory_space<vmem>>, vector<1x64x64xbf16>
    %16 = vector.shape_cast %15 : vector<1x64x64xbf16> to vector<64x64xbf16>
    %cst_23 = arith.constant dense<0.000000e+00> : vector<4x64xf32>
    %17 = tpu.matmul %14, %16, %cst_23 {dimension_numbers = #tpu.dot_dimension_numbers<[1], [0], [0], [1], [0, 0, 1, 1], [], []>} : vector<4x64xbf16>, vector<64x64xbf16>, vector<4x64xf32> -> vector<4x64xf32>
    %18 = arith.addf %12, %17 : vector<4x64xf32>
    %c0_24 = arith.constant 0 : index
    %c0_25 = arith.constant 0 : index
    %c0_26 = arith.constant 0 : index
    %c0_27 = arith.constant 0 : index
    %c0_28 = arith.constant 0 : index
    %19 = vector.load %arg3[%c0_24, %c0_25, %c0_26, %c0_27, %c0_28] : memref<1x1x1x6x64xbf16, #tpu.memory_space<vmem>>, vector<1x1x1x4x64xbf16>
    %20 = vector.shape_cast %19 : vector<1x1x1x4x64xbf16> to vector<4x64xbf16>
    %c3 = arith.constant 3 : index
    %c0_29 = arith.constant 0 : index
    %c0_30 = arith.constant 0 : index
    %21 = vector.load %arg5[%c3, %c0_29, %c0_30] : memref<9x64x64xbf16, #tpu.memory_space<vmem>>, vector<1x64x64xbf16>
    %22 = vector.shape_cast %21 : vector<1x64x64xbf16> to vector<64x64xbf16>
    %cst_31 = arith.constant dense<0.000000e+00> : vector<4x64xf32>
    %23 = tpu.matmul %20, %22, %cst_31 {dimension_numbers = #tpu.dot_dimension_numbers<[1], [0], [0], [1], [0, 0, 1, 1], [], []>} : vector<4x64xbf16>, vector<64x64xbf16>, vector<4x64xf32> -> vector<4x64xf32>
    %24 = arith.addf %18, %23 : vector<4x64xf32>
    %c0_32 = arith.constant 0 : index
    %c0_33 = arith.constant 0 : index
    %c0_34 = arith.constant 0 : index
    %c1_35 = arith.constant 1 : index
    %c0_36 = arith.constant 0 : index
    %25 = vector.load %arg3[%c0_32, %c0_33, %c0_34, %c1_35, %c0_36] : memref<1x1x1x6x64xbf16, #tpu.memory_space<vmem>>, vector<1x1x1x4x64xbf16>
    %26 = vector.shape_cast %25 : vector<1x1x1x4x64xbf16> to vector<4x64xbf16>
    %c4 = arith.constant 4 : index
    %c0_37 = arith.constant 0 : index
    %c0_38 = arith.constant 0 : index
    %27 = vector.load %arg5[%c4, %c0_37, %c0_38] : memref<9x64x64xbf16, #tpu.memory_space<vmem>>, vector<1x64x64xbf16>
    %28 = vector.shape_cast %27 : vector<1x64x64xbf16> to vector<64x64xbf16>
    %cst_39 = arith.constant dense<0.000000e+00> : vector<4x64xf32>
    %29 = tpu.matmul %26, %28, %cst_39 {dimension_numbers = #tpu.dot_dimension_numbers<[1], [0], [0], [1], [0, 0, 1, 1], [], []>} : vector<4x64xbf16>, vector<64x64xbf16>, vector<4x64xf32> -> vector<4x64xf32>
    %30 = arith.addf %24, %29 : vector<4x64xf32>
    %c0_40 = arith.constant 0 : index
    %c0_41 = arith.constant 0 : index
    %c0_42 = arith.constant 0 : index
    %c2_43 = arith.constant 2 : index
    %c0_44 = arith.constant 0 : index
    %31 = vector.load %arg3[%c0_40, %c0_41, %c0_42, %c2_43, %c0_44] : memref<1x1x1x6x64xbf16, #tpu.memory_space<vmem>>, vector<1x1x1x4x64xbf16>
    %32 = vector.shape_cast %31 : vector<1x1x1x4x64xbf16> to vector<4x64xbf16>
    %c5 = arith.constant 5 : index
    %c0_45 = arith.constant 0 : index
    %c0_46 = arith.constant 0 : index
    %33 = vector.load %arg5[%c5, %c0_45, %c0_46] : memref<9x64x64xbf16, #tpu.memory_space<vmem>>, vector<1x64x64xbf16>
    %34 = vector.shape_cast %33 : vector<1x64x64xbf16> to vector<64x64xbf16>
    %cst_47 = arith.constant dense<0.000000e+00> : vector<4x64xf32>
    %35 = tpu.matmul %32, %34, %cst_47 {dimension_numbers = #tpu.dot_dimension_numbers<[1], [0], [0], [1], [0, 0, 1, 1], [], []>} : vector<4x64xbf16>, vector<64x64xbf16>, vector<4x64xf32> -> vector<4x64xf32>
    %36 = arith.addf %30, %35 : vector<4x64xf32>
    %c0_48 = arith.constant 0 : index
    %c0_49 = arith.constant 0 : index
    %c0_50 = arith.constant 0 : index
    %c0_51 = arith.constant 0 : index
    %c0_52 = arith.constant 0 : index
    %37 = vector.load %arg4[%c0_48, %c0_49, %c0_50, %c0_51, %c0_52] : memref<1x1x1x6x64xbf16, #tpu.memory_space<vmem>>, vector<1x1x1x4x64xbf16>
    %38 = vector.shape_cast %37 : vector<1x1x1x4x64xbf16> to vector<4x64xbf16>
    %c6 = arith.constant 6 : index
    %c0_53 = arith.constant 0 : index
    %c0_54 = arith.constant 0 : index
    %39 = vector.load %arg5[%c6, %c0_53, %c0_54] : memref<9x64x64xbf16, #tpu.memory_space<vmem>>, vector<1x64x64xbf16>
    %40 = vector.shape_cast %39 : vector<1x64x64xbf16> to vector<64x64xbf16>
    %cst_55 = arith.constant dense<0.000000e+00> : vector<4x64xf32>
    %41 = tpu.matmul %38, %40, %cst_55 {dimension_numbers = #tpu.dot_dimension_numbers<[1], [0], [0], [1], [0, 0, 1, 1], [], []>} : vector<4x64xbf16>, vector<64x64xbf16>, vector<4x64xf32> -> vector<4x64xf32>
    %42 = arith.addf %36, %41 : vector<4x64xf32>
    %c0_56 = arith.constant 0 : index
    %c0_57 = arith.constant 0 : index
    %c0_58 = arith.constant 0 : index
    %c1_59 = arith.constant 1 : index
    %c0_60 = arith.constant 0 : index
    %43 = vector.load %arg4[%c0_56, %c0_57, %c0_58, %c1_59, %c0_60] : memref<1x1x1x6x64xbf16, #tpu.memory_space<vmem>>, vector<1x1x1x4x64xbf16>
    %44 = vector.shape_cast %43 : vector<1x1x1x4x64xbf16> to vector<4x64xbf16>
    %c7 = arith.constant 7 : index
    %c0_61 = arith.constant 0 : index
    %c0_62 = arith.constant 0 : index
    %45 = vector.load %arg5[%c7, %c0_61, %c0_62] : memref<9x64x64xbf16, #tpu.memory_space<vmem>>, vector<1x64x64xbf16>
    %46 = vector.shape_cast %45 : vector<1x64x64xbf16> to vector<64x64xbf16>
    %cst_63 = arith.constant dense<0.000000e+00> : vector<4x64xf32>
    %47 = tpu.matmul %44, %46, %cst_63 {dimension_numbers = #tpu.dot_dimension_numbers<[1], [0], [0], [1], [0, 0, 1, 1], [], []>} : vector<4x64xbf16>, vector<64x64xbf16>, vector<4x64xf32> -> vector<4x64xf32>
    %48 = arith.addf %42, %47 : vector<4x64xf32>
    %c0_64 = arith.constant 0 : index
    %c0_65 = arith.constant 0 : index
    %c0_66 = arith.constant 0 : index
    %c2_67 = arith.constant 2 : index
    %c0_68 = arith.constant 0 : index
    %49 = vector.load %arg4[%c0_64, %c0_65, %c0_66, %c2_67, %c0_68] : memref<1x1x1x6x64xbf16, #tpu.memory_space<vmem>>, vector<1x1x1x4x64xbf16>
    %50 = vector.shape_cast %49 : vector<1x1x1x4x64xbf16> to vector<4x64xbf16>
    %c8 = arith.constant 8 : index
    %c0_69 = arith.constant 0 : index
    %c0_70 = arith.constant 0 : index
    %51 = vector.load %arg5[%c8, %c0_69, %c0_70] : memref<9x64x64xbf16, #tpu.memory_space<vmem>>, vector<1x64x64xbf16>
    %52 = vector.shape_cast %51 : vector<1x64x64xbf16> to vector<64x64xbf16>
    %cst_71 = arith.constant dense<0.000000e+00> : vector<4x64xf32>
    %53 = tpu.matmul %50, %52, %cst_71 {dimension_numbers = #tpu.dot_dimension_numbers<[1], [0], [0], [1], [0, 0, 1, 1], [], []>} : vector<4x64xbf16>, vector<64x64xbf16>, vector<4x64xf32> -> vector<4x64xf32>
    %54 = arith.addf %48, %53 : vector<4x64xf32>
    %c0_72 = arith.constant 0 : index
    %c0_73 = arith.constant 0 : index
    %55 = vector.load %arg6[%c0_72, %c0_73] : memref<1x64xf32, #tpu.memory_space<vmem>>, vector<1x64xf32>
    %56 = vector.broadcast %55 : vector<1x64xf32> to vector<4x64xf32>
    %57 = arith.addf %54, %56 : vector<4x64xf32>
    %c0_74 = arith.constant 0 : index
    %c0_75 = arith.constant 0 : index
    %c0_76 = arith.constant 0 : index
    %c0_77 = arith.constant 0 : index
    %58 = vector.load %arg7[%c0_74, %c0_75, %c0_76, %c0_77] : memref<1x1x4x64xbf16, #tpu.memory_space<vmem>>, vector<1x1x4x64xbf16>
    %59 = vector.shape_cast %58 : vector<1x1x4x64xbf16> to vector<4x64xbf16>
    %60 = arith.extf %59 : vector<4x64xbf16> to vector<4x64xf32>
    %61 = arith.addf %57, %60 : vector<4x64xf32>
    %cst_78 = arith.constant 0.000000e+00 : f32
    %62 = vector.broadcast %cst_78 : f32 to vector<4x64xf32>
    %63 = arith.maximumf %61, %62 : vector<4x64xf32>
    %64 = arith.truncf %63 : vector<4x64xf32> to vector<4x64xbf16>
    %c0_79 = arith.constant 0 : index
    %c0_80 = arith.constant 0 : index
    %c0_81 = arith.constant 0 : index
    %c0_82 = arith.constant 0 : index
    %65 = vector.load %arg8[%c0_79, %c0_80, %c0_81, %c0_82] : memref<1x1x4x64xbf16, #tpu.memory_space<vmem>>, vector<1x1x4x64xbf16>
    %66 = vector.shape_cast %65 : vector<1x1x4x64xbf16> to vector<4x64xbf16>
    %67 = vector.shape_cast %64 : vector<4x64xbf16> to vector<1x1x4x64xbf16>
    tpu.vector_store %arg8[%c0_79, %c0_80, %c0_81, %c0_82], %67 {strides = array<i32>} : memref<1x1x4x64xbf16, #tpu.memory_space<vmem>>, vector<1x1x4x64xbf16>,
    return
  }
  func.func @transform_0(%arg0: i32, %arg1: i32) -> (i32, i32, i32, i32, i32) {
    %c1_i32 = arith.constant 1 : i32
    %0 = arith.muli %c1_i32, %arg1 : i32
    %c0_i32 = arith.constant 0 : i32
    %1 = arith.addi %0, %c0_i32 : i32
    %c0_i32_0 = arith.constant 0 : i32
    %c0_i32_1 = arith.constant 0 : i32
    %c0_i32_2 = arith.constant 0 : i32
    %c0_i32_3 = arith.constant 0 : i32
    return %arg0, %1, %c0_i32_0, %c0_i32_1, %c0_i32_2 : i32, i32, i32, i32, i32
  }
  func.func @transform_1(%arg0: i32, %arg1: i32) -> (i32, i32, i32, i32, i32) {
    %c1_i32 = arith.constant 1 : i32
    %0 = arith.muli %c1_i32, %arg1 : i32
    %c1_i32_0 = arith.constant 1 : i32
    %1 = arith.addi %0, %c1_i32_0 : i32
    %c0_i32 = arith.constant 0 : i32
    %c0_i32_1 = arith.constant 0 : i32
    %c0_i32_2 = arith.constant 0 : i32
    %c0_i32_3 = arith.constant 0 : i32
    return %arg0, %1, %c0_i32, %c0_i32_1, %c0_i32_2 : i32, i32, i32, i32, i32
  }
  func.func @transform_2(%arg0: i32, %arg1: i32) -> (i32, i32, i32, i32, i32) {
    %c1_i32 = arith.constant 1 : i32
    %0 = arith.muli %c1_i32, %arg1 : i32
    %c2_i32 = arith.constant 2 : i32
    %1 = arith.addi %0, %c2_i32 : i32
    %c0_i32 = arith.constant 0 : i32
    %c0_i32_0 = arith.constant 0 : i32
    %c0_i32_1 = arith.constant 0 : i32
    %c0_i32_2 = arith.constant 0 : i32
    return %arg0, %1, %c0_i32, %c0_i32_0, %c0_i32_1 : i32, i32, i32, i32, i32
  }
  func.func @transform_3(%arg0: i32, %arg1: i32) -> (i32, i32, i32) {
    %c0_i32 = arith.constant 0 : i32
    %c0_i32_0 = arith.constant 0 : i32
    %c0_i32_1 = arith.constant 0 : i32
    %c0_i32_2 = arith.constant 0 : i32
    return %c0_i32, %c0_i32_0, %c0_i32_1 : i32, i32, i32
  }
  func.func @transform_4(%arg0: i32, %arg1: i32) -> (i32, i32) {
    %c0_i32 = arith.constant 0 : i32
    %c0_i32_0 = arith.constant 0 : i32
    %c0_i32_1 = arith.constant 0 : i32
    return %c0_i32, %c0_i32_0 : i32, i32
  }
  func.func @transform_5(%arg0: i32, %arg1: i32) -> (i32, i32, i32, i32) {
    %c0_i32 = arith.constant 0 : i32
    %c0_i32_0 = arith.constant 0 : i32
    %c0_i32_1 = arith.constant 0 : i32
    return %arg0, %arg1, %c0_i32, %c0_i32_0 : i32, i32, i32, i32
  }
  func.func @transform_6(%arg0: i32, %arg1: i32) -> (i32, i32, i32, i32) {
    %c0_i32 = arith.constant 0 : i32
    %c0_i32_0 = arith.constant 0 : i32
    %c0_i32_1 = arith.constant 0 : i32
    return %arg0, %arg1, %c0_i32, %c0_i32_0 : i32, i32, i32, i32
  }
}

module attributes {stable_mosaic.version = 11 : i64} {
  func.func @_conv_kernel(%arg0: i32, %arg1: i32, %arg2: memref<1x1x2x2x64xbf16, #tpu.memory_space<vmem>>, %arg3: memref<1x64x128xbf16, #tpu.memory_space<vmem>>, %arg4: memref<1x128xf32, #tpu.memory_space<vmem>>, %arg5: memref<1x1x2x128xbf16, #tpu.memory_space<vmem>>) attributes {dimension_semantics = [#tpu.dimension_semantics<parallel>, #tpu.dimension_semantics<parallel>], iteration_bounds = array<i64: 2, 2>, scalar_prefetch = 0 : i64, scratch_operands = 0 : i64, tpu.core_type = #tpu.core_type<tc>, window_params = [{transform_indices = @transform_0, window_bounds = array<i64: 1, 1, 2, 2, 64>}, {pipeline_mode = #tpu.pipeline_mode<synchronous>, transform_indices = @transform_1, window_bounds = array<i64: 1, 64, 128>}, {pipeline_mode = #tpu.pipeline_mode<synchronous>, transform_indices = @transform_2, window_bounds = array<i64: 1, 128>}, {transform_indices = @transform_3, window_bounds = array<i64: 1, 1, 2, 128>}]} {
    %cst = arith.constant 0.000000e+00 : f32
    %0 = vector.broadcast %cst : f32 to vector<2x128xf32>
    %c0 = arith.constant 0 : index
    %c0_0 = arith.constant 0 : index
    %c0_1 = arith.constant 0 : index
    %c0_2 = arith.constant 0 : index
    %c0_3 = arith.constant 0 : index
    %1 = vector.load %arg2[%c0, %c0_0, %c0_1, %c0_2, %c0_3] : memref<1x1x2x2x64xbf16, #tpu.memory_space<vmem>>, vector<1x1x1x2x64xbf16>
    %2 = vector.shape_cast %1 : vector<1x1x1x2x64xbf16> to vector<2x64xbf16>
    %c0_4 = arith.constant 0 : index
    %c0_5 = arith.constant 0 : index
    %c0_6 = arith.constant 0 : index
    %3 = vector.load %arg3[%c0_4, %c0_5, %c0_6] : memref<1x64x128xbf16, #tpu.memory_space<vmem>>, vector<1x64x128xbf16>
    %4 = vector.shape_cast %3 : vector<1x64x128xbf16> to vector<64x128xbf16>
    %cst_7 = arith.constant dense<0.000000e+00> : vector<2x128xf32>
    %5 = tpu.matmul %2, %4, %cst_7 {dimension_numbers = #tpu.dot_dimension_numbers<[1], [0], [0], [1], [0, 0, 1, 1], [], []>} : vector<2x64xbf16>, vector<64x128xbf16>, vector<2x128xf32> -> vector<2x128xf32>
    %6 = arith.addf %0, %5 : vector<2x128xf32>
    %c0_8 = arith.constant 0 : index
    %c0_9 = arith.constant 0 : index
    %7 = vector.load %arg4[%c0_8, %c0_9] : memref<1x128xf32, #tpu.memory_space<vmem>>, vector<1x128xf32>
    %8 = vector.broadcast %7 : vector<1x128xf32> to vector<2x128xf32>
    %9 = arith.addf %6, %8 : vector<2x128xf32>
    %10 = arith.truncf %9 : vector<2x128xf32> to vector<2x128xbf16>
    %c0_10 = arith.constant 0 : index
    %c0_11 = arith.constant 0 : index
    %c0_12 = arith.constant 0 : index
    %c0_13 = arith.constant 0 : index
    %11 = vector.load %arg5[%c0_10, %c0_11, %c0_12, %c0_13] : memref<1x1x2x128xbf16, #tpu.memory_space<vmem>>, vector<1x1x2x128xbf16>
    %12 = vector.shape_cast %11 : vector<1x1x2x128xbf16> to vector<2x128xbf16>
    %13 = vector.shape_cast %10 : vector<2x128xbf16> to vector<1x1x2x128xbf16>
    tpu.vector_store %arg5[%c0_10, %c0_11, %c0_12, %c0_13], %13 {strides = array<i32>} : memref<1x1x2x128xbf16, #tpu.memory_space<vmem>>, vector<1x1x2x128xbf16>,
    return
  }
  func.func @transform_0(%arg0: i32, %arg1: i32) -> (i32, i32, i32, i32, i32) {
    %c2_i32 = arith.constant 2 : i32
    %0 = arith.muli %c2_i32, %arg1 : i32
    %c0_i32 = arith.constant 0 : i32
    %1 = arith.addi %0, %c0_i32 : i32
    %c0_i32_0 = arith.constant 0 : i32
    %c0_i32_1 = arith.constant 0 : i32
    %c0_i32_2 = arith.constant 0 : i32
    %c0_i32_3 = arith.constant 0 : i32
    return %arg0, %1, %c0_i32_0, %c0_i32_1, %c0_i32_2 : i32, i32, i32, i32, i32
  }
  func.func @transform_1(%arg0: i32, %arg1: i32) -> (i32, i32, i32) {
    %c0_i32 = arith.constant 0 : i32
    %c0_i32_0 = arith.constant 0 : i32
    %c0_i32_1 = arith.constant 0 : i32
    %c0_i32_2 = arith.constant 0 : i32
    return %c0_i32, %c0_i32_0, %c0_i32_1 : i32, i32, i32
  }
  func.func @transform_2(%arg0: i32, %arg1: i32) -> (i32, i32) {
    %c0_i32 = arith.constant 0 : i32
    %c0_i32_0 = arith.constant 0 : i32
    %c0_i32_1 = arith.constant 0 : i32
    return %c0_i32, %c0_i32_0 : i32, i32
  }
  func.func @transform_3(%arg0: i32, %arg1: i32) -> (i32, i32, i32, i32) {
    %c0_i32 = arith.constant 0 : i32
    %c0_i32_0 = arith.constant 0 : i32
    %c0_i32_1 = arith.constant 0 : i32
    return %arg0, %arg1, %c0_i32, %c0_i32_0 : i32, i32, i32, i32
  }
}

module attributes {stable_mosaic.version = 11 : i64} {
  func.func @_conv_kernel(%arg0: i32, %arg1: i32, %arg2: memref<1x1x2x3x64xbf16, #tpu.memory_space<vmem>>, %arg3: memref<1x1x2x3x64xbf16, #tpu.memory_space<vmem>>, %arg4: memref<1x1x2x3x64xbf16, #tpu.memory_space<vmem>>, %arg5: memref<9x64x128xbf16, #tpu.memory_space<vmem>>, %arg6: memref<1x128xf32, #tpu.memory_space<vmem>>, %arg7: memref<1x1x2x128xbf16, #tpu.memory_space<vmem>>) attributes {dimension_semantics = [#tpu.dimension_semantics<parallel>, #tpu.dimension_semantics<parallel>], iteration_bounds = array<i64: 2, 2>, scalar_prefetch = 0 : i64, scratch_operands = 0 : i64, tpu.core_type = #tpu.core_type<tc>, window_params = [{transform_indices = @transform_0, window_bounds = array<i64: 1, 1, 2, 3, 64>}, {transform_indices = @transform_1, window_bounds = array<i64: 1, 1, 2, 3, 64>}, {transform_indices = @transform_2, window_bounds = array<i64: 1, 1, 2, 3, 64>}, {pipeline_mode = #tpu.pipeline_mode<synchronous>, transform_indices = @transform_3, window_bounds = array<i64: 9, 64, 128>}, {pipeline_mode = #tpu.pipeline_mode<synchronous>, transform_indices = @transform_4, window_bounds = array<i64: 1, 128>}, {transform_indices = @transform_5, window_bounds = array<i64: 1, 1, 2, 128>}]} {
    %cst = arith.constant 0.000000e+00 : f32
    %0 = vector.broadcast %cst : f32 to vector<2x128xf32>
    %c0 = arith.constant 0 : index
    %c0_0 = arith.constant 0 : index
    %c0_1 = arith.constant 0 : index
    %c0_2 = arith.constant 0 : index
    %c0_3 = arith.constant 0 : index
    %1 = vector.load %arg2[%c0, %c0_0, %c0_1, %c0_2, %c0_3] : memref<1x1x2x3x64xbf16, #tpu.memory_space<vmem>>, vector<1x1x1x2x64xbf16>
    %2 = vector.shape_cast %1 : vector<1x1x1x2x64xbf16> to vector<2x64xbf16>
    %c0_4 = arith.constant 0 : index
    %c0_5 = arith.constant 0 : index
    %c0_6 = arith.constant 0 : index
    %3 = vector.load %arg5[%c0_4, %c0_5, %c0_6] : memref<9x64x128xbf16, #tpu.memory_space<vmem>>, vector<1x64x128xbf16>
    %4 = vector.shape_cast %3 : vector<1x64x128xbf16> to vector<64x128xbf16>
    %cst_7 = arith.constant dense<0.000000e+00> : vector<2x128xf32>
    %5 = tpu.matmul %2, %4, %cst_7 {dimension_numbers = #tpu.dot_dimension_numbers<[1], [0], [0], [1], [0, 0, 1, 1], [], []>} : vector<2x64xbf16>, vector<64x128xbf16>, vector<2x128xf32> -> vector<2x128xf32>
    %6 = arith.addf %0, %5 : vector<2x128xf32>
    %c0_8 = arith.constant 0 : index
    %c0_9 = arith.constant 0 : index
    %c1 = arith.constant 1 : index
    %c0_10 = arith.constant 0 : index
    %c0_11 = arith.constant 0 : index
    %7 = vector.load %arg2[%c0_8, %c0_9, %c1, %c0_10, %c0_11] : memref<1x1x2x3x64xbf16, #tpu.memory_space<vmem>>, vector<1x1x1x2x64xbf16>
    %8 = vector.shape_cast %7 : vector<1x1x1x2x64xbf16> to vector<2x64xbf16>
    %c1_12 = arith.constant 1 : index
    %c0_13 = arith.constant 0 : index
    %c0_14 = arith.constant 0 : index
    %9 = vector.load %arg5[%c1_12, %c0_13, %c0_14] : memref<9x64x128xbf16, #tpu.memory_space<vmem>>, vector<1x64x128xbf16>
    %10 = vector.shape_cast %9 : vector<1x64x128xbf16> to vector<64x128xbf16>
    %cst_15 = arith.constant dense<0.000000e+00> : vector<2x128xf32>
    %11 = tpu.matmul %8, %10, %cst_15 {dimension_numbers = #tpu.dot_dimension_numbers<[1], [0], [0], [1], [0, 0, 1, 1], [], []>} : vector<2x64xbf16>, vector<64x128xbf16>, vector<2x128xf32> -> vector<2x128xf32>
    %12 = arith.addf %6, %11 : vector<2x128xf32>
    %c0_16 = arith.constant 0 : index
    %c0_17 = arith.constant 0 : index
    %c0_18 = arith.constant 0 : index
    %c1_19 = arith.constant 1 : index
    %c0_20 = arith.constant 0 : index
    %13 = vector.load %arg2[%c0_16, %c0_17, %c0_18, %c1_19, %c0_20] : memref<1x1x2x3x64xbf16, #tpu.memory_space<vmem>>, vector<1x1x1x2x64xbf16>
    %14 = vector.shape_cast %13 : vector<1x1x1x2x64xbf16> to vector<2x64xbf16>
    %c2 = arith.constant 2 : index
    %c0_21 = arith.constant 0 : index
    %c0_22 = arith.constant 0 : index
    %15 = vector.load %arg5[%c2, %c0_21, %c0_22] : memref<9x64x128xbf16, #tpu.memory_space<vmem>>, vector<1x64x128xbf16>
    %16 = vector.shape_cast %15 : vector<1x64x128xbf16> to vector<64x128xbf16>
    %cst_23 = arith.constant dense<0.000000e+00> : vector<2x128xf32>
    %17 = tpu.matmul %14, %16, %cst_23 {dimension_numbers = #tpu.dot_dimension_numbers<[1], [0], [0], [1], [0, 0, 1, 1], [], []>} : vector<2x64xbf16>, vector<64x128xbf16>, vector<2x128xf32> -> vector<2x128xf32>
    %18 = arith.addf %12, %17 : vector<2x128xf32>
    %c0_24 = arith.constant 0 : index
    %c0_25 = arith.constant 0 : index
    %c0_26 = arith.constant 0 : index
    %c0_27 = arith.constant 0 : index
    %c0_28 = arith.constant 0 : index
    %19 = vector.load %arg3[%c0_24, %c0_25, %c0_26, %c0_27, %c0_28] : memref<1x1x2x3x64xbf16, #tpu.memory_space<vmem>>, vector<1x1x1x2x64xbf16>
    %20 = vector.shape_cast %19 : vector<1x1x1x2x64xbf16> to vector<2x64xbf16>
    %c3 = arith.constant 3 : index
    %c0_29 = arith.constant 0 : index
    %c0_30 = arith.constant 0 : index
    %21 = vector.load %arg5[%c3, %c0_29, %c0_30] : memref<9x64x128xbf16, #tpu.memory_space<vmem>>, vector<1x64x128xbf16>
    %22 = vector.shape_cast %21 : vector<1x64x128xbf16> to vector<64x128xbf16>
    %cst_31 = arith.constant dense<0.000000e+00> : vector<2x128xf32>
    %23 = tpu.matmul %20, %22, %cst_31 {dimension_numbers = #tpu.dot_dimension_numbers<[1], [0], [0], [1], [0, 0, 1, 1], [], []>} : vector<2x64xbf16>, vector<64x128xbf16>, vector<2x128xf32> -> vector<2x128xf32>
    %24 = arith.addf %18, %23 : vector<2x128xf32>
    %c0_32 = arith.constant 0 : index
    %c0_33 = arith.constant 0 : index
    %c1_34 = arith.constant 1 : index
    %c0_35 = arith.constant 0 : index
    %c0_36 = arith.constant 0 : index
    %25 = vector.load %arg3[%c0_32, %c0_33, %c1_34, %c0_35, %c0_36] : memref<1x1x2x3x64xbf16, #tpu.memory_space<vmem>>, vector<1x1x1x2x64xbf16>
    %26 = vector.shape_cast %25 : vector<1x1x1x2x64xbf16> to vector<2x64xbf16>
    %c4 = arith.constant 4 : index
    %c0_37 = arith.constant 0 : index
    %c0_38 = arith.constant 0 : index
    %27 = vector.load %arg5[%c4, %c0_37, %c0_38] : memref<9x64x128xbf16, #tpu.memory_space<vmem>>, vector<1x64x128xbf16>
    %28 = vector.shape_cast %27 : vector<1x64x128xbf16> to vector<64x128xbf16>
    %cst_39 = arith.constant dense<0.000000e+00> : vector<2x128xf32>
    %29 = tpu.matmul %26, %28, %cst_39 {dimension_numbers = #tpu.dot_dimension_numbers<[1], [0], [0], [1], [0, 0, 1, 1], [], []>} : vector<2x64xbf16>, vector<64x128xbf16>, vector<2x128xf32> -> vector<2x128xf32>
    %30 = arith.addf %24, %29 : vector<2x128xf32>
    %c0_40 = arith.constant 0 : index
    %c0_41 = arith.constant 0 : index
    %c0_42 = arith.constant 0 : index
    %c1_43 = arith.constant 1 : index
    %c0_44 = arith.constant 0 : index
    %31 = vector.load %arg3[%c0_40, %c0_41, %c0_42, %c1_43, %c0_44] : memref<1x1x2x3x64xbf16, #tpu.memory_space<vmem>>, vector<1x1x1x2x64xbf16>
    %32 = vector.shape_cast %31 : vector<1x1x1x2x64xbf16> to vector<2x64xbf16>
    %c5 = arith.constant 5 : index
    %c0_45 = arith.constant 0 : index
    %c0_46 = arith.constant 0 : index
    %33 = vector.load %arg5[%c5, %c0_45, %c0_46] : memref<9x64x128xbf16, #tpu.memory_space<vmem>>, vector<1x64x128xbf16>
    %34 = vector.shape_cast %33 : vector<1x64x128xbf16> to vector<64x128xbf16>
    %cst_47 = arith.constant dense<0.000000e+00> : vector<2x128xf32>
    %35 = tpu.matmul %32, %34, %cst_47 {dimension_numbers = #tpu.dot_dimension_numbers<[1], [0], [0], [1], [0, 0, 1, 1], [], []>} : vector<2x64xbf16>, vector<64x128xbf16>, vector<2x128xf32> -> vector<2x128xf32>
    %36 = arith.addf %30, %35 : vector<2x128xf32>
    %c0_48 = arith.constant 0 : index
    %c0_49 = arith.constant 0 : index
    %c0_50 = arith.constant 0 : index
    %c0_51 = arith.constant 0 : index
    %c0_52 = arith.constant 0 : index
    %37 = vector.load %arg4[%c0_48, %c0_49, %c0_50, %c0_51, %c0_52] : memref<1x1x2x3x64xbf16, #tpu.memory_space<vmem>>, vector<1x1x1x2x64xbf16>
    %38 = vector.shape_cast %37 : vector<1x1x1x2x64xbf16> to vector<2x64xbf16>
    %c6 = arith.constant 6 : index
    %c0_53 = arith.constant 0 : index
    %c0_54 = arith.constant 0 : index
    %39 = vector.load %arg5[%c6, %c0_53, %c0_54] : memref<9x64x128xbf16, #tpu.memory_space<vmem>>, vector<1x64x128xbf16>
    %40 = vector.shape_cast %39 : vector<1x64x128xbf16> to vector<64x128xbf16>
    %cst_55 = arith.constant dense<0.000000e+00> : vector<2x128xf32>
    %41 = tpu.matmul %38, %40, %cst_55 {dimension_numbers = #tpu.dot_dimension_numbers<[1], [0], [0], [1], [0, 0, 1, 1], [], []>} : vector<2x64xbf16>, vector<64x128xbf16>, vector<2x128xf32> -> vector<2x128xf32>
    %42 = arith.addf %36, %41 : vector<2x128xf32>
    %c0_56 = arith.constant 0 : index
    %c0_57 = arith.constant 0 : index
    %c1_58 = arith.constant 1 : index
    %c0_59 = arith.constant 0 : index
    %c0_60 = arith.constant 0 : index
    %43 = vector.load %arg4[%c0_56, %c0_57, %c1_58, %c0_59, %c0_60] : memref<1x1x2x3x64xbf16, #tpu.memory_space<vmem>>, vector<1x1x1x2x64xbf16>
    %44 = vector.shape_cast %43 : vector<1x1x1x2x64xbf16> to vector<2x64xbf16>
    %c7 = arith.constant 7 : index
    %c0_61 = arith.constant 0 : index
    %c0_62 = arith.constant 0 : index
    %45 = vector.load %arg5[%c7, %c0_61, %c0_62] : memref<9x64x128xbf16, #tpu.memory_space<vmem>>, vector<1x64x128xbf16>
    %46 = vector.shape_cast %45 : vector<1x64x128xbf16> to vector<64x128xbf16>
    %cst_63 = arith.constant dense<0.000000e+00> : vector<2x128xf32>
    %47 = tpu.matmul %44, %46, %cst_63 {dimension_numbers = #tpu.dot_dimension_numbers<[1], [0], [0], [1], [0, 0, 1, 1], [], []>} : vector<2x64xbf16>, vector<64x128xbf16>, vector<2x128xf32> -> vector<2x128xf32>
    %48 = arith.addf %42, %47 : vector<2x128xf32>
    %c0_64 = arith.constant 0 : index
    %c0_65 = arith.constant 0 : index
    %c0_66 = arith.constant 0 : index
    %c1_67 = arith.constant 1 : index
    %c0_68 = arith.constant 0 : index
    %49 = vector.load %arg4[%c0_64, %c0_65, %c0_66, %c1_67, %c0_68] : memref<1x1x2x3x64xbf16, #tpu.memory_space<vmem>>, vector<1x1x1x2x64xbf16>
    %50 = vector.shape_cast %49 : vector<1x1x1x2x64xbf16> to vector<2x64xbf16>
    %c8 = arith.constant 8 : index
    %c0_69 = arith.constant 0 : index
    %c0_70 = arith.constant 0 : index
    %51 = vector.load %arg5[%c8, %c0_69, %c0_70] : memref<9x64x128xbf16, #tpu.memory_space<vmem>>, vector<1x64x128xbf16>
    %52 = vector.shape_cast %51 : vector<1x64x128xbf16> to vector<64x128xbf16>
    %cst_71 = arith.constant dense<0.000000e+00> : vector<2x128xf32>
    %53 = tpu.matmul %50, %52, %cst_71 {dimension_numbers = #tpu.dot_dimension_numbers<[1], [0], [0], [1], [0, 0, 1, 1], [], []>} : vector<2x64xbf16>, vector<64x128xbf16>, vector<2x128xf32> -> vector<2x128xf32>
    %54 = arith.addf %48, %53 : vector<2x128xf32>
    %c0_72 = arith.constant 0 : index
    %c0_73 = arith.constant 0 : index
    %55 = vector.load %arg6[%c0_72, %c0_73] : memref<1x128xf32, #tpu.memory_space<vmem>>, vector<1x128xf32>
    %56 = vector.broadcast %55 : vector<1x128xf32> to vector<2x128xf32>
    %57 = arith.addf %54, %56 : vector<2x128xf32>
    %cst_74 = arith.constant 0.000000e+00 : f32
    %58 = vector.broadcast %cst_74 : f32 to vector<2x128xf32>
    %59 = arith.maximumf %57, %58 : vector<2x128xf32>
    %60 = arith.truncf %59 : vector<2x128xf32> to vector<2x128xbf16>
    %c0_75 = arith.constant 0 : index
    %c0_76 = arith.constant 0 : index
    %c0_77 = arith.constant 0 : index
    %c0_78 = arith.constant 0 : index
    %61 = vector.load %arg7[%c0_75, %c0_76, %c0_77, %c0_78] : memref<1x1x2x128xbf16, #tpu.memory_space<vmem>>, vector<1x1x2x128xbf16>
    %62 = vector.shape_cast %61 : vector<1x1x2x128xbf16> to vector<2x128xbf16>
    %63 = vector.shape_cast %60 : vector<2x128xbf16> to vector<1x1x2x128xbf16>
    tpu.vector_store %arg7[%c0_75, %c0_76, %c0_77, %c0_78], %63 {strides = array<i32>} : memref<1x1x2x128xbf16, #tpu.memory_space<vmem>>, vector<1x1x2x128xbf16>,
    return
  }
  func.func @transform_0(%arg0: i32, %arg1: i32) -> (i32, i32, i32, i32, i32) {
    %c2_i32 = arith.constant 2 : i32
    %0 = arith.muli %c2_i32, %arg1 : i32
    %c0_i32 = arith.constant 0 : i32
    %1 = arith.addi %0, %c0_i32 : i32
    %c0_i32_0 = arith.constant 0 : i32
    %c0_i32_1 = arith.constant 0 : i32
    %c0_i32_2 = arith.constant 0 : i32
    %c0_i32_3 = arith.constant 0 : i32
    return %arg0, %1, %c0_i32_0, %c0_i32_1, %c0_i32_2 : i32, i32, i32, i32, i32
  }
  func.func @transform_1(%arg0: i32, %arg1: i32) -> (i32, i32, i32, i32, i32) {
    %c2_i32 = arith.constant 2 : i32
    %0 = arith.muli %c2_i32, %arg1 : i32
    %c1_i32 = arith.constant 1 : i32
    %1 = arith.addi %0, %c1_i32 : i32
    %c0_i32 = arith.constant 0 : i32
    %c0_i32_0 = arith.constant 0 : i32
    %c0_i32_1 = arith.constant 0 : i32
    %c0_i32_2 = arith.constant 0 : i32
    return %arg0, %1, %c0_i32, %c0_i32_0, %c0_i32_1 : i32, i32, i32, i32, i32
  }
  func.func @transform_2(%arg0: i32, %arg1: i32) -> (i32, i32, i32, i32, i32) {
    %c2_i32 = arith.constant 2 : i32
    %0 = arith.muli %c2_i32, %arg1 : i32
    %c2_i32_0 = arith.constant 2 : i32
    %1 = arith.addi %0, %c2_i32_0 : i32
    %c0_i32 = arith.constant 0 : i32
    %c0_i32_1 = arith.constant 0 : i32
    %c0_i32_2 = arith.constant 0 : i32
    %c0_i32_3 = arith.constant 0 : i32
    return %arg0, %1, %c0_i32, %c0_i32_1, %c0_i32_2 : i32, i32, i32, i32, i32
  }
  func.func @transform_3(%arg0: i32, %arg1: i32) -> (i32, i32, i32) {
    %c0_i32 = arith.constant 0 : i32
    %c0_i32_0 = arith.constant 0 : i32
    %c0_i32_1 = arith.constant 0 : i32
    %c0_i32_2 = arith.constant 0 : i32
    return %c0_i32, %c0_i32_0, %c0_i32_1 : i32, i32, i32
  }
  func.func @transform_4(%arg0: i32, %arg1: i32) -> (i32, i32) {
    %c0_i32 = arith.constant 0 : i32
    %c0_i32_0 = arith.constant 0 : i32
    %c0_i32_1 = arith.constant 0 : i32
    return %c0_i32, %c0_i32_0 : i32, i32
  }
  func.func @transform_5(%arg0: i32, %arg1: i32) -> (i32, i32, i32, i32) {
    %c0_i32 = arith.constant 0 : i32
    %c0_i32_0 = arith.constant 0 : i32
    %c0_i32_1 = arith.constant 0 : i32
    return %arg0, %arg1, %c0_i32, %c0_i32_0 : i32, i32, i32, i32
  }
}

module attributes {stable_mosaic.version = 11 : i64} {
  func.func @_conv_kernel(%arg0: i32, %arg1: i32, %arg2: memref<1x1x1x4x128xbf16, #tpu.memory_space<vmem>>, %arg3: memref<1x1x1x4x128xbf16, #tpu.memory_space<vmem>>, %arg4: memref<1x1x1x4x128xbf16, #tpu.memory_space<vmem>>, %arg5: memref<9x128x128xbf16, #tpu.memory_space<vmem>>, %arg6: memref<1x128xf32, #tpu.memory_space<vmem>>, %arg7: memref<1x1x2x128xbf16, #tpu.memory_space<vmem>>, %arg8: memref<1x1x2x128xbf16, #tpu.memory_space<vmem>>) attributes {dimension_semantics = [#tpu.dimension_semantics<parallel>, #tpu.dimension_semantics<parallel>], iteration_bounds = array<i64: 2, 2>, scalar_prefetch = 0 : i64, scratch_operands = 0 : i64, tpu.core_type = #tpu.core_type<tc>, window_params = [{transform_indices = @transform_0, window_bounds = array<i64: 1, 1, 1, 4, 128>}, {transform_indices = @transform_1, window_bounds = array<i64: 1, 1, 1, 4, 128>}, {transform_indices = @transform_2, window_bounds = array<i64: 1, 1, 1, 4, 128>}, {pipeline_mode = #tpu.pipeline_mode<synchronous>, transform_indices = @transform_3, window_bounds = array<i64: 9, 128, 128>}, {pipeline_mode = #tpu.pipeline_mode<synchronous>, transform_indices = @transform_4, window_bounds = array<i64: 1, 128>}, {transform_indices = @transform_5, window_bounds = array<i64: 1, 1, 2, 128>}, {transform_indices = @transform_6, window_bounds = array<i64: 1, 1, 2, 128>}]} {
    %cst = arith.constant 0.000000e+00 : f32
    %0 = vector.broadcast %cst : f32 to vector<2x128xf32>
    %c0 = arith.constant 0 : index
    %c0_0 = arith.constant 0 : index
    %c0_1 = arith.constant 0 : index
    %c0_2 = arith.constant 0 : index
    %c0_3 = arith.constant 0 : index
    %1 = vector.load %arg2[%c0, %c0_0, %c0_1, %c0_2, %c0_3] : memref<1x1x1x4x128xbf16, #tpu.memory_space<vmem>>, vector<1x1x1x2x128xbf16>
    %2 = vector.shape_cast %1 : vector<1x1x1x2x128xbf16> to vector<2x128xbf16>
    %c0_4 = arith.constant 0 : index
    %c0_5 = arith.constant 0 : index
    %c0_6 = arith.constant 0 : index
    %3 = vector.load %arg5[%c0_4, %c0_5, %c0_6] : memref<9x128x128xbf16, #tpu.memory_space<vmem>>, vector<1x128x128xbf16>
    %4 = vector.shape_cast %3 : vector<1x128x128xbf16> to vector<128x128xbf16>
    %cst_7 = arith.constant dense<0.000000e+00> : vector<2x128xf32>
    %5 = tpu.matmul %2, %4, %cst_7 {dimension_numbers = #tpu.dot_dimension_numbers<[1], [0], [0], [1], [0, 0, 1, 1], [], []>} : vector<2x128xbf16>, vector<128x128xbf16>, vector<2x128xf32> -> vector<2x128xf32>
    %6 = arith.addf %0, %5 : vector<2x128xf32>
    %c0_8 = arith.constant 0 : index
    %c0_9 = arith.constant 0 : index
    %c0_10 = arith.constant 0 : index
    %c1 = arith.constant 1 : index
    %c0_11 = arith.constant 0 : index
    %7 = vector.load %arg2[%c0_8, %c0_9, %c0_10, %c1, %c0_11] : memref<1x1x1x4x128xbf16, #tpu.memory_space<vmem>>, vector<1x1x1x2x128xbf16>
    %8 = vector.shape_cast %7 : vector<1x1x1x2x128xbf16> to vector<2x128xbf16>
    %c1_12 = arith.constant 1 : index
    %c0_13 = arith.constant 0 : index
    %c0_14 = arith.constant 0 : index
    %9 = vector.load %arg5[%c1_12, %c0_13, %c0_14] : memref<9x128x128xbf16, #tpu.memory_space<vmem>>, vector<1x128x128xbf16>
    %10 = vector.shape_cast %9 : vector<1x128x128xbf16> to vector<128x128xbf16>
    %cst_15 = arith.constant dense<0.000000e+00> : vector<2x128xf32>
    %11 = tpu.matmul %8, %10, %cst_15 {dimension_numbers = #tpu.dot_dimension_numbers<[1], [0], [0], [1], [0, 0, 1, 1], [], []>} : vector<2x128xbf16>, vector<128x128xbf16>, vector<2x128xf32> -> vector<2x128xf32>
    %12 = arith.addf %6, %11 : vector<2x128xf32>
    %c0_16 = arith.constant 0 : index
    %c0_17 = arith.constant 0 : index
    %c0_18 = arith.constant 0 : index
    %c2 = arith.constant 2 : index
    %c0_19 = arith.constant 0 : index
    %13 = vector.load %arg2[%c0_16, %c0_17, %c0_18, %c2, %c0_19] : memref<1x1x1x4x128xbf16, #tpu.memory_space<vmem>>, vector<1x1x1x2x128xbf16>
    %14 = vector.shape_cast %13 : vector<1x1x1x2x128xbf16> to vector<2x128xbf16>
    %c2_20 = arith.constant 2 : index
    %c0_21 = arith.constant 0 : index
    %c0_22 = arith.constant 0 : index
    %15 = vector.load %arg5[%c2_20, %c0_21, %c0_22] : memref<9x128x128xbf16, #tpu.memory_space<vmem>>, vector<1x128x128xbf16>
    %16 = vector.shape_cast %15 : vector<1x128x128xbf16> to vector<128x128xbf16>
    %cst_23 = arith.constant dense<0.000000e+00> : vector<2x128xf32>
    %17 = tpu.matmul %14, %16, %cst_23 {dimension_numbers = #tpu.dot_dimension_numbers<[1], [0], [0], [1], [0, 0, 1, 1], [], []>} : vector<2x128xbf16>, vector<128x128xbf16>, vector<2x128xf32> -> vector<2x128xf32>
    %18 = arith.addf %12, %17 : vector<2x128xf32>
    %c0_24 = arith.constant 0 : index
    %c0_25 = arith.constant 0 : index
    %c0_26 = arith.constant 0 : index
    %c0_27 = arith.constant 0 : index
    %c0_28 = arith.constant 0 : index
    %19 = vector.load %arg3[%c0_24, %c0_25, %c0_26, %c0_27, %c0_28] : memref<1x1x1x4x128xbf16, #tpu.memory_space<vmem>>, vector<1x1x1x2x128xbf16>
    %20 = vector.shape_cast %19 : vector<1x1x1x2x128xbf16> to vector<2x128xbf16>
    %c3 = arith.constant 3 : index
    %c0_29 = arith.constant 0 : index
    %c0_30 = arith.constant 0 : index
    %21 = vector.load %arg5[%c3, %c0_29, %c0_30] : memref<9x128x128xbf16, #tpu.memory_space<vmem>>, vector<1x128x128xbf16>
    %22 = vector.shape_cast %21 : vector<1x128x128xbf16> to vector<128x128xbf16>
    %cst_31 = arith.constant dense<0.000000e+00> : vector<2x128xf32>
    %23 = tpu.matmul %20, %22, %cst_31 {dimension_numbers = #tpu.dot_dimension_numbers<[1], [0], [0], [1], [0, 0, 1, 1], [], []>} : vector<2x128xbf16>, vector<128x128xbf16>, vector<2x128xf32> -> vector<2x128xf32>
    %24 = arith.addf %18, %23 : vector<2x128xf32>
    %c0_32 = arith.constant 0 : index
    %c0_33 = arith.constant 0 : index
    %c0_34 = arith.constant 0 : index
    %c1_35 = arith.constant 1 : index
    %c0_36 = arith.constant 0 : index
    %25 = vector.load %arg3[%c0_32, %c0_33, %c0_34, %c1_35, %c0_36] : memref<1x1x1x4x128xbf16, #tpu.memory_space<vmem>>, vector<1x1x1x2x128xbf16>
    %26 = vector.shape_cast %25 : vector<1x1x1x2x128xbf16> to vector<2x128xbf16>
    %c4 = arith.constant 4 : index
    %c0_37 = arith.constant 0 : index
    %c0_38 = arith.constant 0 : index
    %27 = vector.load %arg5[%c4, %c0_37, %c0_38] : memref<9x128x128xbf16, #tpu.memory_space<vmem>>, vector<1x128x128xbf16>
    %28 = vector.shape_cast %27 : vector<1x128x128xbf16> to vector<128x128xbf16>
    %cst_39 = arith.constant dense<0.000000e+00> : vector<2x128xf32>
    %29 = tpu.matmul %26, %28, %cst_39 {dimension_numbers = #tpu.dot_dimension_numbers<[1], [0], [0], [1], [0, 0, 1, 1], [], []>} : vector<2x128xbf16>, vector<128x128xbf16>, vector<2x128xf32> -> vector<2x128xf32>
    %30 = arith.addf %24, %29 : vector<2x128xf32>
    %c0_40 = arith.constant 0 : index
    %c0_41 = arith.constant 0 : index
    %c0_42 = arith.constant 0 : index
    %c2_43 = arith.constant 2 : index
    %c0_44 = arith.constant 0 : index
    %31 = vector.load %arg3[%c0_40, %c0_41, %c0_42, %c2_43, %c0_44] : memref<1x1x1x4x128xbf16, #tpu.memory_space<vmem>>, vector<1x1x1x2x128xbf16>
    %32 = vector.shape_cast %31 : vector<1x1x1x2x128xbf16> to vector<2x128xbf16>
    %c5 = arith.constant 5 : index
    %c0_45 = arith.constant 0 : index
    %c0_46 = arith.constant 0 : index
    %33 = vector.load %arg5[%c5, %c0_45, %c0_46] : memref<9x128x128xbf16, #tpu.memory_space<vmem>>, vector<1x128x128xbf16>
    %34 = vector.shape_cast %33 : vector<1x128x128xbf16> to vector<128x128xbf16>
    %cst_47 = arith.constant dense<0.000000e+00> : vector<2x128xf32>
    %35 = tpu.matmul %32, %34, %cst_47 {dimension_numbers = #tpu.dot_dimension_numbers<[1], [0], [0], [1], [0, 0, 1, 1], [], []>} : vector<2x128xbf16>, vector<128x128xbf16>, vector<2x128xf32> -> vector<2x128xf32>
    %36 = arith.addf %30, %35 : vector<2x128xf32>
    %c0_48 = arith.constant 0 : index
    %c0_49 = arith.constant 0 : index
    %c0_50 = arith.constant 0 : index
    %c0_51 = arith.constant 0 : index
    %c0_52 = arith.constant 0 : index
    %37 = vector.load %arg4[%c0_48, %c0_49, %c0_50, %c0_51, %c0_52] : memref<1x1x1x4x128xbf16, #tpu.memory_space<vmem>>, vector<1x1x1x2x128xbf16>
    %38 = vector.shape_cast %37 : vector<1x1x1x2x128xbf16> to vector<2x128xbf16>
    %c6 = arith.constant 6 : index
    %c0_53 = arith.constant 0 : index
    %c0_54 = arith.constant 0 : index
    %39 = vector.load %arg5[%c6, %c0_53, %c0_54] : memref<9x128x128xbf16, #tpu.memory_space<vmem>>, vector<1x128x128xbf16>
    %40 = vector.shape_cast %39 : vector<1x128x128xbf16> to vector<128x128xbf16>
    %cst_55 = arith.constant dense<0.000000e+00> : vector<2x128xf32>
    %41 = tpu.matmul %38, %40, %cst_55 {dimension_numbers = #tpu.dot_dimension_numbers<[1], [0], [0], [1], [0, 0, 1, 1], [], []>} : vector<2x128xbf16>, vector<128x128xbf16>, vector<2x128xf32> -> vector<2x128xf32>
    %42 = arith.addf %36, %41 : vector<2x128xf32>
    %c0_56 = arith.constant 0 : index
    %c0_57 = arith.constant 0 : index
    %c0_58 = arith.constant 0 : index
    %c1_59 = arith.constant 1 : index
    %c0_60 = arith.constant 0 : index
    %43 = vector.load %arg4[%c0_56, %c0_57, %c0_58, %c1_59, %c0_60] : memref<1x1x1x4x128xbf16, #tpu.memory_space<vmem>>, vector<1x1x1x2x128xbf16>
    %44 = vector.shape_cast %43 : vector<1x1x1x2x128xbf16> to vector<2x128xbf16>
    %c7 = arith.constant 7 : index
    %c0_61 = arith.constant 0 : index
    %c0_62 = arith.constant 0 : index
    %45 = vector.load %arg5[%c7, %c0_61, %c0_62] : memref<9x128x128xbf16, #tpu.memory_space<vmem>>, vector<1x128x128xbf16>
    %46 = vector.shape_cast %45 : vector<1x128x128xbf16> to vector<128x128xbf16>
    %cst_63 = arith.constant dense<0.000000e+00> : vector<2x128xf32>
    %47 = tpu.matmul %44, %46, %cst_63 {dimension_numbers = #tpu.dot_dimension_numbers<[1], [0], [0], [1], [0, 0, 1, 1], [], []>} : vector<2x128xbf16>, vector<128x128xbf16>, vector<2x128xf32> -> vector<2x128xf32>
    %48 = arith.addf %42, %47 : vector<2x128xf32>
    %c0_64 = arith.constant 0 : index
    %c0_65 = arith.constant 0 : index
    %c0_66 = arith.constant 0 : index
    %c2_67 = arith.constant 2 : index
    %c0_68 = arith.constant 0 : index
    %49 = vector.load %arg4[%c0_64, %c0_65, %c0_66, %c2_67, %c0_68] : memref<1x1x1x4x128xbf16, #tpu.memory_space<vmem>>, vector<1x1x1x2x128xbf16>
    %50 = vector.shape_cast %49 : vector<1x1x1x2x128xbf16> to vector<2x128xbf16>
    %c8 = arith.constant 8 : index
    %c0_69 = arith.constant 0 : index
    %c0_70 = arith.constant 0 : index
    %51 = vector.load %arg5[%c8, %c0_69, %c0_70] : memref<9x128x128xbf16, #tpu.memory_space<vmem>>, vector<1x128x128xbf16>
    %52 = vector.shape_cast %51 : vector<1x128x128xbf16> to vector<128x128xbf16>
    %cst_71 = arith.constant dense<0.000000e+00> : vector<2x128xf32>
    %53 = tpu.matmul %50, %52, %cst_71 {dimension_numbers = #tpu.dot_dimension_numbers<[1], [0], [0], [1], [0, 0, 1, 1], [], []>} : vector<2x128xbf16>, vector<128x128xbf16>, vector<2x128xf32> -> vector<2x128xf32>
    %54 = arith.addf %48, %53 : vector<2x128xf32>
    %c0_72 = arith.constant 0 : index
    %c0_73 = arith.constant 0 : index
    %55 = vector.load %arg6[%c0_72, %c0_73] : memref<1x128xf32, #tpu.memory_space<vmem>>, vector<1x128xf32>
    %56 = vector.broadcast %55 : vector<1x128xf32> to vector<2x128xf32>
    %57 = arith.addf %54, %56 : vector<2x128xf32>
    %c0_74 = arith.constant 0 : index
    %c0_75 = arith.constant 0 : index
    %c0_76 = arith.constant 0 : index
    %c0_77 = arith.constant 0 : index
    %58 = vector.load %arg7[%c0_74, %c0_75, %c0_76, %c0_77] : memref<1x1x2x128xbf16, #tpu.memory_space<vmem>>, vector<1x1x2x128xbf16>
    %59 = vector.shape_cast %58 : vector<1x1x2x128xbf16> to vector<2x128xbf16>
    %60 = arith.extf %59 : vector<2x128xbf16> to vector<2x128xf32>
    %61 = arith.addf %57, %60 : vector<2x128xf32>
    %cst_78 = arith.constant 0.000000e+00 : f32
    %62 = vector.broadcast %cst_78 : f32 to vector<2x128xf32>
    %63 = arith.maximumf %61, %62 : vector<2x128xf32>
    %64 = arith.truncf %63 : vector<2x128xf32> to vector<2x128xbf16>
    %c0_79 = arith.constant 0 : index
    %c0_80 = arith.constant 0 : index
    %c0_81 = arith.constant 0 : index
    %c0_82 = arith.constant 0 : index
    %65 = vector.load %arg8[%c0_79, %c0_80, %c0_81, %c0_82] : memref<1x1x2x128xbf16, #tpu.memory_space<vmem>>, vector<1x1x2x128xbf16>
    %66 = vector.shape_cast %65 : vector<1x1x2x128xbf16> to vector<2x128xbf16>
    %67 = vector.shape_cast %64 : vector<2x128xbf16> to vector<1x1x2x128xbf16>
    tpu.vector_store %arg8[%c0_79, %c0_80, %c0_81, %c0_82], %67 {strides = array<i32>} : memref<1x1x2x128xbf16, #tpu.memory_space<vmem>>, vector<1x1x2x128xbf16>,
    return
  }
  func.func @transform_0(%arg0: i32, %arg1: i32) -> (i32, i32, i32, i32, i32) {
    %c1_i32 = arith.constant 1 : i32
    %0 = arith.muli %c1_i32, %arg1 : i32
    %c0_i32 = arith.constant 0 : i32
    %1 = arith.addi %0, %c0_i32 : i32
    %c0_i32_0 = arith.constant 0 : i32
    %c0_i32_1 = arith.constant 0 : i32
    %c0_i32_2 = arith.constant 0 : i32
    %c0_i32_3 = arith.constant 0 : i32
    return %arg0, %1, %c0_i32_0, %c0_i32_1, %c0_i32_2 : i32, i32, i32, i32, i32
  }
  func.func @transform_1(%arg0: i32, %arg1: i32) -> (i32, i32, i32, i32, i32) {
    %c1_i32 = arith.constant 1 : i32
    %0 = arith.muli %c1_i32, %arg1 : i32
    %c1_i32_0 = arith.constant 1 : i32
    %1 = arith.addi %0, %c1_i32_0 : i32
    %c0_i32 = arith.constant 0 : i32
    %c0_i32_1 = arith.constant 0 : i32
    %c0_i32_2 = arith.constant 0 : i32
    %c0_i32_3 = arith.constant 0 : i32
    return %arg0, %1, %c0_i32, %c0_i32_1, %c0_i32_2 : i32, i32, i32, i32, i32
  }
  func.func @transform_2(%arg0: i32, %arg1: i32) -> (i32, i32, i32, i32, i32) {
    %c1_i32 = arith.constant 1 : i32
    %0 = arith.muli %c1_i32, %arg1 : i32
    %c2_i32 = arith.constant 2 : i32
    %1 = arith.addi %0, %c2_i32 : i32
    %c0_i32 = arith.constant 0 : i32
    %c0_i32_0 = arith.constant 0 : i32
    %c0_i32_1 = arith.constant 0 : i32
    %c0_i32_2 = arith.constant 0 : i32
    return %arg0, %1, %c0_i32, %c0_i32_0, %c0_i32_1 : i32, i32, i32, i32, i32
  }
  func.func @transform_3(%arg0: i32, %arg1: i32) -> (i32, i32, i32) {
    %c0_i32 = arith.constant 0 : i32
    %c0_i32_0 = arith.constant 0 : i32
    %c0_i32_1 = arith.constant 0 : i32
    %c0_i32_2 = arith.constant 0 : i32
    return %c0_i32, %c0_i32_0, %c0_i32_1 : i32, i32, i32
  }
  func.func @transform_4(%arg0: i32, %arg1: i32) -> (i32, i32) {
    %c0_i32 = arith.constant 0 : i32
    %c0_i32_0 = arith.constant 0 : i32
    %c0_i32_1 = arith.constant 0 : i32
    return %c0_i32, %c0_i32_0 : i32, i32
  }
  func.func @transform_5(%arg0: i32, %arg1: i32) -> (i32, i32, i32, i32) {
    %c0_i32 = arith.constant 0 : i32
    %c0_i32_0 = arith.constant 0 : i32
    %c0_i32_1 = arith.constant 0 : i32
    return %arg0, %arg1, %c0_i32, %c0_i32_0 : i32, i32, i32, i32
  }
  func.func @transform_6(%arg0: i32, %arg1: i32) -> (i32, i32, i32, i32) {
    %c0_i32 = arith.constant 0 : i32
    %c0_i32_0 = arith.constant 0 : i32
    %c0_i32_1 = arith.constant 0 : i32
    return %arg0, %arg1, %c0_i32, %c0_i32_0 : i32, i32, i32, i32
  }
}

module attributes {stable_mosaic.version = 11 : i64} {
  func.func @_gap_kernel(%arg0: i32, %arg1: memref<1x2x2x128xbf16, #tpu.memory_space<vmem>>, %arg2: memref<1x1x128xf32, #tpu.memory_space<vmem>>) attributes {dimension_semantics = [#tpu.dimension_semantics<parallel>], iteration_bounds = array<i64: 2>, scalar_prefetch = 0 : i64, scratch_operands = 0 : i64, tpu.core_type = #tpu.core_type<tc>, window_params = [{transform_indices = @transform_0, window_bounds = array<i64: 1, 2, 2, 128>}, {transform_indices = @transform_1, window_bounds = array<i64: 1, 1, 128>}]} {
    %c0 = arith.constant 0 : index
    %c0_0 = arith.constant 0 : index
    %c0_1 = arith.constant 0 : index
    %c0_2 = arith.constant 0 : index
    %0 = vector.load %arg1[%c0, %c0_0, %c0_1, %c0_2] : memref<1x2x2x128xbf16, #tpu.memory_space<vmem>>, vector<1x2x2x128xbf16>
    %1 = vector.shape_cast %0 : vector<1x2x2x128xbf16> to vector<2x2x128xbf16>
    %2 = arith.extf %1 : vector<2x2x128xbf16> to vector<2x2x128xf32>
    %cst = arith.constant dense<0.000000e+00> : vector<2x128xf32>
    %3 = vector.multi_reduction <add>, %2, %cst [0] : vector<2x2x128xf32> to vector<2x128xf32>
    %cst_3 = arith.constant 2.000000e+00 : f32
    %4 = vector.broadcast %cst_3 : f32 to vector<2x128xf32>
    %5 = arith.divf %3, %4 : vector<2x128xf32>
    %cst_4 = arith.constant dense<0.000000e+00> : vector<128xf32>
    %6 = vector.multi_reduction <add>, %5, %cst_4 [0] : vector<2x128xf32> to vector<128xf32>
    %7 = vector.shape_cast %6 : vector<128xf32> to vector<1x128xf32>
    %cst_5 = arith.constant 2.000000e+00 : f32
    %8 = vector.broadcast %cst_5 : f32 to vector<1x128xf32>
    %9 = arith.divf %7, %8 : vector<1x128xf32>
    %c0_6 = arith.constant 0 : index
    %c0_7 = arith.constant 0 : index
    %c0_8 = arith.constant 0 : index
    %10 = vector.load %arg2[%c0_6, %c0_7, %c0_8] : memref<1x1x128xf32, #tpu.memory_space<vmem>>, vector<1x1x128xf32>
    %11 = vector.shape_cast %10 : vector<1x1x128xf32> to vector<1x128xf32>
    %12 = vector.shape_cast %9 : vector<1x128xf32> to vector<1x1x128xf32>
    tpu.vector_store %arg2[%c0_6, %c0_7, %c0_8], %12 {strides = array<i32>} : memref<1x1x128xf32, #tpu.memory_space<vmem>>, vector<1x1x128xf32>,
    return
  }
  func.func @transform_0(%arg0: i32) -> (i32, i32, i32, i32) {
    %c0_i32 = arith.constant 0 : i32
    %c0_i32_0 = arith.constant 0 : i32
    %c0_i32_1 = arith.constant 0 : i32
    %c0_i32_2 = arith.constant 0 : i32
    return %arg0, %c0_i32, %c0_i32_0, %c0_i32_1 : i32, i32, i32, i32
  }
  func.func @transform_1(%arg0: i32) -> (i32, i32, i32) {
    %c0_i32 = arith.constant 0 : i32
    %c0_i32_0 = arith.constant 0 : i32
    %c0_i32_1 = arith.constant 0 : i32
    return %arg0, %c0_i32, %c0_i32_0 : i32, i32, i32
  }
}

</mosaic_0001>

<bundles_post_ra>
// kernel: _lambda_.14
= control target key start
LH: loop header
LB: loop body
LE: loop exit
PB: predicated region body
PF: predicated region fallthrough
CT: control target
= control target key end

     0   :  { %s6313_s30 = smov 0   ;;  %s6315_s10 = smov 0   ;;  %s7177_s0 = inlined_call_operand.vmem [shape: bf16[2,69,2,35,3], index: 0, kind: input, shape index: {}, may-alias: {0,1,2,3,4,5,6}]   ;;  %s7178_s1 = inlined_call_operand.vmem [shape: bf16[2,69,2,35,3], index: 1, kind: input, shape index: {}, may-alias: {0,1,2,3,4,5,6}]   ;;  %s7179_s2 = inlined_call_operand.vmem [shape: bf16[2,69,2,35,3], index: 2, kind: input, shape index: {}, may-alias: {0,1,2,3,4,5,6}]   ;;  %s7180_s3 = inlined_call_operand.vmem [shape: bf16[2,69,2,35,3], index: 3, kind: input, shape index: {}, may-alias: {0,1,2,3,4,5,6}]   ;;  %s7181_s4 = inlined_call_operand.vmem [shape: bf16[2,69,2,35,3], index: 4, kind: input, shape index: {}, may-alias: {0,1,2,3,4,5,6}]   ;;  %s7182_s5 = inlined_call_operand.vmem [shape: bf16[2,69,2,35,3], index: 5, kind: input, shape index: {}, may-alias: {0,1,2,3,4,5,6}]   ;;  %s7183_s6 = inlined_call_operand.vmem [shape: bf16[2,69,2,35,3], index: 6, kind: input, shape index: {}, may-alias: {0,1,2,3,4,5,6}]   ;;  %s7184_s7 = inlined_call_operand.vmem [shape: bf16[49,3,16], index: 7, kind: input, shape index: {}]   ;;  %s7185_s8 = inlined_call_operand.vmem [shape: f32[1,16], index: 8, kind: input, shape index: {}]   ;;  %s7186_s9 = inlined_call_operand.vmem [shape: bf16[2,32,32,16], index: 9, kind: output, shape index: {}]  }
   0x1   :  { %7187 = sst [smem:[#allocation2_spill]] %s7177_s0  ;;  %s6317_s11 = smov 0  }
   0x2   :  { %s6319_s12 = smov 0   ;;  %s6321_s13 = smov 0  }
   0x3 LB: > { %s28_s14 = sadd.s32 1, %s6252_s11  ;;  %s31_s15 = sadd.s32 1, %s6256_s12  ;;  %s6260_s13 = sphi %s6321_s13, %s19_s13   ;;  %s6256_s12 = sphi %s6319_s12, %s7194_s12   ;;  %s6252_s11 = sphi %s6317_s11, %s7193_s11   ;;  %s6248_s10 = sphi %s6315_s10, %s7192_s10   ;;  %s6244_s30 = sphi %s6313_s30, %s7191_s30  }
   0x4   : > { %p29_p0 = scmp.ge.s32.totalorder %s28_s14, 32  ;;  %p5111_p1 = scmp.ge.s32.totalorder %s6260_s13, 1 }
   0x5   : > { %p455_p2 = scmp.lt.s32.totalorder %s6260_s13, 65 }
   0x6   : > { %s7196_s14 = smov (%p29_p0, %s28_s14), 0  ;;  %s7198_s15 = smov (!%p29_p0, %s31_s15), %s6256_s12 }
   0x7   : > { %p456_p3 = pnand %p5111_p1, %p455_p2  ;;  %p33_p4 = scmp.ge.s32.totalorder %s7198_s15, 2 }
   0x8   : > { %v5133_v0 = vld [vmem:[%s7184_s7 + $0x2] sm:$0x3] (!%p456_p3)  ;;  %vm694_vm0 = vcmask (!%p456_p3), 1040384   ;;  %vm695_vm1 = vcmask (!%p456_p3), 1041408   ;;  %s6349_s18 = sshll.u32 (!%p456_p3), %s6244_s30, 1  ;;  %v6262_v1 = vmov (!%p456_p3), 65535  }
   0x9   : > { %s7200_s15 = smov (%p33_p4, %s7198_s15), 0  ;;  %459 = sbr.rel (%p456_p3) target bundleno = 548 (0x224), region = 56 }
   0xa   : > { %v696_v2 = vsel (!%p456_p3), %vm694_vm0, 4294967295, %v6262_v1  ;;  %p567_p5 = scmp.lt.s32.totalorder (!%p456_p3), %s6248_s10, 1  ;;  %p569_p6 = scmp.lt.s32.totalorder (!%p456_p3), %s6349_s18, 68  ;;  %v5285_v3 = vld [vmem:[%s7184_s7 + $0x30] sm:$0x3] (!%p456_p3)  ;;  %vm687_vm2 = vcmask (!%p456_p3), 23552  }
   0xb   : > { %v6355_v4 = vsel (!%p456_p3), %vm695_vm1, %v696_v2, 0  ;;  %s604_s21 = sadd.s32 (!%p456_p3), 3, %s6349_s18  ;;  %v5291_v5 = vld [vmem:[%s7184_s7 + $0x32] sm:$0x3] (!%p456_p3)  ;;  %v669_v9 = vld [vmem:[%s7184_s7] sm:$0x3] (!%p456_p3) }
   0xc   : > { %v699_v6 = vand.u32 (!%p456_p3), %v5133_v0, %v6355_v4  ;;  %v2758_v7 = vand.u32 (!%p456_p3), %v5285_v3, %v6355_v4  ;;  %v6366_v8 = vand.u32 (!%p456_p3), %v5291_v5, %v6355_v4  ;;  %v767_v10 = vand.u32 (!%p456_p3), %v6355_v4, %v669_v9  ;;  %p607_p7 = scmp.lt.s32.totalorder (!%p456_p3), %s604_s21, 68  ;;  %v5142_v11 = vld [vmem:[%s7184_s7 + $0x4] sm:$0x3] (!%p456_p3)  ;;  %s7188_s0 = sld [smem:[#allocation2_spill]] (!%p456_p3)  ;;  %v5296_v28 = vld [vmem:[%s7184_s7 + $0x34] sm:$0x3] (!%p456_p3) }
   0xd   : > { %vm838_vm3 = vsmask.f32 (!%p456_p3), 7424  ;;  %v6390_v14 = vand.u32 (!%p456_p3), %v5142_v11, %v6355_v4  ;;  %vm1029_vm4 = vcmask (!%p456_p3), 1046528   ;;  %v5153_v40 = vld [vmem:[%s7184_s7 + $0x6] sm:$0x3] (!%p456_p3)  ;;  %v2904_v46 = vand.u32 (!%p456_p3), %v5296_v28, %v6355_v4  ;;  %s643_s20 = sadd.s32 (!%p456_p3), 6, %s6349_s18 }
   0xe   : > { %5594 = vmatprep.subr.bf16.mxu1 (!%p456_p3), %v699_v6  ;;  %5738 = vmatprep.subr.bf16.mxu0 (!%p456_p3), %v2758_v7  ;;  %v968_v54 = vand.u32 (!%p456_p3), %v5153_v40, %v6355_v4  ;;  %vm1176_vm5 = vsmask.f32 (!%p456_p3), 6400  ;;  %p646_p12 = scmp.lt.s32.totalorder (!%p456_p3), %s643_s20, 68  ;;  %p657_p13 = scmp.lt.s32.totalorder (!%p456_p3), %s6244_s30, 31  ;;  %vm4867_vm6 = vcmask (!%p456_p3), 125952  }
   0xf   : > { %5595 = vmatpush3.bf16.msra.mxu1 (!%p456_p3), %v699_v6  ;;  %5739 = vmatpush3.bf16.msra.mxu0 (!%p456_p3), %v2758_v7 }
  0x10   : > { %s7202_s10 = smov (!%p567_p5, %s6248_s10), 1  ;;  %s7204_s21 = smov (!%p607_p7, %s604_s21), 68  ;;  %5744 = vmatprep.subr.bf16.mxu0 %v6366_v8  ;;  %5600 = vmatprep.subr.bf16.mxu1 %v767_v10 }
  0x11   : > { %s570_s26 = scalar_select %p569_p6, %s6349_s18, 68 }
  0x12   : > { %s6374_s27 = smul.u32 690, %s7202_s10  ;;  %s7214_s20 = smov (!%p646_p12, %s643_s20), 68 }
  0x13   : > { %s6080_s28 = smul.u32 10, %s570_s26  ;;  %s7216_s30 = smov (!%p657_p13, %s6244_s30), 31 }
  0x14   : > { %s6084_s17 = smul.u32 10, %s7204_s21 }
  0x15   : > { %s573_s29 = sadd.s32 %s6374_s27, %s6080_s28 }
  0x16   : > { %s5113_s16 = sshll.u32 %s573_s29, 2  ;;  %s611_s25 = sadd.s32 %s6084_s17, %s6374_s27 }
  0x17   : > { %s6384_s24 = scalar_lea.vmem %s7188_s0, %s5113_s16  ;;  %s5119_s26 = sshll.u32 %s611_s25, 2 }
  0x18   : > { %v6129_v12 = vld [vmem:[%s6384_s24 + $0x14] sm:$0xff]   ;;  %v6130_v13 = vld [vmem:[%s6384_s24 + $0x1c] sm:$0xff]   ;;  %s6396_s29 = scalar_lea.vmem %s7180_s3, %s5119_s26  ;;  %s617_s16 = sadd.s32 4, %s6349_s18  ;;  %v6436_v38 = vld [vmem:[%s6384_s24 + $0x4] sm:$0xf] }
  0x19   : > { %5596 = vmatprep.mubr.msk.bf16.mxu1 %vm687_vm2, %v6129_v12  ;;  %v6134_v15 = vld [vmem:[%s6384_s24] sm:$0xff]   ;;  %v5280_v16 = vld [vmem:[%s6396_s29 + $0x14] sm:$0xf]  ;;  %v6403_v17 = vld [vmem:[%s6396_s29 + $0x18] sm:$0xf]  ;;  %p6416_p8 = scmp.lt.s32.totalorder %s617_s16, 68 }
  0x1a   : > { %5597 = vmatmul.mubr.msk.bf16.vlgmr.msra.gmra.mrb[0].mxu1 %vm687_vm2, %v6130_v13  ;;  %v5286_v18 = vcombine.low %v5280_v16, %v6403_v17  ;;  %v6407_v19 = vld [vmem:[%s6396_s29 + $0x1c] sm:$0xff]   ;;  %v6411_v20 = vld [vmem:[%s6396_s29 + $0x24] ss:$0 sps:$4 sm:$0x11]   ;;  %v6425_v27 = vld [vmem:[%s6396_s29 + $0x8] sm:$0xff]  }
  0x1b   : > { %5601 = vmatpush3.bf16.msra.mxu1 %v767_v10  ;;  %5602 = vmatprep.mubr.msk.bf16.mxu1 %vm687_vm2, %v6134_v15  ;;  %v2739_v23 = vshll.u32 %v6407_v19, 16  ;;  %v2743_v24 = vshrl.u32 %v6407_v19, 16  ;;  %v2747_v25 = vshll.u32 %v6411_v20, 16  ;;  %v2610_v26 = vld [vmem:[%s6396_s29 + $0x4] sm:$0xf]  ;;  %v2820_v34 = vrot.slane %v6425_v27, 1 }
  0x1c   : > { %5606 = vmatprep.subr.bf16.mxu1 %v6390_v14  ;;  %v2732_v21 = vshrl.u32 %v5286_v18, 16  ;;  %v2734_v22 = vshll.u32 %v5286_v18, 16  ;;  %v2813_v31 = vld [vmem:[%s6396_s29] sm:$0xe]  ;;  %v6439_v39 = vld [vmem:[%s6384_s24 + $0x8] sm:$0xff]   ;;  %s7206_s16 = smov (!%p6416_p8, %s617_s16), 68 }
  0x1d   : > { %v2741_v30 = vrot.slane %v2739_v23, 1  ;;  %v2749_v32 = vrot.slane %v2747_v25, 1  ;;  %v6431_v33 = vcombine.low %v2813_v31, %v2610_v26  ;;  %v818_v35 = vld [vmem:[%s6384_s24] sm:$0xf]  ;;  %v6135_v41 = vld [vmem:[%s6384_s24 + $0x8] sm:$0xff]   ;;  %v847_v47 = vshll.u32 %v6439_v39, 16 }
  0x1e   : > { %v2736_v29 = vrot.slane %v2734_v22, 1  ;;  %v5143_v43 = vcombine.low %v818_v35, %v6436_v38  ;;  %v6138_v49 = vld [vmem:[%s6396_s29 + $0x10] ss:$0 sps:$4 sm:$0x11]   ;;  %v5295_v53 = vld [vmem:[%s6396_s29 + $0x14] sm:$0xe] }
  0x1f   : > { %v2745_v37 = vor.u32 %v2743_v24, %v2741_v30  ;;  %v2819_v42 = vrot.slane %v6431_v33, 1  ;;  %v6461_v52 = vld [vmem:[%s6384_s24 + $0x10] ss:$0 sps:$4 sm:$0x11]   ;;  %v5148_v55 = vld [vmem:[%s6384_s24 + $0x14] sm:$0xf]  ;;  %v5297_v0 = vcombine.low %v5295_v53, %v6403_v17 }
  0x20   : > { %v2737_v36 = vor.u32 %v2736_v29, %v2732_v21  ;;  %v840_v50 = vshrl.u32 %v5143_v43, 16  ;;  %v842_v51 = vshll.u32 %v5143_v43, 16  ;;  %v6468_v56 = vld [vmem:[%s6384_s24 + $0x18] sm:$0xf]  ;;  %v849_v58 = vrot.slane %v847_v47, 1  ;;  %v6479_v62 = vld [vmem:[%s6384_s24 + $0x1c] sm:$0xff]  }
  0x21   : > { %v2750_v45 = vsel %vm838_vm3, %v2745_v37, %v2749_v32  ;;  %v2821_v48 = vsel %vm1029_vm4, %v2819_v42, %v2820_v34  ;;  %v5154_v59 = vcombine.low %v5148_v55, %v6468_v56  ;;  %v851_v60 = vshrl.u32 %v6439_v39, 16  ;;  %s6085_s25 = smul.u32 10, %s7206_s16  ;;  %v5300_v12 = vld [vmem:[%s7184_s7 + $0x36] sm:$0x3]  ;;  %v5159_v15 = vld [vmem:[%s7184_s7 + $0x8] sm:$0x3] }
  0x22   : > { %v2742_v44 = vsel %vm838_vm3, %v2737_v36, %v2741_v30  ;;  %v844_v57 = vrot.slane %v842_v51, 1  ;;  %v855_v61 = vshll.u32 %v6461_v52, 16  ;;  %v949_v3 = vshll.u32 %v6479_v62, 16  ;;  %v6507_v21 = vld [vmem:[%s6384_s24 + $0x24] ss:$0 sps:$4 sm:$0x11]  }
  0x23   : > { %5740 = vmatprep.mubr.msk.bf16.mxu0 %vm687_vm2, %v2742_v44  ;;  %v944_v1 = vshll.u32 %v5154_v59, 16  ;;  %v942_v2 = vshrl.u32 %v5154_v59, 16  ;;  %s624_s26 = sadd.s32 %s6085_s25, %s6374_s27  ;;  %v2822_v5 = vrot.slane %v6138_v49, 1  ;;  %v2892_v10 = vrot.slane %v5297_v0, 1  ;;  %s578_s25 = sadd.s32 1, %s6349_s18 }
  0x24   : > { %5741 = vmatmul.mubr.msk.bf16.vlgmr.msra.gmra.mrb[0].mxu0 %vm687_vm2, %v2750_v45  ;;  %v845_v63 = vor.u32 %v844_v57, %v840_v50  ;;  %s5121_s21 = sshll.u32 %s624_s26, 2  ;;  %v857_v9 = vrot.slane %v855_v61, 1  ;;  %v2893_v11 = vrot.slane %v6407_v19, 1  ;;  %v2993_v18 = vand.u32 %v5300_v12, %v6355_v4  ;;  %p6517_p9 = scmp.lt.s32.totalorder %s578_s25, 68  ;;  %v1023_v29 = vld [vmem:[%s6384_s24] sm:$0xe] }
  0x25   : > { %5745 = vmatpush3.bf16.msra.mxu0 %v6366_v8  ;;  %5746 = vmatprep.mubr.msk.bf16.mxu0 %vm687_vm2, %v2821_v48  ;;  %v946_v7 = vrot.slane %v944_v1, 1  ;;  %v853_v8 = vor.u32 %v851_v60, %v849_v58  ;;  %s6493_s17 = scalar_lea.vmem %s7181_s4, %s5121_s21  ;;  %v2823_v16 = vsel %vm1029_vm4, %v2820_v34, %v2822_v5  ;;  %v2637_v19 = vshll.u32 %v6425_v27, 16  ;;  %v6146_v32 = vld [vmem:[%s6396_s29 + $0x10] ss:$0 sps:$4 sm:$0x33]  }
  0x26   : > { %5603 = vmatmul.mubr.msk.bf16.vlgmr.msra.gmra.mrb[0].mxu1 %vm687_vm2, %v6135_v41  ;;  %5750 = vmatprep.subr.bf16.mxu0 %v2904_v46  ;;  %v850_v6 = vsel %vm838_vm3, %v845_v63, %v849_v58  ;;  %v2894_v22 = vsel %vm1029_vm4, %v2892_v10, %v2893_v11  ;;  %v2641_v23 = vshrl.u32 %v6425_v27, 16  ;;  %v2966_v24 = vshrl.u32 %v6431_v33, 16  ;;  %s7208_s25 = smov (!%p6517_p9, %s578_s25), 68  ;;  %v5304_v45 = vld [vmem:[%s7184_s7 + $0x38] sm:$0x3] }
  0x27   : > { %5607 = vmatpush3.bf16.msra.mxu1 %v6390_v14  ;;  %5608 = vmatprep.mubr.msk.bf16.mxu1 %vm687_vm2, %v850_v6  ;;  %v947_v13 = vor.u32 %v946_v7, %v942_v2  ;;  %v951_v14 = vrot.slane %v949_v3, 1  ;;  %v858_v17 = vsel %vm838_vm3, %v853_v8, %v857_v9  ;;  %v2969_v25 = vshll.u32 %v6431_v33, 16  ;;  %s6082_s21 = smul.u32 10, %s7208_s25  ;;  %v5164_v50 = vld [vmem:[%s7184_s7 + $0xa] sm:$0x3]  ;;  %v6148_v8 = vld [vmem:[%s6493_s17] sm:$0xff]  }
  0x28   : > { %5612 = vmatprep.subr.bf16.mxu1 %v968_v54  ;;  %v1042_v28 = vand.u32 %v5159_v15, %v6355_v4  ;;  %v953_v30 = vshrl.u32 %v6479_v62, 16  ;;  %v957_v31 = vshll.u32 %v6507_v21, 16  ;;  %v2968_v33 = vrot.slane %v2966_v24, 1  ;;  %v5163_v61 = vld [vmem:[%s6384_s24 + $0x14] sm:$0xe] }
  0x29   : > { %v952_v26 = vsel %vm838_vm3, %v947_v13, %v951_v14  ;;  %v2971_v34 = vrot.slane %v2969_v25, 2  ;;  %v2973_v35 = vrot.slane %v2641_v23, 1  ;;  %v2974_v36 = vrot.slane %v2637_v19, 2  ;;  %s585_s19 = sadd.s32 %s6082_s21, %s6374_s27  ;;  %s630_s21 = sadd.s32 5, %s6349_s18  ;;  %v5313_v2 = vld [vmem:[%s7184_s7 + $0x3a] sm:$0x3] }
  0x2a   : > { %v6533_v37 = vcombine.low %v1023_v29, %v6436_v38  ;;  %v2895_v40 = vrot.slane %v6411_v20, 1  ;;  %v955_v41 = vor.u32 %v953_v30, %v951_v14  ;;  %v959_v42 = vrot.slane %v957_v31, 1  ;;  %s5115_s23 = sshll.u32 %s585_s19, 2  ;;  %p633_p10 = scmp.lt.s32.totalorder %s630_s21, 68  ;;  %v5168_v7 = vld [vmem:[%s7184_s7 + $0xc] sm:$0x3] }
  0x2b   : > { %v2972_v43 = vor.u32 %v2971_v34, %v2968_v33  ;;  %v2975_v44 = vor.u32 %v2974_v36, %v2973_v35  ;;  %v2981_v48 = vshll.u32 %v6146_v32, 16  ;;  %v1031_v38 = vrot.slane %v6439_v39, 1  ;;  %s6553_s28 = scalar_lea.vmem %s7178_s1, %s5115_s23  ;;  %v3205_v13 = vld [vmem:[%s6493_s17] sm:$0xf]  ;;  %v5318_v24 = vld [vmem:[%s7184_s7 + $0x3c] sm:$0x3] }
  0x2c   : > { %v1030_v49 = vrot.slane %v6533_v37, 1  ;;  %v2896_v20 = vsel %vm1029_vm4, %v2893_v11, %v2895_v40  ;;  %v960_v51 = vsel %vm838_vm3, %v955_v41, %v959_v42  ;;  %v3071_v53 = vand.u32 %v5304_v45, %v6355_v4  ;;  %s7210_s21 = smov (!%p633_p10, %s630_s21), 68  ;;  %v5324_v41 = vld [vmem:[%s6493_s17 + $0x14] sm:$0xf] }
  0x2d   : > { %v2983_v57 = vrot.slane %v2981_v48, 2  ;;  %v1115_v59 = vand.u32 %v5164_v50, %v6355_v4  ;;  %v5165_v63 = vcombine.low %v5163_v61, %v6468_v56  ;;  %v1033_v1 = vrot.slane %v6461_v52, 1  ;;  %s6086_s23 = smul.u32 10, %s7210_s21  ;;  %v6635_v50 = vld [vmem:[%s6493_s17 + $0x10] ss:$0 sps:$4 sm:$0x11]  }
  0x2e   : > { %v1032_v58 = vsel %vm1029_vm4, %v1030_v49, %v1031_v38  ;;  %v1104_v5 = vrot.slane %v6479_v62, 1  ;;  %v3150_v52 = vand.u32 %v5313_v2, %v6355_v4  ;;  %v1178_v9 = vshrl.u32 %v6533_v37, 16 }
  0x2f   : > { %v1103_v3 = vrot.slane %v5165_v63, 1  ;;  %v1034_v56 = vsel %vm1029_vm4, %v1031_v38, %v1033_v1  ;;  %v1205_v62 = vand.u32 %v5168_v7, %v6355_v4  ;;  %v1181_v11 = vshll.u32 %v6533_v37, 16  ;;  %s637_s25 = sadd.s32 %s6086_s23, %s6374_s27  ;;  %s591_s23 = sadd.s32 2, %s6349_s18 }
  0x30   : > { %5747 = vmatmul.mubr.msk.bf16.vlgmr.msra.gmra.mrb[0].mxu0 %vm687_vm2, %v2823_v16  ;;  %v1180_v12 = vrot.slane %v1178_v9, 1  ;;  %v1185_v15 = vrot.slane %v851_v60, 1  ;;  %v1186_v16 = vrot.slane %v847_v47, 2  ;;  %s5123_s19 = sshll.u32 %s637_s25, 2  ;;  %v6149_v60 = vld [vmem:[%s6493_s17 + $0x8] sm:$0xff]   ;;  %v3252_v30 = vand.u32 %v5318_v24, %v6355_v4  ;;  %p594_p11 = scmp.lt.s32.totalorder %s591_s23, 68 }
  0x31   : > { %5751 = vmatpush3.bf16.msra.mxu0 %v2904_v46  ;;  %5752 = vmatprep.mubr.msk.bf16.mxu0 %vm687_vm2, %v2894_v22  ;;  %v2978_v46 = vshrl.u32 %v6146_v32, 16  ;;  %v1105_v10 = vsel %vm1029_vm4, %v1103_v3, %v1104_v5  ;;  %v1183_v14 = vrot.slane %v1181_v11, 2  ;;  %v6153_v22 = vld [vmem:[%s6384_s24 + $0x10] ss:$0 sps:$4 sm:$0x33]   ;;  %s6608_s24 = scalar_lea.vmem %s7182_s5, %s5123_s19  ;;  %v3241_v61 = vshll.u32 %v6635_v50, 16 }
  0x32   : > { %5609 = vmatmul.mubr.msk.bf16.vlgmr.msra.gmra.mrb[0].mxu1 %vm687_vm2, %v858_v17  ;;  %5756 = vmatprep.subr.bf16.mxu0 %v2993_v18  ;;  %v6591_v17 = vld [vmem:[%s6493_s17 + $0x4] sm:$0xf]  ;;  %v5172_v47 = vld [vmem:[%s7184_s7 + $0xe] sm:$0x3]  ;;  %v1190_v31 = vshrl.u32 %v6153_v22, 16  ;;  %v1193_v32 = vshll.u32 %v6153_v22, 16 }
  0x33   : > { %5613 = vmatpush3.bf16.msra.mxu1 %v968_v54  ;;  %5614 = vmatprep.mubr.msk.bf16.mxu1 %vm687_vm2, %v952_v26  ;;  %v2976_v54 = vsel %vm1176_vm5, %v2972_v43, %v2975_v44  ;;  %v2980_v55 = vrot.slane %v2978_v46, 1  ;;  %v5319_v25 = vcombine.low %v3205_v13, %v6591_v17  ;;  %v6151_v26 = vld [vmem:[%s6493_s17 + $0x14] sm:$0xff]   ;;  %v1184_v39 = vor.u32 %v1183_v14, %v1180_v12  ;;  %s7212_s23 = smov (!%p594_p11, %s591_s23), 68  ;;  %v5329_v46 = vld [vmem:[%s7184_s7 + $0x3e] sm:$0x3]  ;;  %v6158_v12 = vld [vmem:[%s6553_s28 + $0x8] sm:$0xff]  }
  0x34   : > { %5618 = vmatprep.subr.bf16.mxu1 %v1042_v28  ;;  %v1283_v35 = vand.u32 %v5172_v47, %v6355_v4  ;;  %v1192_v36 = vrot.slane %v1190_v31, 1  ;;  %v1195_v37 = vrot.slane %v1193_v32, 2  ;;  %s6083_s26 = smul.u32 10, %s7212_s23  ;;  %v5335_v9 = vld [vmem:[%s7184_s7 + $0x40] sm:$0x3]  ;;  %v6684_v22 = vld [vmem:[%s6553_s28 + $0x8] sm:$0xff]  }
  0x35   : > { %v2984_v0 = vor.u32 %v2983_v57, %v2980_v55  ;;  %v3228_v33 = vshll.u32 %v5319_v25, 16  ;;  %v3226_v42 = vshrl.u32 %v5319_v25, 16  ;;  %v6644_v55 = vld [vmem:[%s6493_s17 + $0x1c] sm:$0xff]   ;;  %v5186_v13 = vld [vmem:[%s7184_s7 + $0x12] sm:$0x3]  ;;  %v3427_v14 = vand.u32 %v5335_v9, %v6355_v4  ;;  %s6087_s25 = smul.u32 10, %s7214_s20 }
  0x36   : > { %v1196_v45 = vor.u32 %v1195_v37, %v1192_v36  ;;  %s598_s16 = sadd.s32 %s6083_s26, %s6374_s27  ;;  %v3335_v3 = vshll.u32 %v6644_v55, 16  ;;  %v3409_v24 = vld [vmem:[%s6493_s17] sm:$0xe]  ;;  %v1464_v25 = vand.u32 %v5186_v13, %v6355_v4  ;;  %v5192_v31 = vld [vmem:[%s6553_s28 + $0x14] sm:$0xf] }
  0x37   : > { %v2985_v6 = vsel %vm1176_vm5, %v2975_v44, %v2984_v0  ;;  %v3230_v43 = vrot.slane %v3228_v33, 1  ;;  %v6625_v44 = vld [vmem:[%s6493_s17 + $0x18] sm:$0xf]  ;;  %s5117_s22 = sshll.u32 %s598_s16, 2  ;;  %v5340_v36 = vld [vmem:[%s7184_s7 + $0x42] sm:$0x3]  ;;  %s650_s26 = sadd.s32 %s6087_s25, %s6374_s27 }
  0x38   : > { %v5330_v38 = vcombine.low %v5324_v41, %v6625_v44  ;;  %s6649_s0 = scalar_lea.vmem %s7179_s2, %s5117_s22  ;;  %v6700_v33 = vld [vmem:[%s6553_s28 + $0x18] sm:$0xf]  ;;  %v5197_v37 = vld [vmem:[%s7184_s7 + $0x14] sm:$0x3]  ;;  %s5125_s16 = sshll.u32 %s650_s26, 2 }
  0x39   : > { %v3231_v48 = vor.u32 %v3230_v43, %v3226_v42  ;;  %v5198_v43 = vcombine.low %v5192_v31, %v6700_v33  ;;  %s6731_s22 = scalar_lea.vmem %s7183_s6, %s5125_s16  ;;  %v6172_v31 = vld [vmem:[%s6493_s17 + $0x10] ss:$0 sps:$4 sm:$0x33]  }
  0x3a   : > { %v3328_v1 = vshrl.u32 %v5330_v38, 16 }
  0x3c   : > { %5753 = vmatmul.mubr.msk.bf16.vlgmr.msra.gmra.mrb[0].mxu0 %vm687_vm2, %v2896_v20  ;;  %v6152_v20 = vld [vmem:[%s6493_s17 + $0x1c] sm:$0xff]  }
  0x3d   : > { %5757 = vmatpush3.bf16.msra.mxu0 %v2993_v18  ;;  %5758 = vmatprep.mubr.msk.bf16.mxu0 %vm687_vm2, %v2976_v54  ;;  %v1106_v18 = vrot.slane %v6507_v21, 1  ;;  %v6611_v21 = vld [vmem:[%s6493_s17 + $0x8] sm:$0xff]   ;;  %v3354_v54 = vand.u32 %v5329_v46, %v6355_v4  ;;  %v3500_v46 = vand.u32 %v5340_v36, %v6355_v4  ;;  %v5348_v36 = vld [vmem:[%s7184_s7 + $0x46] sm:$0x3] }
  0x3e   : > { %5615 = vmatmul.mubr.msk.bf16.vlgmr.msra.gmra.mrb[0].mxu1 %vm687_vm2, %v960_v51  ;;  %5762 = vmatprep.subr.bf16.mxu0 %v3071_v53  ;;  %v3233_v40 = vshll.u32 %v6611_v21, 16  ;;  %v5181_v51 = vld [vmem:[%s7184_s7 + $0x10] sm:$0x3]  ;;  %v3237_v0 = vshrl.u32 %v6611_v21, 16 }
  0x3f   : > { %5619 = vmatpush3.bf16.msra.mxu1 %v1042_v28  ;;  %5620 = vmatprep.mubr.msk.bf16.mxu1 %vm687_vm2, %v1032_v58  ;;  %v1187_v28 = vor.u32 %v1186_v16, %v1185_v15  ;;  %v1107_v29 = vsel %vm1029_vm4, %v1104_v5, %v1106_v18  ;;  %v6157_v58 = vld [vmem:[%s6553_s28] sm:$0xff]   ;;  %v1362_v63 = vand.u32 %v5181_v51, %v6355_v4  ;;  %v3243_v5 = vrot.slane %v3241_v61, 1  ;;  %v6162_v18 = vld [vmem:[%s6553_s28 + $0x14] sm:$0xff]  }
  0x40   : > { %5624 = vmatprep.subr.bf16.mxu1 %v1115_v59  ;;  %v3235_v49 = vrot.slane %v3233_v40, 1 }
  0x41   : > { %v1188_v34 = vsel %vm1176_vm5, %v1184_v39, %v1187_v28 }
  0x42   : > { %v3236_v57 = vsel %vm838_vm3, %v3231_v48, %v3235_v49  ;;  %v3239_v7 = vor.u32 %v3237_v0, %v3235_v49  ;;  %v6717_v48 = vld [vmem:[%s6553_s28 + $0x10] ss:$0 sps:$4 sm:$0x11]  }
  0x44   : > { %v3244_v11 = vsel %vm838_vm3, %v3239_v7, %v3243_v5  ;;  %v3489_v7 = vrot.slane %v6644_v55, 1 }
  0x48   : > { %5759 = vmatmul.mubr.msk.bf16.vlgmr.msra.gmra.mrb[0].mxu0 %vm687_vm2, %v2985_v6  ;;  %v1417_v6 = vld [vmem:[%s6553_s28] sm:$0xf] }
  0x49   : > { %5763 = vmatpush3.bf16.msra.mxu0 %v3071_v53  ;;  %5764 = vmatprep.mubr.msk.bf16.mxu0 %vm687_vm2, %v6148_v8  ;;  %v1197_v53 = vsel %vm1176_vm5, %v1187_v28, %v1196_v45  ;;  %v6694_v28 = vcombine.low %v3409_v24, %v6591_v17  ;;  %v6163_v17 = vld [vmem:[%s6553_s28 + $0x1c] sm:$0xff]  }
  0x4a   : > { %5621 = vmatmul.mubr.msk.bf16.vlgmr.msra.gmra.mrb[0].mxu1 %vm687_vm2, %v1034_v56  ;;  %5768 = vmatprep.subr.bf16.mxu0 %v3150_v52  ;;  %v6665_v56 = vld [vmem:[%s6553_s28 + $0x4] sm:$0xf] }
  0x4b   : > { %5625 = vmatpush3.bf16.msra.mxu1 %v1115_v59  ;;  %5626 = vmatprep.mubr.msk.bf16.mxu1 %vm687_vm2, %v1105_v10  ;;  %v3330_v59 = vshll.u32 %v5330_v38, 16  ;;  %v6671_v10 = vld [vmem:[%s6493_s17 + $0x24] ss:$0 sps:$4 sm:$0x11]   ;;  %v5339_v38 = vld [vmem:[%s6493_s17 + $0x14] sm:$0xe] }
  0x4c   : > { %5630 = vmatprep.subr.bf16.mxu1 %v1205_v62  ;;  %v3343_v16 = vshll.u32 %v6671_v10, 16  ;;  %v3562_v13 = vshrl.u32 %v6694_v28, 16 }
  0x4d   : > { %v3332_v2 = vrot.slane %v3330_v59, 1  ;;  %v5341_v59 = vcombine.low %v5339_v38, %v6625_v44  ;;  %v5344_v44 = vld [vmem:[%s7184_s7 + $0x44] sm:$0x3] }
  0x4e   : > { %v3345_v39 = vrot.slane %v3343_v16, 1 }
  0x4f   : > { %v3333_v8 = vor.u32 %v3332_v2, %v3328_v1  ;;  %v3418_v2 = vrot.slane %v6635_v50, 1  ;;  %v5203_v50 = vld [vmem:[%s7184_s7 + $0x16] sm:$0x3] }
  0x50   : > { %v1639_v16 = vand.u32 %v5203_v50, %v6355_v4  ;;  %v3801_v50 = vld [vmem:[%s6608_s24] sm:$0xf] }
  0x54   : > { %5765 = vmatmul.mubr.msk.bf16.vlgmr.msra.gmra.mrb[0].mxu0 %vm687_vm2, %v6149_v60 }
  0x55   : > { %5769 = vmatpush3.bf16.msra.mxu0 %v3150_v52  ;;  %5770 = vmatprep.mubr.msk.bf16.mxu0 %vm687_vm2, %v6151_v26  ;;  %v3337_v52 = vrot.slane %v3335_v3, 1  ;;  %v3339_v26 = vshrl.u32 %v6644_v55, 16 }
  0x56   : > { %5627 = vmatmul.mubr.msk.bf16.vlgmr.msra.gmra.mrb[0].mxu1 %vm687_vm2, %v1107_v29  ;;  %5774 = vmatprep.subr.bf16.mxu0 %v3252_v30  ;;  %v1445_v29 = vshll.u32 %v6684_v22, 16 }
  0x57   : > { %5631 = vmatpush3.bf16.msra.mxu1 %v1205_v62  ;;  %5632 = vmatprep.mubr.msk.bf16.mxu1 %vm687_vm2, %v1188_v34  ;;  %v5187_v62 = vcombine.low %v1417_v6, %v6665_v56  ;;  %v3338_v15 = vsel %vm838_vm3, %v3333_v8, %v3337_v52  ;;  %v3341_v32 = vor.u32 %v3339_v26, %v3337_v52  ;;  %v3416_v34 = vrot.slane %v6611_v21, 1 }
  0x58   : > { %5636 = vmatprep.subr.bf16.mxu1 %v1283_v35  ;;  %v1447_v42 = vrot.slane %v1445_v29, 1  ;;  %v3488_v6 = vrot.slane %v5341_v59, 1  ;;  %v5357_v59 = vld [vmem:[%s7184_s7 + $0x48] sm:$0x3] }
  0x59   : > { %v1440_v60 = vshll.u32 %v5187_v62, 16  ;;  %v1438_v47 = vshrl.u32 %v5187_v62, 16  ;;  %v3346_v45 = vsel %vm838_vm3, %v3341_v32, %v3345_v39  ;;  %v3419_v9 = vsel %vm1029_vm4, %v3416_v34, %v3418_v2  ;;  %v5212_v2 = vld [vmem:[%s7184_s7 + $0x1a] sm:$0x3] }
  0x5a   : > { %v3490_v55 = vsel %vm1029_vm4, %v3488_v6, %v3489_v7  ;;  %v3569_v39 = vrot.slane %v3237_v0, 1  ;;  %v1628_v0 = vrot.slane %v6684_v22, 1  ;;  %v1801_v6 = vand.u32 %v5212_v2, %v6355_v4  ;;  %v2013_v2 = vld [vmem:[%s6649_s0] sm:$0xf] }
  0x60   : > { %5771 = vmatmul.mubr.msk.bf16.vlgmr.msra.gmra.mrb[0].mxu0 %vm687_vm2, %v6152_v20  ;;  %v6723_v20 = vld [vmem:[%s6553_s28 + $0x1c] sm:$0xff]  }
  0x61   : > { %5775 = vmatpush3.bf16.msra.mxu0 %v3252_v30  ;;  %5776 = vmatprep.mubr.msk.bf16.mxu0 %vm687_vm2, %v3236_v57  ;;  %v1442_v30 = vrot.slane %v1440_v60, 1  ;;  %v1449_v57 = vshrl.u32 %v6684_v22, 16  ;;  %v1547_v61 = vshll.u32 %v6723_v20, 16  ;;  %v1551_v24 = vshrl.u32 %v6723_v20, 16 }
  0x62   : > { %5633 = vmatmul.mubr.msk.bf16.vlgmr.msra.gmra.mrb[0].mxu1 %vm687_vm2, %v1197_v53  ;;  %5780 = vmatprep.subr.bf16.mxu0 %v3354_v54  ;;  %v1566_v53 = vand.u32 %v5197_v37, %v6355_v4  ;;  %v3564_v60 = vrot.slane %v3562_v13, 1  ;;  %v5362_v13 = vld [vmem:[%s7184_s7 + $0x4a] sm:$0x3] }
  0x63   : > { %5637 = vmatpush3.bf16.msra.mxu1 %v1283_v35  ;;  %5638 = vmatprep.mubr.msk.bf16.mxu1 %vm687_vm2, %v6157_v58  ;;  %v3415_v35 = vrot.slane %v6694_v28, 1  ;;  %v1443_v41 = vor.u32 %v1442_v30, %v1438_v47  ;;  %v1453_v58 = vshll.u32 %v6717_v48, 16  ;;  %v1451_v3 = vor.u32 %v1449_v57, %v1447_v42 }
  0x64   : > { %5642 = vmatprep.subr.bf16.mxu1 %v1362_v63  ;;  %v1549_v52 = vrot.slane %v1547_v61, 1  ;;  %v3491_v30 = vrot.slane %v6671_v10, 1 }
  0x65   : > { %v3417_v49 = vsel %vm1029_vm4, %v3415_v35, %v3416_v34  ;;  %v1448_v51 = vsel %vm838_vm3, %v1443_v41, %v1447_v42  ;;  %v1455_v5 = vrot.slane %v1453_v58, 1  ;;  %v3577_v41 = vshll.u32 %v6172_v31, 16 }
  0x66   : > { %v1553_v32 = vor.u32 %v1551_v24, %v1549_v52  ;;  %v3492_v21 = vsel %vm1029_vm4, %v3489_v7, %v3491_v30  ;;  %v3667_v42 = vand.u32 %v5348_v36, %v6355_v4  ;;  %v1630_v58 = vrot.slane %v6717_v48, 1 }
  0x67   : > { %v1456_v62 = vsel %vm838_vm3, %v1451_v3, %v1455_v5  ;;  %v3579_v38 = vrot.slane %v3577_v41, 2  ;;  %v6174_v5 = vld [vmem:[%s6608_s24] sm:$0xff]   ;;  %v3848_v24 = vand.u32 %v5362_v13, %v6355_v4  ;;  %v6900_v13 = vld [vmem:[%s6649_s0 + $0x8] sm:$0xff]  }
  0x68   : > { %v1631_v3 = vsel %vm1029_vm4, %v1628_v0, %v1630_v58  ;;  %v6178_v41 = vld [vmem:[%s6608_s24 + $0x1c] sm:$0xff]  }
  0x6c   : > { %5777 = vmatmul.mubr.msk.bf16.vlgmr.msra.gmra.mrb[0].mxu0 %vm687_vm2, %v3244_v11  ;;  %v3589_v11 = vand.u32 %v5344_v44, %v6355_v4  ;;  %v1781_v44 = vrot.slane %v1449_v57, 1 }
  0x6d   : > { %5781 = vmatpush3.bf16.msra.mxu0 %v3354_v54  ;;  %5782 = vmatprep.mubr.msk.bf16.mxu0 %vm687_vm2, %v3338_v15  ;;  %v1542_v54 = vshll.u32 %v5198_v43, 16 }
  0x6e   : > { %5639 = vmatmul.mubr.msk.bf16.vlgmr.msra.gmra.mrb[0].mxu1 %vm687_vm2, %v6158_v12  ;;  %5786 = vmatprep.subr.bf16.mxu0 %v3427_v14  ;;  %v6754_v12 = vld [vmem:[%s6553_s28 + $0x24] ss:$0 sps:$4 sm:$0x11]  }
  0x6f   : > { %5643 = vmatpush3.bf16.msra.mxu1 %v1362_v63  ;;  %5644 = vmatprep.mubr.msk.bf16.mxu1 %vm687_vm2, %v6162_v18  ;;  %v1540_v63 = vshrl.u32 %v5198_v43, 16  ;;  %v1544_v1 = vrot.slane %v1542_v54, 1  ;;  %v1621_v18 = vld [vmem:[%s6553_s28] sm:$0xe] }
  0x70   : > { %5648 = vmatprep.subr.bf16.mxu1 %v1464_v25  ;;  %v5204_v47 = vcombine.low %v1621_v18, %v6665_v56  ;;  %v5208_v56 = vld [vmem:[%s7184_s7 + $0x18] sm:$0x3] }
  0x71   : > { %v1545_v8 = vor.u32 %v1544_v1, %v1540_v63  ;;  %v1701_v63 = vrot.slane %v6723_v20, 1  ;;  %v6177_v18 = vld [vmem:[%s6608_s24 + $0x14] sm:$0xff]  }
  0x72   : > { %v1627_v37 = vrot.slane %v5204_v47, 1  ;;  %v1774_v20 = vshrl.u32 %v5204_v47, 16  ;;  %v1777_v7 = vshll.u32 %v5204_v47, 16 }
  0x73   : > { %v1550_v15 = vsel %vm838_vm3, %v1545_v8, %v1549_v52  ;;  %v1782_v8 = vrot.slane %v1445_v29, 2  ;;  %v5216_v29 = vld [vmem:[%s7184_s7 + $0x1c] sm:$0x3] }
  0x74   : > { %v1776_v52 = vrot.slane %v1774_v20, 1 }
  0x78   : > { %5783 = vmatmul.mubr.msk.bf16.vlgmr.msra.gmra.mrb[0].mxu0 %vm687_vm2, %v3346_v45  ;;  %v1629_v45 = vsel %vm1029_vm4, %v1627_v37, %v1628_v0 }
  0x79   : > { %5787 = vmatpush3.bf16.msra.mxu0 %v3427_v14  ;;  %5788 = vmatprep.mubr.msk.bf16.mxu0 %vm687_vm2, %v3417_v49  ;;  %v3565_v14 = vshll.u32 %v6694_v28, 16  ;;  %v3570_v28 = vrot.slane %v3233_v40, 2  ;;  %v3574_v40 = vshrl.u32 %v6172_v31, 16 }
  0x7a   : > { %5645 = vmatmul.mubr.msk.bf16.vlgmr.msra.gmra.mrb[0].mxu1 %vm687_vm2, %v6163_v17  ;;  %5792 = vmatprep.subr.bf16.mxu0 %v3500_v46 }
  0x7b   : > { %5649 = vmatpush3.bf16.msra.mxu1 %v1464_v25  ;;  %5650 = vmatprep.mubr.msk.bf16.mxu1 %vm687_vm2, %v1448_v51  ;;  %v1555_v25 = vshll.u32 %v6754_v12, 16  ;;  %v3567_v26 = vrot.slane %v3565_v14, 2  ;;  %v3571_v35 = vor.u32 %v3570_v28, %v3569_v39  ;;  %v3576_v49 = vrot.slane %v3574_v40, 1  ;;  %v5207_v51 = vld [vmem:[%s6553_s28 + $0x14] sm:$0xe]  ;;  %v6175_v14 = vld [vmem:[%s6608_s24 + $0x8] sm:$0xff]  }
  0x7c   : > { %5654 = vmatprep.subr.bf16.mxu1 %v1566_v53  ;;  %v1879_v28 = vand.u32 %v5216_v29, %v6355_v4 }
  0x7d   : > { %v1557_v34 = vrot.slane %v1555_v25, 1  ;;  %v3568_v17 = vor.u32 %v3567_v26, %v3564_v60  ;;  %v3580_v54 = vor.u32 %v3579_v38, %v3576_v49  ;;  %v6834_v60 = vld [vmem:[%s6608_s24 + $0x8] sm:$0xff]   ;;  %v6865_v49 = vld [vmem:[%s6608_s24 + $0x1c] sm:$0xff]  }
  0x7f   : > { %v1558_v10 = vsel %vm838_vm3, %v1553_v32, %v1557_v34  ;;  %v3572_v43 = vsel %vm1176_vm5, %v3568_v17, %v3571_v35  ;;  %v3581_v1 = vsel %vm1176_vm5, %v3571_v35, %v3580_v54  ;;  %v3829_v34 = vshll.u32 %v6834_v60, 16  ;;  %v5368_v17 = vld [vmem:[%s6608_s24 + $0x14] sm:$0xf]  ;;  %v6845_v35 = vld [vmem:[%s6608_s24 + $0x18] sm:$0xf] }
  0x80   : > { %v5374_v40 = vcombine.low %v5368_v17, %v6845_v35  ;;  %v6189_v17 = vld [vmem:[%s6649_s0 + $0x1c] sm:$0xff]  }
  0x81   : > { %v3831_v0 = vrot.slane %v3829_v34, 1 }
  0x82   : > { %v3926_v38 = vshll.u32 %v5374_v40, 16  ;;  %v3924_v58 = vshrl.u32 %v5374_v40, 16 }
  0x84   : > { %5789 = vmatmul.mubr.msk.bf16.vlgmr.msra.gmra.mrb[0].mxu0 %vm687_vm2, %v3419_v9  ;;  %v1779_v9 = vrot.slane %v1777_v7, 2  ;;  %v6184_v7 = vld [vmem:[%s6649_s0 + $0x8] sm:$0xff]  }
  0x85   : > { %5793 = vmatpush3.bf16.msra.mxu0 %v3500_v46  ;;  %5794 = vmatprep.mubr.msk.bf16.mxu0 %vm687_vm2, %v3490_v55  ;;  %v1712_v46 = vand.u32 %v5208_v56, %v6355_v4  ;;  %v6179_v55 = vld [vmem:[%s6553_s28 + $0x10] ss:$0 sps:$4 sm:$0x33]  }
  0x86   : > { %5651 = vmatmul.mubr.msk.bf16.vlgmr.msra.gmra.mrb[0].mxu1 %vm687_vm2, %v1456_v62  ;;  %5798 = vmatprep.subr.bf16.mxu0 %v3589_v11  ;;  %v6818_v62 = vld [vmem:[%s6608_s24 + $0x4] sm:$0xf]  ;;  %v1780_v22 = vor.u32 %v1779_v9, %v1776_v52  ;;  %v1789_v25 = vshll.u32 %v6179_v55, 16  ;;  %v6855_v56 = vld [vmem:[%s6608_s24 + $0x10] ss:$0 sps:$4 sm:$0x11]  }
  0x87   : > { %5655 = vmatpush3.bf16.msra.mxu1 %v1566_v53  ;;  %5656 = vmatprep.mubr.msk.bf16.mxu1 %vm687_vm2, %v1550_v15  ;;  %v5209_v53 = vcombine.low %v5207_v51, %v6700_v33  ;;  %v3746_v33 = vand.u32 %v5357_v59, %v6355_v4  ;;  %v5363_v57 = vcombine.low %v3801_v50, %v6818_v62  ;;  %v3837_v54 = vshll.u32 %v6855_v56, 16  ;;  %v6188_v50 = vld [vmem:[%s6649_s0 + $0x14] sm:$0xff]  }
  0x88   : > { %5660 = vmatprep.subr.bf16.mxu1 %v1639_v16  ;;  %v1783_v15 = vor.u32 %v1782_v8, %v1781_v44  ;;  %v1791_v30 = vrot.slane %v1789_v25, 2  ;;  %v3928_v59 = vrot.slane %v3926_v38, 1  ;;  %v6888_v44 = vld [vmem:[%s6608_s24 + $0x24] ss:$0 sps:$4 sm:$0x11]  }
  0x89   : > { %v1700_v61 = vrot.slane %v5209_v53, 1  ;;  %v3824_v26 = vshll.u32 %v5363_v57, 16  ;;  %v3822_v31 = vshrl.u32 %v5363_v57, 16  ;;  %v3833_v53 = vshrl.u32 %v6834_v60, 16  ;;  %v5230_v8 = vld [vmem:[%s7184_s7 + $0x20] sm:$0x3] }
  0x8a   : > { %v1784_v39 = vsel %vm1176_vm5, %v1780_v22, %v1783_v15  ;;  %v3939_v22 = vshll.u32 %v6888_v44, 16  ;;  %v5236_v25 = vld [vmem:[%s6649_s0 + $0x14] sm:$0xf] }
  0x8b   : > { %v1702_v48 = vsel %vm1029_vm4, %v1700_v61, %v1701_v63  ;;  %v3826_v32 = vrot.slane %v3824_v26, 1  ;;  %v3931_v61 = vshll.u32 %v6865_v49, 16  ;;  %v6913_v26 = vld [vmem:[%s6649_s0 + $0x18] sm:$0xf] }
  0x8d   : > { %v3827_v37 = vor.u32 %v3826_v32, %v3822_v31  ;;  %v5242_v31 = vcombine.low %v5236_v25, %v6913_v26 }
  0x90   : > { %5795 = vmatmul.mubr.msk.bf16.vlgmr.msra.gmra.mrb[0].mxu0 %vm687_vm2, %v3492_v21  ;;  %v5373_v21 = vld [vmem:[%s7184_s7 + $0x4c] sm:$0x3] }
  0x91   : > { %5799 = vmatpush3.bf16.msra.mxu0 %v3589_v11  ;;  %5800 = vmatprep.mubr.msk.bf16.mxu0 %vm687_vm2, %v3572_v43  ;;  %v1703_v11 = vrot.slane %v6754_v12, 1  ;;  %v1786_v12 = vshrl.u32 %v6179_v55, 16  ;;  %v3950_v43 = vand.u32 %v5373_v21, %v6355_v4  ;;  %v2060_v55 = vand.u32 %v5230_v8, %v6355_v4 }
  0x92   : > { %5657 = vmatmul.mubr.msk.bf16.vlgmr.msra.gmra.mrb[0].mxu1 %vm687_vm2, %v1558_v10  ;;  %5804 = vmatprep.subr.bf16.mxu0 %v3667_v42  ;;  %v5225_v10 = vld [vmem:[%s7184_s7 + $0x1e] sm:$0x3] }
  0x93   : > { %5661 = vmatpush3.bf16.msra.mxu1 %v1639_v16  ;;  %5662 = vmatprep.mubr.msk.bf16.mxu1 %vm687_vm2, %v1629_v45  ;;  %v1704_v16 = vsel %vm1029_vm4, %v1701_v63, %v1703_v11  ;;  %v1788_v47 = vrot.slane %v1786_v12, 1  ;;  %v3832_v45 = vsel %vm838_vm3, %v3827_v37, %v3831_v0  ;;  %v1958_v51 = vand.u32 %v5225_v10, %v6355_v4  ;;  %v4005_v11 = vld [vmem:[%s6608_s24] sm:$0xe] }
  0x94   : > { %5666 = vmatprep.subr.bf16.mxu1 %v1712_v46  ;;  %v3835_v63 = vor.u32 %v3833_v53, %v3831_v0  ;;  %v3941_v12 = vrot.slane %v3939_v22, 1  ;;  %v6930_v0 = vld [vmem:[%s6649_s0 + $0x10] ss:$0 sps:$4 sm:$0x11]  }
  0x95   : > { %v1792_v36 = vor.u32 %v1791_v30, %v1788_v47 }
  0x9c   : > { %5801 = vmatmul.mubr.msk.bf16.vlgmr.msra.gmra.mrb[0].mxu0 %vm687_vm2, %v3581_v1  ;;  %v3839_v1 = vrot.slane %v3837_v54, 1 }
  0x9d   : > { %5805 = vmatpush3.bf16.msra.mxu0 %v3667_v42  ;;  %5806 = vmatprep.mubr.msk.bf16.mxu0 %vm687_vm2, %v6174_v5  ;;  %v1793_v42 = vsel %vm1176_vm5, %v1783_v15, %v1792_v36  ;;  %v3929_v5 = vor.u32 %v3928_v59, %v3924_v58  ;;  %v6908_v15 = vcombine.low %v4005_v11, %v6818_v62  ;;  %v5384_v62 = vld [vmem:[%s7184_s7 + $0x50] sm:$0x3]  ;;  %v5241_v36 = vld [vmem:[%s7184_s7 + $0x22] sm:$0x3]  ;;  %v4014_v59 = vrot.slane %v6855_v56, 1 }
  0x9e   : > { %5663 = vmatmul.mubr.msk.bf16.vlgmr.msra.gmra.mrb[0].mxu1 %vm687_vm2, %v1631_v3  ;;  %5810 = vmatprep.subr.bf16.mxu0 %v3746_v33  ;;  %v6879_v3 = vld [vmem:[%s6649_s0 + $0x4] sm:$0xf]  ;;  %v3840_v20 = vsel %vm838_vm3, %v3835_v63, %v3839_v1  ;;  %v4096_v37 = vand.u32 %v5384_v62, %v6355_v4  ;;  %v2162_v10 = vand.u32 %v5241_v36, %v6355_v4  ;;  %v2217_v11 = vld [vmem:[%s6649_s0] sm:$0xe] }
  0x9f   : > { %5667 = vmatpush3.bf16.msra.mxu1 %v1712_v46  ;;  %5668 = vmatprep.mubr.msk.bf16.mxu1 %vm687_vm2, %v1702_v48  ;;  %v6183_v46 = vld [vmem:[%s6649_s0] sm:$0xff]   ;;  %v5379_v48 = vld [vmem:[%s7184_s7 + $0x4e] sm:$0x3]  ;;  %v4158_v8 = vshrl.u32 %v6908_v15, 16 }
  0xa0   : > { %5672 = vmatprep.subr.bf16.mxu1 %v1801_v6  ;;  %v4023_v52 = vand.u32 %v5379_v48, %v6355_v4  ;;  %v5247_v56 = vld [vmem:[%s7184_s7 + $0x24] sm:$0x3] }
  0xa8   : > { %5807 = vmatmul.mubr.msk.bf16.vlgmr.msra.gmra.mrb[0].mxu0 %vm687_vm2, %v6175_v14  ;;  %v3935_v14 = vshrl.u32 %v6865_v49, 16 }
  0xa9   : > { %5811 = vmatpush3.bf16.msra.mxu0 %v3746_v33  ;;  %5812 = vmatprep.mubr.msk.bf16.mxu0 %vm687_vm2, %v6177_v18  ;;  %v3933_v33 = vrot.slane %v3931_v61, 1  ;;  %v2041_v18 = vshll.u32 %v6900_v13, 16 }
  0xaa   : > { %5669 = vmatmul.mubr.msk.bf16.vlgmr.msra.gmra.mrb[0].mxu1 %vm687_vm2, %v1704_v16  ;;  %5816 = vmatprep.subr.bf16.mxu0 %v3848_v24 }
  0xab   : > { %5673 = vmatpush3.bf16.msra.mxu1 %v1801_v6  ;;  %5674 = vmatprep.mubr.msk.bf16.mxu1 %vm687_vm2, %v1784_v39  ;;  %v5231_v6 = vcombine.low %v2013_v2, %v6879_v3  ;;  %v3934_v9 = vsel %vm838_vm3, %v3929_v5, %v3933_v33  ;;  %v4011_v39 = vrot.slane %v6908_v15, 1  ;;  %v2043_v30 = vrot.slane %v2041_v18, 1  ;;  %v5388_v5 = vld [vmem:[%s7184_s7 + $0x52] sm:$0x3] }
  0xac   : > { %5678 = vmatprep.subr.bf16.mxu1 %v1879_v28  ;;  %v4085_v2 = vrot.slane %v6865_v49, 1 }
  0xad   : > { %v2036_v57 = vshll.u32 %v5231_v6, 16  ;;  %v2034_v29 = vshrl.u32 %v5231_v6, 16 }
  0xaf   : > { %v2038_v16 = vrot.slane %v2036_v57, 1 }
  0xb1   : > { %v2039_v47 = vor.u32 %v2038_v16, %v2034_v29  ;;  %v4166_v29 = vrot.slane %v3829_v34, 2  ;;  %v5248_v16 = vcombine.low %v2217_v11, %v6879_v3  ;;  %v5252_v3 = vld [vmem:[%s7184_s7 + $0x26] sm:$0x3] }
  0xb3   : > { %v2044_v40 = vsel %vm838_vm3, %v2039_v47, %v2043_v30  ;;  %v5392_v47 = vld [vmem:[%s7184_s7 + $0x54] sm:$0x3] }
  0xb4   : > { %5813 = vmatmul.mubr.msk.bf16.vlgmr.msra.gmra.mrb[0].mxu0 %vm687_vm2, %v6178_v41  ;;  %v5383_v41 = vld [vmem:[%s6608_s24 + $0x14] sm:$0xe] }
  0xb5   : > { %5817 = vmatpush3.bf16.msra.mxu0 %v3848_v24  ;;  %5818 = vmatprep.mubr.msk.bf16.mxu0 %vm687_vm2, %v3832_v45  ;;  %v3937_v24 = vor.u32 %v3935_v14, %v3933_v33  ;;  %v2045_v45 = vshrl.u32 %v6900_v13, 16  ;;  %v5385_v38 = vcombine.low %v5383_v41, %v6845_v35  ;;  %v4160_v14 = vrot.slane %v4158_v8, 1  ;;  %v5251_v41 = vld [vmem:[%s6649_s0 + $0x14] sm:$0xe]  ;;  %v5406_v8 = vld [vmem:[%s7184_s7 + $0x58] sm:$0x3] }
  0xb6   : > { %5675 = vmatmul.mubr.msk.bf16.vlgmr.msra.gmra.mrb[0].mxu1 %vm687_vm2, %v1793_v42  ;;  %5822 = vmatprep.subr.bf16.mxu0 %v3950_v43  ;;  %v6938_v42 = vld [vmem:[%s6649_s0 + $0x1c] sm:$0xff]  }
  0xb7   : > { %5679 = vmatpush3.bf16.msra.mxu1 %v1879_v28  ;;  %5680 = vmatprep.mubr.msk.bf16.mxu1 %vm687_vm2, %v6183_v46  ;;  %v4012_v28 = vrot.slane %v6834_v60, 1  ;;  %v3942_v32 = vsel %vm838_vm3, %v3937_v24, %v3941_v12  ;;  %v2049_v46 = vshll.u32 %v6930_v0, 16  ;;  %v2143_v58 = vshll.u32 %v6938_v42, 16  ;;  %v6198_v12 = vld [vmem:[%s6608_s24 + $0x10] ss:$0 sps:$4 sm:$0x33]  }
  0xb8   : > { %5684 = vmatprep.subr.bf16.mxu1 %v1958_v51  ;;  %v2047_v61 = vor.u32 %v2045_v45, %v2043_v30  ;;  %v4084_v1 = vrot.slane %v5385_v38, 1  ;;  %v4087_v24 = vrot.slane %v6888_v44, 1  ;;  %v2223_v30 = vrot.slane %v5248_v16, 1  ;;  %v5401_v38 = vld [vmem:[%s7184_s7 + $0x56] sm:$0x3] }
  0xb9   : > { %v4013_v21 = vsel %vm1029_vm4, %v4011_v39, %v4012_v28  ;;  %v2051_v63 = vrot.slane %v2049_v46, 1  ;;  %v2145_v33 = vrot.slane %v2143_v58, 1  ;;  %v4015_v48 = vsel %vm1029_vm4, %v4012_v28, %v4014_v59  ;;  %v5256_v59 = vld [vmem:[%s7184_s7 + $0x28] sm:$0x3] }
  0xba   : > { %v4086_v49 = vsel %vm1029_vm4, %v4084_v1, %v4085_v2  ;;  %v4088_v60 = vsel %vm1029_vm4, %v4085_v2, %v4087_v24  ;;  %v4170_v34 = vshrl.u32 %v6198_v12, 16  ;;  %v2226_v46 = vrot.slane %v6930_v0, 1 }
  0xbb   : > { %v2052_v6 = vsel %vm838_vm3, %v2047_v61, %v2051_v63  ;;  %v6200_v63 = vld [vmem:[%s6731_s22] sm:$0xff]   ;;  %v2370_v1 = vshrl.u32 %v5248_v16, 16  ;;  %v2373_v0 = vshll.u32 %v5248_v16, 16 }
  0xc0   : > { %5819 = vmatmul.mubr.msk.bf16.vlgmr.msra.gmra.mrb[0].mxu0 %vm687_vm2, %v3840_v20  ;;  %v4185_v20 = vand.u32 %v5388_v5, %v6355_v4  ;;  %v2372_v5 = vrot.slane %v2370_v1, 1  ;;  %v6220_v1 = vld [vmem:[%s6396_s29 + $0x4] sm:$0xf] }
  0xc1   : > { %5823 = vmatpush3.bf16.msra.mxu0 %v3950_v43  ;;  %5824 = vmatprep.mubr.msk.bf16.mxu0 %vm687_vm2, %v3934_v9  ;;  %v2138_v43 = vshll.u32 %v5242_v31, 16 }
  0xc2   : > { %5681 = vmatmul.mubr.msk.bf16.vlgmr.msra.gmra.mrb[0].mxu1 %vm687_vm2, %v6184_v7  ;;  %5828 = vmatprep.subr.bf16.mxu0 %v4023_v52  ;;  %v6961_v7 = vld [vmem:[%s6649_s0 + $0x24] ss:$0 sps:$4 sm:$0x11]  }
  0xc3   : > { %5685 = vmatpush3.bf16.msra.mxu1 %v1958_v51  ;;  %5686 = vmatprep.mubr.msk.bf16.mxu1 %vm687_vm2, %v6188_v50  ;;  %v2136_v51 = vshrl.u32 %v5242_v31, 16  ;;  %v2140_v54 = vrot.slane %v2138_v43, 1  ;;  %v2235_v50 = vand.u32 %v5247_v56, %v6355_v4  ;;  %v2151_v57 = vshll.u32 %v6961_v7, 16  ;;  %v4397_v56 = vld [vmem:[%s6731_s22] sm:$0xf] }
  0xc4   : > { %5690 = vmatprep.subr.bf16.mxu1 %v2060_v55  ;;  %v4173_v31 = vshll.u32 %v6198_v12, 16 }
  0xc5   : > { %v2141_v35 = vor.u32 %v2140_v54, %v2136_v51  ;;  %v2153_v39 = vrot.slane %v2151_v57, 1  ;;  %v2297_v54 = vrot.slane %v6938_v42, 1 }
  0xc7   : > { %v2146_v9 = vsel %vm838_vm3, %v2141_v35, %v2145_v33  ;;  %v2375_v35 = vrot.slane %v2373_v0, 2 }
  0xcc   : > { %5825 = vmatmul.mubr.msk.bf16.vlgmr.msra.gmra.mrb[0].mxu0 %vm687_vm2, %v3942_v32  ;;  %v4263_v32 = vand.u32 %v5392_v47, %v6355_v4 }
  0xcd   : > { %5829 = vmatpush3.bf16.msra.mxu0 %v4023_v52  ;;  %5830 = vmatprep.mubr.msk.bf16.mxu0 %vm687_vm2, %v4013_v21  ;;  %v4161_v52 = vshll.u32 %v6908_v15, 16  ;;  %v4165_v15 = vrot.slane %v3833_v53, 1  ;;  %v2224_v53 = vrot.slane %v6900_v13, 1  ;;  %v4172_v21 = vrot.slane %v4170_v34, 1  ;;  %v5260_v13 = vld [vmem:[%s7184_s7 + $0x2a] sm:$0x3] }
  0xce   : > { %5687 = vmatmul.mubr.msk.bf16.vlgmr.msra.gmra.mrb[0].mxu1 %vm687_vm2, %v6189_v17  ;;  %5834 = vmatprep.subr.bf16.mxu0 %v4096_v37 }
  0xcf   : > { %5691 = vmatpush3.bf16.msra.mxu1 %v2060_v55  ;;  %5692 = vmatprep.mubr.msk.bf16.mxu1 %vm687_vm2, %v2044_v40  ;;  %v2147_v55 = vshrl.u32 %v6938_v42, 16  ;;  %v4163_v22 = vrot.slane %v4161_v52, 2  ;;  %v4167_v62 = vor.u32 %v4166_v29, %v4165_v15  ;;  %v2225_v36 = vsel %vm1029_vm4, %v2223_v30, %v2224_v53 }
  0xd0   : > { %5696 = vmatprep.subr.bf16.mxu1 %v2162_v10  ;;  %v4175_v40 = vrot.slane %v4173_v31, 2  ;;  %v2227_v61 = vsel %vm1029_vm4, %v2224_v53, %v2226_v46  ;;  %v2397_v42 = vand.u32 %v5256_v59, %v6355_v4  ;;  %v2475_v29 = vand.u32 %v5260_v13, %v6355_v4  ;;  %v6204_v31 = vld [vmem:[%s6731_s22 + $0x1c] sm:$0xff]  }
  0xd1   : > { %v2149_v25 = vor.u32 %v2147_v55, %v2145_v33  ;;  %v4164_v28 = vor.u32 %v4163_v22, %v4160_v14  ;;  %v2377_v33 = vrot.slane %v2045_v45, 1  ;;  %v6203_v45 = vld [vmem:[%s6731_s22 + $0x14] sm:$0xff]   ;;  %v4444_v55 = vand.u32 %v5406_v8, %v6355_v4  ;;  %v7041_v14 = vld [vmem:[%s6731_s22 + $0x8] sm:$0xff]   ;;  %v2609_v59 = vld [vmem:[%s6396_s29] sm:$0xf] }
  0xd2   : > { %v4176_v43 = vor.u32 %v4175_v40, %v4172_v21  ;;  %v7072_v21 = vld [vmem:[%s6731_s22 + $0x1c] sm:$0xff]   ;;  %v5275_v0 = vcombine.low %v2609_v59, %v6220_v1 }
  0xd3   : > { %v2154_v44 = vsel %vm838_vm3, %v2149_v25, %v2153_v39  ;;  %v4168_v17 = vsel %vm1176_vm5, %v4164_v28, %v4167_v62  ;;  %v4425_v39 = vshll.u32 %v7041_v14, 16  ;;  %v5412_v28 = vld [vmem:[%s6731_s22 + $0x14] sm:$0xf] }
  0xd4   : > { %v4177_v58 = vsel %vm1176_vm5, %v4167_v62, %v4176_v43  ;;  %v7052_v62 = vld [vmem:[%s6731_s22 + $0x18] sm:$0xf]  ;;  %v2632_v8 = vshll.u32 %v5275_v0, 16 }
  0xd5   : > { %v4427_v53 = vrot.slane %v4425_v39, 1  ;;  %v5418_v34 = vcombine.low %v5412_v28, %v7052_v62  ;;  %v6221_v28 = vld [vmem:[%s6396_s29 + $0x10] ss:$0 sps:$4 sm:$0x11]  }
  0xd6   : > { %v2634_v13 = vrot.slane %v2632_v8, 1 }
  0xd7   : > { %v4522_v40 = vshll.u32 %v5418_v34, 16  ;;  %v4520_v46 = vshrl.u32 %v5418_v34, 16 }
  0xd8   : > { %5831 = vmatmul.mubr.msk.bf16.vlgmr.msra.gmra.mrb[0].mxu0 %vm687_vm2, %v4015_v48  ;;  %v2378_v48 = vrot.slane %v2041_v18, 2 }
  0xd9   : > { %5835 = vmatpush3.bf16.msra.mxu0 %v4096_v37  ;;  %5836 = vmatprep.mubr.msk.bf16.mxu0 %vm687_vm2, %v4086_v49  ;;  %v2308_v37 = vand.u32 %v5252_v3, %v6355_v4  ;;  %v6205_v49 = vld [vmem:[%s6649_s0 + $0x10] ss:$0 sps:$4 sm:$0x33]  }
  0xda   : > { %5693 = vmatmul.mubr.msk.bf16.vlgmr.msra.gmra.mrb[0].mxu1 %vm687_vm2, %v2052_v6  ;;  %5840 = vmatprep.subr.bf16.mxu0 %v4185_v20  ;;  %v7025_v6 = vld [vmem:[%s6731_s22 + $0x4] sm:$0xf]  ;;  %v2379_v11 = vor.u32 %v2378_v48, %v2377_v33  ;;  %v2385_v57 = vshll.u32 %v6205_v49, 16  ;;  %v7062_v3 = vld [vmem:[%s6731_s22 + $0x10] ss:$0 sps:$4 sm:$0x11]  }
  0xdb   : > { %5697 = vmatpush3.bf16.msra.mxu1 %v2162_v10  ;;  %5698 = vmatprep.mubr.msk.bf16.mxu1 %vm687_vm2, %v2146_v9  ;;  %v5253_v10 = vcombine.low %v5251_v41, %v6913_v26  ;;  %v4342_v26 = vand.u32 %v5401_v38, %v6355_v4  ;;  %v5407_v52 = vcombine.low %v4397_v56, %v7025_v6  ;;  %v6201_v9 = vld [vmem:[%s6731_s22 + $0x8] sm:$0xff]   ;;  %v4433_v43 = vshll.u32 %v7062_v3, 16  ;;  %v6214_v56 = vld [vmem:[%s6396_s29 + $0x14] sm:$0xff]  }
  0xdc   : > { %5702 = vmatprep.subr.bf16.mxu1 %v2235_v50  ;;  %v2387_v24 = vrot.slane %v2385_v57, 2  ;;  %v4524_v38 = vrot.slane %v4522_v40, 1  ;;  %v5428_v57 = vld [vmem:[%s7184_s7 + $0x5e] sm:$0x3] }
  0xdd   : > { %v2296_v51 = vrot.slane %v5253_v10, 1  ;;  %v4420_v22 = vshll.u32 %v5407_v52, 16  ;;  %v4418_v12 = vshrl.u32 %v5407_v52, 16  ;;  %v4429_v10 = vshrl.u32 %v7041_v14, 16 }
  0xde   : > { %v4531_v52 = vshrl.u32 %v7072_v21, 16 }
  0xdf   : > { %v2298_v2 = vsel %vm1029_vm4, %v2296_v51, %v2297_v54  ;;  %v4422_v25 = vrot.slane %v4420_v22, 1  ;;  %v4527_v51 = vshll.u32 %v7072_v21, 16 }
  0xe1   : > { %v4423_v30 = vor.u32 %v4422_v25, %v4418_v12  ;;  %v5427_v25 = vld [vmem:[%s6731_s22 + $0x14] sm:$0xe] }
  0xe4   : > { %5837 = vmatmul.mubr.msk.bf16.vlgmr.msra.gmra.mrb[0].mxu0 %vm687_vm2, %v4088_v60  ;;  %v5417_v60 = vld [vmem:[%s7184_s7 + $0x5a] sm:$0x3] }
  0xe5   : > { %5841 = vmatpush3.bf16.msra.mxu0 %v4185_v20  ;;  %5842 = vmatprep.mubr.msk.bf16.mxu0 %vm687_vm2, %v4168_v17  ;;  %v2299_v20 = vrot.slane %v6961_v7, 1  ;;  %v2382_v7 = vshrl.u32 %v6205_v49, 16  ;;  %v4546_v17 = vand.u32 %v5417_v60, %v6355_v4 }
  0xe6   : > { %5699 = vmatmul.mubr.msk.bf16.vlgmr.msra.gmra.mrb[0].mxu1 %vm687_vm2, %v2154_v44  ;;  %5846 = vmatprep.subr.bf16.mxu0 %v4263_v32  ;;  %v5269_v44 = vld [vmem:[%s7184_s7 + $0x2c] sm:$0x3] }
  0xe7   : > { %5703 = vmatpush3.bf16.msra.mxu1 %v2235_v50  ;;  %5704 = vmatprep.mubr.msk.bf16.mxu1 %vm687_vm2, %v2225_v36  ;;  %v2376_v50 = vor.u32 %v2375_v35, %v2372_v5  ;;  %v2300_v18 = vsel %vm1029_vm4, %v2297_v54, %v2299_v20  ;;  %v2384_v16 = vrot.slane %v2382_v7, 1  ;;  %v4428_v36 = vsel %vm838_vm3, %v4423_v30, %v4427_v53  ;;  %v7092_v5 = vld [vmem:[%s6731_s22 + $0x24] ss:$0 sps:$4 sm:$0x11]   ;;  %v5274_v35 = vld [vmem:[%s7184_s7 + $0x2e] sm:$0x3] }
  0xe8   : > { %5708 = vmatprep.subr.bf16.mxu1 %v2308_v37  ;;  %v2554_v41 = vand.u32 %v5269_v44, %v6355_v4  ;;  %v4431_v54 = vor.u32 %v4429_v10, %v4427_v53  ;;  %v4601_v20 = vld [vmem:[%s6731_s22] sm:$0xe]  ;;  %v2656_v49 = vand.u32 %v5274_v35, %v6355_v4  ;;  %v4608_v7 = vrot.slane %v7041_v14, 1 }
  0xe9   : > { %v2380_v15 = vsel %vm1176_vm5, %v2376_v50, %v2379_v11  ;;  %v2388_v47 = vor.u32 %v2387_v24, %v2384_v16  ;;  %v5424_v50 = vcombine.low %v4601_v20, %v7025_v6  ;;  %v4692_v16 = vand.u32 %v5428_v57, %v6355_v4  ;;  %v5432_v44 = vld [vmem:[%s7184_s7 + $0x60] sm:$0x3] }
  0xea   : > { %v4610_v30 = vrot.slane %v7062_v3, 1  ;;  %v4683_v40 = vrot.slane %v7092_v5, 1 }
  0xeb   : > { %v4757_v3 = vshll.u32 %v5424_v50, 16 }
  0xf0   : > { %5843 = vmatmul.mubr.msk.bf16.vlgmr.msra.gmra.mrb[0].mxu0 %vm687_vm2, %v4177_v58  ;;  %v4435_v58 = vrot.slane %v4433_v43, 1 }
  0xf1   : > { %5847 = vmatpush3.bf16.msra.mxu0 %v4263_v32  ;;  %5848 = vmatprep.mubr.msk.bf16.mxu0 %vm687_vm2, %v6200_v63  ;;  %v2389_v32 = vsel %vm1176_vm5, %v2379_v11, %v2388_v47  ;;  %v4529_v63 = vrot.slane %v4527_v51, 1  ;;  %v2630_v11 = vshrl.u32 %v5275_v0, 16  ;;  %v5429_v47 = vcombine.low %v5427_v25, %v7052_v62 }
  0xf2   : > { %5705 = vmatmul.mubr.msk.bf16.vlgmr.msra.gmra.mrb[0].mxu1 %vm687_vm2, %v2227_v61  ;;  %5852 = vmatprep.subr.bf16.mxu0 %v4342_v26  ;;  %v4525_v61 = vor.u32 %v4524_v38, %v4520_v46  ;;  %v4781_v62 = vand.u32 %v5432_v44, %v6355_v4 }
  0xf3   : > { %5709 = vmatpush3.bf16.msra.mxu1 %v2308_v37  ;;  %5710 = vmatprep.mubr.msk.bf16.mxu1 %vm687_vm2, %v2298_v2  ;;  %v6209_v37 = vld [vmem:[%s6396_s29] sm:$0xff]   ;;  %v4436_v2 = vsel %vm838_vm3, %v4431_v54, %v4435_v58  ;;  %v2635_v22 = vor.u32 %v2634_v13, %v2630_v11  ;;  %v4680_v34 = vrot.slane %v5429_v47, 1 }
  0xf4   : > { %5714 = vmatprep.subr.bf16.mxu1 %v2397_v42  ;;  %v4530_v48 = vsel %vm838_vm3, %v4525_v61, %v4529_v63 }
  0xfc   : > { %5849 = vmatmul.mubr.msk.bf16.vlgmr.msra.gmra.mrb[0].mxu0 %vm687_vm2, %v6201_v9  ;;  %v4535_v9 = vshll.u32 %v7092_v5, 16 }
  0xfd   : > { %5853 = vmatpush3.bf16.msra.mxu0 %v4342_v26  ;;  %5854 = vmatprep.mubr.msk.bf16.mxu0 %vm687_vm2, %v6203_v45  ;;  %v5423_v26 = vld [vmem:[%s7184_s7 + $0x5c] sm:$0x3] }
  0xfe   : > { %5711 = vmatmul.mubr.msk.bf16.vlgmr.msra.gmra.mrb[0].mxu1 %vm687_vm2, %v2300_v18  ;;  %5858 = vmatprep.subr.bf16.mxu0 %v4444_v55  ;;  %v4619_v33 = vand.u32 %v5423_v26, %v6355_v4  ;;  %v4533_v18 = vor.u32 %v4531_v52, %v4529_v63  ;;  %v4537_v45 = vrot.slane %v4535_v9, 1  ;;  %v4762_v4 = vrot.slane %v4425_v39, 2 }
  0xff   : > { %5715 = vmatpush3.bf16.msra.mxu1 %v2397_v42  ;;  %5716 = vmatprep.mubr.msk.bf16.mxu1 %vm687_vm2, %v2380_v15  ;;  %v6210_v42 = vld [vmem:[%s6396_s29 + $0x8] sm:$0xff]   ;;  %v2639_v15 = vrot.slane %v2637_v19, 1  ;;  %v2645_v19 = vshll.u32 %v6221_v28, 16 }
 0x100   : > { %5720 = vmatprep.subr.bf16.mxu1 %v2475_v29  ;;  %v4538_v6 = vsel %vm838_vm3, %v4533_v18, %v4537_v45 }
 0x101   : > { %v2640_v12 = vsel %vm838_vm3, %v2635_v22, %v2639_v15  ;;  %v2643_v53 = vor.u32 %v2641_v23, %v2639_v15  ;;  %v2647_v60 = vrot.slane %v2645_v19, 1 }
 0x108   : > { %5855 = vmatmul.mubr.msk.bf16.vlgmr.msra.gmra.mrb[0].mxu0 %vm687_vm2, %v6204_v31  ;;  %v4681_v31 = vrot.slane %v7072_v21, 1  ;;  %v4761_v21 = vrot.slane %v4429_v10, 1 }
 0x109   : > { %5859 = vmatpush3.bf16.msra.mxu0 %v4444_v55  ;;  %5860 = vmatprep.mubr.msk.bf16.mxu0 %vm687_vm2, %v4428_v36  ;;  %v4607_v55 = vrot.slane %v5424_v50, 1  ;;  %v4754_v36 = vshrl.u32 %v5424_v50, 16 }
 0x10a   : > { %5717 = vmatmul.mubr.msk.bf16.vlgmr.msra.gmra.mrb[0].mxu1 %vm687_vm2, %v2389_v32  ;;  %5864 = vmatprep.subr.bf16.mxu0 %v4546_v17  ;;  %v4611_v32 = vsel %vm1029_vm4, %v4608_v7, %v4610_v30  ;;  %v4682_v27 = vsel %vm1029_vm4, %v4680_v34, %v4681_v31  ;;  %v4763_v46 = vor.u32 %v4762_v4, %v4761_v21 }
 0x10b   : > { %5721 = vmatpush3.bf16.msra.mxu1 %v2475_v29  ;;  %5722 = vmatprep.mubr.msk.bf16.mxu1 %vm687_vm2, %v6209_v37  ;;  %v6215_v29 = vld [vmem:[%s6396_s29 + $0x1c] sm:$0xff]   ;;  %v4609_v24 = vsel %vm1029_vm4, %v4607_v55, %v4608_v7  ;;  %v4756_v23 = vrot.slane %v4754_v36, 1  ;;  %v4759_v37 = vrot.slane %v4757_v3, 2  ;;  %v4684_v38 = vsel %vm1029_vm4, %v4681_v31, %v4683_v40  ;;  %s5126_s29 = sshll.u32 %s7216_s30, 2 }
 0x10c   : > { %5726 = vmatprep.subr.bf16.mxu1 %v2554_v41 }
 0x10d   : > { %v4760_v43 = vor.u32 %v4759_v37, %v4756_v23 }
 0x10f   : > { %v4764_v58 = vsel %vm1176_vm5, %v4760_v43, %v4763_v46 }
 0x114   : > { %5861 = vmatmul.mubr.msk.bf16.vlgmr.msra.gmra.mrb[0].mxu0 %vm687_vm2, %v4436_v2  ;;  %v5436_v2 = vld [vmem:[%s7185_s8] ss:$0 sm:$0xff] }
 0x115   : > { %5865 = vmatpush3.bf16.msra.mxu0 %v4546_v17  ;;  %5866 = vmatprep.mubr.msk.bf16.mxu0 %vm687_vm2, %v4530_v48  ;;  %v2648_v17 = vsel %vm838_vm3, %v2643_v53, %v2647_v60 }
 0x116   : > { %5723 = vmatmul.mubr.msk.bf16.vlgmr.msra.gmra.mrb[0].mxu1 %vm687_vm2, %v6210_v42  ;;  %5870 = vmatprep.subr.bf16.mxu0 %v4619_v33 }
 0x117   : > { %5727 = vmatpush3.bf16.msra.mxu1 %v2554_v41  ;;  %5728 = vmatprep.mubr.msk.bf16.mxu1 %vm687_vm2, %v6214_v56  ;;  %v6219_v41 = vld [vmem:[%s6731_s22 + $0x10] ss:$0 sps:$4 sm:$0x33]   ;;  %s5127_s22 = sshll.u32 %s7202_s10, 7 }
 0x118   : > { %5732 = vmatprep.subr.bf16.mxu1 %v2656_v49  ;;  %v4766_v51 = vshrl.u32 %v6219_v41, 16  ;;  %v4769_v54 = vshll.u32 %v6219_v41, 16  ;;  %s661_s20 = sadd.s32 %s5127_s22, %s5126_s29 }
 0x119   : > { %s5128_s21 = sshll.u32 %s661_s20, 2 }
 0x11a   : > { %v4768_v14 = vrot.slane %v4766_v51, 1  ;;  %v4771_v39 = vrot.slane %v4769_v54, 2  ;;  %s663_s18 = scalar_lea.vmem %s7186_s9, %s5128_s21 }
 0x11c   : > { %v4772_v10 = vor.u32 %v4771_v39, %v4768_v14 }
 0x11e   : > { %v4773_v59 = vsel %vm1176_vm5, %v4763_v46, %v4772_v10 }
 0x120   : > { %5867 = vmatmul.mubr.msk.bf16.vlgmr.msra.gmra.mrb[0].mxu0 %vm687_vm2, %v4538_v6 }
 0x121   : > { %5871 = vmatpush3.bf16.msra.mxu0 %v4619_v33  ;;  %5872 = vmatprep.mubr.msk.bf16.mxu0 %vm687_vm2, %v4609_v24 }
 0x122   : > { %5729 = vmatmul.mubr.msk.bf16.vlgmr.msra.gmra.mrb[0].mxu1 %vm687_vm2, %v6215_v29  ;;  %5876 = vmatprep.subr.bf16.mxu0 %v4692_v16 }
 0x123   : > { %5733 = vmatpush3.bf16.msra.mxu1 %v2656_v49  ;;  %5734 = vmatprep.mubr.msk.bf16.mxu1 %vm687_vm2, %v2640_v12 }
 0x12c   : > { %5873 = vmatmul.mubr.msk.bf16.vlgmr.msra.gmra.mrb[0].mxu0 %vm687_vm2, %v4611_v32 }
 0x12d   : > { %5877 = vmatpush3.bf16.msra.mxu0 %v4692_v16  ;;  %5878 = vmatprep.mubr.msk.bf16.mxu0 %vm687_vm2, %v4682_v27 }
 0x12e   : > { %5735 = vmatmul.mubr.msk.bf16.vlgmr.msra.gmra.mrb[0].mxu1 %vm687_vm2, %v2648_v17  ;;  %5882 = vmatprep.subr.bf16.mxu0 %v4781_v62 }
 0x138   : > { %5879 = vmatmul.mubr.msk.bf16.vlgmr.msra.gmra.mrb[0].mxu0 %vm687_vm2, %v4684_v38 }
 0x139   : > { %5883 = vmatpush3.bf16.msra.mxu0 %v4781_v62  ;;  %5884 = vmatprep.mubr.msk.bf16.mxu0 %vm687_vm2, %v4764_v58 }
 0x144   : > { %5885 = vmatmul.mubr.msk.bf16.vlgmr.msra.gmra.mrb[0].mxu0 %vm687_vm2, %v4773_v59 }
 0x201   : > { %v5736_v61 = vpop.f32.mrb[0].mxu1 }
 0x202   : > { %v2692_v63 = vpop.f32.mrb[1].mxu1 }
 0x203   : > { %v5737_v26 = vpop.f32.mrb[2].mxu1 }
 0x204   : > { %v2695_v1 = vpop.f32.mrb[3].mxu1 }
 0x217   : > { %v5886_v0 = vpop.f32.mrb[0].mxu0 }
 0x218   : > { %v5888_v42 = vadd.f32 %v5886_v0, %v5736_v61  ;;  %v4817_v5 = vpop.f32.mrb[1].mxu0 }
 0x219   : > { %v5889_v35 = vadd.f32 %v4817_v5, %v2692_v63  ;;  %v5887_v33 = vpop.f32.mrb[2].mxu0 }
 0x21a   : > { %v4845_v48 = vadd.f32 %v5888_v42, %v5436_v2  ;;  %v5890_v56 = vadd.f32 %v5887_v33, %v5737_v26  ;;  %v4820_v20 = vpop.f32.mrb[3].mxu0 }
 0x21b   : > { %v4843_v49 = vadd.f32 %v5889_v35, %v5436_v2  ;;  %v5891_v8 = vadd.f32 %v4820_v20, %v2695_v1 }
 0x21c   : > { %v4849_v52 = vmax.f32 %v4845_v48, 0.0  ;;  %v4846_v9 = vadd.f32 %v5890_v56, %v5436_v2 }
 0x21d   : > { %v4847_v50 = vmax.f32 %v4843_v49, 0.0  ;;  %v4844_v11 = vadd.f32 %v5891_v8, %v5436_v2 }
 0x21e   : > { %v5445_v13 = vpack.c.bf16 %v4849_v52, %v4849_v52  ;;  %v4850_v18 = vmax.f32 %v4846_v9, 0.0 }
 0x21f   : > { %v5443_v45 = vpack.c.bf16 %v4847_v50, %v4847_v50  ;;  %v4848_v55 = vmax.f32 %v4844_v11, 0.0 }
 0x220   : > { %4870 = vst.msk [vmem:[%s663_s18 + $0x8] sm:$0xf] %vm4867_vm6, %v5445_v13  ;;  %v5446_v7 = vpack.c.bf16 %v4850_v18, %v4850_v18 }
 0x221   : > { %4868 = vst.msk [vmem:[%s663_s18] sm:$0xf] %vm4867_vm6, %v5443_v45  ;;  %v5444_v57 = vpack.c.bf16 %v4848_v55, %v4848_v55 }
 0x222   : > { %4871 = vst.msk [vmem:[%s663_s18 + $0xc] sm:$0xf] %vm4867_vm6, %v5446_v7 }
 0x223   : > { %4869 = vst.msk [vmem:[%s663_s18 + $0x4] sm:$0xf] %vm4867_vm6, %v5444_v57 }
 0x224 PF: > { %s19_s13 = sadd.s32 1, %s6260_s13   ;;  %s7191_s30 = smov %s6252_s11 }
 0x225   : > { %p16_p0 = scmp.ge.s32.totalorder %s19_s13, 66   ;;  %s7192_s10 = smov %s6256_s12 }
 0x226   : > { %s7193_s11 = smov %s7196_s14  ;;  %s7194_s12 = smov %s7200_s15 }
 0x227   :  { %18 = sbr.rel (!%p16_p0) target bundleno = 3 (0x3), region = 159 }

// kernel: _lambda_.15
= control target key start
LH: loop header
LB: loop body
LE: loop exit
PB: predicated region body
PF: predicated region fallthrough
CT: control target
= control target key end

     0   :  { %s697_s12 = smov 0   ;;  %s699_s13 = smov 0   ;;  %s817_s0 = inlined_call_operand.vmem [shape: bf16[2,33,2,17,16], index: 0, kind: input, shape index: {}, may-alias: {0,1,2}]   ;;  %s818_s1 = inlined_call_operand.vmem [shape: bf16[2,33,2,17,16], index: 1, kind: input, shape index: {}, may-alias: {0,1,2}]   ;;  %s819_s2 = inlined_call_operand.vmem [shape: bf16[2,33,2,17,16], index: 2, kind: input, shape index: {}, may-alias: {0,1,2}]   ;;  %s820_s3 = inlined_call_operand.vmem [shape: bf16[2,16,16,16], index: 3, kind: output, shape index: {}]  }
   0x1   :  { %s701_s14 = smov 0   ;;  %s703_s15 = smov 0  }
   0x2   :  { %s705_s16 = smov 0  }
   0x3 LB: > { %s22_s17 = sadd.s32 1, %s667_s14  ;;  %s25_s18 = sadd.s32 1, %s671_s15  ;;  %s675_s16 = sphi %s705_s16, %s13_s16   ;;  %s671_s15 = sphi %s703_s15, %s827_s15   ;;  %s667_s14 = sphi %s701_s14, %s826_s14   ;;  %s663_s13 = sphi %s699_s13, %s825_s13   ;;  %s659_s12 = sphi %s697_s12, %s824_s12  }
   0x4   : > { %p23_p0 = scmp.ge.s32.totalorder %s22_s17, 16  ;;  %p575_p1 = scmp.ge.s32.totalorder %s675_s16, 1 }
   0x5   : > { %p209_p2 = scmp.lt.s32.totalorder %s675_s16, 33 }
   0x6   : > { %s829_s17 = smov (%p23_p0, %s22_s17), 0  ;;  %s831_s18 = smov (!%p23_p0, %s25_s18), %s671_s15 }
   0x7   : > { %p210_p3 = pnand %p575_p1, %p209_p2  ;;  %p27_p4 = scmp.ge.s32.totalorder %s831_s18, 2 }
   0x8   : > { %s730_s19 = sshll.u32 (!%p210_p3), %s659_s12, 1  ;;  %p265_p5 = scmp.lt.s32.totalorder (!%p210_p3), %s663_s13, 1  ;;  %vm318_vm0 = vsmask.f32 (!%p210_p3), 3328  ;;  %vm319_vm1 = vsmask.f32 (!%p210_p3), 7440 }
   0x9   : > { %s833_s18 = smov (%p27_p4, %s831_s18), 0  ;;  %213 = sbr.rel (%p210_p3) target bundleno = 49 (0x31), region = 32 }
   0xa   : > { %p267_p6 = scmp.lt.s32.totalorder (!%p210_p3), %s730_s19, 32  ;;  %s276_s20 = sadd.s32 (!%p210_p3), 1, %s730_s19  ;;  %vm769_vm2 = vmor (!%p210_p3), %vm318_vm0, %vm319_vm1  ;;  %vm425_vm3 = vcmask (!%p210_p3), 125952  }
   0xb   : > { %p279_p7 = scmp.lt.s32.totalorder (!%p210_p3), %s276_s20, 32  ;;  %s289_s24 = sadd.s32 (!%p210_p3), 2, %s730_s19 }
   0xc   : > { %p745_p8 = scmp.lt.s32.totalorder (!%p210_p3), %s289_s24, 32  ;;  %p303_p9 = scmp.lt.s32.totalorder (!%p210_p3), %s659_s12, 15 }
  0x10   : > { %s835_s13 = smov (!%p265_p5, %s663_s13), 1  ;;  %s837_s20 = smov (!%p279_p7, %s276_s20), 32 }
  0x11   : > { %s268_s21 = scalar_select %p267_p6, %s730_s19, 32 }
  0x12   : > { %s738_s22 = smul.u32 198, %s835_s13  ;;  %s839_s24 = smov (!%p745_p8, %s289_s24), 32 }
  0x13   : > { %s593_s23 = smul.u32 6, %s268_s21  ;;  %s841_s12 = smov (!%p303_p9, %s659_s12), 15 }
  0x14   : > { %s595_s27 = smul.u32 6, %s837_s20 }
  0x15   : > { %s271_s25 = sadd.s32 %s738_s22, %s593_s23  ;;  %s596_s10 = smul.u32 6, %s839_s24 }
  0x16   : > { %s577_s26 = sshll.u32 %s271_s25, 2  ;;  %s283_s5 = sadd.s32 %s595_s27, %s738_s22 }
  0x17   : > { %s273_s30 = scalar_lea.vmem %s817_s0, %s577_s26  ;;  %s579_s6 = sshll.u32 %s283_s5, 2 }
  0x18   : > { %v310_v0 = vld [vmem:[%s273_s30] sm:$0xf]  ;;  %v311_v1 = vld [vmem:[%s273_s30 + $0x4] sm:$0xf]  ;;  %v585_v2 = vld [vmem:[%s273_s30 + $0xc] sm:$0xf]  ;;  %s753_s9 = scalar_lea.vmem %s818_s1, %s579_s6  ;;  %s296_s11 = sadd.s32 %s596_s10, %s738_s22 }
  0x19   : > { %v322_v3 = vshrl.u32 %v310_v0, 16  ;;  %v317_v4 = vld [vmem:[%s273_s30 + $0x8] sm:$0x1]  ;;  %v325_v5 = vshll.u32 %v310_v0, 16  ;;  %v331_v6 = vshll.u32 %v311_v1, 16  ;;  %v335_v7 = vshrl.u32 %v311_v1, 16 }
  0x1a   : > { %v341_v9 = vshll.u32 %v317_v4, 16  ;;  %v349_v10 = vld [vmem:[%s753_s9] sm:$0xf]  ;;  %v350_v14 = vld [vmem:[%s753_s9 + $0x4] sm:$0xf]  ;;  %v315_v16 = vmax.bf16 %v585_v2, %v310_v0  ;;  %s581_s19 = sshll.u32 %s296_s11, 2 }
  0x1b   : > { %v324_v8 = vrot.slane %v322_v3, 4  ;;  %v327_v11 = vrot.slane %v325_v5, 5  ;;  %v333_v12 = vrot.slane %v331_v6, 5  ;;  %v337_v13 = vrot.slane %v335_v7, 4  ;;  %v586_v15 = vld [vmem:[%s273_s30 + $0x10] sm:$0xf]  ;;  %s776_s22 = scalar_lea.vmem %s819_s2, %s581_s19 }
  0x1c   : > { %v360_v17 = vshrl.u32 %v349_v10, 16  ;;  %v363_v18 = vshll.u32 %v349_v10, 16  ;;  %v343_v20 = vrot.slane %v341_v9, 5  ;;  %v369_v21 = vshll.u32 %v350_v14, 16  ;;  %v358_v23 = vld [vmem:[%s753_s9 + $0x8] sm:$0x1] }
  0x1d   : > { %v328_v19 = vor.u32 %v327_v11, %v324_v8  ;;  %v338_v22 = vor.u32 %v337_v13, %v333_v12  ;;  %v373_v27 = vshrl.u32 %v350_v14, 16  ;;  %v379_v28 = vshll.u32 %v358_v23, 16  ;;  %v387_v36 = vld [vmem:[%s776_s22] sm:$0xf]  ;;  %v388_v37 = vld [vmem:[%s776_s22 + $0x4] sm:$0xf] }
  0x1e   : > { %v362_v25 = vrot.slane %v360_v17, 4  ;;  %v365_v26 = vrot.slane %v363_v18, 5  ;;  %v371_v30 = vrot.slane %v369_v21, 5  ;;  %v316_v31 = vmax.bf16 %v586_v15, %v311_v1  ;;  %v587_v44 = vld [vmem:[%s753_s9 + $0xc] sm:$0xf]  ;;  %s582_s23 = sshll.u32 %s841_s12, 1 }
  0x1f   : > { %v329_v29 = vrot.slane %v328_v19, 4  ;;  %v339_v32 = vrot.slane %v338_v22, 4  ;;  %v375_v34 = vrot.slane %v373_v27, 4  ;;  %v381_v39 = vrot.slane %v379_v28, 5  ;;  %v396_v48 = vld [vmem:[%s776_s22 + $0x8] sm:$0x1] }
  0x20   : > { %v366_v33 = vor.u32 %v365_v26, %v362_v25  ;;  %v398_v42 = vshrl.u32 %v387_v36, 16  ;;  %v401_v43 = vshll.u32 %v387_v36, 16  ;;  %v407_v45 = vshll.u32 %v388_v37, 16  ;;  %s583_s24 = sshll.u32 %s835_s13, 5  ;;  %v588_v54 = vld [vmem:[%s753_s9 + $0x10] sm:$0xf] }
  0x21   : > { %v334_v35 = vsel %vm769_vm2, %v329_v29, %v333_v12  ;;  %v344_v38 = vsel %vm769_vm2, %v339_v32, %v343_v20  ;;  %v376_v47 = vor.u32 %v375_v34, %v371_v30  ;;  %v411_v49 = vshrl.u32 %v388_v37, 16  ;;  %s307_s25 = sadd.s32 %s583_s24, %s582_s23  ;;  %v589_v4 = vld [vmem:[%s776_s22 + $0xc] sm:$0xf]  ;;  %v590_v8 = vld [vmem:[%s776_s22 + $0x10] sm:$0xf] }
  0x22   : > { %v347_v40 = vmax.bf16 %v334_v35, %v315_v16  ;;  %v367_v41 = vrot.slane %v366_v33, 4  ;;  %v348_v46 = vmax.bf16 %v344_v38, %v316_v31  ;;  %v400_v52 = vrot.slane %v398_v42, 4  ;;  %s584_s12 = sshll.u32 %s307_s25, 2 }
  0x23   : > { %v403_v53 = vrot.slane %v401_v43, 5  ;;  %v409_v55 = vrot.slane %v407_v45, 5  ;;  %v377_v57 = vrot.slane %v376_v47, 4  ;;  %v413_v58 = vrot.slane %v411_v49, 4  ;;  %s309_s27 = scalar_lea.vmem %s820_s3, %s584_s12 }
  0x24   : > { %v351_v50 = vmax.bf16 %v349_v10, %v347_v40  ;;  %v372_v51 = vsel %vm769_vm2, %v367_v41, %v371_v30  ;;  %v352_v56 = vmax.bf16 %v350_v14, %v348_v46  ;;  %v417_v61 = vshll.u32 %v396_v48, 16 }
  0x25   : > { %v404_v60 = vor.u32 %v403_v53, %v400_v52  ;;  %v382_v63 = vsel %vm769_vm2, %v377_v57, %v381_v39  ;;  %v414_v0 = vor.u32 %v413_v58, %v409_v55 }
  0x26   : > { %v356_v59 = vmax.bf16 %v587_v44, %v351_v50  ;;  %v357_v62 = vmax.bf16 %v588_v54, %v352_v56  ;;  %v419_v3 = vrot.slane %v417_v61, 5 }
  0x27   : > { %v405_v2 = vrot.slane %v404_v60, 4  ;;  %v415_v6 = vrot.slane %v414_v0, 4 }
  0x28   : > { %v385_v1 = vmax.bf16 %v372_v51, %v356_v59  ;;  %v386_v5 = vmax.bf16 %v382_v63, %v357_v62 }
  0x29   : > { %v410_v9 = vsel %vm769_vm2, %v405_v2, %v409_v55  ;;  %v420_v12 = vsel %vm769_vm2, %v415_v6, %v419_v3 }
  0x2a   : > { %v389_v7 = vmax.bf16 %v387_v36, %v385_v1  ;;  %v390_v10 = vmax.bf16 %v388_v37, %v386_v5 }
  0x2c   : > { %v394_v11 = vmax.bf16 %v589_v4, %v389_v7  ;;  %v395_v13 = vmax.bf16 %v590_v8, %v390_v10 }
  0x2e   : > { %v423_v14 = vmax.bf16 %v410_v9, %v394_v11  ;;  %v424_v15 = vmax.bf16 %v420_v12, %v395_v13 }
  0x30   : > { %426 = vst.msk [vmem:[%s309_s27] sm:$0xf] %vm425_vm3, %v423_v14  ;;  %427 = vst.msk [vmem:[%s309_s27 + $0x4] sm:$0xf] %vm425_vm3, %v424_v15 }
  0x31 PF: > { %s13_s16 = sadd.s32 1, %s675_s16   ;;  %s824_s12 = smov %s667_s14 }
  0x32   : > { %p10_p10 = scmp.ge.s32.totalorder %s13_s16, 34   ;;  %s825_s13 = smov %s671_s15 }
  0x33   : > { %s826_s14 = smov %s829_s17  ;;  %s827_s15 = smov %s833_s18 }
  0x34   :  { %12 = sbr.rel (!%p10_p10) target bundleno = 3 (0x3), region = 71 }

// kernel: _lambda_.16
= control target key start
LH: loop header
LB: loop body
LE: loop exit
PB: predicated region body
PF: predicated region fallthrough
CT: control target
= control target key end

     0   :  { %s1372_s18 = smov 0   ;;  %s1374_s19 = smov 0   ;;  %s1525_s0 = inlined_call_operand.vmem [shape: bf16[2,18,1,18,16], index: 0, kind: input, shape index: {}, may-alias: {0,1,2}]   ;;  %s1526_s1 = inlined_call_operand.vmem [shape: bf16[2,18,1,18,16], index: 1, kind: input, shape index: {}, may-alias: {0,1,2}]   ;;  %s1527_s2 = inlined_call_operand.vmem [shape: bf16[2,18,1,18,16], index: 2, kind: input, shape index: {}, may-alias: {0,1,2}]   ;;  %s1528_s3 = inlined_call_operand.vmem [shape: bf16[9,16,16], index: 3, kind: input, shape index: {}]   ;;  %s1529_s4 = inlined_call_operand.vmem [shape: f32[1,16], index: 4, kind: input, shape index: {}]   ;;  %s1530_s5 = inlined_call_operand.vmem [shape: bf16[2,16,16,16], index: 5, kind: output, shape index: {}]  }
   0x1   :  { %s1376_s20 = smov 0   ;;  %s1378_s21 = smov 0  }
   0x2   :  { %s1380_s22 = smov 0  }
   0x3 LB: > { %s24_s23 = sadd.s32 1, %s1330_s20  ;;  %s27_s24 = sadd.s32 1, %s1334_s21  ;;  %s1338_s22 = sphi %s1380_s22, %s15_s22   ;;  %s1334_s21 = sphi %s1378_s21, %s1534_s21   ;;  %s1330_s20 = sphi %s1376_s20, %s1533_s20   ;;  %s1326_s19 = sphi %s1374_s19, %s1532_s19   ;;  %s1322_s18 = sphi %s1372_s18, %s1531_s18  }
   0x4   : > { %p25_p0 = scmp.ge.s32.totalorder %s24_s23, 16  ;;  %p1103_p1 = scmp.ge.s32.totalorder %s1338_s22, 1 }
   0x5   : > { %p247_p2 = scmp.lt.s32.totalorder %s1338_s22, 33 }
   0x6   : > { %s1536_s23 = smov (%p25_p0, %s24_s23), 0  ;;  %s1538_s24 = smov (!%p25_p0, %s27_s24), %s1334_s21 }
   0x7   : > { %p248_p3 = pnand %p1103_p1, %p247_p2  ;;  %p29_p4 = scmp.ge.s32.totalorder %s1538_s24, 2 }
   0x8   : > { %v1280_v0 = vld [vmem:[%s1528_s3 + $0x8] sm:$0xff] (!%p248_p3)   ;;  %v1340_v1 = vmov (!%p248_p3), 0.0   ;;  %v1281_v2 = vld [vmem:[%s1528_s3] sm:$0xff] (!%p248_p3)   ;;  %vm1341_vm0 = vmmov (!%p248_p3), 0   ;;  %p303_p5 = scmp.lt.s32.totalorder (!%p248_p3), %s1326_s19, 1  ;;  %p305_p6 = scmp.lt.s32.totalorder (!%p248_p3), %s1322_s18, 17 }
   0x9   : > { %s1540_s24 = smov (%p29_p4, %s1538_s24), 0  ;;  %251 = sbr.rel (%p248_p3) target bundleno = 289 (0x121), region = 40 }
   0xa   : > { %1180 = vmatprep.subr.bf16.mxu0 (!%p248_p3), %v1340_v1  ;;  %1186 = vmatprep.subr.bf16.mxu1 (!%p248_p3), %v1340_v1  ;;  %s312_s6 = sadd.s32 (!%p248_p3), 1, %s1322_s18  ;;  %s323_s8 = sadd.s32 (!%p248_p3), 2, %s1322_s18  ;;  %vm379_vm1 = vcmask (!%p248_p3), 130048   ;;  %v1285_v3 = vld [vmem:[%s1528_s3 + $0x18] sm:$0xff] (!%p248_p3)   ;;  %vm360_vm2 = vsmask.f32 (!%p248_p3), 7424 }
   0xb   : > { %1181 = vmatpush3.bf16.msra.mxu0 (!%p248_p3), %v1280_v0  ;;  %1182 = vmatprep.mubr.msk.bf16.mxu0 (!%p248_p3), %vm1341_vm0, %v1340_v1  ;;  %p315_p7 = scmp.lt.s32.totalorder (!%p248_p3), %s312_s6, 17  ;;  %p326_p8 = scmp.lt.s32.totalorder (!%p248_p3), %s323_s8, 17  ;;  %v1284_v16 = vld [vmem:[%s1528_s3 + $0x10] sm:$0xff] (!%p248_p3)   ;;  %vm480_vm3 = vcmask (!%p248_p3), 1046528   ;;  %v1289_v17 = vld [vmem:[%s1528_s3 + $0x28] sm:$0xff] (!%p248_p3)   ;;  %v1287_v36 = vld [vmem:[%s1528_s3 + $0x20] sm:$0xff] (!%p248_p3)  }
   0xc   : > { %1187 = vmatpush3.bf16.msra.mxu1 (!%p248_p3), %v1281_v2  ;;  %1188 = vmatprep.mubr.msk.bf16.mxu1 (!%p248_p3), %vm1341_vm0, %v1340_v1  ;;  %v1294_v42 = vld [vmem:[%s1528_s3 + $0x38] sm:$0xff] (!%p248_p3)   ;;  %v1292_v51 = vld [vmem:[%s1528_s3 + $0x30] sm:$0xff] (!%p248_p3)   ;;  %v1296_v55 = vld [vmem:[%s1528_s3 + $0x40] sm:$0xff] (!%p248_p3)   ;;  %p336_p9 = scmp.lt.s32.totalorder (!%p248_p3), %s1322_s18, 15  ;;  %vm959_vm4 = vcmask (!%p248_p3), 125952  }
   0xd   : > { %1192 = vmatprep.subr.bf16.mxu0 (!%p248_p3), %v1340_v1  ;;  %1198 = vmatprep.subr.bf16.mxu1 (!%p248_p3), %v1340_v1 }
  0x10   : > { %s1542_s19 = smov (!%p303_p5, %s1326_s19), 1  ;;  %s1544_s6 = smov (!%p315_p7, %s312_s6), 17 }
  0x11   : > { %s306_s29 = scalar_select %p305_p6, %s1322_s18, 17 }
  0x12   : > { %s1423_s30 = smul.u32 54, %s1542_s19  ;;  %s1546_s8 = smov (!%p326_p8, %s323_s8), 17 }
  0x13   : > { %s1234_s7 = smul.u32 3, %s306_s29  ;;  %s1548_s18 = smov (!%p336_p9, %s1322_s18), 15 }
  0x14   : > { %s1236_s16 = smul.u32 3, %s1544_s6  ;;  %s1107_s29 = sshll.u32 %s1548_s18, 1 }
  0x15   : > { %s309_s9 = sadd.s32 %s1423_s30, %s1234_s7  ;;  %s1237_s17 = smul.u32 3, %s1546_s8 }
  0x16   : > { %s1104_s10 = sshll.u32 %s309_s9, 2  ;;  %s319_s25 = sadd.s32 %s1236_s16, %s1423_s30 }
  0x17   : > { %s311_s13 = scalar_lea.vmem %s1525_s0, %s1104_s10  ;;  %s1105_s26 = sshll.u32 %s319_s25, 2 }
  0x18   : > { %v344_v4 = vld [vmem:[%s311_s13] sm:$0xf]  ;;  %v345_v5 = vld [vmem:[%s311_s13 + $0x4] sm:$0xf]  ;;  %s330_s27 = sadd.s32 %s1237_s17, %s1423_s30  ;;  %s321_s9 = scalar_lea.vmem %s1526_s1, %s1105_s26 }
  0x19   : > { %v1112_v6 = vcombine.low %v344_v4, %v345_v5  ;;  %v1283_v7 = vld [vmem:[%s311_s13 + $0x8] ss:$0 sps:$4 sm:$0x11]   ;;  %v473_v11 = vld [vmem:[%s311_s13] sm:$0xe]  ;;  %s1106_s11 = sshll.u32 %s330_s27, 2 }
  0x1a   : > { %v369_v10 = vshll.u32 %v1283_v7, 16  ;;  %v1120_v14 = vcombine.low %v473_v11, %v345_v5  ;;  %v482_v18 = vrot.slane %v1283_v7, 1  ;;  %v1288_v19 = vld [vmem:[%s321_s9] sm:$0xff]   ;;  %s1452_s30 = scalar_lea.vmem %s1527_s2, %s1106_s11  ;;  %v1291_v25 = vld [vmem:[%s321_s9 + $0x8] ss:$0 sps:$4 sm:$0x11]  }
  0x1b   : > { %v362_v8 = vshrl.u32 %v1112_v6, 16  ;;  %v364_v9 = vshll.u32 %v1112_v6, 16  ;;  %1189 = vmatmul.mubr.msk.bf16.vlgmr.msra.gmra.mrb[0].mxu1 %vm379_vm1, %v1112_v6  ;;  %v598_v21 = vld [vmem:[%s321_s9] sm:$0xf]  ;;  %v599_v22 = vld [vmem:[%s321_s9 + $0x4] sm:$0xf] }
  0x1c   : > { %1199 = vmatpush3.bf16.msra.mxu1 %v1285_v3  ;;  %1200 = vmatprep.mubr.msk.bf16.mxu1 %vm1341_vm0, %v1340_v1  ;;  %v371_v13 = vrot.slane %v369_v10, 1  ;;  %v481_v23 = vrot.slane %v1120_v14, 1  ;;  %v1130_v24 = vcombine.low %v598_v21, %v599_v22  ;;  %v676_v26 = vld [vmem:[%s321_s9] sm:$0xe]  ;;  %v684_v30 = vrot.slane %v1291_v25, 1  ;;  %s1108_s6 = sshll.u32 %s1542_s19, 5 }
  0x1d   : > { %v366_v12 = vrot.slane %v364_v9, 1  ;;  %1210 = vmatprep.subr.bf16.mxu1 %v1340_v1  ;;  %v1136_v27 = vcombine.low %v676_v26, %v599_v22  ;;  %v800_v28 = vld [vmem:[%s1452_s30] sm:$0xf]  ;;  %v801_v31 = vld [vmem:[%s1452_s30 + $0x4] sm:$0xf]  ;;  %v620_v39 = vshll.u32 %v1291_v25, 16  ;;  %s340_s7 = sadd.s32 %s1108_s6, %s1107_s29 }
  0x1e   : > { %v615_v29 = vshll.u32 %v1130_v24, 16  ;;  %v1146_v33 = vcombine.low %v800_v28, %v801_v31  ;;  %v1298_v34 = vld [vmem:[%s1452_s30 + $0x8] ss:$0 sps:$4 sm:$0x11]   ;;  %v483_v35 = vsel %vm480_vm3, %v481_v23, %v482_v18  ;;  %v613_v37 = vshrl.u32 %v1130_v24, 16  ;;  %v1295_v54 = vld [vmem:[%s1452_s30] sm:$0xff]  }
  0x1f   : > { %v367_v15 = vor.u32 %v366_v12, %v362_v8  ;;  %v683_v32 = vrot.slane %v1136_v27, 1  ;;  %v822_v45 = vshll.u32 %v1298_v34, 16  ;;  %v622_v47 = vrot.slane %v620_v39, 1  ;;  %v878_v53 = vld [vmem:[%s1452_s30] sm:$0xe]  ;;  %s1109_s10 = sshll.u32 %s340_s7, 2 }
  0x20   : > { %v617_v38 = vrot.slane %v615_v29, 1  ;;  %v817_v40 = vshll.u32 %v1146_v33, 16  ;;  %v815_v43 = vshrl.u32 %v1146_v33, 16  ;;  %v1152_v56 = vcombine.low %v878_v53, %v801_v31  ;;  %s342_s18 = scalar_lea.vmem %s1530_s5, %s1109_s10 }
  0x21   : > { %v372_v20 = vsel %vm360_vm2, %v367_v15, %v371_v13  ;;  %v685_v41 = vsel %vm480_vm3, %v683_v32, %v684_v30  ;;  %v824_v49 = vrot.slane %v822_v45, 1  ;;  %v886_v58 = vrot.slane %v1298_v34, 1 }
  0x22   : > { %1183 = vmatmul.mubr.msk.bf16.vlgmr.msra.gmra.mrb[0].mxu0 %vm379_vm1, %v372_v20  ;;  %v819_v44 = vrot.slane %v817_v40, 1  ;;  %v618_v46 = vor.u32 %v617_v38, %v613_v37  ;;  %v885_v57 = vrot.slane %v1152_v56, 1 }
  0x23   : > { %1193 = vmatpush3.bf16.msra.mxu0 %v1284_v16  ;;  %1194 = vmatprep.mubr.msk.bf16.mxu0 %vm1341_vm0, %v1340_v1 }
  0x24   : > { %1204 = vmatprep.subr.bf16.mxu0 %v1340_v1  ;;  %1201 = vmatmul.mubr.msk.bf16.vlgmr.msra.gmra.mrb[4].mxu1 %vm379_vm1, %v1288_v19  ;;  %v820_v48 = vor.u32 %v819_v44, %v815_v43  ;;  %v623_v50 = vsel %vm360_vm2, %v618_v46, %v622_v47  ;;  %v887_v59 = vsel %vm480_vm3, %v885_v57, %v886_v58  ;;  %v1155_v43 = vld [vmem:[%s1529_s4] ss:$0 sm:$0xff] }
  0x25   : > { %1211 = vmatpush3.bf16.msra.mxu1 %v1289_v17  ;;  %1212 = vmatprep.mubr.msk.bf16.mxu1 %vm1341_vm0, %v1340_v1 }
  0x26   : > { %1222 = vmatprep.subr.bf16.mxu1 %v1340_v1  ;;  %v825_v52 = vsel %vm360_vm2, %v820_v48, %v824_v49 }
  0x2a   : > { %1195 = vmatmul.mubr.msk.bf16.vlgmr.msra.gmra.mrb[4].mxu0 %vm379_vm1, %v483_v35 }
  0x2b   : > { %1205 = vmatpush3.bf16.msra.mxu0 %v1287_v36  ;;  %1206 = vmatprep.mubr.msk.bf16.mxu0 %vm1341_vm0, %v1340_v1 }
  0x2c   : > { %1216 = vmatprep.subr.bf16.mxu0 %v1340_v1  ;;  %1213 = vmatmul.mubr.msk.bf16.vlgmr.msra.gmra.mrb[8].mxu1 %vm379_vm1, %v685_v41 }
  0x2d   : > { %1223 = vmatpush3.bf16.msra.mxu1 %v1294_v42  ;;  %1224 = vmatprep.mubr.msk.bf16.mxu1 %vm1341_vm0, %v1340_v1 }
  0x32   : > { %1207 = vmatmul.mubr.msk.bf16.vlgmr.msra.gmra.mrb[8].mxu0 %vm379_vm1, %v623_v50 }
  0x33   : > { %1217 = vmatpush3.bf16.msra.mxu0 %v1292_v51  ;;  %1218 = vmatprep.mubr.msk.bf16.mxu0 %vm1341_vm0, %v1340_v1 }
  0x34   : > { %1228 = vmatprep.subr.bf16.mxu0 %v1340_v1  ;;  %1225 = vmatmul.mubr.msk.bf16.vlgmr.msra.gmra.mrb[12].mxu1 %vm379_vm1, %v825_v52 }
  0x3a   : > { %1219 = vmatmul.mubr.msk.bf16.vlgmr.msra.gmra.mrb[12].mxu0 %vm379_vm1, %v1295_v54 }
  0x3b   : > { %1229 = vmatpush3.bf16.msra.mxu0 %v1296_v55  ;;  %1230 = vmatprep.mubr.msk.bf16.mxu0 %vm1341_vm0, %v1340_v1 }
  0x42   : > { %1231 = vmatmul.mubr.msk.bf16.vlgmr.msra.gmra.mrb[16].mxu0 %vm379_vm1, %v887_v59 }
  0xee   : > { %v466_v60 = vpop.f32.mrb[0].mxu1 }
  0xef   : > { %v1190_v61 = vpop.f32.mrb[1].mxu1 }
  0xf0   : > { %v469_v62 = vpop.f32.mrb[2].mxu1 }
  0xf1   : > { %v1191_v63 = vpop.f32.mrb[3].mxu1 }
  0xf5   : > { %v417_v0 = vpop.f32.mrb[0].mxu0 }
  0xf6   : > { %v467_v2 = vadd.f32 %v466_v60, %v417_v0  ;;  %v1184_v3 = vpop.f32.mrb[1].mxu0 }
  0xf7   : > { %v420_v4 = vpop.f32.mrb[2].mxu0  ;;  %v589_v5 = vpop.f32.mrb[4].mxu1 }
  0xf8   : > { %v470_v6 = vadd.f32 %v469_v62, %v420_v4  ;;  %v1185_v7 = vpop.f32.mrb[3].mxu0  ;;  %v1202_v8 = vpop.f32.mrb[5].mxu1 }
  0xf9   : > { %v592_v9 = vpop.f32.mrb[6].mxu1 }
  0xfa   : > { %v1203_v1 = vpop.f32.mrb[7].mxu1 }
  0xfd   : > { %v527_v10 = vpop.f32.mrb[4].mxu0 }
  0xfe   : > { %v534_v11 = vadd.f32 %v527_v10, %v467_v2  ;;  %v1196_v12 = vpop.f32.mrb[5].mxu0 }
  0xff   : > { %v530_v13 = vpop.f32.mrb[6].mxu0  ;;  %v729_v14 = vpop.f32.mrb[8].mxu1 }
 0x100   : > { %v535_v15 = vadd.f32 %v530_v13, %v470_v6  ;;  %v596_v16 = vadd.f32 %v589_v5, %v534_v11  ;;  %v1197_v17 = vpop.f32.mrb[7].mxu0  ;;  %v1214_v18 = vpop.f32.mrb[9].mxu1 }
 0x101   : > { %v732_v19 = vpop.f32.mrb[10].mxu1 }
 0x102   : > { %v597_v20 = vadd.f32 %v592_v9, %v535_v15  ;;  %v1215_v21 = vpop.f32.mrb[11].mxu1 }
 0x105   : > { %v667_v22 = vpop.f32.mrb[8].mxu0 }
 0x106   : > { %v674_v23 = vadd.f32 %v667_v22, %v596_v16  ;;  %v1208_v24 = vpop.f32.mrb[9].mxu0 }
 0x107   : > { %v670_v25 = vpop.f32.mrb[10].mxu0  ;;  %v869_v26 = vpop.f32.mrb[12].mxu1 }
 0x108   : > { %v675_v27 = vadd.f32 %v670_v25, %v597_v20  ;;  %v736_v28 = vadd.f32 %v729_v14, %v674_v23  ;;  %v1209_v29 = vpop.f32.mrb[11].mxu0  ;;  %v1226_v30 = vpop.f32.mrb[13].mxu1 }
 0x109   : > { %v872_v31 = vpop.f32.mrb[14].mxu1 }
 0x10a   : > { %v737_v32 = vadd.f32 %v732_v19, %v675_v27  ;;  %v1227_v33 = vpop.f32.mrb[15].mxu1 }
 0x10d   : > { %v791_v34 = vpop.f32.mrb[12].mxu0 }
 0x10e   : > { %v798_v35 = vadd.f32 %v791_v34, %v736_v28  ;;  %v1220_v36 = vpop.f32.mrb[13].mxu0 }
 0x10f   : > { %v794_v37 = vpop.f32.mrb[14].mxu0 }
 0x110   : > { %v799_v38 = vadd.f32 %v794_v37, %v737_v32  ;;  %v876_v39 = vadd.f32 %v869_v26, %v798_v35  ;;  %v1221_v40 = vpop.f32.mrb[15].mxu0 }
 0x112   : > { %v877_v41 = vadd.f32 %v872_v31, %v799_v38 }
 0x115   : > { %v931_v42 = vpop.f32.mrb[16].mxu0 }
 0x116   : > { %v938_v44 = vadd.f32 %v931_v42, %v876_v39  ;;  %v1232_v45 = vpop.f32.mrb[17].mxu0 }
 0x117   : > { %v934_v46 = vpop.f32.mrb[18].mxu0 }
 0x118   : > { %v947_v47 = vadd.f32 %v1155_v43, %v938_v44  ;;  %v939_v48 = vadd.f32 %v934_v46, %v877_v41  ;;  %v1233_v49 = vpop.f32.mrb[19].mxu0 }
 0x11a   : > { %v949_v50 = vmax.f32 %v947_v47, 0.0  ;;  %v948_v51 = vadd.f32 %v1155_v43, %v939_v48 }
 0x11c   : > { %v1160_v52 = vpack.c.bf16 %v949_v50, %v949_v50  ;;  %v950_v53 = vmax.f32 %v948_v51, 0.0 }
 0x11e   : > { %960 = vst.msk [vmem:[%s342_s18] sm:$0xf] %vm959_vm4, %v1160_v52  ;;  %v1161_v54 = vpack.c.bf16 %v950_v53, %v950_v53 }
 0x120   : > { %961 = vst.msk [vmem:[%s342_s18 + $0x4] sm:$0xf] %vm959_vm4, %v1161_v54 }
 0x121 PF: > { %s15_s22 = sadd.s32 1, %s1338_s22   ;;  %s1531_s18 = smov %s1330_s20 }
 0x122   : > { %p12_p10 = scmp.ge.s32.totalorder %s15_s22, 34   ;;  %s1532_s19 = smov %s1334_s21 }
 0x123   : > { %s1533_s20 = smov %s1536_s23  ;;  %s1534_s21 = smov %s1540_s24 }
 0x124   :  { %14 = sbr.rel (!%p12_p10) target bundleno = 3 (0x3), region = 84 }

// kernel: _lambda_.17
= control target key start
LH: loop header
LB: loop body
LE: loop exit
PB: predicated region body
PF: predicated region fallthrough
CT: control target
= control target key end

     0   :  { %s1472_s21 = smov 0   ;;  %s1474_s22 = smov 0   ;;  %s1628_s0 = inlined_call_operand.vmem [shape: bf16[2,18,1,18,16], index: 0, kind: input, shape index: {}, may-alias: {0,1,2}]   ;;  %s1629_s1 = inlined_call_operand.vmem [shape: bf16[2,18,1,18,16], index: 1, kind: input, shape index: {}, may-alias: {0,1,2}]   ;;  %s1630_s2 = inlined_call_operand.vmem [shape: bf16[2,18,1,18,16], index: 2, kind: input, shape index: {}, may-alias: {0,1,2}]   ;;  %s1631_s3 = inlined_call_operand.vmem [shape: bf16[9,16,16], index: 3, kind: input, shape index: {}]   ;;  %s1632_s4 = inlined_call_operand.vmem [shape: f32[1,16], index: 4, kind: input, shape index: {}]   ;;  %s1633_s5 = inlined_call_operand.vmem [shape: bf16[2,16,16,16], index: 5, kind: input, shape index: {}]   ;;  %s1634_s6 = inlined_call_operand.vmem [shape: bf16[2,16,16,16], index: 6, kind: output, shape index: {}]  }
   0x1   :  { %s1476_s23 = smov 0   ;;  %s1478_s24 = smov 0  }
   0x2   :  { %s1480_s25 = smov 0  }
   0x3 LB: > { %s25_s26 = sadd.s32 1, %s1425_s23  ;;  %s28_s27 = sadd.s32 1, %s1429_s24  ;;  %s1433_s25 = sphi %s1480_s25, %s16_s25   ;;  %s1429_s24 = sphi %s1478_s24, %s1638_s24   ;;  %s1425_s23 = sphi %s1476_s23, %s1637_s23   ;;  %s1421_s22 = sphi %s1474_s22, %s1636_s22   ;;  %s1417_s21 = sphi %s1472_s21, %s1635_s21  }
   0x4   : > { %p26_p0 = scmp.ge.s32.totalorder %s25_s26, 16  ;;  %p1191_p1 = scmp.ge.s32.totalorder %s1433_s25, 1 }
   0x5   : > { %p288_p2 = scmp.lt.s32.totalorder %s1433_s25, 33 }
   0x6   : > { %s1640_s26 = smov (%p26_p0, %s25_s26), 0  ;;  %s1642_s27 = smov (!%p26_p0, %s28_s27), %s1429_s24 }
   0x7   : > { %p289_p3 = pnand %p1191_p1, %p288_p2  ;;  %p30_p4 = scmp.ge.s32.totalorder %s1642_s27, 2 }
   0x8   : > { %v1375_v0 = vld [vmem:[%s1631_s3 + $0x8] sm:$0xff] (!%p289_p3)   ;;  %v1435_v1 = vmov (!%p289_p3), 0.0   ;;  %v1376_v2 = vld [vmem:[%s1631_s3] sm:$0xff] (!%p289_p3)   ;;  %vm1436_vm0 = vmmov (!%p289_p3), 0   ;;  %p355_p5 = scmp.lt.s32.totalorder (!%p289_p3), %s1421_s22, 1  ;;  %p357_p6 = scmp.lt.s32.totalorder (!%p289_p3), %s1417_s21, 17 }
   0x9   : > { %s1644_s27 = smov (%p30_p4, %s1642_s27), 0  ;;  %292 = sbr.rel (%p289_p3) target bundleno = 291 (0x123), region = 44 }
   0xa   : > { %1275 = vmatprep.subr.bf16.mxu0 (!%p289_p3), %v1435_v1  ;;  %1281 = vmatprep.subr.bf16.mxu1 (!%p289_p3), %v1435_v1  ;;  %s364_s10 = sadd.s32 (!%p289_p3), 1, %s1417_s21  ;;  %s375_s12 = sadd.s32 (!%p289_p3), 2, %s1417_s21  ;;  %vm440_vm1 = vcmask (!%p289_p3), 130048   ;;  %v1380_v3 = vld [vmem:[%s1631_s3 + $0x18] sm:$0xff] (!%p289_p3)   ;;  %vm421_vm2 = vsmask.f32 (!%p289_p3), 7424 }
   0xb   : > { %1276 = vmatpush3.bf16.msra.mxu0 (!%p289_p3), %v1375_v0  ;;  %1277 = vmatprep.mubr.msk.bf16.mxu0 (!%p289_p3), %vm1436_vm0, %v1435_v1  ;;  %p367_p7 = scmp.lt.s32.totalorder (!%p289_p3), %s364_s10, 17  ;;  %p378_p8 = scmp.lt.s32.totalorder (!%p289_p3), %s375_s12, 17  ;;  %v1379_v16 = vld [vmem:[%s1631_s3 + $0x10] sm:$0xff] (!%p289_p3)   ;;  %vm541_vm3 = vcmask (!%p289_p3), 1046528   ;;  %v1384_v17 = vld [vmem:[%s1631_s3 + $0x28] sm:$0xff] (!%p289_p3)   ;;  %v1382_v36 = vld [vmem:[%s1631_s3 + $0x20] sm:$0xff] (!%p289_p3)  }
   0xc   : > { %1282 = vmatpush3.bf16.msra.mxu1 (!%p289_p3), %v1376_v2  ;;  %1283 = vmatprep.mubr.msk.bf16.mxu1 (!%p289_p3), %vm1436_vm0, %v1435_v1  ;;  %v1389_v42 = vld [vmem:[%s1631_s3 + $0x38] sm:$0xff] (!%p289_p3)   ;;  %v1387_v51 = vld [vmem:[%s1631_s3 + $0x30] sm:$0xff] (!%p289_p3)   ;;  %v1391_v55 = vld [vmem:[%s1631_s3 + $0x40] sm:$0xff] (!%p289_p3)   ;;  %p388_p9 = scmp.lt.s32.totalorder (!%p289_p3), %s1417_s21, 15  ;;  %vm1026_vm4 = vcmask (!%p289_p3), 125952  }
   0xd   : > { %1287 = vmatprep.subr.bf16.mxu0 (!%p289_p3), %v1435_v1  ;;  %1293 = vmatprep.subr.bf16.mxu1 (!%p289_p3), %v1435_v1 }
  0x10   : > { %s1646_s22 = smov (!%p355_p5, %s1421_s22), 1  ;;  %s1648_s10 = smov (!%p367_p7, %s364_s10), 17 }
  0x11   : > { %s358_s8 = scalar_select %p357_p6, %s1417_s21, 17 }
  0x12   : > { %s1523_s9 = smul.u32 54, %s1646_s22  ;;  %s1650_s12 = smov (!%p378_p8, %s375_s12), 17 }
  0x13   : > { %s1329_s11 = smul.u32 3, %s358_s8  ;;  %s1652_s21 = smov (!%p388_p9, %s1417_s21), 15 }
  0x14   : > { %s1331_s20 = smul.u32 3, %s1648_s10  ;;  %s1195_s10 = sshll.u32 %s1652_s21, 1 }
  0x15   : > { %s361_s13 = sadd.s32 %s1523_s9, %s1329_s11  ;;  %s1332_s28 = smul.u32 3, %s1650_s12 }
  0x16   : > { %s1192_s14 = sshll.u32 %s361_s13, 2  ;;  %s371_s29 = sadd.s32 %s1331_s20, %s1523_s9 }
  0x17   : > { %s363_s17 = scalar_lea.vmem %s1628_s0, %s1192_s14  ;;  %s1193_s30 = sshll.u32 %s371_s29, 2 }
  0x18   : > { %v405_v4 = vld [vmem:[%s363_s17] sm:$0xf]  ;;  %v406_v5 = vld [vmem:[%s363_s17 + $0x4] sm:$0xf]  ;;  %s382_s7 = sadd.s32 %s1332_s28, %s1523_s9  ;;  %s373_s14 = scalar_lea.vmem %s1629_s1, %s1193_s30 }
  0x19   : > { %v1203_v6 = vcombine.low %v405_v4, %v406_v5  ;;  %v1378_v7 = vld [vmem:[%s363_s17 + $0x8] ss:$0 sps:$4 sm:$0x11]   ;;  %v534_v11 = vld [vmem:[%s363_s17] sm:$0xe]  ;;  %s1194_s16 = sshll.u32 %s382_s7, 2 }
  0x1a   : > { %v430_v10 = vshll.u32 %v1378_v7, 16  ;;  %v1211_v14 = vcombine.low %v534_v11, %v406_v5  ;;  %v543_v18 = vrot.slane %v1378_v7, 1  ;;  %v1383_v19 = vld [vmem:[%s373_s14] sm:$0xff]   ;;  %s1552_s9 = scalar_lea.vmem %s1630_s2, %s1194_s16  ;;  %v1386_v25 = vld [vmem:[%s373_s14 + $0x8] ss:$0 sps:$4 sm:$0x11]  }
  0x1b   : > { %v423_v8 = vshrl.u32 %v1203_v6, 16  ;;  %v425_v9 = vshll.u32 %v1203_v6, 16  ;;  %1284 = vmatmul.mubr.msk.bf16.vlgmr.msra.gmra.mrb[0].mxu1 %vm440_vm1, %v1203_v6  ;;  %v659_v21 = vld [vmem:[%s373_s14] sm:$0xf]  ;;  %v660_v22 = vld [vmem:[%s373_s14 + $0x4] sm:$0xf] }
  0x1c   : > { %1294 = vmatpush3.bf16.msra.mxu1 %v1380_v3  ;;  %1295 = vmatprep.mubr.msk.bf16.mxu1 %vm1436_vm0, %v1435_v1  ;;  %v432_v13 = vrot.slane %v430_v10, 1  ;;  %v542_v23 = vrot.slane %v1211_v14, 1  ;;  %v1221_v24 = vcombine.low %v659_v21, %v660_v22  ;;  %v737_v26 = vld [vmem:[%s373_s14] sm:$0xe]  ;;  %v745_v30 = vrot.slane %v1386_v25, 1  ;;  %s1196_s13 = sshll.u32 %s1646_s22, 5 }
  0x1d   : > { %v427_v12 = vrot.slane %v425_v9, 1  ;;  %1305 = vmatprep.subr.bf16.mxu1 %v1435_v1  ;;  %v1227_v27 = vcombine.low %v737_v26, %v660_v22  ;;  %v861_v28 = vld [vmem:[%s1552_s9] sm:$0xf]  ;;  %v862_v31 = vld [vmem:[%s1552_s9 + $0x4] sm:$0xf]  ;;  %v681_v39 = vshll.u32 %v1386_v25, 16  ;;  %s392_s14 = sadd.s32 %s1196_s13, %s1195_s10 }
  0x1e   : > { %v676_v29 = vshll.u32 %v1221_v24, 16  ;;  %v1237_v33 = vcombine.low %v861_v28, %v862_v31  ;;  %v1393_v34 = vld [vmem:[%s1552_s9 + $0x8] ss:$0 sps:$4 sm:$0x11]   ;;  %v544_v35 = vsel %vm541_vm3, %v542_v23, %v543_v18  ;;  %v674_v37 = vshrl.u32 %v1221_v24, 16  ;;  %v1390_v54 = vld [vmem:[%s1552_s9] sm:$0xff]  }
  0x1f   : > { %v428_v15 = vor.u32 %v427_v12, %v423_v8  ;;  %v744_v32 = vrot.slane %v1227_v27, 1  ;;  %v883_v45 = vshll.u32 %v1393_v34, 16  ;;  %v683_v47 = vrot.slane %v681_v39, 1  ;;  %v939_v53 = vld [vmem:[%s1552_s9] sm:$0xe]  ;;  %s1197_s12 = sshll.u32 %s392_s14, 2 }
  0x20   : > { %v678_v38 = vrot.slane %v676_v29, 1  ;;  %v878_v40 = vshll.u32 %v1237_v33, 16  ;;  %v876_v43 = vshrl.u32 %v1237_v33, 16  ;;  %v1243_v56 = vcombine.low %v939_v53, %v862_v31  ;;  %s394_s21 = scalar_lea.vmem %s1633_s5, %s1197_s12  ;;  %s403_s19 = scalar_lea.vmem %s1634_s6, %s1197_s12 }
  0x21   : > { %v433_v20 = vsel %vm421_vm2, %v428_v15, %v432_v13  ;;  %v746_v41 = vsel %vm541_vm3, %v744_v32, %v745_v30  ;;  %v885_v49 = vrot.slane %v883_v45, 1  ;;  %v947_v58 = vrot.slane %v1393_v34, 1 }
  0x22   : > { %1278 = vmatmul.mubr.msk.bf16.vlgmr.msra.gmra.mrb[0].mxu0 %vm440_vm1, %v433_v20  ;;  %v880_v44 = vrot.slane %v878_v40, 1  ;;  %v679_v46 = vor.u32 %v678_v38, %v674_v37  ;;  %v946_v57 = vrot.slane %v1243_v56, 1 }
  0x23   : > { %1288 = vmatpush3.bf16.msra.mxu0 %v1379_v16  ;;  %1289 = vmatprep.mubr.msk.bf16.mxu0 %vm1436_vm0, %v1435_v1 }
  0x24   : > { %1299 = vmatprep.subr.bf16.mxu0 %v1435_v1  ;;  %1296 = vmatmul.mubr.msk.bf16.vlgmr.msra.gmra.mrb[4].mxu1 %vm440_vm1, %v1383_v19  ;;  %v881_v48 = vor.u32 %v880_v44, %v876_v43  ;;  %v684_v50 = vsel %vm421_vm2, %v679_v46, %v683_v47  ;;  %v948_v59 = vsel %vm541_vm3, %v946_v57, %v947_v58  ;;  %v1246_v44 = vld [vmem:[%s1632_s4] ss:$0 sm:$0xff] }
  0x25   : > { %1306 = vmatpush3.bf16.msra.mxu1 %v1384_v17  ;;  %1307 = vmatprep.mubr.msk.bf16.mxu1 %vm1436_vm0, %v1435_v1 }
  0x26   : > { %1317 = vmatprep.subr.bf16.mxu1 %v1435_v1  ;;  %v886_v52 = vsel %vm421_vm2, %v881_v48, %v885_v49 }
  0x2a   : > { %1290 = vmatmul.mubr.msk.bf16.vlgmr.msra.gmra.mrb[4].mxu0 %vm440_vm1, %v544_v35 }
  0x2b   : > { %1300 = vmatpush3.bf16.msra.mxu0 %v1382_v36  ;;  %1301 = vmatprep.mubr.msk.bf16.mxu0 %vm1436_vm0, %v1435_v1 }
  0x2c   : > { %1311 = vmatprep.subr.bf16.mxu0 %v1435_v1  ;;  %1308 = vmatmul.mubr.msk.bf16.vlgmr.msra.gmra.mrb[8].mxu1 %vm440_vm1, %v746_v41 }
  0x2d   : > { %1318 = vmatpush3.bf16.msra.mxu1 %v1389_v42  ;;  %1319 = vmatprep.mubr.msk.bf16.mxu1 %vm1436_vm0, %v1435_v1  ;;  %v1254_v42 = vld [vmem:[%s394_s21] sm:$0xff]  }
  0x2e   : > { %v1255_v46 = vunpack.c.l.bf16 %v1254_v42 }
  0x32   : > { %1302 = vmatmul.mubr.msk.bf16.vlgmr.msra.gmra.mrb[8].mxu0 %vm440_vm1, %v684_v50 }
  0x33   : > { %1312 = vmatpush3.bf16.msra.mxu0 %v1387_v51  ;;  %1313 = vmatprep.mubr.msk.bf16.mxu0 %vm1436_vm0, %v1435_v1  ;;  %v1256_v51 = vunpack.c.h.bf16 %v1254_v42 }
  0x34   : > { %1323 = vmatprep.subr.bf16.mxu0 %v1435_v1  ;;  %1320 = vmatmul.mubr.msk.bf16.vlgmr.msra.gmra.mrb[12].mxu1 %vm440_vm1, %v886_v52 }
  0x3a   : > { %1314 = vmatmul.mubr.msk.bf16.vlgmr.msra.gmra.mrb[12].mxu0 %vm440_vm1, %v1390_v54 }
  0x3b   : > { %1324 = vmatpush3.bf16.msra.mxu0 %v1391_v55  ;;  %1325 = vmatprep.mubr.msk.bf16.mxu0 %vm1436_vm0, %v1435_v1 }
  0x42   : > { %1326 = vmatmul.mubr.msk.bf16.vlgmr.msra.gmra.mrb[16].mxu0 %vm440_vm1, %v948_v59 }
  0xee   : > { %v527_v60 = vpop.f32.mrb[0].mxu1 }
  0xef   : > { %v1285_v61 = vpop.f32.mrb[1].mxu1 }
  0xf0   : > { %v530_v62 = vpop.f32.mrb[2].mxu1 }
  0xf1   : > { %v1286_v63 = vpop.f32.mrb[3].mxu1 }
  0xf5   : > { %v478_v0 = vpop.f32.mrb[0].mxu0 }
  0xf6   : > { %v528_v2 = vadd.f32 %v527_v60, %v478_v0  ;;  %v1279_v3 = vpop.f32.mrb[1].mxu0 }
  0xf7   : > { %v481_v4 = vpop.f32.mrb[2].mxu0  ;;  %v650_v5 = vpop.f32.mrb[4].mxu1 }
  0xf8   : > { %v531_v6 = vadd.f32 %v530_v62, %v481_v4  ;;  %v1280_v7 = vpop.f32.mrb[3].mxu0  ;;  %v1297_v8 = vpop.f32.mrb[5].mxu1 }
  0xf9   : > { %v653_v1 = vpop.f32.mrb[6].mxu1 }
  0xfa   : > { %v1298_v9 = vpop.f32.mrb[7].mxu1 }
  0xfd   : > { %v588_v10 = vpop.f32.mrb[4].mxu0 }
  0xfe   : > { %v595_v11 = vadd.f32 %v588_v10, %v528_v2  ;;  %v1291_v12 = vpop.f32.mrb[5].mxu0 }
  0xff   : > { %v591_v13 = vpop.f32.mrb[6].mxu0  ;;  %v790_v14 = vpop.f32.mrb[8].mxu1 }
 0x100   : > { %v596_v15 = vadd.f32 %v591_v13, %v531_v6  ;;  %v657_v16 = vadd.f32 %v650_v5, %v595_v11  ;;  %v1292_v17 = vpop.f32.mrb[7].mxu0  ;;  %v1309_v18 = vpop.f32.mrb[9].mxu1 }
 0x101   : > { %v793_v19 = vpop.f32.mrb[10].mxu1 }
 0x102   : > { %v658_v20 = vadd.f32 %v653_v1, %v596_v15  ;;  %v1310_v21 = vpop.f32.mrb[11].mxu1 }
 0x105   : > { %v728_v22 = vpop.f32.mrb[8].mxu0 }
 0x106   : > { %v735_v23 = vadd.f32 %v728_v22, %v657_v16  ;;  %v1303_v24 = vpop.f32.mrb[9].mxu0 }
 0x107   : > { %v731_v25 = vpop.f32.mrb[10].mxu0  ;;  %v930_v26 = vpop.f32.mrb[12].mxu1 }
 0x108   : > { %v736_v27 = vadd.f32 %v731_v25, %v658_v20  ;;  %v797_v28 = vadd.f32 %v790_v14, %v735_v23  ;;  %v1304_v29 = vpop.f32.mrb[11].mxu0  ;;  %v1321_v30 = vpop.f32.mrb[13].mxu1 }
 0x109   : > { %v933_v31 = vpop.f32.mrb[14].mxu1 }
 0x10a   : > { %v798_v32 = vadd.f32 %v793_v19, %v736_v27  ;;  %v1322_v33 = vpop.f32.mrb[15].mxu1 }
 0x10d   : > { %v852_v34 = vpop.f32.mrb[12].mxu0 }
 0x10e   : > { %v859_v35 = vadd.f32 %v852_v34, %v797_v28  ;;  %v1315_v36 = vpop.f32.mrb[13].mxu0 }
 0x10f   : > { %v855_v37 = vpop.f32.mrb[14].mxu0 }
 0x110   : > { %v860_v38 = vadd.f32 %v855_v37, %v798_v32  ;;  %v937_v39 = vadd.f32 %v930_v26, %v859_v35  ;;  %v1316_v40 = vpop.f32.mrb[15].mxu0 }
 0x112   : > { %v938_v41 = vadd.f32 %v933_v31, %v860_v38 }
 0x115   : > { %v992_v43 = vpop.f32.mrb[16].mxu0 }
 0x116   : > { %v999_v45 = vadd.f32 %v992_v43, %v937_v39  ;;  %v1327_v47 = vpop.f32.mrb[17].mxu0 }
 0x117   : > { %v995_v48 = vpop.f32.mrb[18].mxu0 }
 0x118   : > { %v1008_v49 = vadd.f32 %v1246_v44, %v999_v45  ;;  %v1000_v50 = vadd.f32 %v995_v48, %v938_v41  ;;  %v1328_v52 = vpop.f32.mrb[19].mxu0 }
 0x11a   : > { %v1014_v53 = vadd.f32 %v1255_v46, %v1008_v49  ;;  %v1009_v54 = vadd.f32 %v1246_v44, %v1000_v50 }
 0x11c   : > { %v1016_v55 = vmax.f32 %v1014_v53, 0.0  ;;  %v1015_v56 = vadd.f32 %v1256_v51, %v1009_v54 }
 0x11e   : > { %v1251_v57 = vpack.c.bf16 %v1016_v55, %v1016_v55  ;;  %v1017_v58 = vmax.f32 %v1015_v56, 0.0 }
 0x120   : > { %1027 = vst.msk [vmem:[%s403_s19] sm:$0xf] %vm1026_vm4, %v1251_v57  ;;  %v1252_v59 = vpack.c.bf16 %v1017_v58, %v1017_v58 }
 0x122   : > { %1028 = vst.msk [vmem:[%s403_s19 + $0x4] sm:$0xf] %vm1026_vm4, %v1252_v59 }
 0x123 PF: > { %s16_s25 = sadd.s32 1, %s1433_s25   ;;  %s1635_s21 = smov %s1425_s23 }
 0x124   : > { %p13_p10 = scmp.ge.s32.totalorder %s16_s25, 34   ;;  %s1636_s22 = smov %s1429_s24 }
 0x125   : > { %s1637_s23 = smov %s1640_s26  ;;  %s1638_s24 = smov %s1644_s27 }
 0x126   :  { %15 = sbr.rel (!%p13_p10) target bundleno = 3 (0x3), region = 91 }

// kernel: _lambda_.19
= control target key start
LH: loop header
LB: loop body
LE: loop exit
PB: predicated region body
PF: predicated region fallthrough
CT: control target
= control target key end

     0   :  { %s496_s12 = smov 0   ;;  %s498_s13 = smov 0   ;;  %s558_s0 = inlined_call_operand.vmem [shape: bf16[2,15,2,8,16], index: 0, kind: input, shape index: {}]   ;;  %s559_s1 = inlined_call_operand.vmem [shape: bf16[1,16,32], index: 1, kind: input, shape index: {}]   ;;  %s560_s2 = inlined_call_operand.vmem [shape: f32[1,32], index: 2, kind: input, shape index: {}]   ;;  %s561_s3 = inlined_call_operand.vmem [shape: bf16[2,8,8,32], index: 3, kind: output, shape index: {}]  }
   0x1   :  { %s500_s14 = smov 0   ;;  %s502_s15 = smov 0  }
   0x2   :  { %s504_s16 = smov 0  }
   0x3 LB: > { %s22_s17 = sadd.s32 1, %s464_s14  ;;  %s25_s18 = sadd.s32 1, %s468_s15  ;;  %s472_s16 = sphi %s504_s16, %s13_s16   ;;  %s468_s15 = sphi %s502_s15, %s565_s15   ;;  %s464_s14 = sphi %s500_s14, %s564_s14   ;;  %s460_s13 = sphi %s498_s13, %s563_s13   ;;  %s456_s12 = sphi %s496_s12, %s562_s12  }
   0x4   : > { %p23_p0 = scmp.ge.s32.totalorder %s22_s17, 8  ;;  %p371_p1 = scmp.ge.s32.totalorder %s472_s16, 1 }
   0x5   : > { %p161_p2 = scmp.lt.s32.totalorder %s472_s16, 17 }
   0x6   : > { %s567_s17 = smov (%p23_p0, %s22_s17), 0  ;;  %s569_s18 = smov (!%p23_p0, %s25_s18), %s468_s15 }
   0x7   : > { %p162_p3 = pnand %p371_p1, %p161_p2  ;;  %p27_p4 = scmp.ge.s32.totalorder %s569_s18, 2 }
   0x8   : > { %v433_v0 = vld [vmem:[%s559_s1] sm:$0xff] (!%p162_p3)   ;;  %v474_v1 = vmov (!%p162_p3), 0.0   ;;  %s372_s21 = sshll.u32 (!%p162_p3), %s456_s12, 1  ;;  %p194_p5 = scmp.lt.s32.totalorder (!%p162_p3), %s460_s13, 1  ;;  %vm475_vm0 = vmmov (!%p162_p3), 0   ;;  %vm229_vm1 = vcmask (!%p162_p3), 130048  }
   0x9   : > { %s571_s18 = smov (%p27_p4, %s569_s18), 0  ;;  %165 = sbr.rel (%p162_p3) target bundleno = 240 (0xf0), region = 32 }
   0xa   : > { %384 = vmatprep.subr.bf16.mxu0 (!%p162_p3), %v474_v1  ;;  %386 = vmatprep.mubr.msk.bf16.mxu0 (!%p162_p3), %vm475_vm0, %v474_v1  ;;  %p196_p6 = scmp.lt.s32.totalorder (!%p162_p3), %s372_s21, 14  ;;  %p206_p7 = scmp.lt.s32.totalorder (!%p162_p3), %s456_s12, 7  ;;  %v377_v3 = vld [vmem:[%s560_s2] ss:$0 sm:$0xff] (!%p162_p3)  ;;  %vm274_vm2 = vcmask (!%p162_p3), 257024  }
   0xb   : > { %385 = vmatpush3.bf16.msra.mxu0 (!%p162_p3), %v433_v0 }
  0x10   : > { %s573_s13 = smov (!%p194_p5, %s460_s13), 1  ;;  %s575_s21 = smov (!%p196_p6, %s372_s21), 14 }
  0x11   : > { %s390_s22 = smul.u32 30, %s573_s13  ;;  %s373_s23 = sshll.u32 %s575_s21, 1 }
  0x12   : > { %s577_s12 = smov (!%p206_p7, %s456_s12), 7  ;;  %s375_s29 = sshll.u32 %s573_s13, 3 }
  0x13   : > { %s200_s24 = sadd.s32 %s390_s22, %s373_s23  ;;  %s209_s30 = sadd.s32 %s375_s29, %s577_s12 }
  0x14   : > { %s374_s25 = sshll.u32 %s200_s24, 2  ;;  %s376_s6 = sshll.u32 %s209_s30, 2 }
  0x15   : > { %s202_s28 = scalar_lea.vmem %s558_s0, %s374_s25  ;;  %s211_s9 = scalar_lea.vmem %s561_s3, %s376_s6 }
  0x16   : > { %v213_v2 = vld [vmem:[%s202_s28] sm:$0xf] }
  0x17   : > { %387 = vmatmul.mubr.msk.bf16.vlgmr.msra.gmra.mrb[0].mxu0 %vm229_vm1, %v213_v2 }
  0xea   : > { %v267_v4 = vpop.f32.mrb[0].mxu0 }
  0xeb   : > { %v268_v5 = vadd.f32 %v377_v3, %v267_v4  ;;  %v388_v6 = vpop.f32.mrb[1].mxu0 }
  0xec   : > { %v270_v7 = vpop.f32.mrb[2].mxu0 }
  0xed   : > { %v273_v8 = vpack.c.bf16 %v268_v5, %v268_v5  ;;  %v389_v9 = vpop.f32.mrb[3].mxu0 }
  0xef   : > { %275 = vst.msk [vmem:[%s211_s9] sm:$0xf] %vm274_vm2, %v273_v8 }
  0xf0 PF: > { %s13_s16 = sadd.s32 1, %s472_s16   ;;  %s562_s12 = smov %s464_s14 }
  0xf1   : > { %p10_p8 = scmp.ge.s32.totalorder %s13_s16, 18   ;;  %s563_s13 = smov %s468_s15 }
  0xf2   : > { %s564_s14 = smov %s567_s17  ;;  %s565_s15 = smov %s571_s18 }
  0xf3   :  { %12 = sbr.rel (!%p10_p8) target bundleno = 3 (0x3), region = 62 }

// kernel: _lambda_.18
= control target key start
LH: loop header
LB: loop body
LE: loop exit
PB: predicated region body
PF: predicated region fallthrough
CT: control target
= control target key end

     0   :  { %s1296_s18 = smov 0   ;;  %s1298_s19 = smov 0   ;;  %s1433_s0 = inlined_call_operand.vmem [shape: bf16[2,17,2,9,16], index: 0, kind: input, shape index: {}, may-alias: {0,1,2}]   ;;  %s1434_s1 = inlined_call_operand.vmem [shape: bf16[2,17,2,9,16], index: 1, kind: input, shape index: {}, may-alias: {0,1,2}]   ;;  %s1435_s2 = inlined_call_operand.vmem [shape: bf16[2,17,2,9,16], index: 2, kind: input, shape index: {}, may-alias: {0,1,2}]   ;;  %s1436_s3 = inlined_call_operand.vmem [shape: bf16[9,16,32], index: 3, kind: input, shape index: {}]   ;;  %s1437_s4 = inlined_call_operand.vmem [shape: f32[1,32], index: 4, kind: input, shape index: {}]   ;;  %s1438_s5 = inlined_call_operand.vmem [shape: bf16[2,8,8,32], index: 5, kind: output, shape index: {}]  }
   0x1   :  { %s1300_s20 = smov 0   ;;  %s1302_s21 = smov 0  }
   0x2   :  { %s1304_s22 = smov 0  }
   0x3 LB: > { %s24_s23 = sadd.s32 1, %s1254_s20  ;;  %s27_s24 = sadd.s32 1, %s1258_s21  ;;  %s1262_s22 = sphi %s1304_s22, %s15_s22   ;;  %s1258_s21 = sphi %s1302_s21, %s1442_s21   ;;  %s1254_s20 = sphi %s1300_s20, %s1441_s20   ;;  %s1250_s19 = sphi %s1298_s19, %s1440_s19   ;;  %s1246_s18 = sphi %s1296_s18, %s1439_s18  }
   0x4   : > { %p25_p0 = scmp.ge.s32.totalorder %s24_s23, 8  ;;  %p1042_p1 = scmp.ge.s32.totalorder %s1262_s22, 1 }
   0x5   : > { %p259_p2 = scmp.lt.s32.totalorder %s1262_s22, 17 }
   0x6   : > { %s1444_s23 = smov (%p25_p0, %s24_s23), 0  ;;  %s1446_s24 = smov (!%p25_p0, %s27_s24), %s1258_s21 }
   0x7   : > { %p260_p3 = pnand %p1042_p1, %p259_p2  ;;  %p29_p4 = scmp.ge.s32.totalorder %s1446_s24, 2 }
   0x8   : > { %v1212_v0 = vld [vmem:[%s1436_s3 + $0x8] sm:$0xff] (!%p260_p3)   ;;  %v1264_v1 = vmov (!%p260_p3), 0.0   ;;  %v1213_v2 = vld [vmem:[%s1436_s3] sm:$0xff] (!%p260_p3)   ;;  %vm1265_vm0 = vmmov (!%p260_p3), 0   ;;  %s1043_s29 = sshll.u32 (!%p260_p3), %s1246_s18, 1  ;;  %p318_p5 = scmp.lt.s32.totalorder (!%p260_p3), %s1250_s19, 1 }
   0x9   : > { %s1448_s24 = smov (%p29_p4, %s1446_s24), 0  ;;  %263 = sbr.rel (%p260_p3) target bundleno = 277 (0x115), region = 40 }
   0xa   : > { %1115 = vmatprep.subr.bf16.mxu0 (!%p260_p3), %v1264_v1  ;;  %1121 = vmatprep.subr.bf16.mxu1 (!%p260_p3), %v1264_v1  ;;  %p320_p6 = scmp.lt.s32.totalorder (!%p260_p3), %s1043_s29, 16  ;;  %s329_s7 = sadd.s32 (!%p260_p3), 1, %s1043_s29  ;;  %vm377_vm1 = vcmask (!%p260_p3), 130048   ;;  %v1215_v3 = vld [vmem:[%s1436_s3 + $0x10] sm:$0xff] (!%p260_p3)   ;;  %v1216_v4 = vld [vmem:[%s1436_s3 + $0x18] sm:$0xff] (!%p260_p3)   ;;  %v1217_v11 = vld [vmem:[%s1436_s3 + $0x20] sm:$0xff] (!%p260_p3)  }
   0xb   : > { %1116 = vmatpush3.bf16.msra.mxu0 (!%p260_p3), %v1212_v0  ;;  %1117 = vmatprep.mubr.msk.bf16.mxu0 (!%p260_p3), %vm1265_vm0, %v1264_v1  ;;  %p332_p7 = scmp.lt.s32.totalorder (!%p260_p3), %s329_s7, 16  ;;  %s342_s12 = sadd.s32 (!%p260_p3), 2, %s1043_s29  ;;  %v1219_v12 = vld [vmem:[%s1436_s3 + $0x28] sm:$0xff] (!%p260_p3)   ;;  %v1220_v20 = vld [vmem:[%s1436_s3 + $0x30] sm:$0xff] (!%p260_p3)   ;;  %v1221_v22 = vld [vmem:[%s1436_s3 + $0x38] sm:$0xff] (!%p260_p3)   ;;  %vm899_vm2 = vcmask (!%p260_p3), 257024  }
   0xc   : > { %1122 = vmatpush3.bf16.msra.mxu1 (!%p260_p3), %v1213_v2  ;;  %1123 = vmatprep.mubr.msk.bf16.mxu1 (!%p260_p3), %vm1265_vm0, %v1264_v1  ;;  %p345_p8 = scmp.lt.s32.totalorder (!%p260_p3), %s342_s12, 16  ;;  %v1223_v26 = vld [vmem:[%s1436_s3 + $0x40] sm:$0xff] (!%p260_p3)   ;;  %p356_p9 = scmp.lt.s32.totalorder (!%p260_p3), %s1246_s18, 7 }
   0xd   : > { %1127 = vmatprep.subr.bf16.mxu0 (!%p260_p3), %v1264_v1  ;;  %1133 = vmatprep.subr.bf16.mxu1 (!%p260_p3), %v1264_v1 }
  0x10   : > { %s1450_s19 = smov (!%p318_p5, %s1250_s19), 1  ;;  %s1452_s7 = smov (!%p332_p7, %s329_s7), 16 }
  0x11   : > { %s321_s30 = scalar_select %p320_p6, %s1043_s29, 16 }
  0x12   : > { %s1346_s6 = smul.u32 68, %s1450_s19  ;;  %s1454_s12 = smov (!%p345_p8, %s342_s12), 16 }
  0x13   : > { %s1044_s8 = sshll.u32 %s321_s30, 2  ;;  %s1047_s26 = sshll.u32 %s1452_s7, 2 }
  0x14   : > { %s324_s9 = sadd.s32 %s1346_s6, %s1044_s8  ;;  %s336_s27 = sadd.s32 %s1346_s6, %s1047_s26 }
  0x15   : > { %s1045_s13 = sshll.u32 %s324_s9, 2  ;;  %s1050_s28 = sshll.u32 %s1454_s12, 2 }
  0x16   : > { %s326_s16 = scalar_lea.vmem %s1433_s0, %s1045_s13  ;;  %s1048_s29 = sshll.u32 %s336_s27, 2 }
  0x17   : > { %v1054_v5 = vld [vmem:[%s326_s16 + $0x8] sm:$0xf]  ;;  %v1214_v6 = vld [vmem:[%s326_s16] sm:$0x1f]   ;;  %s349_s30 = sadd.s32 %s1346_s6, %s1050_s28  ;;  %s338_s7 = scalar_lea.vmem %s1434_s1, %s1048_s29 }
  0x18   : > { %1118 = vmatmul.mubr.msk.bf16.vlgmr.msra.gmra.mrb[0].mxu0 %vm377_vm1, %v1054_v5  ;;  %v363_v7 = vld [vmem:[%s326_s16] sm:$0xf]  ;;  %v481_v8 = vshrl.u32 %v1214_v6, 16  ;;  %v483_v9 = vshll.u32 %v1214_v6, 16  ;;  %s1051_s15 = sshll.u32 %s349_s30, 2  ;;  %s1456_s18 = smov (!%p356_p9, %s1246_s18), 7 }
  0x19   : > { %1124 = vmatmul.mubr.msk.bf16.vlgmr.msra.gmra.mrb[0].mxu1 %vm377_vm1, %v363_v7  ;;  %1128 = vmatpush3.bf16.msra.mxu0 %v1215_v3  ;;  %v537_v14 = vld [vmem:[%s338_s7] sm:$0xf]  ;;  %s351_s6 = scalar_lea.vmem %s1435_s2, %s1051_s15  ;;  %v1070_v19 = vld [vmem:[%s338_s7 + $0x8] sm:$0xf]  ;;  %s1052_s30 = sshll.u32 %s1450_s19, 3 }
  0x1a   : > { %1134 = vmatpush3.bf16.msra.mxu1 %v1216_v4  ;;  %1129 = vmatprep.mubr.msk.bf16.mxu0 %vm1265_vm0, %v1264_v1  ;;  %v485_v10 = vrot.slane %v483_v9, 1  ;;  %v1218_v15 = vld [vmem:[%s338_s7] sm:$0x1f]   ;;  %v1084_v27 = vld [vmem:[%s351_s6 + $0x8] sm:$0xf]  ;;  %s359_s8 = sadd.s32 %s1052_s30, %s1456_s18 }
  0x1b   : > { %1139 = vmatprep.subr.bf16.mxu0 %v1264_v1  ;;  %1135 = vmatprep.mubr.msk.bf16.mxu1 %vm1265_vm0, %v1264_v1  ;;  %v657_v16 = vshrl.u32 %v1218_v15, 16  ;;  %v659_v17 = vshll.u32 %v1218_v15, 16  ;;  %v1222_v23 = vld [vmem:[%s351_s6] sm:$0x1f]   ;;  %s1053_s11 = sshll.u32 %s359_s8, 2 }
  0x1c   : > { %1145 = vmatprep.subr.bf16.mxu1 %v1264_v1  ;;  %v486_v13 = vor.u32 %v485_v10, %v481_v8  ;;  %v835_v24 = vshll.u32 %v1222_v23, 16  ;;  %v713_v25 = vld [vmem:[%s351_s6] sm:$0xf]  ;;  %v833_v28 = vshrl.u32 %v1222_v23, 16  ;;  %s361_s14 = scalar_lea.vmem %s1438_s5, %s1053_s11 }
  0x1d   : > { %v661_v18 = vrot.slane %v659_v17, 1  ;;  %v1094_v7 = vld [vmem:[%s1437_s4] ss:$0 sm:$0xff] }
  0x1e   : > { %v837_v29 = vrot.slane %v835_v24, 1 }
  0x1f   : > { %v662_v21 = vor.u32 %v661_v18, %v657_v16 }
  0x20   : > { %1130 = vmatmul.mubr.msk.bf16.vlgmr.msra.gmra.mrb[4].mxu0 %vm377_vm1, %v486_v13  ;;  %v838_v30 = vor.u32 %v837_v29, %v833_v28 }
  0x21   : > { %1140 = vmatpush3.bf16.msra.mxu0 %v1217_v11  ;;  %1136 = vmatmul.mubr.msk.bf16.vlgmr.msra.gmra.mrb[4].mxu1 %vm377_vm1, %v537_v14 }
  0x22   : > { %1146 = vmatpush3.bf16.msra.mxu1 %v1219_v12  ;;  %1141 = vmatprep.mubr.msk.bf16.mxu0 %vm1265_vm0, %v1264_v1 }
  0x23   : > { %1151 = vmatprep.subr.bf16.mxu0 %v1264_v1  ;;  %1147 = vmatprep.mubr.msk.bf16.mxu1 %vm1265_vm0, %v1264_v1 }
  0x24   : > { %1157 = vmatprep.subr.bf16.mxu1 %v1264_v1 }
  0x28   : > { %1142 = vmatmul.mubr.msk.bf16.vlgmr.msra.gmra.mrb[8].mxu0 %vm377_vm1, %v1070_v19 }
  0x29   : > { %1152 = vmatpush3.bf16.msra.mxu0 %v1220_v20  ;;  %1148 = vmatmul.mubr.msk.bf16.vlgmr.msra.gmra.mrb[8].mxu1 %vm377_vm1, %v662_v21 }
  0x2a   : > { %1158 = vmatpush3.bf16.msra.mxu1 %v1221_v22  ;;  %1153 = vmatprep.mubr.msk.bf16.mxu0 %vm1265_vm0, %v1264_v1 }
  0x2b   : > { %1163 = vmatprep.subr.bf16.mxu0 %v1264_v1  ;;  %1159 = vmatprep.mubr.msk.bf16.mxu1 %vm1265_vm0, %v1264_v1 }
  0x30   : > { %1154 = vmatmul.mubr.msk.bf16.vlgmr.msra.gmra.mrb[12].mxu0 %vm377_vm1, %v713_v25 }
  0x31   : > { %1164 = vmatpush3.bf16.msra.mxu0 %v1223_v26  ;;  %1160 = vmatmul.mubr.msk.bf16.vlgmr.msra.gmra.mrb[12].mxu1 %vm377_vm1, %v1084_v27 }
  0x32   : > { %1165 = vmatprep.mubr.msk.bf16.mxu0 %vm1265_vm0, %v1264_v1 }
  0x38   : > { %1166 = vmatmul.mubr.msk.bf16.vlgmr.msra.gmra.mrb[16].mxu0 %vm377_vm1, %v838_v30 }
  0xeb   : > { %v415_v31 = vpop.f32.mrb[0].mxu0 }
  0xec   : > { %v464_v32 = vpop.f32.mrb[0].mxu1  ;;  %v1119_v33 = vpop.f32.mrb[1].mxu0 }
  0xed   : > { %v465_v34 = vadd.f32 %v464_v32, %v415_v31  ;;  %v418_v35 = vpop.f32.mrb[2].mxu0  ;;  %v1125_v36 = vpop.f32.mrb[1].mxu1 }
  0xee   : > { %v1120_v37 = vpop.f32.mrb[3].mxu0  ;;  %v467_v38 = vpop.f32.mrb[2].mxu1 }
  0xef   : > { %v1126_v39 = vpop.f32.mrb[3].mxu1 }
  0xf3   : > { %v530_v40 = vpop.f32.mrb[4].mxu0 }
  0xf4   : > { %v536_v41 = vadd.f32 %v530_v40, %v465_v34  ;;  %v1131_v42 = vpop.f32.mrb[5].mxu0  ;;  %v584_v43 = vpop.f32.mrb[4].mxu1 }
  0xf5   : > { %v533_v44 = vpop.f32.mrb[6].mxu0  ;;  %v1137_v45 = vpop.f32.mrb[5].mxu1 }
  0xf6   : > { %v590_v46 = vadd.f32 %v584_v43, %v536_v41  ;;  %v1132_v47 = vpop.f32.mrb[7].mxu0  ;;  %v587_v48 = vpop.f32.mrb[6].mxu1 }
  0xf7   : > { %v1138_v49 = vpop.f32.mrb[7].mxu1 }
  0xfb   : > { %v639_v50 = vpop.f32.mrb[8].mxu0 }
  0xfc   : > { %v645_v51 = vadd.f32 %v639_v50, %v590_v46  ;;  %v1143_v52 = vpop.f32.mrb[9].mxu0  ;;  %v706_v53 = vpop.f32.mrb[8].mxu1 }
  0xfd   : > { %v642_v54 = vpop.f32.mrb[10].mxu0  ;;  %v1149_v55 = vpop.f32.mrb[9].mxu1 }
  0xfe   : > { %v712_v56 = vadd.f32 %v706_v53, %v645_v51  ;;  %v1144_v57 = vpop.f32.mrb[11].mxu0  ;;  %v709_v58 = vpop.f32.mrb[10].mxu1 }
  0xff   : > { %v1150_v59 = vpop.f32.mrb[11].mxu1 }
 0x103   : > { %v760_v60 = vpop.f32.mrb[12].mxu0 }
 0x104   : > { %v766_v61 = vadd.f32 %v760_v60, %v712_v56  ;;  %v1155_v62 = vpop.f32.mrb[13].mxu0  ;;  %v815_v63 = vpop.f32.mrb[12].mxu1 }
 0x105   : > { %v763_v0 = vpop.f32.mrb[14].mxu0  ;;  %v1161_v1 = vpop.f32.mrb[13].mxu1 }
 0x106   : > { %v821_v2 = vadd.f32 %v815_v63, %v766_v61  ;;  %v1156_v3 = vpop.f32.mrb[15].mxu0  ;;  %v818_v4 = vpop.f32.mrb[14].mxu1 }
 0x107   : > { %v1162_v5 = vpop.f32.mrb[15].mxu1 }
 0x10b   : > { %v882_v6 = vpop.f32.mrb[16].mxu0 }
 0x10c   : > { %v888_v8 = vadd.f32 %v882_v6, %v821_v2  ;;  %v1167_v9 = vpop.f32.mrb[17].mxu0 }
 0x10d   : > { %v885_v10 = vpop.f32.mrb[18].mxu0 }
 0x10e   : > { %v896_v11 = vadd.f32 %v1094_v7, %v888_v8  ;;  %v1168_v12 = vpop.f32.mrb[19].mxu0 }
 0x110   : > { %v897_v13 = vmax.f32 %v896_v11, 0.0 }
 0x112   : > { %v898_v14 = vpack.c.bf16 %v897_v13, %v897_v13 }
 0x114   : > { %900 = vst.msk [vmem:[%s361_s14] sm:$0xf] %vm899_vm2, %v898_v14 }
 0x115 PF: > { %s15_s22 = sadd.s32 1, %s1262_s22   ;;  %s1439_s18 = smov %s1254_s20 }
 0x116   : > { %p12_p10 = scmp.ge.s32.totalorder %s15_s22, 18   ;;  %s1440_s19 = smov %s1258_s21 }
 0x117   : > { %s1441_s20 = smov %s1444_s23  ;;  %s1442_s21 = smov %s1448_s24 }
 0x118   :  { %14 = sbr.rel (!%p12_p10) target bundleno = 3 (0x3), region = 87 }

// kernel: _lambda_.20
= control target key start
LH: loop header
LB: loop body
LE: loop exit
PB: predicated region body
PF: predicated region fallthrough
CT: control target
= control target key end

     0   :  { %s1496_s21 = smov 0   ;;  %s1498_s22 = smov 0   ;;  %s1685_s0 = inlined_call_operand.vmem [shape: bf16[2,10,1,10,32], index: 0, kind: input, shape index: {}, may-alias: {0,1,2}]   ;;  %s1686_s1 = inlined_call_operand.vmem [shape: bf16[2,10,1,10,32], index: 1, kind: input, shape index: {}, may-alias: {0,1,2}]   ;;  %s1687_s2 = inlined_call_operand.vmem [shape: bf16[2,10,1,10,32], index: 2, kind: input, shape index: {}, may-alias: {0,1,2}]   ;;  %s1688_s3 = inlined_call_operand.vmem [shape: bf16[9,32,32], index: 3, kind: input, shape index: {}]   ;;  %s1689_s4 = inlined_call_operand.vmem [shape: f32[1,32], index: 4, kind: input, shape index: {}]   ;;  %s1690_s5 = inlined_call_operand.vmem [shape: bf16[2,8,8,32], index: 5, kind: input, shape index: {}]   ;;  %s1691_s6 = inlined_call_operand.vmem [shape: bf16[2,8,8,32], index: 6, kind: output, shape index: {}]  }
   0x1   :  { %s1500_s23 = smov 0   ;;  %s1502_s24 = smov 0  }
   0x2   :  { %s1504_s25 = smov 0  }
   0x3 LB: > { %s25_s26 = sadd.s32 1, %s1449_s23  ;;  %s28_s27 = sadd.s32 1, %s1453_s24  ;;  %s1457_s25 = sphi %s1504_s25, %s16_s25   ;;  %s1453_s24 = sphi %s1502_s24, %s1695_s24   ;;  %s1449_s23 = sphi %s1500_s23, %s1694_s23   ;;  %s1445_s22 = sphi %s1498_s22, %s1693_s22   ;;  %s1441_s21 = sphi %s1496_s21, %s1692_s21  }
   0x4   : > { %p26_p0 = scmp.ge.s32.totalorder %s25_s26, 8  ;;  %p1174_p1 = scmp.ge.s32.totalorder %s1457_s25, 1 }
   0x5   : > { %p287_p2 = scmp.lt.s32.totalorder %s1457_s25, 17 }
   0x6   : > { %s1697_s26 = smov (%p26_p0, %s25_s26), 0  ;;  %s1699_s27 = smov (!%p26_p0, %s28_s27), %s1453_s24 }
   0x7   : > { %p288_p3 = pnand %p1174_p1, %p287_p2  ;;  %p30_p4 = scmp.ge.s32.totalorder %s1699_s27, 2 }
   0x8   : > { %v1395_v0 = vld [vmem:[%s1688_s3 + $0x10] sm:$0xff] (!%p288_p3)   ;;  %v1459_v1 = vmov (!%p288_p3), 0.0   ;;  %v1396_v2 = vld [vmem:[%s1688_s3] sm:$0xff] (!%p288_p3)   ;;  %v1397_v3 = vld [vmem:[%s1688_s3 + $0x18] sm:$0xff] (!%p288_p3)   ;;  %vm1460_vm0 = vmmov (!%p288_p3), 0   ;;  %p352_p5 = scmp.lt.s32.totalorder (!%p288_p3), %s1445_s22, 1 }
   0x9   : > { %s1701_s27 = smov (%p30_p4, %s1699_s27), 0  ;;  %291 = sbr.rel (%p288_p3) target bundleno = 287 (0x11f), region = 44 }
   0xa   : > { %1280 = vmatprep.subr.bf16.mxu0 (!%p288_p3), %v1459_v1  ;;  %1288 = vmatprep.subr.bf16.mxu1 (!%p288_p3), %v1459_v1  ;;  %v1398_v4 = vld [vmem:[%s1688_s3 + $0x8] sm:$0xff] (!%p288_p3)   ;;  %p354_p6 = scmp.lt.s32.totalorder (!%p288_p3), %s1441_s21, 9  ;;  %s361_s16 = sadd.s32 (!%p288_p3), 1, %s1441_s21  ;;  %vm435_vm1 = vcmask (!%p288_p3), 261120   ;;  %v1401_v5 = vld [vmem:[%s1688_s3 + $0x30] sm:$0xff] (!%p288_p3)   ;;  %v1403_v9 = vld [vmem:[%s1688_s3 + $0x38] sm:$0xff] (!%p288_p3)  }
   0xb   : > { %1281 = vmatpush3.bf16.msra.mxu0 (!%p288_p3), %v1395_v0  ;;  %1284 = vmatprep.mubr.msk.bf16.mxu0 (!%p288_p3), %vm1460_vm0, %v1459_v1  ;;  %p364_p7 = scmp.lt.s32.totalorder (!%p288_p3), %s361_s16, 9  ;;  %s372_s9 = sadd.s32 (!%p288_p3), 2, %s1441_s21  ;;  %v1400_v12 = vld [vmem:[%s1688_s3 + $0x20] sm:$0xff] (!%p288_p3)   ;;  %v1407_v15 = vld [vmem:[%s1688_s3 + $0x50] sm:$0xff] (!%p288_p3)   ;;  %v1402_v23 = vld [vmem:[%s1688_s3 + $0x28] sm:$0xff] (!%p288_p3)   ;;  %vm1019_vm2 = vcmask (!%p288_p3), 257024  }
   0xc   : > { %1289 = vmatpush3.bf16.msra.mxu1 (!%p288_p3), %v1396_v2  ;;  %1282 = vmatprep.subr.bf16.mxu0 (!%p288_p3), %v1459_v1  ;;  %p375_p8 = scmp.lt.s32.totalorder (!%p288_p3), %s372_s9, 9  ;;  %v1409_v24 = vld [vmem:[%s1688_s3 + $0x58] sm:$0xff] (!%p288_p3)   ;;  %v1405_v28 = vld [vmem:[%s1688_s3 + $0x40] sm:$0xff] (!%p288_p3)   ;;  %v1412_v33 = vld [vmem:[%s1688_s3 + $0x70] sm:$0xff] (!%p288_p3)   ;;  %p385_p9 = scmp.lt.s32.totalorder (!%p288_p3), %s1441_s21, 7 }
   0xd   : > { %1290 = vmatprep.subr.bf16.mxu1 (!%p288_p3), %v1459_v1  ;;  %1292 = vmatprep.mubr.msk.bf16.mxu1 (!%p288_p3), %vm1460_vm0, %v1459_v1  ;;  %v1408_v37 = vld [vmem:[%s1688_s3 + $0x48] sm:$0xff] (!%p288_p3)   ;;  %v1414_v40 = vld [vmem:[%s1688_s3 + $0x78] sm:$0xff] (!%p288_p3)   ;;  %v1410_v42 = vld [vmem:[%s1688_s3 + $0x60] sm:$0xff] (!%p288_p3)  }
   0xe   : > { %v1413_v44 = vld [vmem:[%s1688_s3 + $0x68] sm:$0xff] (!%p288_p3)   ;;  %v1416_v46 = vld [vmem:[%s1688_s3 + $0x80] sm:$0xff] (!%p288_p3)  }
   0xf   : > { %1283 = vmatpush3.bf16.msra.mxu0 (!%p288_p3), %v1397_v3  ;;  %v1417_v49 = vld [vmem:[%s1688_s3 + $0x88] sm:$0xff] (!%p288_p3)  }
  0x10   : > { %s1703_s22 = smov (!%p352_p5, %s1445_s22), 1  ;;  %1291 = vmatpush3.bf16.msra.mxu1 %v1398_v4  ;;  %1296 = vmatprep.subr.bf16.mxu0 %v1459_v1  ;;  %s1705_s16 = smov (!%p364_p7, %s361_s16), 9 }
  0x11   : > { %s355_s12 = scalar_select %p354_p6, %s1441_s21, 9  ;;  %1304 = vmatprep.subr.bf16.mxu1 %v1459_v1 }
  0x12   : > { %s1557_s13 = smul.u32 20, %s1703_s22  ;;  %s1177_s8 = sshll.u32 %s1705_s16, 1 }
  0x13   : > { %s1175_s14 = sshll.u32 %s355_s12, 1  ;;  %s1707_s9 = smov (!%p375_p8, %s372_s9), 9 }
  0x14   : > { %s358_s15 = sadd.s32 %s1557_s13, %s1175_s14  ;;  %s368_s12 = sadd.s32 %s1557_s13, %s1177_s8 }
  0x15   : > { %s1176_s17 = sshll.u32 %s358_s15, 2  ;;  %s1178_s14 = sshll.u32 %s368_s12, 2 }
  0x16   : > { %s360_s29 = scalar_lea.vmem %s1685_s0, %s1176_s17  ;;  %s370_s18 = scalar_lea.vmem %s1686_s1, %s1178_s14 }
  0x17   : > { %v400_v6 = vld [vmem:[%s360_s29] sm:$0xf]  ;;  %v405_v7 = vld [vmem:[%s360_s29 + $0x4] sm:$0x1]  ;;  %s1709_s21 = smov (!%p385_p9, %s1441_s21), 7 }
  0x18   : > { %v1189_v8 = vcombine.low %v400_v6, %v405_v7  ;;  %1293 = vmatmul.mubr.msk.bf16.vlgmr.msra.gmra.mrb[0].mxu1 %vm435_vm1, %v400_v6  ;;  %v534_v14 = vld [vmem:[%s360_s29] sm:$0xe]  ;;  %v663_v19 = vld [vmem:[%s370_s18 + $0x4] sm:$0x1]  ;;  %s1179_s29 = sshll.u32 %s1707_s9, 1 }
  0x19   : > { %1305 = vmatpush3.bf16.msra.mxu1 %v1401_v5  ;;  %1308 = vmatprep.mubr.msk.bf16.mxu1 %vm1460_vm0, %v1459_v1  ;;  %v600_v17 = vld [vmem:[%s370_s18] sm:$0xf]  ;;  %v1200_v21 = vcombine.low %v534_v14, %v405_v7  ;;  %s379_s8 = sadd.s32 %s1557_s13, %s1179_s29 }
  0x1a   : > { %v417_v10 = vshrl.u32 %v1189_v8, 16  ;;  %v419_v11 = vshll.u32 %v1189_v8, 16  ;;  %1306 = vmatprep.subr.bf16.mxu1 %v1459_v1  ;;  %v662_v18 = vld [vmem:[%s370_s18] sm:$0xf]  ;;  %s1180_s10 = sshll.u32 %s379_s8, 2 }
  0x1b   : > { %v737_v20 = vld [vmem:[%s370_s18] sm:$0xe]  ;;  %v1215_v22 = vcombine.low %v662_v18, %v663_v19  ;;  %v543_v26 = vrot.slane %v1200_v21, 1  ;;  %s1606_s9 = scalar_lea.vmem %s1687_s2, %s1180_s10 }
  0x1c   : > { %v421_v13 = vrot.slane %v419_v11, 1  ;;  %v1223_v25 = vcombine.low %v737_v20, %v663_v19  ;;  %v865_v29 = vld [vmem:[%s1606_s9] sm:$0xf]  ;;  %v866_v30 = vld [vmem:[%s1606_s9 + $0x4] sm:$0x1] }
  0x1d   : > { %1307 = vmatpush3.bf16.msra.mxu1 %v1403_v9  ;;  %v677_v27 = vshll.u32 %v1215_v22, 16  ;;  %v1238_v32 = vcombine.low %v865_v29, %v866_v30  ;;  %v675_v34 = vshrl.u32 %v1215_v22, 16  ;;  %v803_v45 = vld [vmem:[%s1606_s9] sm:$0xf] }
  0x1e   : > { %v422_v16 = vor.u32 %v421_v13, %v417_v10  ;;  %1320 = vmatprep.subr.bf16.mxu1 %v1459_v1  ;;  %v746_v31 = vrot.slane %v1223_v25, 1  ;;  %v940_v47 = vld [vmem:[%s1606_s9] sm:$0xe]  ;;  %s1181_s9 = sshll.u32 %s1703_s22, 3 }
  0x1f   : > { %v679_v35 = vrot.slane %v677_v27, 1  ;;  %v880_v36 = vshll.u32 %v1238_v32, 16  ;;  %v878_v38 = vshrl.u32 %v1238_v32, 16  ;;  %v1246_v48 = vcombine.low %v940_v47, %v866_v30  ;;  %s388_s14 = sadd.s32 %s1181_s9, %s1709_s21 }
  0x20   : > { %1285 = vmatmul.mubr.msk.bf16.vlgmr.msra.gmra.mrb[0].mxu0 %vm435_vm1, %v422_v16  ;;  %1309 = vmatmul.mubr.msk.bf16.vlgmr.msra.gmra.mrb[4].mxu1 %vm435_vm1, %v600_v17  ;;  %s1182_s15 = sshll.u32 %s388_s14, 2 }
  0x21   : > { %1297 = vmatpush3.bf16.msra.mxu0 %v1400_v12  ;;  %1300 = vmatprep.mubr.msk.bf16.mxu0 %vm1460_vm0, %v1459_v1  ;;  %v882_v39 = vrot.slane %v880_v36, 1  ;;  %v680_v41 = vor.u32 %v679_v35, %v675_v34  ;;  %v949_v50 = vrot.slane %v1246_v48, 1  ;;  %s390_s18 = scalar_lea.vmem %s1690_s5, %s1182_s15  ;;  %s398_s16 = scalar_lea.vmem %s1691_s6, %s1182_s15 }
  0x22   : > { %1298 = vmatprep.subr.bf16.mxu0 %v1459_v1  ;;  %1321 = vmatpush3.bf16.msra.mxu1 %v1407_v15 }
  0x23   : > { %1322 = vmatprep.subr.bf16.mxu1 %v1459_v1  ;;  %1324 = vmatprep.mubr.msk.bf16.mxu1 %vm1460_vm0, %v1459_v1  ;;  %v883_v43 = vor.u32 %v882_v39, %v878_v38 }
  0x25   : > { %1299 = vmatpush3.bf16.msra.mxu0 %v1402_v23 }
  0x26   : > { %1312 = vmatprep.subr.bf16.mxu0 %v1459_v1  ;;  %1323 = vmatpush3.bf16.msra.mxu1 %v1409_v24 }
  0x27   : > { %1336 = vmatprep.subr.bf16.mxu1 %v1459_v1 }
  0x28   : > { %1301 = vmatmul.mubr.msk.bf16.vlgmr.msra.gmra.mrb[4].mxu0 %vm435_vm1, %v543_v26  ;;  %v1014_v26 = vld [vmem:[%s390_s18] sm:$0xf] }
  0x29   : > { %1313 = vmatpush3.bf16.msra.mxu0 %v1405_v28  ;;  %1316 = vmatprep.mubr.msk.bf16.mxu0 %vm1460_vm0, %v1459_v1  ;;  %v1250_v28 = vld [vmem:[%s1689_s4] ss:$0 sm:$0xff]  ;;  %v1015_v30 = vunpack.c.l.bf16 %v1014_v26 }
  0x2a   : > { %1314 = vmatprep.subr.bf16.mxu0 %v1459_v1  ;;  %1325 = vmatmul.mubr.msk.bf16.vlgmr.msra.gmra.mrb[8].mxu1 %vm435_vm1, %v746_v31 }
  0x2b   : > { %1337 = vmatpush3.bf16.msra.mxu1 %v1412_v33  ;;  %1340 = vmatprep.mubr.msk.bf16.mxu1 %vm1460_vm0, %v1459_v1 }
  0x2c   : > { %1338 = vmatprep.subr.bf16.mxu1 %v1459_v1 }
  0x2d   : > { %1315 = vmatpush3.bf16.msra.mxu0 %v1408_v37 }
  0x2e   : > { %1328 = vmatprep.subr.bf16.mxu0 %v1459_v1 }
  0x2f   : > { %1339 = vmatpush3.bf16.msra.mxu1 %v1414_v40 }
  0x30   : > { %1317 = vmatmul.mubr.msk.bf16.vlgmr.msra.gmra.mrb[8].mxu0 %vm435_vm1, %v680_v41 }
  0x31   : > { %1329 = vmatpush3.bf16.msra.mxu0 %v1410_v42  ;;  %1332 = vmatprep.mubr.msk.bf16.mxu0 %vm1460_vm0, %v1459_v1 }
  0x32   : > { %1330 = vmatprep.subr.bf16.mxu0 %v1459_v1  ;;  %1341 = vmatmul.mubr.msk.bf16.vlgmr.msra.gmra.mrb[12].mxu1 %vm435_vm1, %v883_v43 }
  0x35   : > { %1331 = vmatpush3.bf16.msra.mxu0 %v1413_v44 }
  0x36   : > { %1344 = vmatprep.subr.bf16.mxu0 %v1459_v1 }
  0x38   : > { %1333 = vmatmul.mubr.msk.bf16.vlgmr.msra.gmra.mrb[12].mxu0 %vm435_vm1, %v803_v45 }
  0x39   : > { %1345 = vmatpush3.bf16.msra.mxu0 %v1416_v46  ;;  %1348 = vmatprep.mubr.msk.bf16.mxu0 %vm1460_vm0, %v1459_v1 }
  0x3a   : > { %1346 = vmatprep.subr.bf16.mxu0 %v1459_v1 }
  0x3d   : > { %1347 = vmatpush3.bf16.msra.mxu0 %v1417_v49 }
  0x40   : > { %1349 = vmatmul.mubr.msk.bf16.vlgmr.msra.gmra.mrb[16].mxu0 %vm435_vm1, %v949_v50 }
  0xeb   : > { %v528_v51 = vpop.f32.mrb[0].mxu1 }
  0xec   : > { %v1294_v52 = vpop.f32.mrb[1].mxu1 }
  0xed   : > { %v531_v53 = vpop.f32.mrb[2].mxu1 }
  0xee   : > { %v1295_v54 = vpop.f32.mrb[3].mxu1 }
  0xf3   : > { %v473_v55 = vpop.f32.mrb[0].mxu0  ;;  %v655_v56 = vpop.f32.mrb[4].mxu1 }
  0xf4   : > { %v529_v57 = vadd.f32 %v528_v51, %v473_v55  ;;  %v1286_v58 = vpop.f32.mrb[1].mxu0  ;;  %v1310_v59 = vpop.f32.mrb[5].mxu1 }
  0xf5   : > { %v476_v60 = vpop.f32.mrb[2].mxu0  ;;  %v658_v61 = vpop.f32.mrb[6].mxu1 }
  0xf6   : > { %v1287_v62 = vpop.f32.mrb[3].mxu0  ;;  %v1311_v63 = vpop.f32.mrb[7].mxu1 }
  0xfb   : > { %v593_v0 = vpop.f32.mrb[4].mxu0 }
  0xfc   : > { %v599_v1 = vadd.f32 %v593_v0, %v529_v57  ;;  %v1302_v2 = vpop.f32.mrb[5].mxu0 }
  0xfd   : > { %v596_v3 = vpop.f32.mrb[6].mxu0  ;;  %v796_v4 = vpop.f32.mrb[8].mxu1 }
  0xfe   : > { %v661_v5 = vadd.f32 %v655_v56, %v599_v1  ;;  %v1303_v6 = vpop.f32.mrb[7].mxu0  ;;  %v1326_v7 = vpop.f32.mrb[9].mxu1 }
  0xff   : > { %v799_v8 = vpop.f32.mrb[10].mxu1 }
 0x100   : > { %v1327_v9 = vpop.f32.mrb[11].mxu1 }
 0x103   : > { %v730_v10 = vpop.f32.mrb[8].mxu0 }
 0x104   : > { %v736_v11 = vadd.f32 %v730_v10, %v661_v5  ;;  %v1318_v12 = vpop.f32.mrb[9].mxu0 }
 0x105   : > { %v733_v13 = vpop.f32.mrb[10].mxu0  ;;  %v933_v14 = vpop.f32.mrb[12].mxu1 }
 0x106   : > { %v802_v15 = vadd.f32 %v796_v4, %v736_v11  ;;  %v1319_v16 = vpop.f32.mrb[11].mxu0  ;;  %v1342_v17 = vpop.f32.mrb[13].mxu1 }
 0x107   : > { %v936_v18 = vpop.f32.mrb[14].mxu1 }
 0x108   : > { %v1343_v19 = vpop.f32.mrb[15].mxu1 }
 0x10b   : > { %v858_v20 = vpop.f32.mrb[12].mxu0 }
 0x10c   : > { %v864_v21 = vadd.f32 %v858_v20, %v802_v15  ;;  %v1334_v22 = vpop.f32.mrb[13].mxu0 }
 0x10d   : > { %v861_v23 = vpop.f32.mrb[14].mxu0 }
 0x10e   : > { %v939_v24 = vadd.f32 %v933_v14, %v864_v21  ;;  %v1335_v25 = vpop.f32.mrb[15].mxu0 }
 0x113   : > { %v999_v27 = vpop.f32.mrb[16].mxu0 }
 0x114   : > { %v1005_v29 = vadd.f32 %v999_v27, %v939_v24  ;;  %v1350_v31 = vpop.f32.mrb[17].mxu0 }
 0x115   : > { %v1002_v32 = vpop.f32.mrb[18].mxu0 }
 0x116   : > { %v1013_v33 = vadd.f32 %v1250_v28, %v1005_v29  ;;  %v1351_v34 = vpop.f32.mrb[19].mxu0 }
 0x118   : > { %v1016_v35 = vadd.f32 %v1015_v30, %v1013_v33 }
 0x11a   : > { %v1017_v36 = vmax.f32 %v1016_v35, 0.0 }
 0x11c   : > { %v1018_v37 = vpack.c.bf16 %v1017_v36, %v1017_v36 }
 0x11e   : > { %1020 = vst.msk [vmem:[%s398_s16] sm:$0xf] %vm1019_vm2, %v1018_v37 }
 0x11f PF: > { %s16_s25 = sadd.s32 1, %s1457_s25   ;;  %s1692_s21 = smov %s1449_s23 }
 0x120   : > { %p13_p10 = scmp.ge.s32.totalorder %s16_s25, 18   ;;  %s1693_s22 = smov %s1453_s24 }
 0x121   : > { %s1694_s23 = smov %s1697_s26  ;;  %s1695_s24 = smov %s1701_s27 }
 0x122   :  { %15 = sbr.rel (!%p13_p10) target bundleno = 3 (0x3), region = 91 }

// kernel: _lambda_.22
= control target key start
LH: loop header
LB: loop body
LE: loop exit
PB: predicated region body
PF: predicated region fallthrough
CT: control target
= control target key end

     0   :  { %s509_s12 = smov 0   ;;  %s511_s13 = smov 0   ;;  %s574_s0 = inlined_call_operand.vmem [shape: bf16[2,7,2,4,32], index: 0, kind: input, shape index: {}]   ;;  %s575_s1 = inlined_call_operand.vmem [shape: bf16[1,32,64], index: 1, kind: input, shape index: {}]   ;;  %s576_s2 = inlined_call_operand.vmem [shape: f32[1,64], index: 2, kind: input, shape index: {}]   ;;  %s577_s3 = inlined_call_operand.vmem [shape: bf16[2,4,4,64], index: 3, kind: output, shape index: {}]  }
   0x1   :  { %s513_s14 = smov 0   ;;  %s515_s15 = smov 0  }
   0x2   :  { %s517_s16 = smov 0  }
   0x3 LB: > { %s22_s17 = sadd.s32 1, %s477_s14  ;;  %s25_s18 = sadd.s32 1, %s481_s15  ;;  %s485_s16 = sphi %s517_s16, %s13_s16   ;;  %s481_s15 = sphi %s515_s15, %s581_s15   ;;  %s477_s14 = sphi %s513_s14, %s580_s14   ;;  %s473_s13 = sphi %s511_s13, %s579_s13   ;;  %s469_s12 = sphi %s509_s12, %s578_s12  }
   0x4   : > { %p23_p0 = scmp.ge.s32.totalorder %s22_s17, 4  ;;  %p379_p1 = scmp.ge.s32.totalorder %s485_s16, 1 }
   0x5   : > { %p161_p2 = scmp.lt.s32.totalorder %s485_s16, 9 }
   0x6   : > { %s583_s17 = smov (%p23_p0, %s22_s17), 0  ;;  %s585_s18 = smov (!%p23_p0, %s25_s18), %s481_s15 }
   0x7   : > { %p162_p3 = pnand %p379_p1, %p161_p2  ;;  %p27_p4 = scmp.ge.s32.totalorder %s585_s18, 2 }
   0x8   : > { %v445_v0 = vld [vmem:[%s575_s1] sm:$0xff] (!%p162_p3)   ;;  %v487_v1 = vmov (!%p162_p3), 0.0   ;;  %v446_v2 = vld [vmem:[%s575_s1 + $0x8] sm:$0xff] (!%p162_p3)   ;;  %vm488_vm0 = vmmov (!%p162_p3), 0   ;;  %s380_s23 = sshll.u32 (!%p162_p3), %s469_s12, 1  ;;  %p194_p5 = scmp.lt.s32.totalorder (!%p162_p3), %s473_s13, 1 }
   0x9   : > { %s587_s18 = smov (%p27_p4, %s585_s18), 0  ;;  %165 = sbr.rel (%p162_p3) target bundleno = 240 (0xf0), region = 32 }
   0xa   : > { %394 = vmatprep.subr.bf16.mxu0 (!%p162_p3), %v487_v1  ;;  %398 = vmatprep.mubr.msk.bf16.mxu0 (!%p162_p3), %vm488_vm0, %v487_v1  ;;  %p196_p6 = scmp.lt.s32.totalorder (!%p162_p3), %s380_s23, 6  ;;  %vm237_vm1 = vcmask (!%p162_p3), 261120   ;;  %p206_p7 = scmp.lt.s32.totalorder (!%p162_p3), %s469_s12, 3  ;;  %v385_v4 = vld [vmem:[%s576_s2] ss:$0 sm:$0xff] (!%p162_p3)  ;;  %vm282_vm2 = vcmask (!%p162_p3), 517120  }
   0xb   : > { %395 = vmatpush3.bf16.msra.mxu0 (!%p162_p3), %v445_v0 }
   0xc   : > { %396 = vmatprep.subr.bf16.mxu0 (!%p162_p3), %v487_v1 }
   0xf   : > { %397 = vmatpush3.bf16.msra.mxu0 (!%p162_p3), %v446_v2 }
  0x10   : > { %s589_s13 = smov (!%p194_p5, %s473_s13), 1  ;;  %s591_s23 = smov (!%p196_p6, %s380_s23), 6 }
  0x11   : > { %s402_s24 = smul.u32 14, %s589_s13  ;;  %s381_s25 = sshll.u32 %s591_s23, 1 }
  0x12   : > { %s593_s12 = smov (!%p206_p7, %s469_s12), 3  ;;  %s383_s4 = sshll.u32 %s589_s13, 2 }
  0x13   : > { %s200_s26 = sadd.s32 %s402_s24, %s381_s25  ;;  %s209_s5 = sadd.s32 %s383_s4, %s593_s12 }
  0x14   : > { %s382_s27 = sshll.u32 %s200_s26, 1  ;;  %s384_s8 = sshll.u32 %s209_s5, 1 }
  0x15   : > { %s202_s30 = scalar_lea.vmem %s574_s0, %s382_s27  ;;  %s211_s11 = scalar_lea.vmem %s577_s3, %s384_s8 }
  0x16   : > { %v213_v3 = vld [vmem:[%s202_s30] sm:$0x3] }
  0x17   : > { %399 = vmatmul.mubr.msk.bf16.vlgmr.msra.gmra.mrb[0].mxu0 %vm237_vm1, %v213_v3 }
  0xea   : > { %v275_v5 = vpop.f32.mrb[0].mxu0 }
  0xeb   : > { %v276_v6 = vadd.f32 %v385_v4, %v275_v5  ;;  %v400_v7 = vpop.f32.mrb[1].mxu0 }
  0xec   : > { %v278_v8 = vpop.f32.mrb[2].mxu0 }
  0xed   : > { %v281_v9 = vpack.c.bf16 %v276_v6, %v276_v6  ;;  %v401_v10 = vpop.f32.mrb[3].mxu0 }
  0xef   : > { %283 = vst.msk [vmem:[%s211_s11] sm:$0x3] %vm282_vm2, %v281_v9 }
  0xf0 PF: > { %s13_s16 = sadd.s32 1, %s485_s16   ;;  %s578_s12 = smov %s477_s14 }
  0xf1   : > { %p10_p8 = scmp.ge.s32.totalorder %s13_s16, 10   ;;  %s579_s13 = smov %s481_s15 }
  0xf2   : > { %s580_s14 = smov %s583_s17  ;;  %s581_s15 = smov %s587_s18 }
  0xf3   :  { %12 = sbr.rel (!%p10_p8) target bundleno = 3 (0x3), region = 62 }

// kernel: _lambda_.25
= control target key start
LH: loop header
LB: loop body
LE: loop exit
PB: predicated region body
PF: predicated region fallthrough
CT: control target
= control target key end

     0   :  { %s518_s12 = smov 0   ;;  %s520_s13 = smov 0   ;;  %s589_s0 = inlined_call_operand.vmem [shape: bf16[2,3,2,2,64], index: 0, kind: input, shape index: {}]   ;;  %s590_s1 = inlined_call_operand.vmem [shape: bf16[1,64,128], index: 1, kind: input, shape index: {}]   ;;  %s591_s2 = inlined_call_operand.vmem [shape: f32[1,128], index: 2, kind: input, shape index: {}]   ;;  %s592_s3 = inlined_call_operand.vmem [shape: bf16[2,2,2,128], index: 3, kind: output, shape index: {}]  }
   0x1   :  { %s522_s14 = smov 0   ;;  %s524_s15 = smov 0  }
   0x2   :  { %s526_s16 = smov 0  }
   0x3 LB: > { %s22_s17 = sadd.s32 1, %s486_s14  ;;  %s25_s18 = sadd.s32 1, %s490_s15  ;;  %s494_s16 = sphi %s526_s16, %s13_s16   ;;  %s490_s15 = sphi %s524_s15, %s596_s15   ;;  %s486_s14 = sphi %s522_s14, %s595_s14   ;;  %s482_s13 = sphi %s520_s13, %s594_s13   ;;  %s478_s12 = sphi %s518_s12, %s593_s12  }
   0x4   : > { %p23_p0 = scmp.ge.s32.totalorder %s22_s17, 2  ;;  %p380_p1 = scmp.ge.s32.totalorder %s494_s16, 1 }
   0x5   : > { %p160_p2 = scmp.lt.s32.totalorder %s494_s16, 5 }
   0x6   : > { %s598_s17 = smov (%p23_p0, %s22_s17), 0  ;;  %s600_s18 = smov (!%p23_p0, %s25_s18), %s490_s15 }
   0x7   : > { %p161_p3 = pnand %p380_p1, %p160_p2  ;;  %p27_p4 = scmp.ge.s32.totalorder %s600_s18, 2 }
   0x8   : > { %v452_v0 = vld [vmem:[%s590_s1] sm:$0xff] (!%p161_p3)   ;;  %v496_v1 = vmov (!%p161_p3), 0.0   ;;  %v453_v2 = vld [vmem:[%s590_s1 + $0x8] sm:$0xff] (!%p161_p3)   ;;  %vm497_vm0 = vmmov (!%p161_p3), 0   ;;  %s381_s23 = sshll.u32 (!%p161_p3), %s478_s12, 1  ;;  %p191_p5 = scmp.lt.s32.totalorder (!%p161_p3), %s482_s13, 1 }
   0x9   : > { %s602_s18 = smov (%p27_p4, %s600_s18), 0  ;;  %164 = sbr.rel (%p161_p3) target bundleno = 243 (0xf3), region = 32 }
   0xa   : > { %397 = vmatprep.subr.bf16.mxu0 (!%p161_p3), %v496_v1  ;;  %405 = vmatprep.mubr.msk.bf16.mxu0 (!%p161_p3), %vm497_vm0, %v496_v1  ;;  %p193_p6 = scmp.lt.s32.totalorder (!%p161_p3), %s381_s23, 2  ;;  %v454_v3 = vld [vmem:[%s590_s1 + $0x10] sm:$0xff] (!%p161_p3)   ;;  %v455_v4 = vld [vmem:[%s590_s1 + $0x18] sm:$0xff] (!%p161_p3)   ;;  %vm248_vm1 = vcmask (!%p161_p3), 523264   ;;  %p202_p7 = scmp.lt.s32.totalorder (!%p161_p3), %s478_s12, 1 }
   0xb   : > { %398 = vmatpush3.bf16.msra.mxu0 (!%p161_p3), %v452_v0  ;;  %v384_v6 = vld [vmem:[%s591_s2] ss:$0 sm:$0xff] (!%p161_p3) }
   0xc   : > { %399 = vmatprep.subr.bf16.mxu0 (!%p161_p3), %v496_v1 }
   0xf   : > { %400 = vmatpush3.bf16.msra.mxu0 (!%p161_p3), %v453_v2 }
  0x10   : > { %s604_s13 = smov (!%p191_p5, %s482_s13), 1  ;;  %s606_s23 = smov (!%p193_p6, %s381_s23), 2  ;;  %401 = vmatprep.subr.bf16.mxu0 %v496_v1 }
  0x11   : > { %s409_s26 = smul.u32 6, %s604_s13  ;;  %s382_s27 = sshll.u32 %s606_s23, 1 }
  0x12   : > { %s608_s12 = smov (!%p202_p7, %s478_s12), 1  ;;  %s383_s7 = sshll.u32 %s604_s13, 1 }
  0x13   : > { %s197_s28 = sadd.s32 %s409_s26, %s382_s27  ;;  %402 = vmatpush3.bf16.msra.mxu0 %v454_v3  ;;  %s205_s10 = sadd.s32 %s383_s7, %s608_s12 }
  0x14   : > { %403 = vmatprep.subr.bf16.mxu0 %v496_v1  ;;  %s198_s6 = scalar_lea.vmem %s589_s0, %s197_s28  ;;  %s206_s20 = scalar_lea.vmem %s592_s3, %s205_s10 }
  0x15   : > { %v208_v5 = vld [vmem:[%s198_s6] sm:$0x1] }
  0x17   : > { %404 = vmatpush3.bf16.msra.mxu0 %v455_v4 }
  0x1a   : > { %406 = vmatmul.mubr.msk.bf16.vlgmr.msra.gmra.mrb[0].mxu0 %vm248_vm1, %v208_v5 }
  0xed   : > { %v286_v7 = vpop.f32.mrb[0].mxu0 }
  0xee   : > { %v287_v8 = vadd.f32 %v384_v6, %v286_v7  ;;  %v407_v9 = vpop.f32.mrb[1].mxu0 }
  0xef   : > { %v289_v10 = vpop.f32.mrb[2].mxu0 }
  0xf0   : > { %v292_v11 = vpack.c.bf16 %v287_v8, %v287_v8  ;;  %v408_v12 = vpop.f32.mrb[3].mxu0 }
  0xf2   : > { %293 = vst [vmem:[%s206_s20] sm:$0x1] %v292_v11 }
  0xf3 PF: > { %s13_s16 = sadd.s32 1, %s494_s16   ;;  %s593_s12 = smov %s486_s14 }
  0xf4   : > { %p10_p8 = scmp.ge.s32.totalorder %s13_s16, 6   ;;  %s594_s13 = smov %s490_s15 }
  0xf5   : > { %s595_s14 = smov %s598_s17  ;;  %s596_s15 = smov %s602_s18 }
  0xf6   :  { %12 = sbr.rel (!%p10_p8) target bundleno = 3 (0x3), region = 62 }

// kernel: _lambda_.21
= control target key start
LH: loop header
LB: loop body
LE: loop exit
PB: predicated region body
PF: predicated region fallthrough
CT: control target
= control target key end

     0   :  { %s1420_s18 = smov 0   ;;  %s1422_s19 = smov 0   ;;  %s1603_s0 = inlined_call_operand.vmem [shape: bf16[2,9,2,5,32], index: 0, kind: input, shape index: {}, may-alias: {0,1,2}]   ;;  %s1604_s1 = inlined_call_operand.vmem [shape: bf16[2,9,2,5,32], index: 1, kind: input, shape index: {}, may-alias: {0,1,2}]   ;;  %s1605_s2 = inlined_call_operand.vmem [shape: bf16[2,9,2,5,32], index: 2, kind: input, shape index: {}, may-alias: {0,1,2}]   ;;  %s1606_s3 = inlined_call_operand.vmem [shape: bf16[9,32,64], index: 3, kind: input, shape index: {}]   ;;  %s1607_s4 = inlined_call_operand.vmem [shape: f32[1,64], index: 4, kind: input, shape index: {}]   ;;  %s1608_s5 = inlined_call_operand.vmem [shape: bf16[2,4,4,64], index: 5, kind: output, shape index: {}]  }
   0x1   :  { %s1424_s20 = smov 0   ;;  %s1426_s21 = smov 0  }
   0x2   :  { %s1428_s22 = smov 0  }
   0x3 LB: > { %s24_s23 = sadd.s32 1, %s1378_s20  ;;  %s27_s24 = sadd.s32 1, %s1382_s21  ;;  %s1386_s22 = sphi %s1428_s22, %s15_s22   ;;  %s1382_s21 = sphi %s1426_s21, %s1612_s21   ;;  %s1378_s20 = sphi %s1424_s20, %s1611_s20   ;;  %s1374_s19 = sphi %s1422_s19, %s1610_s19   ;;  %s1370_s18 = sphi %s1420_s18, %s1609_s18  }
   0x4   : > { %p25_p0 = scmp.ge.s32.totalorder %s24_s23, 4  ;;  %p1105_p1 = scmp.ge.s32.totalorder %s1386_s22, 1 }
   0x5   : > { %p259_p2 = scmp.lt.s32.totalorder %s1386_s22, 9 }
   0x6   : > { %s1614_s23 = smov (%p25_p0, %s24_s23), 0  ;;  %s1616_s24 = smov (!%p25_p0, %s27_s24), %s1382_s21 }
   0x7   : > { %p260_p3 = pnand %p1105_p1, %p259_p2  ;;  %p29_p4 = scmp.ge.s32.totalorder %s1616_s24, 2 }
   0x8   : > { %v1327_v0 = vld [vmem:[%s1606_s3 + $0x10] sm:$0xff] (!%p260_p3)   ;;  %v1388_v1 = vmov (!%p260_p3), 0.0   ;;  %v1328_v2 = vld [vmem:[%s1606_s3] sm:$0xff] (!%p260_p3)   ;;  %v1329_v3 = vld [vmem:[%s1606_s3 + $0x18] sm:$0xff] (!%p260_p3)   ;;  %vm1389_vm0 = vmmov (!%p260_p3), 0   ;;  %s1468_s6 = sshll.u32 (!%p260_p3), %s1370_s18, 1 }
   0x9   : > { %s1618_s24 = smov (%p29_p4, %s1616_s24), 0  ;;  %263 = sbr.rel (%p260_p3) target bundleno = 277 (0x115), region = 40 }
   0xa   : > { %1212 = vmatprep.subr.bf16.mxu0 (!%p260_p3), %v1388_v1  ;;  %1220 = vmatprep.subr.bf16.mxu1 (!%p260_p3), %v1388_v1  ;;  %v1330_v4 = vld [vmem:[%s1606_s3 + $0x8] sm:$0xff] (!%p260_p3)   ;;  %p318_p5 = scmp.lt.s32.totalorder (!%p260_p3), %s1374_s19, 1  ;;  %p320_p6 = scmp.lt.s32.totalorder (!%p260_p3), %s1468_s6, 8  ;;  %vm387_vm1 = vcmask (!%p260_p3), 261120   ;;  %v1332_v5 = vld [vmem:[%s1606_s3 + $0x20] sm:$0xff] (!%p260_p3)   ;;  %v1333_v6 = vld [vmem:[%s1606_s3 + $0x30] sm:$0xff] (!%p260_p3)  }
   0xb   : > { %1213 = vmatpush3.bf16.msra.mxu0 (!%p260_p3), %v1327_v0  ;;  %1216 = vmatprep.mubr.msk.bf16.mxu0 (!%p260_p3), %vm1389_vm0, %v1388_v1  ;;  %s329_s13 = sadd.s32 (!%p260_p3), 1, %s1468_s6  ;;  %v1334_v10 = vld [vmem:[%s1606_s3 + $0x28] sm:$0xff] (!%p260_p3)   ;;  %v1335_v11 = vld [vmem:[%s1606_s3 + $0x38] sm:$0xff] (!%p260_p3)   ;;  %v1336_v14 = vld [vmem:[%s1606_s3 + $0x40] sm:$0xff] (!%p260_p3)   ;;  %s342_s15 = sadd.s32 (!%p260_p3), 2, %s1468_s6  ;;  %vm962_vm2 = vcmask (!%p260_p3), 517120  }
   0xc   : > { %1221 = vmatpush3.bf16.msra.mxu1 (!%p260_p3), %v1328_v2  ;;  %1214 = vmatprep.subr.bf16.mxu0 (!%p260_p3), %v1388_v1  ;;  %p332_p7 = scmp.lt.s32.totalorder (!%p260_p3), %s329_s13, 8  ;;  %v1338_v16 = vld [vmem:[%s1606_s3 + $0x50] sm:$0xff] (!%p260_p3)   ;;  %p345_p8 = scmp.lt.s32.totalorder (!%p260_p3), %s342_s15, 8  ;;  %v1339_v22 = vld [vmem:[%s1606_s3 + $0x48] sm:$0xff] (!%p260_p3)   ;;  %v1340_v23 = vld [vmem:[%s1606_s3 + $0x58] sm:$0xff] (!%p260_p3)  }
   0xd   : > { %1222 = vmatprep.subr.bf16.mxu1 (!%p260_p3), %v1388_v1  ;;  %1224 = vmatprep.mubr.msk.bf16.mxu1 (!%p260_p3), %vm1389_vm0, %v1388_v1  ;;  %v1341_v25 = vld [vmem:[%s1606_s3 + $0x60] sm:$0xff] (!%p260_p3)   ;;  %v1342_v28 = vld [vmem:[%s1606_s3 + $0x70] sm:$0xff] (!%p260_p3)   ;;  %v1343_v30 = vld [vmem:[%s1606_s3 + $0x68] sm:$0xff] (!%p260_p3)   ;;  %p356_p9 = scmp.lt.s32.totalorder (!%p260_p3), %s1370_s18, 3 }
   0xe   : > { %v1344_v31 = vld [vmem:[%s1606_s3 + $0x78] sm:$0xff] (!%p260_p3)   ;;  %v1346_v34 = vld [vmem:[%s1606_s3 + $0x80] sm:$0xff] (!%p260_p3)   ;;  %v1347_v38 = vld [vmem:[%s1606_s3 + $0x88] sm:$0xff] (!%p260_p3)  }
   0xf   : > { %1215 = vmatpush3.bf16.msra.mxu0 (!%p260_p3), %v1329_v3 }
  0x10   : > { %s1620_s19 = smov (!%p318_p5, %s1374_s19), 1  ;;  %1223 = vmatpush3.bf16.msra.mxu1 %v1330_v4  ;;  %1228 = vmatprep.subr.bf16.mxu0 %v1388_v1  ;;  %s1622_s13 = smov (!%p332_p7, %s329_s13), 8 }
  0x11   : > { %s321_s9 = scalar_select %p320_p6, %s1468_s6, 8  ;;  %1236 = vmatprep.subr.bf16.mxu1 %v1388_v1 }
  0x12   : > { %s1484_s10 = smul.u32 18, %s1620_s19  ;;  %s1624_s15 = smov (!%p345_p8, %s342_s15), 8 }
  0x13   : > { %s1107_s11 = sshll.u32 %s321_s9, 1  ;;  %s1110_s9 = sshll.u32 %s1622_s13, 1 }
  0x14   : > { %s324_s12 = sadd.s32 %s1484_s10, %s1107_s11  ;;  %s1113_s7 = sshll.u32 %s1624_s15, 1 }
  0x15   : > { %s1108_s14 = sshll.u32 %s324_s12, 2  ;;  %s349_s8 = sadd.s32 %s1484_s10, %s1113_s7 }
  0x16   : > { %s326_s28 = scalar_lea.vmem %s1603_s0, %s1108_s14  ;;  %s336_s14 = sadd.s32 %s1484_s10, %s1110_s9 }
  0x17   : > { %v1117_v7 = vld [vmem:[%s326_s28 + $0x4] sm:$0x3]  ;;  %v363_v8 = vld [vmem:[%s326_s28] sm:$0x3]  ;;  %s1111_s16 = sshll.u32 %s336_s14, 2  ;;  %s1114_s9 = sshll.u32 %s349_s8, 2 }
  0x18   : > { %1217 = vmatmul.mubr.msk.bf16.vlgmr.msra.gmra.mrb[0].mxu0 %vm387_vm1, %v1117_v7  ;;  %v1331_v9 = vld [vmem:[%s326_s28] ss:$0 sps:$4 sm:$0x77]   ;;  %1225 = vmatmul.mubr.msk.bf16.vlgmr.msra.gmra.mrb[0].mxu1 %vm387_vm1, %v363_v8  ;;  %s338_s13 = scalar_lea.vmem %s1604_s1, %s1111_s16  ;;  %s351_s15 = scalar_lea.vmem %s1605_s2, %s1114_s9 }
  0x19   : > { %1229 = vmatpush3.bf16.msra.mxu0 %v1332_v5  ;;  %1237 = vmatpush3.bf16.msra.mxu1 %v1333_v6  ;;  %v496_v12 = vshrl.u32 %v1331_v9, 16  ;;  %v498_v13 = vshll.u32 %v1331_v9, 16  ;;  %v558_v18 = vld [vmem:[%s338_s13] sm:$0x3]  ;;  %v1143_v26 = vld [vmem:[%s338_s13 + $0x4] sm:$0x3] }
  0x1a   : > { %1230 = vmatprep.subr.bf16.mxu0 %v1388_v1  ;;  %1238 = vmatprep.subr.bf16.mxu1 %v1388_v1  ;;  %v1337_v19 = vld [vmem:[%s338_s13] ss:$0 sps:$4 sm:$0x77]   ;;  %v1166_v35 = vld [vmem:[%s351_s15 + $0x4] sm:$0x3]  ;;  %s1626_s18 = smov (!%p356_p9, %s1370_s18), 3 }
  0x1b   : > { %1232 = vmatprep.mubr.msk.bf16.mxu0 %vm1389_vm0, %v1388_v1  ;;  %1240 = vmatprep.mubr.msk.bf16.mxu1 %vm1389_vm0, %v1388_v1  ;;  %v500_v15 = vrot.slane %v498_v13, 1  ;;  %v693_v20 = vshrl.u32 %v1337_v19, 16  ;;  %v695_v21 = vshll.u32 %v1337_v19, 16  ;;  %v1345_v29 = vld [vmem:[%s351_s15] ss:$0 sps:$4 sm:$0x77]  }
  0x1c   : > { %v892_v32 = vshll.u32 %v1345_v29, 16  ;;  %v755_v33 = vld [vmem:[%s351_s15] sm:$0x3]  ;;  %v890_v36 = vshrl.u32 %v1345_v29, 16  ;;  %s1115_s7 = sshll.u32 %s1620_s19, 2 }
  0x1d   : > { %1231 = vmatpush3.bf16.msra.mxu0 %v1334_v10  ;;  %1239 = vmatpush3.bf16.msra.mxu1 %v1335_v11  ;;  %v501_v17 = vor.u32 %v500_v15, %v496_v12  ;;  %v697_v24 = vrot.slane %v695_v21, 1  ;;  %s359_s8 = sadd.s32 %s1115_s7, %s1626_s18 }
  0x1e   : > { %1244 = vmatprep.subr.bf16.mxu0 %v1388_v1  ;;  %1252 = vmatprep.subr.bf16.mxu1 %v1388_v1  ;;  %v894_v37 = vrot.slane %v892_v32, 1  ;;  %s1116_s12 = sshll.u32 %s359_s8, 1 }
  0x1f   : > { %v698_v27 = vor.u32 %v697_v24, %v693_v20  ;;  %s361_s15 = scalar_lea.vmem %s1608_s5, %s1116_s12 }
  0x20   : > { %1233 = vmatmul.mubr.msk.bf16.vlgmr.msra.gmra.mrb[4].mxu0 %vm387_vm1, %v501_v17  ;;  %1241 = vmatmul.mubr.msk.bf16.vlgmr.msra.gmra.mrb[4].mxu1 %vm387_vm1, %v558_v18  ;;  %v895_v39 = vor.u32 %v894_v37, %v890_v36 }
  0x21   : > { %1245 = vmatpush3.bf16.msra.mxu0 %v1336_v14  ;;  %1253 = vmatpush3.bf16.msra.mxu1 %v1338_v16  ;;  %v1182_v16 = vld [vmem:[%s1607_s4] ss:$0 sm:$0xff] }
  0x22   : > { %1246 = vmatprep.subr.bf16.mxu0 %v1388_v1  ;;  %1254 = vmatprep.subr.bf16.mxu1 %v1388_v1 }
  0x23   : > { %1248 = vmatprep.mubr.msk.bf16.mxu0 %vm1389_vm0, %v1388_v1  ;;  %1256 = vmatprep.mubr.msk.bf16.mxu1 %vm1389_vm0, %v1388_v1 }
  0x25   : > { %1247 = vmatpush3.bf16.msra.mxu0 %v1339_v22  ;;  %1255 = vmatpush3.bf16.msra.mxu1 %v1340_v23 }
  0x26   : > { %1260 = vmatprep.subr.bf16.mxu0 %v1388_v1  ;;  %1268 = vmatprep.subr.bf16.mxu1 %v1388_v1 }
  0x28   : > { %1249 = vmatmul.mubr.msk.bf16.vlgmr.msra.gmra.mrb[8].mxu0 %vm387_vm1, %v1143_v26  ;;  %1257 = vmatmul.mubr.msk.bf16.vlgmr.msra.gmra.mrb[8].mxu1 %vm387_vm1, %v698_v27 }
  0x29   : > { %1261 = vmatpush3.bf16.msra.mxu0 %v1341_v25  ;;  %1269 = vmatpush3.bf16.msra.mxu1 %v1342_v28 }
  0x2a   : > { %1262 = vmatprep.subr.bf16.mxu0 %v1388_v1  ;;  %1270 = vmatprep.subr.bf16.mxu1 %v1388_v1 }
  0x2b   : > { %1264 = vmatprep.mubr.msk.bf16.mxu0 %vm1389_vm0, %v1388_v1  ;;  %1272 = vmatprep.mubr.msk.bf16.mxu1 %vm1389_vm0, %v1388_v1 }
  0x2d   : > { %1263 = vmatpush3.bf16.msra.mxu0 %v1343_v30  ;;  %1271 = vmatpush3.bf16.msra.mxu1 %v1344_v31 }
  0x2e   : > { %1276 = vmatprep.subr.bf16.mxu0 %v1388_v1 }
  0x30   : > { %1265 = vmatmul.mubr.msk.bf16.vlgmr.msra.gmra.mrb[12].mxu0 %vm387_vm1, %v755_v33  ;;  %1273 = vmatmul.mubr.msk.bf16.vlgmr.msra.gmra.mrb[12].mxu1 %vm387_vm1, %v1166_v35 }
  0x31   : > { %1277 = vmatpush3.bf16.msra.mxu0 %v1346_v34  ;;  %1280 = vmatprep.mubr.msk.bf16.mxu0 %vm1389_vm0, %v1388_v1 }
  0x32   : > { %1278 = vmatprep.subr.bf16.mxu0 %v1388_v1 }
  0x35   : > { %1279 = vmatpush3.bf16.msra.mxu0 %v1347_v38 }
  0x38   : > { %1281 = vmatmul.mubr.msk.bf16.vlgmr.msra.gmra.mrb[16].mxu0 %vm387_vm1, %v895_v39 }
  0xeb   : > { %v425_v40 = vpop.f32.mrb[0].mxu0  ;;  %v480_v41 = vpop.f32.mrb[0].mxu1 }
  0xec   : > { %v1218_v42 = vpop.f32.mrb[1].mxu0  ;;  %v481_v43 = vadd.f32 %v480_v41, %v425_v40  ;;  %v1226_v44 = vpop.f32.mrb[1].mxu1 }
  0xed   : > { %v428_v45 = vpop.f32.mrb[2].mxu0  ;;  %v483_v46 = vpop.f32.mrb[2].mxu1 }
  0xee   : > { %v1219_v47 = vpop.f32.mrb[3].mxu0  ;;  %v1227_v48 = vpop.f32.mrb[3].mxu1 }
  0xf3   : > { %v551_v49 = vpop.f32.mrb[4].mxu0  ;;  %v613_v50 = vpop.f32.mrb[4].mxu1 }
  0xf4   : > { %v557_v51 = vadd.f32 %v551_v49, %v481_v43  ;;  %v1234_v52 = vpop.f32.mrb[5].mxu0  ;;  %v1242_v53 = vpop.f32.mrb[5].mxu1 }
  0xf5   : > { %v554_v54 = vpop.f32.mrb[6].mxu0  ;;  %v616_v55 = vpop.f32.mrb[6].mxu1 }
  0xf6   : > { %v619_v56 = vadd.f32 %v613_v50, %v557_v51  ;;  %v1235_v57 = vpop.f32.mrb[7].mxu0  ;;  %v1243_v58 = vpop.f32.mrb[7].mxu1 }
  0xfb   : > { %v676_v59 = vpop.f32.mrb[8].mxu0  ;;  %v748_v60 = vpop.f32.mrb[8].mxu1 }
  0xfc   : > { %v682_v61 = vadd.f32 %v676_v59, %v619_v56  ;;  %v1250_v62 = vpop.f32.mrb[9].mxu0  ;;  %v1258_v63 = vpop.f32.mrb[9].mxu1 }
  0xfd   : > { %v679_v0 = vpop.f32.mrb[10].mxu0  ;;  %v751_v1 = vpop.f32.mrb[10].mxu1 }
  0xfe   : > { %v754_v2 = vadd.f32 %v748_v60, %v682_v61  ;;  %v1251_v3 = vpop.f32.mrb[11].mxu0  ;;  %v1259_v4 = vpop.f32.mrb[11].mxu1 }
 0x103   : > { %v810_v5 = vpop.f32.mrb[12].mxu0  ;;  %v873_v6 = vpop.f32.mrb[12].mxu1 }
 0x104   : > { %v816_v7 = vadd.f32 %v810_v5, %v754_v2  ;;  %v1266_v8 = vpop.f32.mrb[13].mxu0  ;;  %v1274_v9 = vpop.f32.mrb[13].mxu1 }
 0x105   : > { %v813_v10 = vpop.f32.mrb[14].mxu0  ;;  %v876_v11 = vpop.f32.mrb[14].mxu1 }
 0x106   : > { %v879_v12 = vadd.f32 %v873_v6, %v816_v7  ;;  %v1267_v13 = vpop.f32.mrb[15].mxu0  ;;  %v1275_v14 = vpop.f32.mrb[15].mxu1 }
 0x10b   : > { %v945_v15 = vpop.f32.mrb[16].mxu0 }
 0x10c   : > { %v951_v17 = vadd.f32 %v945_v15, %v879_v12  ;;  %v1282_v18 = vpop.f32.mrb[17].mxu0 }
 0x10d   : > { %v948_v19 = vpop.f32.mrb[18].mxu0 }
 0x10e   : > { %v959_v20 = vadd.f32 %v1182_v16, %v951_v17  ;;  %v1283_v21 = vpop.f32.mrb[19].mxu0 }
 0x110   : > { %v960_v22 = vmax.f32 %v959_v20, 0.0 }
 0x112   : > { %v961_v23 = vpack.c.bf16 %v960_v22, %v960_v22 }
 0x114   : > { %963 = vst.msk [vmem:[%s361_s15] sm:$0x3] %vm962_vm2, %v961_v23 }
 0x115 PF: > { %s15_s22 = sadd.s32 1, %s1386_s22   ;;  %s1609_s18 = smov %s1378_s20 }
 0x116   : > { %p12_p10 = scmp.ge.s32.totalorder %s15_s22, 10   ;;  %s1610_s19 = smov %s1382_s21 }
 0x117   : > { %s1611_s20 = smov %s1614_s23  ;;  %s1612_s21 = smov %s1618_s24 }
 0x118   :  { %14 = sbr.rel (!%p12_p10) target bundleno = 3 (0x3), region = 87 }

// kernel: _lambda_.23
= control target key start
LH: loop header
LB: loop body
LE: loop exit
PB: predicated region body
PF: predicated region fallthrough
CT: control target
= control target key end

     0   :  { %s1733_s21 = smov 0   ;;  %s1735_s22 = smov 0   ;;  %s2003_s0 = inlined_call_operand.vmem [shape: bf16[2,6,1,6,64], index: 0, kind: input, shape index: {}, may-alias: {0,1,2}]   ;;  %s2004_s1 = inlined_call_operand.vmem [shape: bf16[2,6,1,6,64], index: 1, kind: input, shape index: {}, may-alias: {0,1,2}]   ;;  %s2005_s2 = inlined_call_operand.vmem [shape: bf16[2,6,1,6,64], index: 2, kind: input, shape index: {}, may-alias: {0,1,2}]   ;;  %s2006_s3 = inlined_call_operand.vmem [shape: bf16[9,64,64], index: 3, kind: input, shape index: {}]   ;;  %s2007_s4 = inlined_call_operand.vmem [shape: f32[1,64], index: 4, kind: input, shape index: {}]   ;;  %s2008_s5 = inlined_call_operand.vmem [shape: bf16[2,4,4,64], index: 5, kind: input, shape index: {}]   ;;  %s2009_s6 = inlined_call_operand.vmem [shape: bf16[2,4,4,64], index: 6, kind: output, shape index: {}]  }
   0x1   :  { %s1737_s23 = smov 0   ;;  %s1739_s24 = smov 0  }
   0x2   :  { %s1741_s25 = smov 0  }
   0x3 LB: > { %s25_s26 = sadd.s32 1, %s1686_s23  ;;  %s28_s27 = sadd.s32 1, %s1690_s24  ;;  %s1694_s25 = sphi %s1741_s25, %s16_s25   ;;  %s1690_s24 = sphi %s1739_s24, %s2013_s24   ;;  %s1686_s23 = sphi %s1737_s23, %s2012_s23   ;;  %s1682_s22 = sphi %s1735_s22, %s2011_s22   ;;  %s1678_s21 = sphi %s1733_s21, %s2010_s21  }
   0x4   : > { %p26_p0 = scmp.ge.s32.totalorder %s25_s26, 4  ;;  %p1292_p1 = scmp.ge.s32.totalorder %s1694_s25, 1 }
   0x5   : > { %p284_p2 = scmp.lt.s32.totalorder %s1694_s25, 9 }
   0x6   : > { %s2015_s26 = smov (%p26_p0, %s25_s26), 0  ;;  %s2017_s27 = smov (!%p26_p0, %s28_s27), %s1690_s24 }
   0x7   : > { %p285_p3 = pnand %p1292_p1, %p284_p2  ;;  %p30_p4 = scmp.ge.s32.totalorder %s2017_s27, 2 }
   0x8   : > { %v1614_v0 = vld [vmem:[%s2006_s3 + $0x20] sm:$0xff] (!%p285_p3)   ;;  %v1696_v1 = vmov (!%p285_p3), 0.0   ;;  %v1616_v3 = vld [vmem:[%s2006_s3 + $0x28] sm:$0xff] (!%p285_p3)   ;;  %vm1697_vm0 = vmmov (!%p285_p3), 0   ;;  %p346_p5 = scmp.lt.s32.totalorder (!%p285_p3), %s1682_s22, 1  ;;  %p348_p6 = scmp.lt.s32.totalorder (!%p285_p3), %s1678_s21, 5 }
   0x9   : > { %s2019_s27 = smov (%p30_p4, %s2017_s27), 0  ;;  %288 = sbr.rel (%p285_p3) target bundleno = 317 (0x13d), region = 44 }
   0xa   : > { %1463 = vmatprep.subr.bf16.mxu0 (!%p285_p3), %v1696_v1  ;;  %1475 = vmatprep.subr.bf16.mxu1 (!%p285_p3), %v1696_v1  ;;  %v1615_v2 = vld [vmem:[%s2006_s3] sm:$0xff] (!%p285_p3)   ;;  %v1617_v4 = vld [vmem:[%s2006_s3 + $0x8] sm:$0xff] (!%p285_p3)   ;;  %v1618_v5 = vld [vmem:[%s2006_s3 + $0x30] sm:$0xff] (!%p285_p3)   ;;  %s354_s19 = sadd.s32 (!%p285_p3), 1, %s1678_s21  ;;  %vm444_vm1 = vcmask (!%p285_p3), 523264   ;;  %s364_s7 = sadd.s32 (!%p285_p3), 2, %s1678_s21 }
   0xb   : > { %1464 = vmatpush3.bf16.msra.mxu0 (!%p285_p3), %v1614_v0  ;;  %1471 = vmatprep.mubr.msk.bf16.mxu0 (!%p285_p3), %vm1697_vm0, %v1696_v1  ;;  %v1619_v6 = vld [vmem:[%s2006_s3 + $0x10] sm:$0xff] (!%p285_p3)   ;;  %v1620_v7 = vld [vmem:[%s2006_s3 + $0x38] sm:$0xff] (!%p285_p3)   ;;  %p357_p7 = scmp.lt.s32.totalorder (!%p285_p3), %s354_s19, 5  ;;  %v1624_v14 = vld [vmem:[%s2006_s3 + $0x60] sm:$0xff] (!%p285_p3)   ;;  %p367_p8 = scmp.lt.s32.totalorder (!%p285_p3), %s364_s7, 5  ;;  %vm1146_vm2 = vcmask (!%p285_p3), 517120  }
   0xc   : > { %1476 = vmatpush3.bf16.msra.mxu1 (!%p285_p3), %v1615_v2  ;;  %1465 = vmatprep.subr.bf16.mxu0 (!%p285_p3), %v1696_v1  ;;  %v1621_v8 = vld [vmem:[%s2006_s3 + $0x18] sm:$0xff] (!%p285_p3)   ;;  %v1623_v15 = vld [vmem:[%s2006_s3 + $0x40] sm:$0xff] (!%p285_p3)   ;;  %v1626_v17 = vld [vmem:[%s2006_s3 + $0x68] sm:$0xff] (!%p285_p3)   ;;  %p376_p9 = scmp.lt.s32.totalorder (!%p285_p3), %s1678_s21, 3 }
   0xd   : > { %1477 = vmatprep.subr.bf16.mxu1 (!%p285_p3), %v1696_v1  ;;  %1483 = vmatprep.mubr.msk.bf16.mxu1 (!%p285_p3), %vm1697_vm0, %v1696_v1  ;;  %v1625_v18 = vld [vmem:[%s2006_s3 + $0x48] sm:$0xff] (!%p285_p3)   ;;  %v1627_v19 = vld [vmem:[%s2006_s3 + $0x50] sm:$0xff] (!%p285_p3)   ;;  %v1630_v22 = vld [vmem:[%s2006_s3 + $0x78] sm:$0xff] (!%p285_p3)  }
   0xe   : > { %v1628_v20 = vld [vmem:[%s2006_s3 + $0x70] sm:$0xff] (!%p285_p3)   ;;  %v1629_v23 = vld [vmem:[%s2006_s3 + $0x58] sm:$0xff] (!%p285_p3)   ;;  %v1635_v25 = vld [vmem:[%s2006_s3 + $0xa0] sm:$0xff] (!%p285_p3)  }
   0xf   : > { %1466 = vmatpush3.bf16.msra.mxu0 (!%p285_p3), %v1616_v3  ;;  %v1632_v27 = vld [vmem:[%s2006_s3 + $0x80] sm:$0xff] (!%p285_p3)   ;;  %v1637_v29 = vld [vmem:[%s2006_s3 + $0xa8] sm:$0xff] (!%p285_p3)   ;;  %v1639_v32 = vld [vmem:[%s2006_s3 + $0xb0] sm:$0xff] (!%p285_p3)  }
  0x10   : > { %s2021_s22 = smov (!%p346_p5, %s1682_s22), 1  ;;  %1478 = vmatpush3.bf16.msra.mxu1 %v1617_v4  ;;  %1467 = vmatprep.subr.bf16.mxu0 %v1696_v1  ;;  %s2023_s19 = smov (!%p357_p7, %s354_s19), 5  ;;  %v1636_v30 = vld [vmem:[%s2006_s3 + $0x88] sm:$0xff]   ;;  %v1638_v33 = vld [vmem:[%s2006_s3 + $0x90] sm:$0xff]   ;;  %v1641_v37 = vld [vmem:[%s2006_s3 + $0xb8] sm:$0xff]  }
  0x11   : > { %s349_s12 = scalar_select %p348_p6, %s1678_s21, 5  ;;  %1479 = vmatprep.subr.bf16.mxu1 %v1696_v1  ;;  %v1640_v38 = vld [vmem:[%s2006_s3 + $0x98] sm:$0xff]   ;;  %v1643_v41 = vld [vmem:[%s2006_s3 + $0xe0] sm:$0xff]   ;;  %v1645_v44 = vld [vmem:[%s2006_s3 + $0xe8] sm:$0xff]  }
  0x12   : > { %s1797_s15 = smul.u32 6, %s2021_s22  ;;  %s2025_s7 = smov (!%p367_p8, %s364_s7), 5  ;;  %v1642_v42 = vld [vmem:[%s2006_s3 + $0xc0] sm:$0xff]   ;;  %v1644_v45 = vld [vmem:[%s2006_s3 + $0xc8] sm:$0xff]   ;;  %v1647_v47 = vld [vmem:[%s2006_s3 + $0xf0] sm:$0xff]  }
  0x13   : > { %1468 = vmatpush3.bf16.msra.mxu0 %v1618_v5  ;;  %v1646_v48 = vld [vmem:[%s2006_s3 + $0xd0] sm:$0xff]   ;;  %v1649_v51 = vld [vmem:[%s2006_s3 + $0xf8] sm:$0xff]   ;;  %v1652_v55 = vld [vmem:[%s2006_s3 + $0x100] sm:$0xff]   ;;  %s2027_s21 = smov (!%p376_p9, %s1678_s21), 3 }
  0x14   : > { %s351_s18 = sadd.s32 %s1797_s15, %s349_s12  ;;  %1480 = vmatpush3.bf16.msra.mxu1 %v1619_v6  ;;  %1469 = vmatprep.subr.bf16.mxu0 %v1696_v1  ;;  %s360_s16 = sadd.s32 %s1797_s15, %s2023_s19  ;;  %v1648_v52 = vld [vmem:[%s2006_s3 + $0xd8] sm:$0xff]   ;;  %v1653_v56 = vld [vmem:[%s2006_s3 + $0x108] sm:$0xff]   ;;  %v1654_v57 = vld [vmem:[%s2006_s3 + $0x110] sm:$0xff]  }
  0x15   : > { %s1293_s20 = sshll.u32 %s351_s18, 2  ;;  %1481 = vmatprep.subr.bf16.mxu1 %v1696_v1  ;;  %s1294_s17 = sshll.u32 %s360_s16, 2  ;;  %v1655_v59 = vld [vmem:[%s2006_s3 + $0x118] sm:$0xff]  }
  0x16   : > { %s1812_s8 = scalar_lea.vmem %s2003_s0, %s1293_s20  ;;  %s1838_s30 = scalar_lea.vmem %s2004_s1, %s1294_s17 }
  0x17   : > { %v1622_v9 = vld [vmem:[%s1812_s8] ss:$0 sps:$4 sm:$0x77]   ;;  %1470 = vmatpush3.bf16.msra.mxu0 %v1620_v7  ;;  %s370_s20 = sadd.s32 %s1797_s15, %s2025_s7 }
  0x18   : > { %v414_v10 = vshrl.u32 %v1622_v9, 16  ;;  %v416_v11 = vshll.u32 %v1622_v9, 16  ;;  %v391_v12 = vld [vmem:[%s1812_s8] sm:$0x3]  ;;  %1482 = vmatpush3.bf16.msra.mxu1 %v1621_v8  ;;  %1487 = vmatprep.subr.bf16.mxu0 %v1696_v1  ;;  %s1295_s9 = sshll.u32 %s370_s20, 2 }
  0x19   : > { %1499 = vmatprep.subr.bf16.mxu1 %v1696_v1  ;;  %v1631_v21 = vld [vmem:[%s1812_s8] ss:$0 sps:$4 sm:$0x66]   ;;  %s1886_s12 = scalar_lea.vmem %s2005_s2, %s1295_s9 }
  0x1a   : > { %v418_v13 = vrot.slane %v416_v11, 1  ;;  %v568_v24 = vrot.slane %v1631_v21, 1  ;;  %v637_v26 = vld [vmem:[%s1838_s30] sm:$0x3] }
  0x1b   : > { %1484 = vmatmul.mubr.msk.bf16.vlgmr.msra.gmra.mrb[0].mxu1 %vm444_vm1, %v391_v12  ;;  %v1633_v28 = vld [vmem:[%s1838_s30] ss:$0 sps:$4 sm:$0x77]  }
  0x1c   : > { %v419_v16 = vor.u32 %v418_v13, %v414_v10  ;;  %1500 = vmatpush3.bf16.msra.mxu1 %v1624_v14  ;;  %1507 = vmatprep.mubr.msk.bf16.mxu1 %vm1697_vm0, %v1696_v1  ;;  %v731_v31 = vshll.u32 %v1633_v28, 16  ;;  %v1634_v34 = vld [vmem:[%s1838_s30] ss:$0 sps:$4 sm:$0x66]   ;;  %v729_v35 = vshrl.u32 %v1633_v28, 16 }
  0x1d   : > { %1501 = vmatprep.subr.bf16.mxu1 %v1696_v1  ;;  %v816_v39 = vrot.slane %v1634_v34, 1  ;;  %v1650_v43 = vld [vmem:[%s1886_s12] ss:$0 sps:$4 sm:$0x77]  }
  0x1e   : > { %1472 = vmatmul.mubr.msk.bf16.vlgmr.msra.gmra.mrb[0].mxu0 %vm444_vm1, %v419_v16  ;;  %v733_v36 = vrot.slane %v731_v31, 1  ;;  %v979_v46 = vshll.u32 %v1650_v43, 16  ;;  %v977_v49 = vshrl.u32 %v1650_v43, 16  ;;  %v885_v54 = vld [vmem:[%s1886_s12] sm:$0x3] }
  0x1f   : > { %1488 = vmatpush3.bf16.msra.mxu0 %v1623_v15  ;;  %1495 = vmatprep.mubr.msk.bf16.mxu0 %vm1697_vm0, %v1696_v1  ;;  %v1651_v58 = vld [vmem:[%s1886_s12] ss:$0 sps:$4 sm:$0x66]   ;;  %s1296_s12 = sshll.u32 %s2021_s22, 2 }
  0x20   : > { %1489 = vmatprep.subr.bf16.mxu0 %v1696_v1  ;;  %1502 = vmatpush3.bf16.msra.mxu1 %v1626_v17  ;;  %v734_v40 = vor.u32 %v733_v36, %v729_v35  ;;  %v981_v50 = vrot.slane %v979_v46, 1  ;;  %v1064_v60 = vrot.slane %v1651_v58, 1  ;;  %s379_s16 = sadd.s32 %s1296_s12, %s2027_s21 }
  0x21   : > { %1503 = vmatprep.subr.bf16.mxu1 %v1696_v1  ;;  %s1297_s17 = sshll.u32 %s379_s16, 1 }
  0x22   : > { %v982_v53 = vor.u32 %v981_v50, %v977_v49  ;;  %s381_s8 = scalar_lea.vmem %s2008_s5, %s1297_s17  ;;  %s389_s19 = scalar_lea.vmem %s2009_s6, %s1297_s17 }
  0x23   : > { %1490 = vmatpush3.bf16.msra.mxu0 %v1625_v18  ;;  %v1141_v36 = vld [vmem:[%s381_s8] sm:$0x3] }
  0x24   : > { %1491 = vmatprep.subr.bf16.mxu0 %v1696_v1  ;;  %1504 = vmatpush3.bf16.msra.mxu1 %v1628_v20 }
  0x25   : > { %1505 = vmatprep.subr.bf16.mxu1 %v1696_v1 }
  0x27   : > { %1492 = vmatpush3.bf16.msra.mxu0 %v1627_v19 }
  0x28   : > { %1493 = vmatprep.subr.bf16.mxu0 %v1696_v1  ;;  %1506 = vmatpush3.bf16.msra.mxu1 %v1630_v22 }
  0x29   : > { %1523 = vmatprep.subr.bf16.mxu1 %v1696_v1 }
  0x2b   : > { %1494 = vmatpush3.bf16.msra.mxu0 %v1629_v23  ;;  %1508 = vmatmul.mubr.msk.bf16.vlgmr.msra.gmra.mrb[4].mxu1 %vm444_vm1, %v637_v26 }
  0x2c   : > { %1511 = vmatprep.subr.bf16.mxu0 %v1696_v1  ;;  %1524 = vmatpush3.bf16.msra.mxu1 %v1635_v25 }
  0x2d   : > { %1525 = vmatprep.subr.bf16.mxu1 %v1696_v1  ;;  %1531 = vmatprep.mubr.msk.bf16.mxu1 %vm1697_vm0, %v1696_v1 }
  0x2e   : > { %1496 = vmatmul.mubr.msk.bf16.vlgmr.msra.gmra.mrb[4].mxu0 %vm444_vm1, %v568_v24 }
  0x2f   : > { %1512 = vmatpush3.bf16.msra.mxu0 %v1632_v27  ;;  %1519 = vmatprep.mubr.msk.bf16.mxu0 %vm1697_vm0, %v1696_v1 }
  0x30   : > { %1513 = vmatprep.subr.bf16.mxu0 %v1696_v1  ;;  %1526 = vmatpush3.bf16.msra.mxu1 %v1637_v29 }
  0x31   : > { %1527 = vmatprep.subr.bf16.mxu1 %v1696_v1 }
  0x33   : > { %1514 = vmatpush3.bf16.msra.mxu0 %v1636_v30 }
  0x34   : > { %1515 = vmatprep.subr.bf16.mxu0 %v1696_v1  ;;  %1528 = vmatpush3.bf16.msra.mxu1 %v1639_v32 }
  0x35   : > { %1529 = vmatprep.subr.bf16.mxu1 %v1696_v1 }
  0x37   : > { %1516 = vmatpush3.bf16.msra.mxu0 %v1638_v33 }
  0x38   : > { %1517 = vmatprep.subr.bf16.mxu0 %v1696_v1  ;;  %1530 = vmatpush3.bf16.msra.mxu1 %v1641_v37 }
  0x39   : > { %1547 = vmatprep.subr.bf16.mxu1 %v1696_v1 }
  0x3b   : > { %1518 = vmatpush3.bf16.msra.mxu0 %v1640_v38  ;;  %1532 = vmatmul.mubr.msk.bf16.vlgmr.msra.gmra.mrb[8].mxu1 %vm444_vm1, %v816_v39  ;;  %v1415_v38 = vld [vmem:[%s2007_s4] ss:$0 sm:$0xff] }
  0x3c   : > { %1535 = vmatprep.subr.bf16.mxu0 %v1696_v1  ;;  %1548 = vmatpush3.bf16.msra.mxu1 %v1643_v41 }
  0x3d   : > { %1549 = vmatprep.subr.bf16.mxu1 %v1696_v1  ;;  %1555 = vmatprep.mubr.msk.bf16.mxu1 %vm1697_vm0, %v1696_v1 }
  0x3e   : > { %1520 = vmatmul.mubr.msk.bf16.vlgmr.msra.gmra.mrb[8].mxu0 %vm444_vm1, %v734_v40  ;;  %v1142_v40 = vunpack.c.l.bf16 %v1141_v36 }
  0x3f   : > { %1536 = vmatpush3.bf16.msra.mxu0 %v1642_v42  ;;  %1543 = vmatprep.mubr.msk.bf16.mxu0 %vm1697_vm0, %v1696_v1 }
  0x40   : > { %1537 = vmatprep.subr.bf16.mxu0 %v1696_v1  ;;  %1550 = vmatpush3.bf16.msra.mxu1 %v1645_v44 }
  0x41   : > { %1551 = vmatprep.subr.bf16.mxu1 %v1696_v1 }
  0x43   : > { %1538 = vmatpush3.bf16.msra.mxu0 %v1644_v45 }
  0x44   : > { %1539 = vmatprep.subr.bf16.mxu0 %v1696_v1  ;;  %1552 = vmatpush3.bf16.msra.mxu1 %v1647_v47 }
  0x45   : > { %1553 = vmatprep.subr.bf16.mxu1 %v1696_v1 }
  0x47   : > { %1540 = vmatpush3.bf16.msra.mxu0 %v1646_v48 }
  0x48   : > { %1541 = vmatprep.subr.bf16.mxu0 %v1696_v1  ;;  %1554 = vmatpush3.bf16.msra.mxu1 %v1649_v51 }
  0x4b   : > { %1542 = vmatpush3.bf16.msra.mxu0 %v1648_v52  ;;  %1556 = vmatmul.mubr.msk.bf16.vlgmr.msra.gmra.mrb[12].mxu1 %vm444_vm1, %v982_v53 }
  0x4c   : > { %1559 = vmatprep.subr.bf16.mxu0 %v1696_v1 }
  0x4e   : > { %1544 = vmatmul.mubr.msk.bf16.vlgmr.msra.gmra.mrb[12].mxu0 %vm444_vm1, %v885_v54 }
  0x4f   : > { %1560 = vmatpush3.bf16.msra.mxu0 %v1652_v55  ;;  %1567 = vmatprep.mubr.msk.bf16.mxu0 %vm1697_vm0, %v1696_v1 }
  0x50   : > { %1561 = vmatprep.subr.bf16.mxu0 %v1696_v1 }
  0x53   : > { %1562 = vmatpush3.bf16.msra.mxu0 %v1653_v56 }
  0x54   : > { %1563 = vmatprep.subr.bf16.mxu0 %v1696_v1 }
  0x57   : > { %1564 = vmatpush3.bf16.msra.mxu0 %v1654_v57 }
  0x58   : > { %1565 = vmatprep.subr.bf16.mxu0 %v1696_v1 }
  0x5b   : > { %1566 = vmatpush3.bf16.msra.mxu0 %v1655_v59 }
  0x5e   : > { %1568 = vmatmul.mubr.msk.bf16.vlgmr.msra.gmra.mrb[16].mxu0 %vm444_vm1, %v1064_v60 }
  0xee   : > { %v549_v61 = vpop.f32.mrb[0].mxu1 }
  0xef   : > { %v1485_v63 = vpop.f32.mrb[1].mxu1 }
  0xf0   : > { %v552_v3 = vpop.f32.mrb[2].mxu1 }
  0xf1   : > { %v482_v62 = vpop.f32.mrb[0].mxu0  ;;  %v1486_v5 = vpop.f32.mrb[3].mxu1 }
  0xf2   : > { %v1473_v0 = vpop.f32.mrb[1].mxu0  ;;  %v550_v2 = vadd.f32 %v549_v61, %v482_v62 }
  0xf3   : > { %v485_v4 = vpop.f32.mrb[2].mxu0 }
  0xf4   : > { %v1474_v6 = vpop.f32.mrb[3].mxu0 }
  0xfe   : > { %v708_v7 = vpop.f32.mrb[4].mxu1 }
  0xff   : > { %v1509_v9 = vpop.f32.mrb[5].mxu1 }
 0x100   : > { %v711_v1 = vpop.f32.mrb[6].mxu1 }
 0x101   : > { %v630_v8 = vpop.f32.mrb[4].mxu0  ;;  %v1510_v13 = vpop.f32.mrb[7].mxu1 }
 0x102   : > { %v636_v10 = vadd.f32 %v630_v8, %v550_v2  ;;  %v1497_v11 = vpop.f32.mrb[5].mxu0 }
 0x103   : > { %v633_v12 = vpop.f32.mrb[6].mxu0 }
 0x104   : > { %v714_v14 = vadd.f32 %v708_v7, %v636_v10  ;;  %v1498_v15 = vpop.f32.mrb[7].mxu0 }
 0x10e   : > { %v878_v16 = vpop.f32.mrb[8].mxu1 }
 0x10f   : > { %v1533_v18 = vpop.f32.mrb[9].mxu1 }
 0x110   : > { %v881_v21 = vpop.f32.mrb[10].mxu1 }
 0x111   : > { %v796_v17 = vpop.f32.mrb[8].mxu0  ;;  %v1534_v23 = vpop.f32.mrb[11].mxu1 }
 0x112   : > { %v802_v19 = vadd.f32 %v796_v17, %v714_v14  ;;  %v1521_v20 = vpop.f32.mrb[9].mxu0 }
 0x113   : > { %v799_v22 = vpop.f32.mrb[10].mxu0 }
 0x114   : > { %v884_v24 = vadd.f32 %v878_v16, %v802_v19  ;;  %v1522_v25 = vpop.f32.mrb[11].mxu0 }
 0x11e   : > { %v1044_v26 = vpop.f32.mrb[12].mxu1 }
 0x11f   : > { %v1557_v28 = vpop.f32.mrb[13].mxu1 }
 0x120   : > { %v1047_v31 = vpop.f32.mrb[14].mxu1 }
 0x121   : > { %v956_v27 = vpop.f32.mrb[12].mxu0  ;;  %v1558_v33 = vpop.f32.mrb[15].mxu1 }
 0x122   : > { %v962_v29 = vadd.f32 %v956_v27, %v884_v24  ;;  %v1545_v30 = vpop.f32.mrb[13].mxu0 }
 0x123   : > { %v959_v32 = vpop.f32.mrb[14].mxu0 }
 0x124   : > { %v1050_v34 = vadd.f32 %v1044_v26, %v962_v29  ;;  %v1546_v35 = vpop.f32.mrb[15].mxu0 }
 0x131   : > { %v1126_v37 = vpop.f32.mrb[16].mxu0 }
 0x132   : > { %v1132_v39 = vadd.f32 %v1126_v37, %v1050_v34  ;;  %v1569_v41 = vpop.f32.mrb[17].mxu0 }
 0x133   : > { %v1129_v42 = vpop.f32.mrb[18].mxu0 }
 0x134   : > { %v1140_v43 = vadd.f32 %v1415_v38, %v1132_v39  ;;  %v1570_v44 = vpop.f32.mrb[19].mxu0 }
 0x136   : > { %v1143_v45 = vadd.f32 %v1142_v40, %v1140_v43 }
 0x138   : > { %v1144_v46 = vmax.f32 %v1143_v45, 0.0 }
 0x13a   : > { %v1145_v47 = vpack.c.bf16 %v1144_v46, %v1144_v46 }
 0x13c   : > { %1147 = vst.msk [vmem:[%s389_s19] sm:$0x3] %vm1146_vm2, %v1145_v47 }
 0x13d PF: > { %s16_s25 = sadd.s32 1, %s1694_s25   ;;  %s2010_s21 = smov %s1686_s23 }
 0x13e   : > { %p13_p10 = scmp.ge.s32.totalorder %s16_s25, 10   ;;  %s2011_s22 = smov %s1690_s24 }
 0x13f   : > { %s2012_s23 = smov %s2015_s26  ;;  %s2013_s24 = smov %s2019_s27 }
 0x140   :  { %15 = sbr.rel (!%p13_p10) target bundleno = 3 (0x3), region = 91 }

// kernel: _lambda_.27
= control target key start
LH: loop header
LB: loop body
LE: loop exit
PB: predicated region body
PF: predicated region fallthrough
CT: control target
= control target key end

     0   :  { %6 = vsyncpa [#allocation3], 0  ;;  %s420_s0 = inlined_call_operand.vmem [shape: bf16[2,2,2,128], index: 0, kind: input, shape index: {}]   ;;  %s421_s1 = inlined_call_operand.hbm [shape: f32[2,1,128], index: 1, kind: output, shape index: {}]  }
   0x1   :  { %8 = vsyncpa [#allocation3 + $0x1], 0  ;;  %s320_s6 = smov 0   ;;  %s322_s7 = smov 0  }
   0x2   :  { %s324_s8 = smov 0   ;;  %s326_s9 = smov 0  }
   0x3 LB: > { %s341_s10 = sadd.s32 4294967295, %s307_s9   ;;  %s198_s11 = sadd.s32 4294967294, %s307_s9   ;;  %s307_s9 = sphi %s326_s9, %s427_s9   ;;  %s303_s8 = sphi %s324_s8, %s426_s8   ;;  %s299_s7 = sphi %s322_s7, %s425_s7   ;;  %s295_s6 = sphi %s320_s6, %s424_s6  }
   0x4   : > { %s345_s12 = sadd.s32 1, %s307_s9   ;;  %s47_s13 = sadd.s32 1, %s303_s8 }
   0x5   : > { %s44_s14 = ssub.s32 %s307_s9, %s345_s12  ;;  %p57_p0 = scmp.ne.s32.totalorder %s303_s8, %s299_s7 }
   0x6   : > { %p45_p1 = scmp.eq.s32.totalorder %s44_s14, 0  ;;  %p58_p2 = scmp.eq.s32.totalorder %s341_s10, 1 }
   0x7   : > { %p63_p3 = scmp.ne.s32.totalorder %s299_s7, %s295_s6  ;;  %p64_p4 = scmp.eq.s32.totalorder %s198_s11, 1 }
   0x8   : > { %s356_s15 = scalar_select %p45_p1, %s303_s8, %s47_s13  }
   0x9   : > { %p358_p5 = por %p58_p2, %p57_p0  ;;  %p362_p6 = por %p64_p4, %p63_p3 }
   0xa   : > { %p201_p7 = scmp.ge.s32.totalorder %s307_s9, 1  ;;  %p89_p8 = scmp.lt.s32.totalorder %s307_s9, 3 }
   0xc   : > { %p90_p9 = pnand %p201_p7, %p89_p8 }
   0xd   : > { %p107_p10 = scmp.lt.s32.totalorder (!%p90_p9), %s341_s10, 1  ;;  %vm115_vm0 = vcmask (!%p90_p9), 1041408   ;;  %s105_s23 = sand.u32 (!%p90_p9), 1, %s299_s7  }
   0xe   : > { %93 = sbr.rel (%p90_p9) target bundleno = 62 (0x3e), region = 24  ;;  %s106_s24 = scalar_lea.vmem (!%p90_p9), [#allocation2], %s105_s23 }
   0xf   : > { %s143_s25 = sshll.u32 (!%p90_p9), %s106_s24, 4  ;;  %s203_s26 = sshll.u32 (!%p90_p9), %s341_s10, 4  ;;  %s375_s25 = int_to_ptr.vmem [resolvable:$true] %s143_s25 }
  0x10   : > { %s380_s29 = scalar_lea.hbm (!%p90_p9), %s421_s1, %s203_s26  ;;  %s131_s30 = scalar_lea.sflag (!%p90_p9), [#allocation3], %s105_s23 }
  0x11   : > { %s245_s2 = scalar_lea.vmem (!%p90_p9), %s375_s25, 16  ;;  %s309_s3 = smov (!%p90_p9), [#allocation2]  }
  0x12   : > { %p246_p11 = scmp.ne.s32.totalorder (!%p90_p9), %s375_s25, %s245_s2  ;;  %s249_s4 = sshll.u32 (!%p90_p9), %s309_s3, 4  ;;  %s250_s4 = int_to_ptr.vmem [resolvable:$false] %s249_s4 }
  0x13   : > { %s251_s5 = scalar_lea.vmem (!%p90_p9), %s250_s4, 32  ;;  %p252_p0 = scmp.lt.s32.totalorder (!%p90_p9), %s375_s25, %s250_s4 }
  0x14   : > { %p247_p12 = pnand (!%p90_p9), %p246_p11, %p358_p5  ;;  %p253_p1 = scmp.lt.s32.totalorder (!%p90_p9), %s251_s5, %s245_s2 }
  0x15   : > { %s108_s18 = scalar_select %p107_p10, %s341_s10, 1 }
  0x16   : > { %p248_p13 = pneg %p247_p12  ;;  %p254_p2 = por %p253_p1, %p252_p0 }
  0x17   : > { %s202_s19 = sshll.u32 %s108_s18, 1 }
  0x18   : > { %s110_s22 = scalar_lea.vmem %s420_s0, %s202_s19  ;;  %p255_p3 = pnand %p254_p2, %p248_p13 }
  0x19   : > { %v111_v0 = vld [vmem:[%s110_s22] sm:$0x1]  ;;  %v112_v1 = vld [vmem:[%s110_s22 + $0x1] sm:$0x1] }
  0x1a   : > { %v113_v2 = vunpack.c.l.bf16 %v111_v0  ;;  %v114_v3 = vunpack.c.l.bf16 %v112_v1 }
  0x1c   : > { %v116_v4 = vsel %vm115_vm0, %v113_v2, 0.0  ;;  %v117_v5 = vsel %vm115_vm0, %v114_v3, 0.0 }
  0x1d   : > { %v118_v6 = vadd.f32 %v117_v5, %v116_v4 }
  0x1f   : > { %v120_v7 = vmul.f32 0.5, %v118_v6 }
  0x21   : > { %v121_v8 = vsel %vm115_vm0, %v120_v7, 0.0 }
  0x22   : > { %v122_v9 = vrot.slane %v121_v8, 4 }
  0x24   : > { %v123_v10 = vadd.f32 %v122_v9, %v121_v8 }
  0x26   : > { %v124_v11 = vrot.slane %v123_v10, 2 }
  0x28   : > { %v125_v12 = vadd.f32 %v124_v11, %v123_v10 }
  0x2a   : > { %v126_v13 = vrot.slane %v125_v12, 1 }
  0x2c   : > { %v127_v14 = vadd.f32 %v126_v13, %v125_v12 }
  0x2e   : > { %v128_v15 = vmul.f32 0.5, %v127_v14 }
  0x30   : > { %129 = vst [vmem:[%s106_s24] sm:$0x1] %v128_v15 }
  0x31   : > { %258 = shalt.err (!%p255_p3)
}
  0x32   : > { %s259_s10 = scalar_lea.hbm %s380_s29, 16  ;;  %s263_s14 = scalar_lea.hbm %s421_s1, 32 }
  0x33   : > { %p260_p4 = scmp.ne.s32.totalorder %s380_s29, %s259_s10  ;;  %p264_p9 = scmp.lt.u32.totalorder %s380_s29, %s421_s1 }
  0x34   : > { %p265_p10 = scmp.lt.u32.totalorder %s263_s14, %s259_s10  ;;  %p267_p12 = scmp.lt.u32.totalorder %s259_s10, %s380_s29 }
  0x35   : > { %p261_p7 = pnand %p260_p4, %p358_p5 }
  0x36   : > { %p266_p11 = por %p265_p10, %p264_p9 }
  0x37   : > { %p262_p8 = pneg %p261_p7 }
  0x38   : > { %p268_p13 = por %p267_p12, %p266_p11 }
  0x3a   : > { %p269_p0 = pnand %p268_p13, %p262_p8 }
  0x3c   : > { %272 = shalt.err (!%p269_p0)
}
  0x3d   : > { %206 = dma.vmem_to_hbm [thread:$0]  (%p358_p5), %s375_s25, 16, %s380_s29, %s131_s30  }
  0x3e PF: > { %p212_p1 = scmp.ge.s32.totalorder %s307_s9, 2  ;;  %s155_s20 = sand.u32 1, %s295_s6  }
  0x3f   : > { %s156_s21 = scalar_lea.sflag [#allocation3], %s155_s20 }
  0x40   : > { %p209_p2 = pnand %p212_p1, %p362_p6 }
  0x42   : > { %290 = dma.done.wait (!%p209_p2), %s156_s21, 16  }
  0x43   : > { %292 = vsyncadd (!%p209_p2), %s156_s21, 4294967280  ;;  %p11_p3 = scmp.ge.s32.totalorder %s345_s12, 4   ;;  %s424_s6 = smov %s299_s7 }
  0x44   : > { %s425_s7 = smov %s303_s8  ;;  %s426_s8 = smov %s356_s15 }
  0x45   : > { %s427_s9 = smov %s345_s12  ;;  %13 = sbr.rel (!%p11_p3) target bundleno = 3 (0x3), region = 59 }
  0x4c   :  { %160 = vsyncpa [#allocation3], 1 }
  0x4d   :  { %162 = vsyncpa [#allocation3 + $0x1], 1 }

// kernel: _lambda_.24
= control target key start
LH: loop header
LB: loop body
LE: loop exit
PB: predicated region body
PF: predicated region fallthrough
CT: control target
= control target key end

     0   :  { %s1688_s18 = smov 0   ;;  %s1690_s19 = smov 0   ;;  %s1948_s0 = inlined_call_operand.vmem [shape: bf16[2,5,2,3,64], index: 0, kind: input, shape index: {}, may-alias: {0,1,2}]   ;;  %s1949_s1 = inlined_call_operand.vmem [shape: bf16[2,5,2,3,64], index: 1, kind: input, shape index: {}, may-alias: {0,1,2}]   ;;  %s1950_s2 = inlined_call_operand.vmem [shape: bf16[2,5,2,3,64], index: 2, kind: input, shape index: {}, may-alias: {0,1,2}]   ;;  %s1951_s3 = inlined_call_operand.vmem [shape: bf16[9,64,128], index: 3, kind: input, shape index: {}]   ;;  %s1952_s4 = inlined_call_operand.vmem [shape: f32[1,128], index: 4, kind: input, shape index: {}]   ;;  %s1953_s5 = inlined_call_operand.vmem [shape: bf16[2,2,2,128], index: 5, kind: output, shape index: {}]  }
   0x1   :  { %s1692_s20 = smov 0   ;;  %s1694_s21 = smov 0  }
   0x2   :  { %s1696_s22 = smov 0  }
   0x3 LB: > { %s24_s23 = sadd.s32 1, %s1646_s20  ;;  %s27_s24 = sadd.s32 1, %s1650_s21  ;;  %s1654_s22 = sphi %s1696_s22, %s15_s22   ;;  %s1650_s21 = sphi %s1694_s21, %s1957_s21   ;;  %s1646_s20 = sphi %s1692_s20, %s1956_s20   ;;  %s1642_s19 = sphi %s1690_s19, %s1955_s19   ;;  %s1638_s18 = sphi %s1688_s18, %s1954_s18  }
   0x4   : > { %p25_p0 = scmp.ge.s32.totalorder %s24_s23, 2  ;;  %p1255_p1 = scmp.ge.s32.totalorder %s1654_s22, 1 }
   0x5   : > { %p259_p2 = scmp.lt.s32.totalorder %s1654_s22, 5 }
   0x6   : > { %s1959_s23 = smov (%p25_p0, %s24_s23), 0  ;;  %s1961_s24 = smov (!%p25_p0, %s27_s24), %s1650_s21 }
   0x7   : > { %p260_p3 = pnand %p1255_p1, %p259_p2  ;;  %p29_p4 = scmp.ge.s32.totalorder %s1961_s24, 2 }
   0x8   : > { %v1580_v0 = vld [vmem:[%s1951_s3 + $0x20] sm:$0xff] (!%p260_p3)   ;;  %v1656_v1 = vmov (!%p260_p3), 0.0   ;;  %v1582_v3 = vld [vmem:[%s1951_s3 + $0x28] sm:$0xff] (!%p260_p3)   ;;  %vm1657_vm0 = vmmov (!%p260_p3), 0   ;;  %s1736_s6 = sshll.u32 (!%p260_p3), %s1638_s18, 1  ;;  %p317_p5 = scmp.lt.s32.totalorder (!%p260_p3), %s1642_s19, 1 }
   0x9   : > { %s1963_s24 = smov (%p29_p4, %s1961_s24), 0  ;;  %263 = sbr.rel (%p260_p3) target bundleno = 311 (0x137), region = 40 }
   0xa   : > { %1429 = vmatprep.subr.bf16.mxu0 (!%p260_p3), %v1656_v1  ;;  %1441 = vmatprep.subr.bf16.mxu1 (!%p260_p3), %v1656_v1  ;;  %v1581_v2 = vld [vmem:[%s1951_s3] sm:$0xff] (!%p260_p3)   ;;  %v1583_v4 = vld [vmem:[%s1951_s3 + $0x8] sm:$0xff] (!%p260_p3)   ;;  %p319_p6 = scmp.lt.s32.totalorder (!%p260_p3), %s1736_s6, 4  ;;  %v1584_v5 = vld [vmem:[%s1951_s3 + $0x30] sm:$0xff] (!%p260_p3)   ;;  %s328_s17 = sadd.s32 (!%p260_p3), 1, %s1736_s6  ;;  %vm405_vm1 = vcmask (!%p260_p3), 523264  }
   0xb   : > { %1430 = vmatpush3.bf16.msra.mxu0 (!%p260_p3), %v1580_v0  ;;  %1437 = vmatprep.mubr.msk.bf16.mxu0 (!%p260_p3), %vm1657_vm0, %v1656_v1  ;;  %v1585_v6 = vld [vmem:[%s1951_s3 + $0x10] sm:$0xff] (!%p260_p3)   ;;  %v1586_v7 = vld [vmem:[%s1951_s3 + $0x38] sm:$0xff] (!%p260_p3)   ;;  %p331_p7 = scmp.lt.s32.totalorder (!%p260_p3), %s328_s17, 4  ;;  %v1588_v10 = vld [vmem:[%s1951_s3 + $0x40] sm:$0xff] (!%p260_p3)   ;;  %p355_p9 = scmp.lt.s32.totalorder (!%p260_p3), %s1638_s18, 1 }
   0xc   : > { %1442 = vmatpush3.bf16.msra.mxu1 (!%p260_p3), %v1581_v2  ;;  %1431 = vmatprep.subr.bf16.mxu0 (!%p260_p3), %v1656_v1  ;;  %v1587_v8 = vld [vmem:[%s1951_s3 + $0x18] sm:$0xff] (!%p260_p3)   ;;  %v1589_v11 = vld [vmem:[%s1951_s3 + $0x60] sm:$0xff] (!%p260_p3)   ;;  %v1590_v14 = vld [vmem:[%s1951_s3 + $0x48] sm:$0xff] (!%p260_p3)  }
   0xd   : > { %1443 = vmatprep.subr.bf16.mxu1 (!%p260_p3), %v1656_v1  ;;  %1449 = vmatprep.mubr.msk.bf16.mxu1 (!%p260_p3), %vm1657_vm0, %v1656_v1  ;;  %v1591_v15 = vld [vmem:[%s1951_s3 + $0x68] sm:$0xff] (!%p260_p3)   ;;  %v1592_v17 = vld [vmem:[%s1951_s3 + $0x50] sm:$0xff] (!%p260_p3)   ;;  %v1594_v21 = vld [vmem:[%s1951_s3 + $0x58] sm:$0xff] (!%p260_p3)  }
   0xe   : > { %v1593_v19 = vld [vmem:[%s1951_s3 + $0x70] sm:$0xff] (!%p260_p3)   ;;  %v1595_v22 = vld [vmem:[%s1951_s3 + $0x78] sm:$0xff] (!%p260_p3)   ;;  %v1596_v24 = vld [vmem:[%s1951_s3 + $0x80] sm:$0xff] (!%p260_p3)  }
   0xf   : > { %1432 = vmatpush3.bf16.msra.mxu0 (!%p260_p3), %v1582_v3  ;;  %v1597_v25 = vld [vmem:[%s1951_s3 + $0xa0] sm:$0xff] (!%p260_p3)   ;;  %v1598_v27 = vld [vmem:[%s1951_s3 + $0x88] sm:$0xff] (!%p260_p3)   ;;  %v1600_v31 = vld [vmem:[%s1951_s3 + $0x90] sm:$0xff] (!%p260_p3)  }
  0x10   : > { %s1965_s19 = smov (!%p317_p5, %s1642_s19), 1  ;;  %1444 = vmatpush3.bf16.msra.mxu1 %v1583_v4  ;;  %1433 = vmatprep.subr.bf16.mxu0 %v1656_v1  ;;  %s1967_s17 = smov (!%p331_p7, %s328_s17), 4  ;;  %v1599_v29 = vld [vmem:[%s1951_s3 + $0xa8] sm:$0xff]   ;;  %v1601_v32 = vld [vmem:[%s1951_s3 + $0xb0] sm:$0xff]   ;;  %v1602_v35 = vld [vmem:[%s1951_s3 + $0x98] sm:$0xff]  }
  0x11   : > { %s320_s11 = scalar_select %p319_p6, %s1736_s6, 4  ;;  %1445 = vmatprep.subr.bf16.mxu1 %v1656_v1  ;;  %v1603_v36 = vld [vmem:[%s1951_s3 + $0xb8] sm:$0xff]   ;;  %v1604_v38 = vld [vmem:[%s1951_s3 + $0xc0] sm:$0xff]   ;;  %v1606_v41 = vld [vmem:[%s1951_s3 + $0xc8] sm:$0xff]  }
  0x12   : > { %s1759_s14 = smul.u32 10, %s1965_s19  ;;  %s1260_s26 = sshll.u32 %s1967_s17, 1  ;;  %v1605_v40 = vld [vmem:[%s1951_s3 + $0xe0] sm:$0xff]   ;;  %v1607_v42 = vld [vmem:[%s1951_s3 + $0xe8] sm:$0xff]   ;;  %v1608_v43 = vld [vmem:[%s1951_s3 + $0xd0] sm:$0xff]  }
  0x13   : > { %s1257_s15 = sshll.u32 %s320_s11, 1  ;;  %1434 = vmatpush3.bf16.msra.mxu0 %v1584_v5  ;;  %s341_s11 = sadd.s32 2, %s1736_s6  ;;  %v1609_v44 = vld [vmem:[%s1951_s3 + $0xf0] sm:$0xff]   ;;  %v1610_v45 = vld [vmem:[%s1951_s3 + $0xd8] sm:$0xff]   ;;  %v1612_v48 = vld [vmem:[%s1951_s3 + $0x100] sm:$0xff]  }
  0x14   : > { %s323_s16 = sadd.s32 %s1759_s14, %s1257_s15  ;;  %1446 = vmatpush3.bf16.msra.mxu1 %v1585_v6  ;;  %1435 = vmatprep.subr.bf16.mxu0 %v1656_v1  ;;  %s335_s29 = sadd.s32 %s1759_s14, %s1260_s26  ;;  %v1611_v46 = vld [vmem:[%s1951_s3 + $0xf8] sm:$0xff]   ;;  %v1613_v51 = vld [vmem:[%s1951_s3 + $0x108] sm:$0xff]   ;;  %v1614_v53 = vld [vmem:[%s1951_s3 + $0x110] sm:$0xff]  }
  0x15   : > { %s1258_s27 = sshll.u32 %s323_s16, 1  ;;  %1447 = vmatprep.subr.bf16.mxu1 %v1656_v1  ;;  %s1261_s7 = sshll.u32 %s335_s29, 1  ;;  %v1615_v56 = vld [vmem:[%s1951_s3 + $0x118] sm:$0xff]  }
  0x16   : > { %s325_s8 = scalar_lea.vmem %s1948_s0, %s1258_s27  ;;  %s1817_s15 = scalar_lea.vmem %s1949_s1, %s1261_s7 }
  0x17   : > { %v1266_v9 = vld [vmem:[%s325_s8 + $0x2] sm:$0x1]  ;;  %1436 = vmatpush3.bf16.msra.mxu0 %v1586_v7  ;;  %v361_v12 = vld [vmem:[%s325_s8] sm:$0x1]  ;;  %p344_p8 = scmp.lt.s32.totalorder %s341_s11, 4  ;;  %s1971_s18 = smov (!%p355_p9, %s1638_s18), 1 }
  0x18   : > { %1448 = vmatpush3.bf16.msra.mxu1 %v1587_v8  ;;  %1453 = vmatprep.subr.bf16.mxu0 %v1656_v1  ;;  %v1293_v13 = vld.sshfl [vmem:[%s325_s8] sm:$0x3 pattern:$0x76325410]  ;;  %v1312_v37 = vld [vmem:[%s1817_s15 + $0x2] sm:$0x1] }
  0x19   : > { %1465 = vmatprep.subr.bf16.mxu1 %v1656_v1  ;;  %v537_v16 = vshll.u32 %v1293_v13, 16  ;;  %v535_v18 = vshrl.u32 %v1293_v13, 16  ;;  %v609_v26 = vld [vmem:[%s1817_s15] sm:$0x1]  ;;  %s1969_s11 = smov (!%p344_p8, %s341_s11), 4 }
  0x1a   : > { %1438 = vmatmul.mubr.msk.bf16.vlgmr.msra.gmra.mrb[0].mxu0 %vm405_vm1, %v1266_v9  ;;  %v1334_v28 = vld.sshfl [vmem:[%s1817_s15] sm:$0x3 pattern:$0x76325410]  ;;  %s1263_s17 = sshll.u32 %s1969_s11, 1  ;;  %s1265_s11 = sshll.u32 %s1965_s19, 1 }
  0x1b   : > { %1450 = vmatmul.mubr.msk.bf16.vlgmr.msra.gmra.mrb[0].mxu1 %vm405_vm1, %v361_v12  ;;  %1454 = vmatpush3.bf16.msra.mxu0 %v1588_v10  ;;  %v539_v20 = vrot.slane %v537_v16, 1  ;;  %v787_v30 = vshll.u32 %v1334_v28, 16  ;;  %v785_v33 = vshrl.u32 %v1334_v28, 16  ;;  %s348_s8 = sadd.s32 %s1759_s14, %s1263_s17  ;;  %s358_s14 = sadd.s32 %s1265_s11, %s1971_s18 }
  0x1c   : > { %1466 = vmatpush3.bf16.msra.mxu1 %v1589_v11  ;;  %1455 = vmatprep.subr.bf16.mxu0 %v1656_v1  ;;  %s1264_s13 = sshll.u32 %s348_s8, 1  ;;  %s359_s6 = scalar_lea.vmem %s1953_s5, %s358_s14 }
  0x1d   : > { %1467 = vmatprep.subr.bf16.mxu1 %v1656_v1  ;;  %1461 = vmatprep.mubr.msk.bf16.mxu0 %vm1657_vm0, %v1656_v1  ;;  %v540_v23 = vor.u32 %v539_v20, %v535_v18  ;;  %v789_v34 = vrot.slane %v787_v30, 1  ;;  %s350_s28 = scalar_lea.vmem %s1950_s2, %s1264_s13 }
  0x1e   : > { %1473 = vmatprep.mubr.msk.bf16.mxu1 %vm1657_vm0, %v1656_v1  ;;  %v859_v47 = vld [vmem:[%s350_s28] sm:$0x1]  ;;  %v1353_v49 = vld [vmem:[%s350_s28 + $0x2] sm:$0x1] }
  0x1f   : > { %1456 = vmatpush3.bf16.msra.mxu0 %v1590_v14  ;;  %v790_v39 = vor.u32 %v789_v34, %v785_v33  ;;  %v1375_v50 = vld.sshfl [vmem:[%s350_s28] sm:$0x3 pattern:$0x76325410] }
  0x20   : > { %1468 = vmatpush3.bf16.msra.mxu1 %v1591_v15  ;;  %1457 = vmatprep.subr.bf16.mxu0 %v1656_v1  ;;  %v1037_v52 = vshll.u32 %v1375_v50, 16  ;;  %v1035_v54 = vshrl.u32 %v1375_v50, 16  ;;  %v1381_v34 = vld [vmem:[%s1952_s4] ss:$0 sm:$0xff] }
  0x21   : > { %1469 = vmatprep.subr.bf16.mxu1 %v1656_v1 }
  0x22   : > { %v1039_v55 = vrot.slane %v1037_v52, 1 }
  0x23   : > { %1458 = vmatpush3.bf16.msra.mxu0 %v1592_v17 }
  0x24   : > { %1470 = vmatpush3.bf16.msra.mxu1 %v1593_v19  ;;  %1459 = vmatprep.subr.bf16.mxu0 %v1656_v1  ;;  %v1040_v57 = vor.u32 %v1039_v55, %v1035_v54 }
  0x25   : > { %1471 = vmatprep.subr.bf16.mxu1 %v1656_v1 }
  0x27   : > { %1460 = vmatpush3.bf16.msra.mxu0 %v1594_v21 }
  0x28   : > { %1472 = vmatpush3.bf16.msra.mxu1 %v1595_v22  ;;  %1477 = vmatprep.subr.bf16.mxu0 %v1656_v1 }
  0x29   : > { %1489 = vmatprep.subr.bf16.mxu1 %v1656_v1 }
  0x2a   : > { %1462 = vmatmul.mubr.msk.bf16.vlgmr.msra.gmra.mrb[4].mxu0 %vm405_vm1, %v540_v23 }
  0x2b   : > { %1478 = vmatpush3.bf16.msra.mxu0 %v1596_v24  ;;  %1474 = vmatmul.mubr.msk.bf16.vlgmr.msra.gmra.mrb[4].mxu1 %vm405_vm1, %v609_v26 }
  0x2c   : > { %1490 = vmatpush3.bf16.msra.mxu1 %v1597_v25  ;;  %1479 = vmatprep.subr.bf16.mxu0 %v1656_v1 }
  0x2d   : > { %1491 = vmatprep.subr.bf16.mxu1 %v1656_v1  ;;  %1485 = vmatprep.mubr.msk.bf16.mxu0 %vm1657_vm0, %v1656_v1 }
  0x2e   : > { %1497 = vmatprep.mubr.msk.bf16.mxu1 %vm1657_vm0, %v1656_v1 }
  0x2f   : > { %1480 = vmatpush3.bf16.msra.mxu0 %v1598_v27 }
  0x30   : > { %1492 = vmatpush3.bf16.msra.mxu1 %v1599_v29  ;;  %1481 = vmatprep.subr.bf16.mxu0 %v1656_v1 }
  0x31   : > { %1493 = vmatprep.subr.bf16.mxu1 %v1656_v1 }
  0x33   : > { %1482 = vmatpush3.bf16.msra.mxu0 %v1600_v31 }
  0x34   : > { %1494 = vmatpush3.bf16.msra.mxu1 %v1601_v32  ;;  %1483 = vmatprep.subr.bf16.mxu0 %v1656_v1 }
  0x35   : > { %1495 = vmatprep.subr.bf16.mxu1 %v1656_v1 }
  0x37   : > { %1484 = vmatpush3.bf16.msra.mxu0 %v1602_v35 }
  0x38   : > { %1496 = vmatpush3.bf16.msra.mxu1 %v1603_v36  ;;  %1501 = vmatprep.subr.bf16.mxu0 %v1656_v1 }
  0x39   : > { %1513 = vmatprep.subr.bf16.mxu1 %v1656_v1 }
  0x3a   : > { %1486 = vmatmul.mubr.msk.bf16.vlgmr.msra.gmra.mrb[8].mxu0 %vm405_vm1, %v1312_v37 }
  0x3b   : > { %1502 = vmatpush3.bf16.msra.mxu0 %v1604_v38  ;;  %1498 = vmatmul.mubr.msk.bf16.vlgmr.msra.gmra.mrb[8].mxu1 %vm405_vm1, %v790_v39 }
  0x3c   : > { %1514 = vmatpush3.bf16.msra.mxu1 %v1605_v40  ;;  %1503 = vmatprep.subr.bf16.mxu0 %v1656_v1 }
  0x3d   : > { %1515 = vmatprep.subr.bf16.mxu1 %v1656_v1  ;;  %1509 = vmatprep.mubr.msk.bf16.mxu0 %vm1657_vm0, %v1656_v1 }
  0x3e   : > { %1521 = vmatprep.mubr.msk.bf16.mxu1 %vm1657_vm0, %v1656_v1 }
  0x3f   : > { %1504 = vmatpush3.bf16.msra.mxu0 %v1606_v41 }
  0x40   : > { %1516 = vmatpush3.bf16.msra.mxu1 %v1607_v42  ;;  %1505 = vmatprep.subr.bf16.mxu0 %v1656_v1 }
  0x41   : > { %1517 = vmatprep.subr.bf16.mxu1 %v1656_v1 }
  0x43   : > { %1506 = vmatpush3.bf16.msra.mxu0 %v1608_v43 }
  0x44   : > { %1518 = vmatpush3.bf16.msra.mxu1 %v1609_v44  ;;  %1507 = vmatprep.subr.bf16.mxu0 %v1656_v1 }
  0x45   : > { %1519 = vmatprep.subr.bf16.mxu1 %v1656_v1 }
  0x47   : > { %1508 = vmatpush3.bf16.msra.mxu0 %v1610_v45 }
  0x48   : > { %1520 = vmatpush3.bf16.msra.mxu1 %v1611_v46  ;;  %1525 = vmatprep.subr.bf16.mxu0 %v1656_v1 }
  0x4a   : > { %1510 = vmatmul.mubr.msk.bf16.vlgmr.msra.gmra.mrb[12].mxu0 %vm405_vm1, %v859_v47 }
  0x4b   : > { %1526 = vmatpush3.bf16.msra.mxu0 %v1612_v48  ;;  %1522 = vmatmul.mubr.msk.bf16.vlgmr.msra.gmra.mrb[12].mxu1 %vm405_vm1, %v1353_v49 }
  0x4c   : > { %1527 = vmatprep.subr.bf16.mxu0 %v1656_v1  ;;  %1533 = vmatprep.mubr.msk.bf16.mxu0 %vm1657_vm0, %v1656_v1 }
  0x4f   : > { %1528 = vmatpush3.bf16.msra.mxu0 %v1613_v51 }
  0x50   : > { %1529 = vmatprep.subr.bf16.mxu0 %v1656_v1 }
  0x53   : > { %1530 = vmatpush3.bf16.msra.mxu0 %v1614_v53 }
  0x54   : > { %1531 = vmatprep.subr.bf16.mxu0 %v1656_v1 }
  0x57   : > { %1532 = vmatpush3.bf16.msra.mxu0 %v1615_v56 }
  0x5a   : > { %1534 = vmatmul.mubr.msk.bf16.vlgmr.msra.gmra.mrb[16].mxu0 %vm405_vm1, %v1040_v57 }
  0xed   : > { %v443_v58 = vpop.f32.mrb[0].mxu0 }
  0xee   : > { %v1439_v59 = vpop.f32.mrb[1].mxu0  ;;  %v510_v60 = vpop.f32.mrb[0].mxu1 }
  0xef   : > { %v511_v61 = vadd.f32 %v510_v60, %v443_v58  ;;  %v446_v62 = vpop.f32.mrb[2].mxu0  ;;  %v1451_v63 = vpop.f32.mrb[1].mxu1 }
  0xf0   : > { %v1440_v0 = vpop.f32.mrb[3].mxu0  ;;  %v513_v2 = vpop.f32.mrb[2].mxu1 }
  0xf1   : > { %v1452_v3 = vpop.f32.mrb[3].mxu1 }
  0xfd   : > { %v602_v4 = vpop.f32.mrb[4].mxu0 }
  0xfe   : > { %v608_v5 = vadd.f32 %v602_v4, %v511_v61  ;;  %v1463_v6 = vpop.f32.mrb[5].mxu0  ;;  %v680_v7 = vpop.f32.mrb[4].mxu1 }
  0xff   : > { %v605_v8 = vpop.f32.mrb[6].mxu0  ;;  %v1475_v9 = vpop.f32.mrb[5].mxu1 }
 0x100   : > { %v686_v1 = vadd.f32 %v680_v7, %v608_v5  ;;  %v1464_v10 = vpop.f32.mrb[7].mxu0  ;;  %v683_v11 = vpop.f32.mrb[6].mxu1 }
 0x101   : > { %v1476_v12 = vpop.f32.mrb[7].mxu1 }
 0x10d   : > { %v759_v13 = vpop.f32.mrb[8].mxu0 }
 0x10e   : > { %v765_v14 = vadd.f32 %v759_v13, %v686_v1  ;;  %v1487_v15 = vpop.f32.mrb[9].mxu0  ;;  %v852_v16 = vpop.f32.mrb[8].mxu1 }
 0x10f   : > { %v762_v17 = vpop.f32.mrb[10].mxu0  ;;  %v1499_v18 = vpop.f32.mrb[9].mxu1 }
 0x110   : > { %v858_v19 = vadd.f32 %v852_v16, %v765_v14  ;;  %v1488_v20 = vpop.f32.mrb[11].mxu0  ;;  %v855_v21 = vpop.f32.mrb[10].mxu1 }
 0x111   : > { %v1500_v22 = vpop.f32.mrb[11].mxu1 }
 0x11d   : > { %v930_v23 = vpop.f32.mrb[12].mxu0 }
 0x11e   : > { %v936_v24 = vadd.f32 %v930_v23, %v858_v19  ;;  %v1511_v25 = vpop.f32.mrb[13].mxu0  ;;  %v1009_v26 = vpop.f32.mrb[12].mxu1 }
 0x11f   : > { %v933_v27 = vpop.f32.mrb[14].mxu0  ;;  %v1523_v28 = vpop.f32.mrb[13].mxu1 }
 0x120   : > { %v1015_v29 = vadd.f32 %v1009_v26, %v936_v24  ;;  %v1512_v30 = vpop.f32.mrb[15].mxu0  ;;  %v1012_v31 = vpop.f32.mrb[14].mxu1 }
 0x121   : > { %v1524_v32 = vpop.f32.mrb[15].mxu1 }
 0x12d   : > { %v1102_v33 = vpop.f32.mrb[16].mxu0 }
 0x12e   : > { %v1108_v35 = vadd.f32 %v1102_v33, %v1015_v29  ;;  %v1535_v36 = vpop.f32.mrb[17].mxu0 }
 0x12f   : > { %v1105_v37 = vpop.f32.mrb[18].mxu0 }
 0x130   : > { %v1116_v38 = vadd.f32 %v1381_v34, %v1108_v35  ;;  %v1536_v39 = vpop.f32.mrb[19].mxu0 }
 0x132   : > { %v1117_v40 = vmax.f32 %v1116_v38, 0.0 }
 0x134   : > { %v1118_v41 = vpack.c.bf16 %v1117_v40, %v1117_v40 }
 0x136   : > { %1119 = vst [vmem:[%s359_s6] sm:$0x1] %v1118_v41 }
 0x137 PF: > { %s15_s22 = sadd.s32 1, %s1654_s22   ;;  %s1954_s18 = smov %s1646_s20 }
 0x138   : > { %p12_p10 = scmp.ge.s32.totalorder %s15_s22, 6   ;;  %s1955_s19 = smov %s1650_s21 }
 0x139   : > { %s1956_s20 = smov %s1959_s23  ;;  %s1957_s21 = smov %s1963_s24 }
 0x13a   :  { %14 = sbr.rel (!%p12_p10) target bundleno = 3 (0x3), region = 87 }

// kernel: _lambda_.26
= control target key start
LH: loop header
LB: loop body
LE: loop exit
PB: predicated region body
PF: predicated region fallthrough
CT: control target
= control target key end

     0   :  { %s2243_s21 = smov 0   ;;  %s2245_s22 = smov 0   ;;  %s2648_s0 = inlined_call_operand.vmem [shape: bf16[2,4,1,4,128], index: 0, kind: input, shape index: {}, may-alias: {0,1,2}]   ;;  %s2649_s1 = inlined_call_operand.vmem [shape: bf16[2,4,1,4,128], index: 1, kind: input, shape index: {}, may-alias: {0,1,2}]   ;;  %s2650_s2 = inlined_call_operand.vmem [shape: bf16[2,4,1,4,128], index: 2, kind: input, shape index: {}, may-alias: {0,1,2}]   ;;  %s2651_s3 = inlined_call_operand.vmem [shape: bf16[9,128,128], index: 3, kind: input, shape index: {}]   ;;  %s2652_s4 = inlined_call_operand.vmem [shape: f32[1,128], index: 4, kind: input, shape index: {}]   ;;  %s2653_s5 = inlined_call_operand.vmem [shape: bf16[2,2,2,128], index: 5, kind: input, shape index: {}]   ;;  %s2654_s6 = inlined_call_operand.vmem [shape: bf16[2,2,2,128], index: 6, kind: output, shape index: {}]  }
   0x1   :  { %s2247_s23 = smov 0   ;;  %s2249_s24 = smov 0  }
   0x2   :  { %s2251_s25 = smov 0  }
   0x3 LB: > { %s25_s26 = sadd.s32 1, %s2196_s23  ;;  %s28_s27 = sadd.s32 1, %s2200_s24  ;;  %s2204_s25 = sphi %s2251_s25, %s16_s25   ;;  %s2200_s24 = sphi %s2249_s24, %s2658_s24   ;;  %s2196_s23 = sphi %s2247_s23, %s2657_s23   ;;  %s2192_s22 = sphi %s2245_s22, %s2656_s22   ;;  %s2188_s21 = sphi %s2243_s21, %s2655_s21  }
   0x4   : > { %p26_p0 = scmp.ge.s32.totalorder %s25_s26, 2  ;;  %p1573_p1 = scmp.ge.s32.totalorder %s2204_s25, 1 }
   0x5   : > { %p283_p2 = scmp.lt.s32.totalorder %s2204_s25, 5 }
   0x6   : > { %s2660_s26 = smov (%p26_p0, %s25_s26), 0  ;;  %s2662_s27 = smov (!%p26_p0, %s28_s27), %s2200_s24 }
   0x7   : > { %p284_p3 = pnand %p1573_p1, %p283_p2  ;;  %p30_p4 = scmp.ge.s32.totalorder %s2662_s27, 2 }
   0x8   : > { %v2094_v0 = vld [vmem:[%s2651_s3 + $0x40] sm:$0xff] (!%p284_p3)   ;;  %v2206_v1 = vmov (!%p284_p3), 0.0   ;;  %v2096_v3 = vld [vmem:[%s2651_s3 + $0x48] sm:$0xff] (!%p284_p3)   ;;  %vm2207_vm0 = vmmov (!%p284_p3), 0   ;;  %p343_p5 = scmp.lt.s32.totalorder (!%p284_p3), %s2192_s22, 1  ;;  %p345_p6 = scmp.lt.s32.totalorder (!%p284_p3), %s2188_s21, 3 }
   0x9   : > { %s2664_s27 = smov (%p30_p4, %s2662_s27), 0  ;;  %287 = sbr.rel (%p284_p3) target bundleno = 393 (0x189), region = 44 }
   0xa   : > { %1872 = vmatprep.subr.bf16.mxu0 (!%p284_p3), %v2206_v1  ;;  %1892 = vmatprep.subr.bf16.mxu1 (!%p284_p3), %v2206_v1  ;;  %v2095_v2 = vld [vmem:[%s2651_s3] sm:$0xff] (!%p284_p3)   ;;  %v2097_v4 = vld [vmem:[%s2651_s3 + $0x8] sm:$0xff] (!%p284_p3)   ;;  %v2098_v5 = vld [vmem:[%s2651_s3 + $0x50] sm:$0xff] (!%p284_p3)   ;;  %s361_s8 = sadd.s32 (!%p284_p3), 2, %s2188_s21  ;;  %p373_p9 = scmp.lt.s32.totalorder (!%p284_p3), %s2188_s21, 1 }
   0xb   : > { %1873 = vmatpush3.bf16.msra.mxu0 (!%p284_p3), %v2094_v0  ;;  %1888 = vmatprep.mubr.msk.bf16.mxu0 (!%p284_p3), %vm2207_vm0, %v2206_v1  ;;  %v2099_v6 = vld [vmem:[%s2651_s3 + $0x10] sm:$0xff] (!%p284_p3)   ;;  %v2100_v7 = vld [vmem:[%s2651_s3 + $0x58] sm:$0xff] (!%p284_p3)   ;;  %v2102_v9 = vld [vmem:[%s2651_s3 + $0x60] sm:$0xff] (!%p284_p3)   ;;  %p364_p8 = scmp.lt.s32.totalorder (!%p284_p3), %s361_s8, 3 }
   0xc   : > { %1893 = vmatpush3.bf16.msra.mxu1 (!%p284_p3), %v2095_v2  ;;  %1874 = vmatprep.subr.bf16.mxu0 (!%p284_p3), %v2206_v1  ;;  %v2101_v8 = vld [vmem:[%s2651_s3 + $0x18] sm:$0xff] (!%p284_p3)   ;;  %v2103_v10 = vld [vmem:[%s2651_s3 + $0x20] sm:$0xff] (!%p284_p3)   ;;  %v2104_v12 = vld [vmem:[%s2651_s3 + $0x68] sm:$0xff] (!%p284_p3)  }
   0xd   : > { %1894 = vmatprep.subr.bf16.mxu1 (!%p284_p3), %v2206_v1  ;;  %1908 = vmatprep.mubr.msk.bf16.mxu1 (!%p284_p3), %vm2207_vm0, %v2206_v1  ;;  %v2105_v13 = vld [vmem:[%s2651_s3 + $0x28] sm:$0xff] (!%p284_p3)   ;;  %v2106_v15 = vld [vmem:[%s2651_s3 + $0x70] sm:$0xff] (!%p284_p3)   ;;  %v2108_v19 = vld [vmem:[%s2651_s3 + $0x78] sm:$0xff] (!%p284_p3)  }
   0xe   : > { %v2107_v16 = vld [vmem:[%s2651_s3 + $0x30] sm:$0xff] (!%p284_p3)   ;;  %v2109_v20 = vld [vmem:[%s2651_s3 + $0x38] sm:$0xff] (!%p284_p3)   ;;  %v2110_v23 = vld [vmem:[%s2651_s3 + $0x80] sm:$0xff] (!%p284_p3)  }
   0xf   : > { %1875 = vmatpush3.bf16.msra.mxu0 (!%p284_p3), %v2096_v3  ;;  %v2111_v24 = vld [vmem:[%s2651_s3 + $0xc0] sm:$0xff] (!%p284_p3)   ;;  %v2112_v25 = vld [vmem:[%s2651_s3 + $0x88] sm:$0xff] (!%p284_p3)   ;;  %v2114_v27 = vld [vmem:[%s2651_s3 + $0x90] sm:$0xff] (!%p284_p3)  }
  0x10   : > { %s2666_s22 = smov (!%p343_p5, %s2192_s22), 1  ;;  %1895 = vmatpush3.bf16.msra.mxu1 %v2097_v4  ;;  %1876 = vmatprep.subr.bf16.mxu0 %v2206_v1  ;;  %v2113_v26 = vld [vmem:[%s2651_s3 + $0xc8] sm:$0xff]   ;;  %v2115_v28 = vld [vmem:[%s2651_s3 + $0xd0] sm:$0xff]   ;;  %v2116_v29 = vld [vmem:[%s2651_s3 + $0x98] sm:$0xff]   ;;  %s2670_s8 = smov (!%p364_p8, %s361_s8), 3 }
  0x11   : > { %s346_s12 = scalar_select %p345_p6, %s2188_s21, 3  ;;  %1896 = vmatprep.subr.bf16.mxu1 %v2206_v1  ;;  %v2117_v30 = vld [vmem:[%s2651_s3 + $0xd8] sm:$0xff]   ;;  %v2118_v31 = vld [vmem:[%s2651_s3 + $0xa0] sm:$0xff]   ;;  %v2120_v33 = vld [vmem:[%s2651_s3 + $0xa8] sm:$0xff]  }
  0x12   : > { %s2307_s15 = sshll.u32 %s2666_s22, 2  ;;  %v2119_v32 = vld [vmem:[%s2651_s3 + $0xe0] sm:$0xff]   ;;  %v2121_v34 = vld [vmem:[%s2651_s3 + $0xe8] sm:$0xff]   ;;  %v2122_v35 = vld [vmem:[%s2651_s3 + $0xb0] sm:$0xff]  }
  0x13   : > { %s348_s18 = sadd.s32 %s2307_s15, %s346_s12  ;;  %1877 = vmatpush3.bf16.msra.mxu0 %v2098_v5  ;;  %s351_s12 = sadd.s32 1, %s2188_s21  ;;  %v2123_v36 = vld [vmem:[%s2651_s3 + $0xf0] sm:$0xff]   ;;  %v2124_v38 = vld [vmem:[%s2651_s3 + $0xb8] sm:$0xff]   ;;  %v2126_v41 = vld [vmem:[%s2651_s3 + $0x100] sm:$0xff]  }
  0x14   : > { %s1575_s28 = sshll.u32 %s348_s18, 1  ;;  %1897 = vmatpush3.bf16.msra.mxu1 %v2099_v6  ;;  %1878 = vmatprep.subr.bf16.mxu0 %v2206_v1  ;;  %p354_p7 = scmp.lt.s32.totalorder %s351_s12, 3  ;;  %v2125_v39 = vld [vmem:[%s2651_s3 + $0xf8] sm:$0xff]   ;;  %v2127_v42 = vld [vmem:[%s2651_s3 + $0x140] sm:$0xff]   ;;  %v2128_v44 = vld [vmem:[%s2651_s3 + $0x108] sm:$0xff]  }
  0x15   : > { %1898 = vmatprep.subr.bf16.mxu1 %v2206_v1  ;;  %s2326_s9 = scalar_lea.vmem %s2648_s0, %s1575_s28  ;;  %v2129_v45 = vld [vmem:[%s2651_s3 + $0x148] sm:$0xff]   ;;  %v2130_v46 = vld [vmem:[%s2651_s3 + $0x110] sm:$0xff]   ;;  %v2132_v48 = vld [vmem:[%s2651_s3 + $0x118] sm:$0xff]   ;;  %s367_s20 = sadd.s32 %s2307_s15, %s2670_s8 }
  0x16   : > { %v1598_v11 = vld.sshfl [vmem:[%s2326_s9] sm:$0x3 pattern:$0x76325410]  ;;  %s2668_s12 = smov (!%p354_p7, %s351_s12), 3  ;;  %v2131_v47 = vld [vmem:[%s2651_s3 + $0x150] sm:$0xff]  }
  0x17   : > { %1879 = vmatpush3.bf16.msra.mxu0 %v2100_v7  ;;  %v432_v14 = vshll.u32 %v1598_v11, 16  ;;  %v430_v17 = vshrl.u32 %v1598_v11, 16  ;;  %v386_v22 = vld [vmem:[%s2326_s9] sm:$0x1]  ;;  %s357_s7 = sadd.s32 %s2307_s15, %s2668_s12  ;;  %v2133_v49 = vld [vmem:[%s2651_s3 + $0x158] sm:$0xff]   ;;  %v2136_v53 = vld [vmem:[%s2651_s3 + $0x128] sm:$0xff]  }
  0x18   : > { %1899 = vmatpush3.bf16.msra.mxu1 %v2101_v8  ;;  %1880 = vmatprep.subr.bf16.mxu0 %v2206_v1  ;;  %v1631_v37 = vld.sshfl [vmem:[%s2326_s9] sm:$0x2 pattern:$0x76325410]  ;;  %s1577_s11 = sshll.u32 %s357_s7, 1  ;;  %v2137_v54 = vld [vmem:[%s2651_s3 + $0x168] sm:$0xff]  }
  0x19   : > { %1900 = vmatprep.subr.bf16.mxu1 %v2206_v1  ;;  %v434_v18 = vrot.slane %v432_v14, 1  ;;  %s2436_s19 = scalar_lea.vmem %s2649_s1, %s1577_s11  ;;  %v639_v40 = vrot.slane %v1631_v37, 1  ;;  %v2134_v50 = vld [vmem:[%s2651_s3 + $0x120] sm:$0xff]   ;;  %v2138_v56 = vld [vmem:[%s2651_s3 + $0x130] sm:$0xff]   ;;  %v2140_v60 = vld [vmem:[%s2651_s3 + $0x138] sm:$0xff]   ;;  %s1579_s30 = sshll.u32 %s367_s20, 1 }
  0x1a   : > { %v730_v43 = vld [vmem:[%s2436_s19] sm:$0x1]  ;;  %v2139_v57 = vld [vmem:[%s2651_s3 + $0x170] sm:$0xff]   ;;  %v2141_v61 = vld [vmem:[%s2651_s3 + $0x178] sm:$0xff]   ;;  %s2558_s13 = scalar_lea.vmem %s2650_s2, %s1579_s30  ;;  %s2672_s21 = smov (!%p373_p9, %s2188_s21), 1 }
  0x1b   : > { %1881 = vmatpush3.bf16.msra.mxu0 %v2102_v9  ;;  %v435_v21 = vor.u32 %v434_v18, %v430_v17  ;;  %v2135_v51 = vld [vmem:[%s2651_s3 + $0x160] sm:$0xff]   ;;  %v2144_v4 = vld [vmem:[%s2651_s3 + $0x188] sm:$0xff]   ;;  %v2146_v6 = vld [vmem:[%s2651_s3 + $0x190] sm:$0xff]  }
  0x1c   : > { %1901 = vmatpush3.bf16.msra.mxu1 %v2103_v10  ;;  %1882 = vmatprep.subr.bf16.mxu0 %v2206_v1  ;;  %v1680_v52 = vld.sshfl [vmem:[%s2436_s19] sm:$0x3 pattern:$0x76325410]  ;;  %v2145_v5 = vld [vmem:[%s2651_s3 + $0x1c8] sm:$0xff]   ;;  %v2147_v7 = vld [vmem:[%s2651_s3 + $0x1d0] sm:$0xff]  }
  0x1d   : > { %1902 = vmatprep.subr.bf16.mxu1 %v2206_v1  ;;  %v866_v55 = vshll.u32 %v1680_v52, 16  ;;  %v864_v58 = vshrl.u32 %v1680_v52, 16  ;;  %v1705_v62 = vld.sshfl [vmem:[%s2436_s19] sm:$0x2 pattern:$0x76325410] }
  0x1e   : > { %v2142_v0 = vld [vmem:[%s2651_s3 + $0x180] sm:$0xff]   ;;  %v986_v2 = vrot.slane %v1705_v62, 1  ;;  %v2148_v8 = vld [vmem:[%s2651_s3 + $0x198] sm:$0xff]   ;;  %v2155_v17 = vld [vmem:[%s2651_s3 + $0x1f0] sm:$0xff]  }
  0x1f   : > { %1883 = vmatpush3.bf16.msra.mxu0 %v2104_v12  ;;  %v868_v59 = vrot.slane %v866_v55, 1  ;;  %v2143_v3 = vld [vmem:[%s2651_s3 + $0x1c0] sm:$0xff]   ;;  %v2149_v9 = vld [vmem:[%s2651_s3 + $0x1d8] sm:$0xff]   ;;  %v2152_v12 = vld [vmem:[%s2651_s3 + $0x1a8] sm:$0xff]  }
  0x20   : > { %1903 = vmatpush3.bf16.msra.mxu1 %v2105_v13  ;;  %1884 = vmatprep.subr.bf16.mxu0 %v2206_v1  ;;  %v2150_v10 = vld [vmem:[%s2651_s3 + $0x1a0] sm:$0xff]   ;;  %v2153_v13 = vld [vmem:[%s2651_s3 + $0x1e8] sm:$0xff]   ;;  %v2156_v18 = vld [vmem:[%s2651_s3 + $0x1b8] sm:$0xff]  }
  0x21   : > { %1904 = vmatprep.subr.bf16.mxu1 %v2206_v1  ;;  %v869_v63 = vor.u32 %v868_v59, %v864_v58  ;;  %v2151_v11 = vld [vmem:[%s2651_s3 + $0x1e0] sm:$0xff]  }
  0x22   : > { %v1754_v14 = vld.sshfl [vmem:[%s2558_s13] sm:$0x3 pattern:$0x76325410] }
  0x23   : > { %1885 = vmatpush3.bf16.msra.mxu0 %v2106_v15  ;;  %v2154_v15 = vld [vmem:[%s2651_s3 + $0x1b0] sm:$0xff]  }
  0x24   : > { %1905 = vmatpush3.bf16.msra.mxu1 %v2107_v16  ;;  %1886 = vmatprep.subr.bf16.mxu0 %v2206_v1  ;;  %v1213_v16 = vshll.u32 %v1754_v14, 16 }
  0x25   : > { %1906 = vmatprep.subr.bf16.mxu1 %v2206_v1 }
  0x27   : > { %1887 = vmatpush3.bf16.msra.mxu0 %v2108_v19  ;;  %v1211_v19 = vshrl.u32 %v1754_v14, 16 }
  0x28   : > { %1907 = vmatpush3.bf16.msra.mxu1 %v2109_v20  ;;  %1912 = vmatprep.subr.bf16.mxu0 %v2206_v1  ;;  %v1215_v20 = vrot.slane %v1213_v16, 1 }
  0x29   : > { %1932 = vmatprep.subr.bf16.mxu1 %v2206_v1 }
  0x2a   : > { %1889 = vmatmul.mubr.bf16.vlgmr.msra.gmra.mrb[0].mxu0 %v435_v21  ;;  %v2157_v21 = vld [vmem:[%s2651_s3 + $0x1f8] sm:$0xff]  }
  0x2b   : > { %1909 = vmatmul.mubr.bf16.vlgmr.msra.gmra.mrb[0].mxu1 %v386_v22  ;;  %1913 = vmatpush3.bf16.msra.mxu0 %v2110_v23  ;;  %v1077_v22 = vld [vmem:[%s2558_s13] sm:$0x1] }
  0x2c   : > { %1933 = vmatpush3.bf16.msra.mxu1 %v2111_v24  ;;  %1914 = vmatprep.subr.bf16.mxu0 %v2206_v1  ;;  %v2158_v23 = vld [vmem:[%s2651_s3 + $0x200] sm:$0xff]   ;;  %v1216_v24 = vor.u32 %v1215_v20, %v1211_v19 }
  0x2d   : > { %1934 = vmatprep.subr.bf16.mxu1 %v2206_v1  ;;  %1928 = vmatprep.mubr.msk.bf16.mxu0 %vm2207_vm0, %v2206_v1 }
  0x2e   : > { %1948 = vmatprep.mubr.msk.bf16.mxu1 %vm2207_vm0, %v2206_v1 }
  0x2f   : > { %1915 = vmatpush3.bf16.msra.mxu0 %v2112_v25  ;;  %v2159_v25 = vld [vmem:[%s2651_s3 + $0x208] sm:$0xff]  }
  0x30   : > { %1935 = vmatpush3.bf16.msra.mxu1 %v2113_v26  ;;  %1916 = vmatprep.subr.bf16.mxu0 %v2206_v1  ;;  %v2160_v26 = vld [vmem:[%s2651_s3 + $0x210] sm:$0xff]  }
  0x31   : > { %1936 = vmatprep.subr.bf16.mxu1 %v2206_v1 }
  0x33   : > { %1917 = vmatpush3.bf16.msra.mxu0 %v2114_v27  ;;  %v2161_v27 = vld [vmem:[%s2651_s3 + $0x218] sm:$0xff]  }
  0x34   : > { %1937 = vmatpush3.bf16.msra.mxu1 %v2115_v28  ;;  %1918 = vmatprep.subr.bf16.mxu0 %v2206_v1  ;;  %v2162_v28 = vld [vmem:[%s2651_s3 + $0x220] sm:$0xff]  }
  0x35   : > { %1938 = vmatprep.subr.bf16.mxu1 %v2206_v1 }
  0x37   : > { %1919 = vmatpush3.bf16.msra.mxu0 %v2116_v29  ;;  %v2163_v29 = vld [vmem:[%s2651_s3 + $0x228] sm:$0xff]  }
  0x38   : > { %1939 = vmatpush3.bf16.msra.mxu1 %v2117_v30  ;;  %1920 = vmatprep.subr.bf16.mxu0 %v2206_v1  ;;  %v2164_v30 = vld [vmem:[%s2651_s3 + $0x230] sm:$0xff]  }
  0x39   : > { %1940 = vmatprep.subr.bf16.mxu1 %v2206_v1 }
  0x3b   : > { %1921 = vmatpush3.bf16.msra.mxu0 %v2118_v31  ;;  %v2165_v31 = vld [vmem:[%s2651_s3 + $0x238] sm:$0xff]  }
  0x3c   : > { %1941 = vmatpush3.bf16.msra.mxu1 %v2119_v32  ;;  %1922 = vmatprep.subr.bf16.mxu0 %v2206_v1  ;;  %v1779_v32 = vld.sshfl [vmem:[%s2558_s13] sm:$0x2 pattern:$0x76325410]  ;;  %s1580_s13 = sshll.u32 %s2666_s22, 1 }
  0x3d   : > { %1942 = vmatprep.subr.bf16.mxu1 %v2206_v1  ;;  %s376_s10 = sadd.s32 %s1580_s13, %s2672_s21 }
  0x3e   : > { %s377_s11 = scalar_lea.vmem %s2653_s5, %s376_s10  ;;  %s384_s16 = scalar_lea.vmem %s2654_s6, %s376_s10 }
  0x3f   : > { %1923 = vmatpush3.bf16.msra.mxu0 %v2120_v33  ;;  %v1333_v33 = vrot.slane %v1779_v32, 1 }
  0x40   : > { %1943 = vmatpush3.bf16.msra.mxu1 %v2121_v34  ;;  %1924 = vmatprep.subr.bf16.mxu0 %v2206_v1 }
  0x41   : > { %1944 = vmatprep.subr.bf16.mxu1 %v2206_v1 }
  0x43   : > { %1925 = vmatpush3.bf16.msra.mxu0 %v2122_v35 }
  0x44   : > { %1945 = vmatpush3.bf16.msra.mxu1 %v2123_v36  ;;  %1926 = vmatprep.subr.bf16.mxu0 %v2206_v1 }
  0x45   : > { %1946 = vmatprep.subr.bf16.mxu1 %v2206_v1 }
  0x47   : > { %1927 = vmatpush3.bf16.msra.mxu0 %v2124_v38 }
  0x48   : > { %1947 = vmatpush3.bf16.msra.mxu1 %v2125_v39  ;;  %1952 = vmatprep.subr.bf16.mxu0 %v2206_v1 }
  0x49   : > { %1972 = vmatprep.subr.bf16.mxu1 %v2206_v1 }
  0x4a   : > { %1929 = vmatmul.mubr.bf16.vlgmr.msra.gmra.mrb[4].mxu0 %v639_v40 }
  0x4b   : > { %1953 = vmatpush3.bf16.msra.mxu0 %v2126_v41  ;;  %1949 = vmatmul.mubr.bf16.vlgmr.msra.gmra.mrb[4].mxu1 %v730_v43 }
  0x4c   : > { %1973 = vmatpush3.bf16.msra.mxu1 %v2127_v42  ;;  %1954 = vmatprep.subr.bf16.mxu0 %v2206_v1 }
  0x4d   : > { %1974 = vmatprep.subr.bf16.mxu1 %v2206_v1  ;;  %1968 = vmatprep.mubr.msk.bf16.mxu0 %vm2207_vm0, %v2206_v1 }
  0x4e   : > { %1988 = vmatprep.mubr.msk.bf16.mxu1 %vm2207_vm0, %v2206_v1 }
  0x4f   : > { %1955 = vmatpush3.bf16.msra.mxu0 %v2128_v44 }
  0x50   : > { %1975 = vmatpush3.bf16.msra.mxu1 %v2129_v45  ;;  %1956 = vmatprep.subr.bf16.mxu0 %v2206_v1 }
  0x51   : > { %1976 = vmatprep.subr.bf16.mxu1 %v2206_v1 }
  0x53   : > { %1957 = vmatpush3.bf16.msra.mxu0 %v2130_v46 }
  0x54   : > { %1977 = vmatpush3.bf16.msra.mxu1 %v2131_v47  ;;  %1958 = vmatprep.subr.bf16.mxu0 %v2206_v1 }
  0x55   : > { %1978 = vmatprep.subr.bf16.mxu1 %v2206_v1 }
  0x57   : > { %1959 = vmatpush3.bf16.msra.mxu0 %v2132_v48 }
  0x58   : > { %1979 = vmatpush3.bf16.msra.mxu1 %v2133_v49  ;;  %1960 = vmatprep.subr.bf16.mxu0 %v2206_v1 }
  0x59   : > { %1980 = vmatprep.subr.bf16.mxu1 %v2206_v1 }
  0x5b   : > { %1961 = vmatpush3.bf16.msra.mxu0 %v2134_v50 }
  0x5c   : > { %1981 = vmatpush3.bf16.msra.mxu1 %v2135_v51  ;;  %1962 = vmatprep.subr.bf16.mxu0 %v2206_v1 }
  0x5d   : > { %1982 = vmatprep.subr.bf16.mxu1 %v2206_v1 }
  0x5f   : > { %1963 = vmatpush3.bf16.msra.mxu0 %v2136_v53 }
  0x60   : > { %1983 = vmatpush3.bf16.msra.mxu1 %v2137_v54  ;;  %1964 = vmatprep.subr.bf16.mxu0 %v2206_v1 }
  0x61   : > { %1984 = vmatprep.subr.bf16.mxu1 %v2206_v1 }
  0x63   : > { %1965 = vmatpush3.bf16.msra.mxu0 %v2138_v56 }
  0x64   : > { %1985 = vmatpush3.bf16.msra.mxu1 %v2139_v57  ;;  %1966 = vmatprep.subr.bf16.mxu0 %v2206_v1 }
  0x65   : > { %1986 = vmatprep.subr.bf16.mxu1 %v2206_v1 }
  0x67   : > { %1967 = vmatpush3.bf16.msra.mxu0 %v2140_v60 }
  0x68   : > { %1987 = vmatpush3.bf16.msra.mxu1 %v2141_v61  ;;  %1992 = vmatprep.subr.bf16.mxu0 %v2206_v1 }
  0x69   : > { %2012 = vmatprep.subr.bf16.mxu1 %v2206_v1 }
  0x6a   : > { %1969 = vmatmul.mubr.bf16.vlgmr.msra.gmra.mrb[8].mxu0 %v869_v63 }
  0x6b   : > { %1993 = vmatpush3.bf16.msra.mxu0 %v2142_v0  ;;  %1989 = vmatmul.mubr.bf16.vlgmr.msra.gmra.mrb[8].mxu1 %v986_v2 }
  0x6c   : > { %2013 = vmatpush3.bf16.msra.mxu1 %v2143_v3  ;;  %1994 = vmatprep.subr.bf16.mxu0 %v2206_v1 }
  0x6d   : > { %2014 = vmatprep.subr.bf16.mxu1 %v2206_v1  ;;  %2008 = vmatprep.mubr.msk.bf16.mxu0 %vm2207_vm0, %v2206_v1 }
  0x6e   : > { %2028 = vmatprep.mubr.msk.bf16.mxu1 %vm2207_vm0, %v2206_v1 }
  0x6f   : > { %1995 = vmatpush3.bf16.msra.mxu0 %v2144_v4 }
  0x70   : > { %2015 = vmatpush3.bf16.msra.mxu1 %v2145_v5  ;;  %1996 = vmatprep.subr.bf16.mxu0 %v2206_v1 }
  0x71   : > { %2016 = vmatprep.subr.bf16.mxu1 %v2206_v1 }
  0x73   : > { %1997 = vmatpush3.bf16.msra.mxu0 %v2146_v6 }
  0x74   : > { %2017 = vmatpush3.bf16.msra.mxu1 %v2147_v7  ;;  %1998 = vmatprep.subr.bf16.mxu0 %v2206_v1 }
  0x75   : > { %2018 = vmatprep.subr.bf16.mxu1 %v2206_v1 }
  0x77   : > { %1999 = vmatpush3.bf16.msra.mxu0 %v2148_v8 }
  0x78   : > { %2019 = vmatpush3.bf16.msra.mxu1 %v2149_v9  ;;  %2000 = vmatprep.subr.bf16.mxu0 %v2206_v1  ;;  %v1432_v9 = vld [vmem:[%s377_s11] sm:$0x1] }
  0x79   : > { %2020 = vmatprep.subr.bf16.mxu1 %v2206_v1 }
  0x7b   : > { %2001 = vmatpush3.bf16.msra.mxu0 %v2150_v10 }
  0x7c   : > { %2021 = vmatpush3.bf16.msra.mxu1 %v2151_v11  ;;  %2002 = vmatprep.subr.bf16.mxu0 %v2206_v1  ;;  %v1788_v11 = vld [vmem:[%s2652_s4] ss:$0 sm:$0xff] }
  0x7d   : > { %2022 = vmatprep.subr.bf16.mxu1 %v2206_v1 }
  0x7f   : > { %2003 = vmatpush3.bf16.msra.mxu0 %v2152_v12 }
  0x80   : > { %2023 = vmatpush3.bf16.msra.mxu1 %v2153_v13  ;;  %2004 = vmatprep.subr.bf16.mxu0 %v2206_v1  ;;  %v1433_v13 = vunpack.c.l.bf16 %v1432_v9 }
  0x81   : > { %2024 = vmatprep.subr.bf16.mxu1 %v2206_v1 }
  0x83   : > { %2005 = vmatpush3.bf16.msra.mxu0 %v2154_v15 }
  0x84   : > { %2025 = vmatpush3.bf16.msra.mxu1 %v2155_v17  ;;  %2006 = vmatprep.subr.bf16.mxu0 %v2206_v1 }
  0x85   : > { %2026 = vmatprep.subr.bf16.mxu1 %v2206_v1 }
  0x87   : > { %2007 = vmatpush3.bf16.msra.mxu0 %v2156_v18 }
  0x88   : > { %2027 = vmatpush3.bf16.msra.mxu1 %v2157_v21  ;;  %2032 = vmatprep.subr.bf16.mxu0 %v2206_v1 }
  0x8a   : > { %2009 = vmatmul.mubr.bf16.vlgmr.msra.gmra.mrb[12].mxu0 %v1077_v22 }
  0x8b   : > { %2033 = vmatpush3.bf16.msra.mxu0 %v2158_v23  ;;  %2029 = vmatmul.mubr.bf16.vlgmr.msra.gmra.mrb[12].mxu1 %v1216_v24 }
  0x8c   : > { %2034 = vmatprep.subr.bf16.mxu0 %v2206_v1  ;;  %2048 = vmatprep.mubr.msk.bf16.mxu0 %vm2207_vm0, %v2206_v1 }
  0x8f   : > { %2035 = vmatpush3.bf16.msra.mxu0 %v2159_v25 }
  0x90   : > { %2036 = vmatprep.subr.bf16.mxu0 %v2206_v1 }
  0x93   : > { %2037 = vmatpush3.bf16.msra.mxu0 %v2160_v26 }
  0x94   : > { %2038 = vmatprep.subr.bf16.mxu0 %v2206_v1 }
  0x97   : > { %2039 = vmatpush3.bf16.msra.mxu0 %v2161_v27 }
  0x98   : > { %2040 = vmatprep.subr.bf16.mxu0 %v2206_v1 }
  0x9b   : > { %2041 = vmatpush3.bf16.msra.mxu0 %v2162_v28 }
  0x9c   : > { %2042 = vmatprep.subr.bf16.mxu0 %v2206_v1 }
  0x9f   : > { %2043 = vmatpush3.bf16.msra.mxu0 %v2163_v29 }
  0xa0   : > { %2044 = vmatprep.subr.bf16.mxu0 %v2206_v1 }
  0xa3   : > { %2045 = vmatpush3.bf16.msra.mxu0 %v2164_v30 }
  0xa4   : > { %2046 = vmatprep.subr.bf16.mxu0 %v2206_v1 }
  0xa7   : > { %2047 = vmatpush3.bf16.msra.mxu0 %v2165_v31 }
  0xaa   : > { %2049 = vmatmul.mubr.bf16.vlgmr.msra.gmra.mrb[16].mxu0 %v1333_v33 }
  0xfd   : > { %v519_v34 = vpop.f32.mrb[0].mxu0 }
  0xfe   : > { %v1890_v35 = vpop.f32.mrb[1].mxu0  ;;  %v607_v36 = vpop.f32.mrb[0].mxu1 }
  0xff   : > { %v608_v37 = vadd.f32 %v607_v36, %v519_v34  ;;  %v522_v38 = vpop.f32.mrb[2].mxu0  ;;  %v1910_v39 = vpop.f32.mrb[1].mxu1 }
 0x100   : > { %v1891_v40 = vpop.f32.mrb[3].mxu0  ;;  %v610_v41 = vpop.f32.mrb[2].mxu1 }
 0x101   : > { %v1911_v42 = vpop.f32.mrb[3].mxu1 }
 0x11d   : > { %v723_v43 = vpop.f32.mrb[4].mxu0 }
 0x11e   : > { %v729_v44 = vadd.f32 %v723_v43, %v608_v37  ;;  %v1930_v45 = vpop.f32.mrb[5].mxu0  ;;  %v830_v46 = vpop.f32.mrb[4].mxu1 }
 0x11f   : > { %v726_v47 = vpop.f32.mrb[6].mxu0  ;;  %v1950_v48 = vpop.f32.mrb[5].mxu1 }
 0x120   : > { %v836_v49 = vadd.f32 %v830_v46, %v729_v44  ;;  %v1931_v1 = vpop.f32.mrb[7].mxu0  ;;  %v833_v50 = vpop.f32.mrb[6].mxu1 }
 0x121   : > { %v1951_v51 = vpop.f32.mrb[7].mxu1 }
 0x13d   : > { %v953_v52 = vpop.f32.mrb[8].mxu0 }
 0x13e   : > { %v959_v53 = vadd.f32 %v953_v52, %v836_v49  ;;  %v1970_v54 = vpop.f32.mrb[9].mxu0  ;;  %v1070_v55 = vpop.f32.mrb[8].mxu1 }
 0x13f   : > { %v956_v56 = vpop.f32.mrb[10].mxu0  ;;  %v1990_v57 = vpop.f32.mrb[9].mxu1 }
 0x140   : > { %v1076_v58 = vadd.f32 %v1070_v55, %v959_v53  ;;  %v1971_v59 = vpop.f32.mrb[11].mxu0  ;;  %v1073_v60 = vpop.f32.mrb[10].mxu1 }
 0x141   : > { %v1991_v61 = vpop.f32.mrb[11].mxu1 }
 0x15d   : > { %v1177_v62 = vpop.f32.mrb[12].mxu0 }
 0x15e   : > { %v1183_v63 = vadd.f32 %v1177_v62, %v1076_v58  ;;  %v2010_v0 = vpop.f32.mrb[13].mxu0  ;;  %v1300_v2 = vpop.f32.mrb[12].mxu1 }
 0x15f   : > { %v1180_v3 = vpop.f32.mrb[14].mxu0  ;;  %v2030_v4 = vpop.f32.mrb[13].mxu1 }
 0x160   : > { %v1306_v5 = vadd.f32 %v1300_v2, %v1183_v63  ;;  %v2011_v6 = vpop.f32.mrb[15].mxu0  ;;  %v1303_v7 = vpop.f32.mrb[14].mxu1 }
 0x161   : > { %v2031_v8 = vpop.f32.mrb[15].mxu1 }
 0x17d   : > { %v1417_v10 = vpop.f32.mrb[16].mxu0 }
 0x17e   : > { %v1423_v12 = vadd.f32 %v1417_v10, %v1306_v5  ;;  %v2050_v14 = vpop.f32.mrb[17].mxu0 }
 0x17f   : > { %v1420_v15 = vpop.f32.mrb[18].mxu0 }
 0x180   : > { %v1431_v16 = vadd.f32 %v1788_v11, %v1423_v12  ;;  %v2051_v17 = vpop.f32.mrb[19].mxu0 }
 0x182   : > { %v1434_v18 = vadd.f32 %v1433_v13, %v1431_v16 }
 0x184   : > { %v1435_v19 = vmax.f32 %v1434_v18, 0.0 }
 0x186   : > { %v1436_v20 = vpack.c.bf16 %v1435_v19, %v1435_v19 }
 0x188   : > { %1437 = vst [vmem:[%s384_s16] sm:$0x1] %v1436_v20 }
 0x189 PF: > { %s16_s25 = sadd.s32 1, %s2204_s25   ;;  %s2655_s21 = smov %s2196_s23 }
 0x18a   : > { %p13_p10 = scmp.ge.s32.totalorder %s16_s25, 6   ;;  %s2656_s22 = smov %s2200_s24 }
 0x18b   : > { %s2657_s23 = smov %s2660_s26  ;;  %s2658_s24 = smov %s2664_s27 }
 0x18c   :  { %15 = sbr.rel (!%p13_p10) target bundleno = 3 (0x3), region = 91 }

</bundles_post_ra>
